<compile_context>
chip_gen: v6e
topology: v6e:2x2x1
jax: 0.10.0
libtpu: 0.0.40
codegen_flags: <defaults>
</compile_context>

<pallas_src>
import functools
import math

import jax
import jax.numpy as jnp
from jax.experimental import pallas as pl
from jax.experimental.pallas import tpu as pltpu

# ----------------------------- configuration ------------------------------
IMAGE_SIZE = 16
PATCH_SIZE = 4
DATA_DIM = 3
DIM = 32
DEPTH = 2
HEADS = 4
MLP_DIM = 64
N_EMBEDDINGS = 32
EMBEDDING_DIM = 16
MIN_VAL, MAX_VAL = 0.0, 3.0
SHIFT = (MIN_VAL + MAX_VAL) / 2.0      # VQVAE.transform(x)=x-shift, reverse(x)=x+shift

NPATCH = (IMAGE_SIZE // PATCH_SIZE) ** 2
PATCH_DIM = DATA_DIM * PATCH_SIZE * PATCH_SIZE
DH = DIM // HEADS

# ----------------------- packed-parameter layout ---------------------------
W_ROWS, W_COLS = 64, 128            # padded (fan_in, fan_out) for every matrix
V_COLS = 128                        # padded width for every bias / LN vector
OUT_WIDTH = 128                     # packed lane-dense output: xhat|z_e|e|pad

# weight-matrix slots
W_PE = 0
W_ENC_L0 = 1                         # 4 per encoder layer: w_qkv, w_o, w1, w2
W_EO = W_ENC_L0 + 4 * DEPTH
W_POS_E = W_EO + 1
W_CB = W_POS_E + 1
W_DI = W_CB + 1
W_DEC_L0 = W_DI + 1                  # 4 per decoder layer
W_DO = W_DEC_L0 + 4 * DEPTH
W_POS_D = W_DO + 1
N_WMATS = W_POS_D + 1

# vector slots
V_B_PE = 0
V_ENC_L0 = 1                         # 8 per layer: ln1_g, ln1_b, b_qkv, b_o,
V_B_EO = V_ENC_L0 + 8 * DEPTH        #              ln2_g, ln2_b, b1, b2
V_B_DI = V_B_EO + 1
V_DEC_L0 = V_B_DI + 1
V_B_DO = V_DEC_L0 + 8 * DEPTH
N_VECS = V_B_DO + 1


# --------------------------- fused Pallas kernel ----------------------------
def _fused_forward_kernel(tok_ref, wbuf_ref, vbuf_ref, out_ref, *, batch):
    """One grid step processes `batch` images entirely in VMEM."""
    M = batch * NPATCH
    scale = 1.0 / math.sqrt(DH)

    def W(i, fi, fo):                 # packed weight matrix (static slice)
        return wbuf_ref[i, :fi, :fo]

    def V(i, n):                      # packed bias / LN vector -> (1, n)
        return vbuf_ref[i:i + 1, :n]

    def layernorm(x, g, b):
        mean = jnp.mean(x, axis=-1, keepdims=True)
        var = jnp.mean((x - mean) ** 2, axis=-1, keepdims=True)
        return (x - mean) * jax.lax.rsqrt(var + 1e-5) * g + b

    def transformer_block(h, wbase, vbase):
        w_qkv = W(wbase + 0, DIM, 3 * DIM)
        w_o = W(wbase + 1, DIM, DIM)
        w1 = W(wbase + 2, DIM, MLP_DIM)
        w2 = W(wbase + 3, MLP_DIM, DIM)
        ln1_g, ln1_b = V(vbase + 0, DIM), V(vbase + 1, DIM)
        b_qkv = V(vbase + 2, 3 * DIM)
        b_o = V(vbase + 3, DIM)
        ln2_g, ln2_b = V(vbase + 4, DIM), V(vbase + 5, DIM)
        b1 = V(vbase + 6, MLP_DIM)
        b2 = V(vbase + 7, DIM)

        # --- pre-norm multi-head self-attention (per-image batched) ---
        xn = layernorm(h, ln1_g, ln1_b)
        qkv = jnp.dot(xn, w_qkv, preferred_element_type=jnp.float32) + b_qkv
        qkv3 = qkv.reshape(batch, NPATCH, 3 * DIM)
        heads = []
        for hd in range(HEADS):
            q = qkv3[:, :, hd * DH:(hd + 1) * DH] * scale
            k = qkv3[:, :, DIM + hd * DH:DIM + (hd + 1) * DH]
            v = qkv3[:, :, 2 * DIM + hd * DH:2 * DIM + (hd + 1) * DH]
            s = jnp.einsum('bqd,bkd->bqk', q, k,
                           preferred_element_type=jnp.float32)     # (B, N, N)
            s = s - jnp.max(s, axis=-1, keepdims=True)
            p = jnp.exp(s)
            p = p / jnp.sum(p, axis=-1, keepdims=True)              # exact softmax
            heads.append(jnp.einsum('bqk,bkd->bqd', p, v,
                                    preferred_element_type=jnp.float32))
        # heads packed into contiguous lane slices -> ONE output projection
        o = jnp.concatenate(heads, axis=-1).reshape(M, DIM)
        h = h + jnp.dot(o, w_o, preferred_element_type=jnp.float32) + b_o

        # --- pre-norm MLP ---
        xn = layernorm(h, ln2_g, ln2_b)
        m = jnp.dot(xn, w1, preferred_element_type=jnp.float32) + b1
        # TODO(synk): PyTorch nn.GELU defaults to exact erf; tanh approx used here.
        m = jax.nn.gelu(m, approximate=True)
        m = jnp.dot(m, w2, preferred_element_type=jnp.float32) + b2
        return h + m

    def add_pos(h, pos):              # broadcast add, no per-image copies
        return (h.reshape(batch, NPATCH, DIM) + pos[None, :, :]).reshape(M, DIM)

    # ------------------------------ encoder --------------------------------
    tok = tok_ref[...] - SHIFT                                     # transform(x)
    h = jnp.dot(tok, W(W_PE, PATCH_DIM, DIM),
                preferred_element_type=jnp.float32) + V(V_B_PE, DIM)
    h = add_pos(h, W(W_POS_E, NPATCH, DIM))
    for l in range(DEPTH):
        h = transformer_block(h, W_ENC_L0 + 4 * l, V_ENC_L0 + 8 * l)
    z_e = jnp.dot(h, W(W_EO, DIM, EMBEDDING_DIM),
                  preferred_element_type=jnp.float32) + V(V_B_EO, EMBEDDING_DIM)

    # -------------------------- vector quantization -------------------------
    cb = W(W_CB, N_EMBEDDINGS, EMBEDDING_DIM)                       # (n_e, E)
    z2 = jnp.sum(z_e * z_e, axis=1, keepdims=True)                  # (M, 1)
    c2 = jnp.sum(cb * cb, axis=1)[None, :]                          # (1, n_e)
    d = z2 + c2 - 2.0 * jnp.einsum('me,ne->mn', z_e, cb,
                                   preferred_element_type=jnp.float32)
    iota = jax.lax.broadcasted_iota(jnp.int32, d.shape, 1)
    min_d = jnp.min(d, axis=1, keepdims=True)
    idx = jnp.min(jnp.where(d <= min_d, iota, N_EMBEDDINGS), axis=1, keepdims=True)
    onehot = (iota == idx).astype(jnp.float32)                      # scatter_ one-hot
    e = jnp.dot(onehot, cb, preferred_element_type=jnp.float32)     # (M, E)

    # ------------------------------ decoder --------------------------------
    # z_q = z + (e - z).detach() == e in value; decoder consumes z_q.
    h = jnp.dot(e, W(W_DI, EMBEDDING_DIM, DIM),
                preferred_element_type=jnp.float32) + V(V_B_DI, DIM)
    h = add_pos(h, W(W_POS_D, NPATCH, DIM))
    for l in range(DEPTH):
        h = transformer_block(h, W_DEC_L0 + 4 * l, V_DEC_L0 + 8 * l)
    xhat = jnp.dot(h, W(W_DO, DIM, PATCH_DIM),
                   preferred_element_type=jnp.float32) + V(V_B_DO, PATCH_DIM)
    xhat = xhat + SHIFT                                             # reverse(x)

    # lane-dense packed output: [xhat | z_e | e | 0-pad] -> one full (M, 128) store
    pad = jnp.zeros((M, OUT_WIDTH - PATCH_DIM - 2 * EMBEDDING_DIM), jnp.float32)
    out_ref[...] = jnp.concatenate([xhat, z_e, e, pad], axis=-1)


# ------------------------------ parameter packing ----------------------------
def _pad_mat(a):
    a = jnp.asarray(a, jnp.float32)
    if a.ndim == 1:
        a = a.reshape(1, -1)
    return jnp.pad(a, ((0, W_ROWS - a.shape[0]), (0, W_COLS - a.shape[1])))


def _pad_vec(a):
    a = jnp.asarray(a, jnp.float32).reshape(1, -1)
    return jnp.pad(a, ((0, 0), (0, V_COLS - a.shape[1])))


def _pack_params(params):
    enc, dec, cb = params["enc"], params["dec"], params["codebook"]
    mats, vecs = [], []

    mats.append(enc["w_pe"]); vecs.append(enc["b_pe"])
    for lp in enc["layers"]:
        mats += [lp["w_qkv"], lp["w_o"], lp["w1"], lp["w2"]]
        vecs += [lp["ln1_g"], lp["ln1_b"], lp["b_qkv"], lp["b_o"],
                 lp["ln2_g"], lp["ln2_b"], lp["b1"], lp["b2"]]
    mats.append(enc["w_out"]); vecs.append(enc["b_out"])
    mats.append(enc["pos"].reshape(NPATCH, DIM))
    mats.append(cb)
    mats.append(dec["w_in"]); vecs.append(dec["b_in"])
    for lp in dec["layers"]:
        mats += [lp["w_qkv"], lp["w_o"], lp["w1"], lp["w2"]]
        vecs += [lp["ln1_g"], lp["ln1_b"], lp["b_qkv"], lp["b_o"],
                 lp["ln2_g"], lp["ln2_b"], lp["b1"], lp["b2"]]
    mats.append(dec["w_out"]); vecs.append(dec["b_out"])
    mats.append(dec["pos"].reshape(NPATCH, DIM))

    assert len(mats) == N_WMATS and len(vecs) == N_VECS
    wbuf = jnp.stack([_pad_mat(m) for m in mats])          # (N_WMATS, 64, 128)
    vbuf = jnp.concatenate([_pad_vec(v) for v in vecs])    # (N_VECS, 128)
    return wbuf, vbuf


# ------------------------------ glue / model --------------------------------
def patchify(x, p):
    # x: (B, H, W, C) -> (B, num_patches, p*p*C); patch dims ordered (p1, p2, c)
    B, H, W, C = x.shape
    x = x.reshape(B, H // p, p, W // p, p, C)
    x = x.transpose(0, 1, 3, 2, 4, 5)
    return x.reshape(B, (H // p) * (W // p), p * p * C)


def unpatchify(patches, p, H, W, C):
    B, n, _ = patches.shape
    h, w = H // p, W // p
    x = patches.reshape(B, h, w, p, p, C)
    x = x.transpose(0, 1, 3, 2, 4, 5)
    return x.reshape(B, H, W, C)


def _pick_tile(batch, max_imgs=8):
    # up to 8 images per grid step -> 128 rows feeding every matmul
    t = min(batch, max_imgs)
    while batch % t:
        t -= 1
    return t


def vitvqvae_forward(params, x):
    """Forward pass of ViTVQVAE: returns (x_hat, z_e, e).  x is NHWC f32."""
    B = x.shape[0]
    tok = patchify(x, PATCH_SIZE).reshape(B * NPATCH, PATCH_DIM)
    wbuf, vbuf = _pack_params(params)

    tile_imgs = _pick_tile(B)
    m_tile = tile_imgs * NPATCH

    out = pl.pallas_call(
        functools.partial(_fused_forward_kernel, batch=tile_imgs),
        grid=(B // tile_imgs,),
        in_specs=[
            pl.BlockSpec((m_tile, PATCH_DIM), lambda i: (i, 0)),
            # constant block index -> weights stay VMEM-resident across steps
            pl.BlockSpec((N_WMATS, W_ROWS, W_COLS), lambda i: (0, 0, 0)),
            pl.BlockSpec((N_VECS, V_COLS), lambda i: (0, 0)),
        ],
        out_specs=pl.BlockSpec((m_tile, OUT_WIDTH), lambda i: (i, 0)),
        out_shape=jax.ShapeDtypeStruct((B * NPATCH, OUT_WIDTH), jnp.float32),
        compiler_params=pltpu.CompilerParams(dimension_semantics=("parallel",)),
    )(tok, wbuf, vbuf)

    xhat_p = out[:, :PATCH_DIM].reshape(B, NPATCH, PATCH_DIM)
    z_e = out[:, PATCH_DIM:PATCH_DIM + EMBEDDING_DIM]
    e = out[:, PATCH_DIM + EMBEDDING_DIM:PATCH_DIM + 2 * EMBEDDING_DIM]

    x_hat = unpatchify(xhat_p, PATCH_SIZE, IMAGE_SIZE, IMAGE_SIZE, DATA_DIM)
    return (x_hat,
            z_e.reshape(B, NPATCH, EMBEDDING_DIM),
            e.reshape(B, NPATCH, EMBEDDING_DIM))


# ------------------------------ parameter init ------------------------------
def _dense(key, fan_in, fan_out):
    kw, kb = jax.random.split(key)
    w = jax.random.normal(kw, (fan_in, fan_out), jnp.float32) * 0.02
    b = jax.random.normal(kb, (fan_out,), jnp.float32) * 0.01
    return w, b


def _transformer_layers(key, depth):
    layers = []
    for i in range(depth):
        ks = jax.random.split(jax.random.fold_in(key, i), 4)
        w_qkv, b_qkv = _dense(ks[0], DIM, 3 * DIM)
        w_o, b_o = _dense(ks[1], DIM, DIM)
        w1, b1 = _dense(ks[2], DIM, MLP_DIM)
        w2, b2 = _dense(ks[3], MLP_DIM, DIM)
        layers.append(dict(
            ln1_g=jnp.ones((DIM,), jnp.float32), ln1_b=jnp.zeros((DIM,), jnp.float32),
            ln2_g=jnp.ones((DIM,), jnp.float32), ln2_b=jnp.zeros((DIM,), jnp.float32),
            w_qkv=w_qkv, b_qkv=b_qkv, w_o=w_o, b_o=b_o,
            w1=w1, b1=b1, w2=w2, b2=b2))
    return layers


def init_params(key):
    ke, kd, kc = jax.random.split(key, 3)
    ke1, ke2, ke3, ke4 = jax.random.split(ke, 4)
    kd1, kd2, kd3, kd4 = jax.random.split(kd, 4)

    w_pe, b_pe = _dense(ke1, PATCH_DIM, DIM)
    w_eo, b_eo = _dense(ke2, DIM, EMBEDDING_DIM)
    enc = dict(w_pe=w_pe, b_pe=b_pe,
               pos=jax.random.normal(ke3, (1, NPATCH, DIM), jnp.float32),
               layers=_transformer_layers(ke4, DEPTH),
               w_out=w_eo, b_out=b_eo)

    w_di, b_di = _dense(kd1, EMBEDDING_DIM, DIM)
    w_do, b_do = _dense(kd2, DIM, PATCH_DIM)
    dec = dict(w_in=w_di, b_in=b_di,
               pos=jax.random.normal(kd3, (1, NPATCH, DIM), jnp.float32),
               layers=_transformer_layers(kd4, DEPTH),
               w_out=w_do, b_out=b_do)

    # VectorQuantizer: embedding.weight ~ U(-1/n_e, 1/n_e)
    codebook = jax.random.uniform(
        kc, (N_EMBEDDINGS, EMBEDDING_DIM), jnp.float32,
        minval=-1.0 / N_EMBEDDINGS, maxval=1.0 / N_EMBEDDINGS)

    return dict(enc=enc, dec=dec, codebook=codebook)


# ------------------------------------ main -----------------------------------
if __name__ == "__main__":
    key = jax.random.PRNGKey(0)
    k_x, k_p = jax.random.split(key)

    params = init_params(k_p)
    # deterministic "quantized-pixel" image in [0, 3], NHWC
    x = jax.random.uniform(
        k_x, (2, IMAGE_SIZE, IMAGE_SIZE, DATA_DIM), jnp.float32,
        minval=MIN_VAL, maxval=MAX_VAL)

    fwd = jax.jit(vitvqvae_forward)
    x_hat, z_e, e = fwd(params, x)
    jax.block_until_ready((x_hat, z_e, e))

    assert x_hat.shape == (2, IMAGE_SIZE, IMAGE_SIZE, DATA_DIM)
    assert z_e.shape == (2, NPATCH, EMBEDDING_DIM)
    assert e.shape == (2, NPATCH, EMBEDDING_DIM)
    assert bool(jnp.all(jnp.isfinite(x_hat)))
    assert bool(jnp.all(jnp.isfinite(z_e)))
    assert bool(jnp.all(jnp.isfinite(e)))
    print("KERNEL_OK")
</pallas_src>

<mosaic_0001>
module attributes {stable_mosaic.version = 11 : i64} {
  func.func @_fused_forward_kernel(%arg0: i32, %arg1: memref<32x48xf32, #tpu.memory_space<vmem>>, %arg2: memref<23x64x128xf32, #tpu.memory_space<vmem>>, %arg3: memref<36x128xf32, #tpu.memory_space<vmem>>, %arg4: memref<32x128xf32, #tpu.memory_space<vmem>>) attributes {dimension_semantics = [#tpu.dimension_semantics<parallel>], iteration_bounds = array<i64: 1>, scalar_prefetch = 0 : i64, scratch_operands = 0 : i64, tpu.core_type = #tpu.core_type<tc>, window_params = [{transform_indices = @transform_0, window_bounds = array<i64: 32, 48>}, {pipeline_mode = #tpu.pipeline_mode<synchronous>, transform_indices = @transform_1, window_bounds = array<i64: 23, 64, 128>}, {pipeline_mode = #tpu.pipeline_mode<synchronous>, transform_indices = @transform_2, window_bounds = array<i64: 36, 128>}, {transform_indices = @transform_3, window_bounds = array<i64: 32, 128>}]} {
    %c0 = arith.constant 0 : index
    %c0_0 = arith.constant 0 : index
    %0 = vector.load %arg1[%c0, %c0_0] : memref<32x48xf32, #tpu.memory_space<vmem>>, vector<32x48xf32>
    %cst = arith.constant 1.500000e+00 : f32
    %1 = vector.broadcast %cst : f32 to vector<32x48xf32>
    %2 = arith.subf %0, %1 : vector<32x48xf32>
    %c0_1 = arith.constant 0 : index
    %c0_2 = arith.constant 0 : index
    %c0_3 = arith.constant 0 : index
    %3 = vector.load %arg2[%c0_1, %c0_2, %c0_3] : memref<23x64x128xf32, #tpu.memory_space<vmem>>, vector<1x48x32xf32>
    %4 = vector.shape_cast %3 : vector<1x48x32xf32> to vector<48x32xf32>
    %cst_4 = arith.constant dense<0.000000e+00> : vector<32x32xf32>
    %5 = tpu.matmul %2, %4, %cst_4 {dimension_numbers = #tpu.dot_dimension_numbers<[1], [0], [0], [1], [0, 0, 1, 1], [], []>} : vector<32x48xf32>, vector<48x32xf32>, vector<32x32xf32> -> vector<32x32xf32>
    %c0_5 = arith.constant 0 : index
    %c0_6 = arith.constant 0 : index
    %6 = vector.load %arg3[%c0_5, %c0_6] : memref<36x128xf32, #tpu.memory_space<vmem>>, vector<1x32xf32>
    %7 = vector.broadcast %6 : vector<1x32xf32> to vector<32x32xf32>
    %8 = arith.addf %5, %7 : vector<32x32xf32>
    %c10 = arith.constant 10 : index
    %c0_7 = arith.constant 0 : index
    %c0_8 = arith.constant 0 : index
    %9 = vector.load %arg2[%c10, %c0_7, %c0_8] : memref<23x64x128xf32, #tpu.memory_space<vmem>>, vector<1x16x32xf32>
    %10 = vector.shape_cast %9 : vector<1x16x32xf32> to vector<16x32xf32>
    %11 = vector.shape_cast %8 : vector<32x32xf32> to vector<2x16x32xf32>
    %12 = vector.shape_cast %10 : vector<16x32xf32> to vector<1x16x32xf32>
    %13 = vector.broadcast %12 : vector<1x16x32xf32> to vector<2x16x32xf32>
    %14 = arith.addf %11, %13 : vector<2x16x32xf32>
    %15 = vector.shape_cast %14 : vector<2x16x32xf32> to vector<32x32xf32>
    %c1 = arith.constant 1 : index
    %c0_9 = arith.constant 0 : index
    %c0_10 = arith.constant 0 : index
    %16 = vector.load %arg2[%c1, %c0_9, %c0_10] : memref<23x64x128xf32, #tpu.memory_space<vmem>>, vector<1x32x96xf32>
    %17 = vector.shape_cast %16 : vector<1x32x96xf32> to vector<32x96xf32>
    %c2 = arith.constant 2 : index
    %c0_11 = arith.constant 0 : index
    %c0_12 = arith.constant 0 : index
    %18 = vector.load %arg2[%c2, %c0_11, %c0_12] : memref<23x64x128xf32, #tpu.memory_space<vmem>>, vector<1x32x32xf32>
    %19 = vector.shape_cast %18 : vector<1x32x32xf32> to vector<32x32xf32>
    %c3 = arith.constant 3 : index
    %c0_13 = arith.constant 0 : index
    %c0_14 = arith.constant 0 : index
    %20 = vector.load %arg2[%c3, %c0_13, %c0_14] : memref<23x64x128xf32, #tpu.memory_space<vmem>>, vector<1x32x64xf32>
    %21 = vector.shape_cast %20 : vector<1x32x64xf32> to vector<32x64xf32>
    %c4 = arith.constant 4 : index
    %c0_15 = arith.constant 0 : index
    %c0_16 = arith.constant 0 : index
    %22 = vector.load %arg2[%c4, %c0_15, %c0_16] : memref<23x64x128xf32, #tpu.memory_space<vmem>>, vector<1x64x32xf32>
    %23 = vector.shape_cast %22 : vector<1x64x32xf32> to vector<64x32xf32>
    %c1_17 = arith.constant 1 : index
    %c0_18 = arith.constant 0 : index
    %24 = vector.load %arg3[%c1_17, %c0_18] : memref<36x128xf32, #tpu.memory_space<vmem>>, vector<1x32xf32>
    %c2_19 = arith.constant 2 : index
    %c0_20 = arith.constant 0 : index
    %25 = vector.load %arg3[%c2_19, %c0_20] : memref<36x128xf32, #tpu.memory_space<vmem>>, vector<1x32xf32>
    %c3_21 = arith.constant 3 : index
    %c0_22 = arith.constant 0 : index
    %26 = vector.load %arg3[%c3_21, %c0_22] : memref<36x128xf32, #tpu.memory_space<vmem>>, vector<1x96xf32>
    %c4_23 = arith.constant 4 : index
    %c0_24 = arith.constant 0 : index
    %27 = vector.load %arg3[%c4_23, %c0_24] : memref<36x128xf32, #tpu.memory_space<vmem>>, vector<1x32xf32>
    %c5 = arith.constant 5 : index
    %c0_25 = arith.constant 0 : index
    %28 = vector.load %arg3[%c5, %c0_25] : memref<36x128xf32, #tpu.memory_space<vmem>>, vector<1x32xf32>
    %c6 = arith.constant 6 : index
    %c0_26 = arith.constant 0 : index
    %29 = vector.load %arg3[%c6, %c0_26] : memref<36x128xf32, #tpu.memory_space<vmem>>, vector<1x32xf32>
    %c7 = arith.constant 7 : index
    %c0_27 = arith.constant 0 : index
    %30 = vector.load %arg3[%c7, %c0_27] : memref<36x128xf32, #tpu.memory_space<vmem>>, vector<1x64xf32>
    %c8 = arith.constant 8 : index
    %c0_28 = arith.constant 0 : index
    %31 = vector.load %arg3[%c8, %c0_28] : memref<36x128xf32, #tpu.memory_space<vmem>>, vector<1x32xf32>
    %cst_29 = arith.constant dense<0.000000e+00> : vector<32xf32>
    %32 = vector.multi_reduction <add>, %15, %cst_29 [1] : vector<32x32xf32> to vector<32xf32>
    %33 = vector.shape_cast %32 : vector<32xf32> to vector<32x1xf32>
    %cst_30 = arith.constant 3.200000e+01 : f32
    %34 = vector.broadcast %cst_30 : f32 to vector<32x1xf32>
    %35 = arith.divf %33, %34 : vector<32x1xf32>
    %36 = vector.broadcast %35 : vector<32x1xf32> to vector<32x32xf32>
    %37 = arith.subf %15, %36 : vector<32x32xf32>
    %38 = arith.mulf %37, %37 : vector<32x32xf32>
    %cst_31 = arith.constant dense<0.000000e+00> : vector<32xf32>
    %39 = vector.multi_reduction <add>, %38, %cst_31 [1] : vector<32x32xf32> to vector<32xf32>
    %40 = vector.shape_cast %39 : vector<32xf32> to vector<32x1xf32>
    %cst_32 = arith.constant 3.200000e+01 : f32
    %41 = vector.broadcast %cst_32 : f32 to vector<32x1xf32>
    %42 = arith.divf %40, %41 : vector<32x1xf32>
    %43 = vector.broadcast %35 : vector<32x1xf32> to vector<32x32xf32>
    %44 = arith.subf %15, %43 : vector<32x32xf32>
    %cst_33 = arith.constant 9.99999974E-6 : f32
    %45 = vector.broadcast %cst_33 : f32 to vector<32x1xf32>
    %46 = arith.addf %42, %45 : vector<32x1xf32>
    %47 = math.rsqrt %46 : vector<32x1xf32>
    %48 = vector.broadcast %47 : vector<32x1xf32> to vector<32x32xf32>
    %49 = arith.mulf %44, %48 : vector<32x32xf32>
    %50 = vector.broadcast %24 : vector<1x32xf32> to vector<32x32xf32>
    %51 = arith.mulf %49, %50 : vector<32x32xf32>
    %52 = vector.broadcast %25 : vector<1x32xf32> to vector<32x32xf32>
    %53 = arith.addf %51, %52 : vector<32x32xf32>
    %cst_34 = arith.constant dense<0.000000e+00> : vector<32x96xf32>
    %54 = tpu.matmul %53, %17, %cst_34 {dimension_numbers = #tpu.dot_dimension_numbers<[1], [0], [0], [1], [0, 0, 1, 1], [], []>} : vector<32x32xf32>, vector<32x96xf32>, vector<32x96xf32> -> vector<32x96xf32>
    %55 = vector.broadcast %26 : vector<1x96xf32> to vector<32x96xf32>
    %56 = arith.addf %54, %55 : vector<32x96xf32>
    %57 = vector.shape_cast %56 : vector<32x96xf32> to vector<2x16x96xf32>
    %58 = vector.extract_strided_slice %57 {offsets = [0, 0, 0], sizes = [2, 16, 8], strides = [1, 1, 1]} : vector<2x16x96xf32> to vector<2x16x8xf32>
    %cst_35 = arith.constant 0.353553385 : f32
    %59 = vector.broadcast %cst_35 : f32 to vector<2x16x8xf32>
    %60 = arith.mulf %58, %59 : vector<2x16x8xf32>
    %61 = vector.extract_strided_slice %57 {offsets = [0, 0, 32], sizes = [2, 16, 8], strides = [1, 1, 1]} : vector<2x16x96xf32> to vector<2x16x8xf32>
    %62 = vector.extract_strided_slice %57 {offsets = [0, 0, 64], sizes = [2, 16, 8], strides = [1, 1, 1]} : vector<2x16x96xf32> to vector<2x16x8xf32>
    "tpu.trace_start"() <{level = 10 : i32, message = "bqd,bkd->bqk"}> : () -> ()
    %cst_36 = arith.constant dense<0.000000e+00> : vector<2x16x16xf32>
    %63 = tpu.matmul %60, %61, %cst_36 {dimension_numbers = #tpu.dot_dimension_numbers<[2], [2], [1], [1], [0, 0, 0, 1, 1, 1], [0], [0]>} : vector<2x16x8xf32>, vector<2x16x8xf32>, vector<2x16x16xf32> -> vector<2x16x16xf32>
    "tpu.trace_stop"() : () -> ()
    %cst_37 = arith.constant dense<0xFF800000> : vector<2x16xf32>
    %64 = vector.multi_reduction <maximumf>, %63, %cst_37 [2] : vector<2x16x16xf32> to vector<2x16xf32>
    %65 = vector.shape_cast %64 : vector<2x16xf32> to vector<2x16x1xf32>
    %66 = vector.broadcast %65 : vector<2x16x1xf32> to vector<2x16x16xf32>
    %67 = arith.subf %63, %66 : vector<2x16x16xf32>
    %68 = math.exp %67 : vector<2x16x16xf32>
    %cst_38 = arith.constant dense<0.000000e+00> : vector<2x16xf32>
    %69 = vector.multi_reduction <add>, %68, %cst_38 [2] : vector<2x16x16xf32> to vector<2x16xf32>
    %70 = vector.shape_cast %69 : vector<2x16xf32> to vector<2x16x1xf32>
    %71 = vector.broadcast %70 : vector<2x16x1xf32> to vector<2x16x16xf32>
    %72 = arith.divf %68, %71 : vector<2x16x16xf32>
    "tpu.trace_start"() <{level = 10 : i32, message = "bqk,bkd->bqd"}> : () -> ()
    %cst_39 = arith.constant dense<0.000000e+00> : vector<2x16x8xf32>
    %73 = tpu.matmul %72, %62, %cst_39 {dimension_numbers = #tpu.dot_dimension_numbers<[2], [1], [1], [2], [0, 0, 0, 1, 1, 2], [0], [0]>} : vector<2x16x16xf32>, vector<2x16x8xf32>, vector<2x16x8xf32> -> vector<2x16x8xf32>
    "tpu.trace_stop"() : () -> ()
    %74 = vector.extract_strided_slice %57 {offsets = [0, 0, 8], sizes = [2, 16, 8], strides = [1, 1, 1]} : vector<2x16x96xf32> to vector<2x16x8xf32>
    %cst_40 = arith.constant 0.353553385 : f32
    %75 = vector.broadcast %cst_40 : f32 to vector<2x16x8xf32>
    %76 = arith.mulf %74, %75 : vector<2x16x8xf32>
    %77 = vector.extract_strided_slice %57 {offsets = [0, 0, 40], sizes = [2, 16, 8], strides = [1, 1, 1]} : vector<2x16x96xf32> to vector<2x16x8xf32>
    %78 = vector.extract_strided_slice %57 {offsets = [0, 0, 72], sizes = [2, 16, 8], strides = [1, 1, 1]} : vector<2x16x96xf32> to vector<2x16x8xf32>
    "tpu.trace_start"() <{level = 10 : i32, message = "bqd,bkd->bqk"}> : () -> ()
    %cst_41 = arith.constant dense<0.000000e+00> : vector<2x16x16xf32>
    %79 = tpu.matmul %76, %77, %cst_41 {dimension_numbers = #tpu.dot_dimension_numbers<[2], [2], [1], [1], [0, 0, 0, 1, 1, 1], [0], [0]>} : vector<2x16x8xf32>, vector<2x16x8xf32>, vector<2x16x16xf32> -> vector<2x16x16xf32>
    "tpu.trace_stop"() : () -> ()
    %cst_42 = arith.constant dense<0xFF800000> : vector<2x16xf32>
    %80 = vector.multi_reduction <maximumf>, %79, %cst_42 [2] : vector<2x16x16xf32> to vector<2x16xf32>
    %81 = vector.shape_cast %80 : vector<2x16xf32> to vector<2x16x1xf32>
    %82 = vector.broadcast %81 : vector<2x16x1xf32> to vector<2x16x16xf32>
    %83 = arith.subf %79, %82 : vector<2x16x16xf32>
    %84 = math.exp %83 : vector<2x16x16xf32>
    %cst_43 = arith.constant dense<0.000000e+00> : vector<2x16xf32>
    %85 = vector.multi_reduction <add>, %84, %cst_43 [2] : vector<2x16x16xf32> to vector<2x16xf32>
    %86 = vector.shape_cast %85 : vector<2x16xf32> to vector<2x16x1xf32>
    %87 = vector.broadcast %86 : vector<2x16x1xf32> to vector<2x16x16xf32>
    %88 = arith.divf %84, %87 : vector<2x16x16xf32>
    "tpu.trace_start"() <{level = 10 : i32, message = "bqk,bkd->bqd"}> : () -> ()
    %cst_44 = arith.constant dense<0.000000e+00> : vector<2x16x8xf32>
    %89 = tpu.matmul %88, %78, %cst_44 {dimension_numbers = #tpu.dot_dimension_numbers<[2], [1], [1], [2], [0, 0, 0, 1, 1, 2], [0], [0]>} : vector<2x16x16xf32>, vector<2x16x8xf32>, vector<2x16x8xf32> -> vector<2x16x8xf32>
    "tpu.trace_stop"() : () -> ()
    %90 = vector.extract_strided_slice %57 {offsets = [0, 0, 16], sizes = [2, 16, 8], strides = [1, 1, 1]} : vector<2x16x96xf32> to vector<2x16x8xf32>
    %cst_45 = arith.constant 0.353553385 : f32
    %91 = vector.broadcast %cst_45 : f32 to vector<2x16x8xf32>
    %92 = arith.mulf %90, %91 : vector<2x16x8xf32>
    %93 = vector.extract_strided_slice %57 {offsets = [0, 0, 48], sizes = [2, 16, 8], strides = [1, 1, 1]} : vector<2x16x96xf32> to vector<2x16x8xf32>
    %94 = vector.extract_strided_slice %57 {offsets = [0, 0, 80], sizes = [2, 16, 8], strides = [1, 1, 1]} : vector<2x16x96xf32> to vector<2x16x8xf32>
    "tpu.trace_start"() <{level = 10 : i32, message = "bqd,bkd->bqk"}> : () -> ()
    %cst_46 = arith.constant dense<0.000000e+00> : vector<2x16x16xf32>
    %95 = tpu.matmul %92, %93, %cst_46 {dimension_numbers = #tpu.dot_dimension_numbers<[2], [2], [1], [1], [0, 0, 0, 1, 1, 1], [0], [0]>} : vector<2x16x8xf32>, vector<2x16x8xf32>, vector<2x16x16xf32> -> vector<2x16x16xf32>
    "tpu.trace_stop"() : () -> ()
    %cst_47 = arith.constant dense<0xFF800000> : vector<2x16xf32>
    %96 = vector.multi_reduction <maximumf>, %95, %cst_47 [2] : vector<2x16x16xf32> to vector<2x16xf32>
    %97 = vector.shape_cast %96 : vector<2x16xf32> to vector<2x16x1xf32>
    %98 = vector.broadcast %97 : vector<2x16x1xf32> to vector<2x16x16xf32>
    %99 = arith.subf %95, %98 : vector<2x16x16xf32>
    %100 = math.exp %99 : vector<2x16x16xf32>
    %cst_48 = arith.constant dense<0.000000e+00> : vector<2x16xf32>
    %101 = vector.multi_reduction <add>, %100, %cst_48 [2] : vector<2x16x16xf32> to vector<2x16xf32>
    %102 = vector.shape_cast %101 : vector<2x16xf32> to vector<2x16x1xf32>
    %103 = vector.broadcast %102 : vector<2x16x1xf32> to vector<2x16x16xf32>
    %104 = arith.divf %100, %103 : vector<2x16x16xf32>
    "tpu.trace_start"() <{level = 10 : i32, message = "bqk,bkd->bqd"}> : () -> ()
    %cst_49 = arith.constant dense<0.000000e+00> : vector<2x16x8xf32>
    %105 = tpu.matmul %104, %94, %cst_49 {dimension_numbers = #tpu.dot_dimension_numbers<[2], [1], [1], [2], [0, 0, 0, 1, 1, 2], [0], [0]>} : vector<2x16x16xf32>, vector<2x16x8xf32>, vector<2x16x8xf32> -> vector<2x16x8xf32>
    "tpu.trace_stop"() : () -> ()
    %106 = vector.extract_strided_slice %57 {offsets = [0, 0, 24], sizes = [2, 16, 8], strides = [1, 1, 1]} : vector<2x16x96xf32> to vector<2x16x8xf32>
    %cst_50 = arith.constant 0.353553385 : f32
    %107 = vector.broadcast %cst_50 : f32 to vector<2x16x8xf32>
    %108 = arith.mulf %106, %107 : vector<2x16x8xf32>
    %109 = vector.extract_strided_slice %57 {offsets = [0, 0, 56], sizes = [2, 16, 8], strides = [1, 1, 1]} : vector<2x16x96xf32> to vector<2x16x8xf32>
    %110 = vector.extract_strided_slice %57 {offsets = [0, 0, 88], sizes = [2, 16, 8], strides = [1, 1, 1]} : vector<2x16x96xf32> to vector<2x16x8xf32>
    "tpu.trace_start"() <{level = 10 : i32, message = "bqd,bkd->bqk"}> : () -> ()
    %cst_51 = arith.constant dense<0.000000e+00> : vector<2x16x16xf32>
    %111 = tpu.matmul %108, %109, %cst_51 {dimension_numbers = #tpu.dot_dimension_numbers<[2], [2], [1], [1], [0, 0, 0, 1, 1, 1], [0], [0]>} : vector<2x16x8xf32>, vector<2x16x8xf32>, vector<2x16x16xf32> -> vector<2x16x16xf32>
    "tpu.trace_stop"() : () -> ()
    %cst_52 = arith.constant dense<0xFF800000> : vector<2x16xf32>
    %112 = vector.multi_reduction <maximumf>, %111, %cst_52 [2] : vector<2x16x16xf32> to vector<2x16xf32>
    %113 = vector.shape_cast %112 : vector<2x16xf32> to vector<2x16x1xf32>
    %114 = vector.broadcast %113 : vector<2x16x1xf32> to vector<2x16x16xf32>
    %115 = arith.subf %111, %114 : vector<2x16x16xf32>
    %116 = math.exp %115 : vector<2x16x16xf32>
    %cst_53 = arith.constant dense<0.000000e+00> : vector<2x16xf32>
    %117 = vector.multi_reduction <add>, %116, %cst_53 [2] : vector<2x16x16xf32> to vector<2x16xf32>
    %118 = vector.shape_cast %117 : vector<2x16xf32> to vector<2x16x1xf32>
    %119 = vector.broadcast %118 : vector<2x16x1xf32> to vector<2x16x16xf32>
    %120 = arith.divf %116, %119 : vector<2x16x16xf32>
    "tpu.trace_start"() <{level = 10 : i32, message = "bqk,bkd->bqd"}> : () -> ()
    %cst_54 = arith.constant dense<0.000000e+00> : vector<2x16x8xf32>
    %121 = tpu.matmul %120, %110, %cst_54 {dimension_numbers = #tpu.dot_dimension_numbers<[2], [1], [1], [2], [0, 0, 0, 1, 1, 2], [0], [0]>} : vector<2x16x16xf32>, vector<2x16x8xf32>, vector<2x16x8xf32> -> vector<2x16x8xf32>
    "tpu.trace_stop"() : () -> ()
    %122 = tpu.concatenate %73, %89, %105, %121 in 2 : vector<2x16x8xf32>, vector<2x16x8xf32>, vector<2x16x8xf32>, vector<2x16x8xf32> -> vector<2x16x32xf32>
    %123 = vector.shape_cast %122 : vector<2x16x32xf32> to vector<32x32xf32>
    %cst_55 = arith.constant dense<0.000000e+00> : vector<32x32xf32>
    %124 = tpu.matmul %123, %19, %cst_55 {dimension_numbers = #tpu.dot_dimension_numbers<[1], [0], [0], [1], [0, 0, 1, 1], [], []>} : vector<32x32xf32>, vector<32x32xf32>, vector<32x32xf32> -> vector<32x32xf32>
    %125 = arith.addf %15, %124 : vector<32x32xf32>
    %126 = vector.broadcast %27 : vector<1x32xf32> to vector<32x32xf32>
    %127 = arith.addf %125, %126 : vector<32x32xf32>
    %cst_56 = arith.constant dense<0.000000e+00> : vector<32xf32>
    %128 = vector.multi_reduction <add>, %127, %cst_56 [1] : vector<32x32xf32> to vector<32xf32>
    %129 = vector.shape_cast %128 : vector<32xf32> to vector<32x1xf32>
    %cst_57 = arith.constant 3.200000e+01 : f32
    %130 = vector.broadcast %cst_57 : f32 to vector<32x1xf32>
    %131 = arith.divf %129, %130 : vector<32x1xf32>
    %132 = vector.broadcast %131 : vector<32x1xf32> to vector<32x32xf32>
    %133 = arith.subf %127, %132 : vector<32x32xf32>
    %134 = arith.mulf %133, %133 : vector<32x32xf32>
    %cst_58 = arith.constant dense<0.000000e+00> : vector<32xf32>
    %135 = vector.multi_reduction <add>, %134, %cst_58 [1] : vector<32x32xf32> to vector<32xf32>
    %136 = vector.shape_cast %135 : vector<32xf32> to vector<32x1xf32>
    %cst_59 = arith.constant 3.200000e+01 : f32
    %137 = vector.broadcast %cst_59 : f32 to vector<32x1xf32>
    %138 = arith.divf %136, %137 : vector<32x1xf32>
    %139 = vector.broadcast %131 : vector<32x1xf32> to vector<32x32xf32>
    %140 = arith.subf %127, %139 : vector<32x32xf32>
    %cst_60 = arith.constant 9.99999974E-6 : f32
    %141 = vector.broadcast %cst_60 : f32 to vector<32x1xf32>
    %142 = arith.addf %138, %141 : vector<32x1xf32>
    %143 = math.rsqrt %142 : vector<32x1xf32>
    %144 = vector.broadcast %143 : vector<32x1xf32> to vector<32x32xf32>
    %145 = arith.mulf %140, %144 : vector<32x32xf32>
    %146 = vector.broadcast %28 : vector<1x32xf32> to vector<32x32xf32>
    %147 = arith.mulf %145, %146 : vector<32x32xf32>
    %148 = vector.broadcast %29 : vector<1x32xf32> to vector<32x32xf32>
    %149 = arith.addf %147, %148 : vector<32x32xf32>
    %cst_61 = arith.constant dense<0.000000e+00> : vector<32x64xf32>
    %150 = tpu.matmul %149, %21, %cst_61 {dimension_numbers = #tpu.dot_dimension_numbers<[1], [0], [0], [1], [0, 0, 1, 1], [], []>} : vector<32x32xf32>, vector<32x64xf32>, vector<32x64xf32> -> vector<32x64xf32>
    %151 = vector.broadcast %30 : vector<1x64xf32> to vector<32x64xf32>
    %152 = arith.addf %150, %151 : vector<32x64xf32>
    %153 = arith.mulf %152, %152 : vector<32x64xf32>
    %154 = arith.mulf %152, %153 : vector<32x64xf32>
    %cst_62 = arith.constant 4.471500e-02 : f32
    %155 = vector.broadcast %cst_62 : f32 to vector<32x64xf32>
    %156 = arith.mulf %155, %154 : vector<32x64xf32>
    %157 = arith.addf %152, %156 : vector<32x64xf32>
    %cst_63 = arith.constant 0.797884583 : f32
    %158 = vector.broadcast %cst_63 : f32 to vector<32x64xf32>
    %159 = arith.mulf %158, %157 : vector<32x64xf32>
    %160 = math.tanh %159 : vector<32x64xf32>
    %cst_64 = arith.constant 1.000000e+00 : f32
    %161 = vector.broadcast %cst_64 : f32 to vector<32x64xf32>
    %162 = arith.addf %161, %160 : vector<32x64xf32>
    %cst_65 = arith.constant 5.000000e-01 : f32
    %163 = vector.broadcast %cst_65 : f32 to vector<32x64xf32>
    %164 = arith.mulf %163, %162 : vector<32x64xf32>
    %165 = arith.mulf %152, %164 : vector<32x64xf32>
    %cst_66 = arith.constant dense<0.000000e+00> : vector<32x32xf32>
    %166 = tpu.matmul %165, %23, %cst_66 {dimension_numbers = #tpu.dot_dimension_numbers<[1], [0], [0], [1], [0, 0, 1, 1], [], []>} : vector<32x64xf32>, vector<64x32xf32>, vector<32x32xf32> -> vector<32x32xf32>
    %167 = vector.broadcast %31 : vector<1x32xf32> to vector<32x32xf32>
    %168 = arith.addf %166, %167 : vector<32x32xf32>
    %169 = arith.addf %127, %168 : vector<32x32xf32>
    %c5_67 = arith.constant 5 : index
    %c0_68 = arith.constant 0 : index
    %c0_69 = arith.constant 0 : index
    %170 = vector.load %arg2[%c5_67, %c0_68, %c0_69] : memref<23x64x128xf32, #tpu.memory_space<vmem>>, vector<1x32x96xf32>
    %171 = vector.shape_cast %170 : vector<1x32x96xf32> to vector<32x96xf32>
    %c6_70 = arith.constant 6 : index
    %c0_71 = arith.constant 0 : index
    %c0_72 = arith.constant 0 : index
    %172 = vector.load %arg2[%c6_70, %c0_71, %c0_72] : memref<23x64x128xf32, #tpu.memory_space<vmem>>, vector<1x32x32xf32>
    %173 = vector.shape_cast %172 : vector<1x32x32xf32> to vector<32x32xf32>
    %c7_73 = arith.constant 7 : index
    %c0_74 = arith.constant 0 : index
    %c0_75 = arith.constant 0 : index
    %174 = vector.load %arg2[%c7_73, %c0_74, %c0_75] : memref<23x64x128xf32, #tpu.memory_space<vmem>>, vector<1x32x64xf32>
    %175 = vector.shape_cast %174 : vector<1x32x64xf32> to vector<32x64xf32>
    %c8_76 = arith.constant 8 : index
    %c0_77 = arith.constant 0 : index
    %c0_78 = arith.constant 0 : index
    %176 = vector.load %arg2[%c8_76, %c0_77, %c0_78] : memref<23x64x128xf32, #tpu.memory_space<vmem>>, vector<1x64x32xf32>
    %177 = vector.shape_cast %176 : vector<1x64x32xf32> to vector<64x32xf32>
    %c9 = arith.constant 9 : index
    %c0_79 = arith.constant 0 : index
    %178 = vector.load %arg3[%c9, %c0_79] : memref<36x128xf32, #tpu.memory_space<vmem>>, vector<1x32xf32>
    %c10_80 = arith.constant 10 : index
    %c0_81 = arith.constant 0 : index
    %179 = vector.load %arg3[%c10_80, %c0_81] : memref<36x128xf32, #tpu.memory_space<vmem>>, vector<1x32xf32>
    %c11 = arith.constant 11 : index
    %c0_82 = arith.constant 0 : index
    %180 = vector.load %arg3[%c11, %c0_82] : memref<36x128xf32, #tpu.memory_space<vmem>>, vector<1x96xf32>
    %c12 = arith.constant 12 : index
    %c0_83 = arith.constant 0 : index
    %181 = vector.load %arg3[%c12, %c0_83] : memref<36x128xf32, #tpu.memory_space<vmem>>, vector<1x32xf32>
    %c13 = arith.constant 13 : index
    %c0_84 = arith.constant 0 : index
    %182 = vector.load %arg3[%c13, %c0_84] : memref<36x128xf32, #tpu.memory_space<vmem>>, vector<1x32xf32>
    %c14 = arith.constant 14 : index
    %c0_85 = arith.constant 0 : index
    %183 = vector.load %arg3[%c14, %c0_85] : memref<36x128xf32, #tpu.memory_space<vmem>>, vector<1x32xf32>
    %c15 = arith.constant 15 : index
    %c0_86 = arith.constant 0 : index
    %184 = vector.load %arg3[%c15, %c0_86] : memref<36x128xf32, #tpu.memory_space<vmem>>, vector<1x64xf32>
    %c16 = arith.constant 16 : index
    %c0_87 = arith.constant 0 : index
    %185 = vector.load %arg3[%c16, %c0_87] : memref<36x128xf32, #tpu.memory_space<vmem>>, vector<1x32xf32>
    %cst_88 = arith.constant dense<0.000000e+00> : vector<32xf32>
    %186 = vector.multi_reduction <add>, %169, %cst_88 [1] : vector<32x32xf32> to vector<32xf32>
    %187 = vector.shape_cast %186 : vector<32xf32> to vector<32x1xf32>
    %cst_89 = arith.constant 3.200000e+01 : f32
    %188 = vector.broadcast %cst_89 : f32 to vector<32x1xf32>
    %189 = arith.divf %187, %188 : vector<32x1xf32>
    %190 = vector.broadcast %189 : vector<32x1xf32> to vector<32x32xf32>
    %191 = arith.subf %169, %190 : vector<32x32xf32>
    %192 = arith.mulf %191, %191 : vector<32x32xf32>
    %cst_90 = arith.constant dense<0.000000e+00> : vector<32xf32>
    %193 = vector.multi_reduction <add>, %192, %cst_90 [1] : vector<32x32xf32> to vector<32xf32>
    %194 = vector.shape_cast %193 : vector<32xf32> to vector<32x1xf32>
    %cst_91 = arith.constant 3.200000e+01 : f32
    %195 = vector.broadcast %cst_91 : f32 to vector<32x1xf32>
    %196 = arith.divf %194, %195 : vector<32x1xf32>
    %197 = vector.broadcast %189 : vector<32x1xf32> to vector<32x32xf32>
    %198 = arith.subf %169, %197 : vector<32x32xf32>
    %cst_92 = arith.constant 9.99999974E-6 : f32
    %199 = vector.broadcast %cst_92 : f32 to vector<32x1xf32>
    %200 = arith.addf %196, %199 : vector<32x1xf32>
    %201 = math.rsqrt %200 : vector<32x1xf32>
    %202 = vector.broadcast %201 : vector<32x1xf32> to vector<32x32xf32>
    %203 = arith.mulf %198, %202 : vector<32x32xf32>
    %204 = vector.broadcast %178 : vector<1x32xf32> to vector<32x32xf32>
    %205 = arith.mulf %203, %204 : vector<32x32xf32>
    %206 = vector.broadcast %179 : vector<1x32xf32> to vector<32x32xf32>
    %207 = arith.addf %205, %206 : vector<32x32xf32>
    %cst_93 = arith.constant dense<0.000000e+00> : vector<32x96xf32>
    %208 = tpu.matmul %207, %171, %cst_93 {dimension_numbers = #tpu.dot_dimension_numbers<[1], [0], [0], [1], [0, 0, 1, 1], [], []>} : vector<32x32xf32>, vector<32x96xf32>, vector<32x96xf32> -> vector<32x96xf32>
    %209 = vector.broadcast %180 : vector<1x96xf32> to vector<32x96xf32>
    %210 = arith.addf %208, %209 : vector<32x96xf32>
    %211 = vector.shape_cast %210 : vector<32x96xf32> to vector<2x16x96xf32>
    %212 = vector.extract_strided_slice %211 {offsets = [0, 0, 0], sizes = [2, 16, 8], strides = [1, 1, 1]} : vector<2x16x96xf32> to vector<2x16x8xf32>
    %cst_94 = arith.constant 0.353553385 : f32
    %213 = vector.broadcast %cst_94 : f32 to vector<2x16x8xf32>
    %214 = arith.mulf %212, %213 : vector<2x16x8xf32>
    %215 = vector.extract_strided_slice %211 {offsets = [0, 0, 32], sizes = [2, 16, 8], strides = [1, 1, 1]} : vector<2x16x96xf32> to vector<2x16x8xf32>
    %216 = vector.extract_strided_slice %211 {offsets = [0, 0, 64], sizes = [2, 16, 8], strides = [1, 1, 1]} : vector<2x16x96xf32> to vector<2x16x8xf32>
    "tpu.trace_start"() <{level = 10 : i32, message = "bqd,bkd->bqk"}> : () -> ()
    %cst_95 = arith.constant dense<0.000000e+00> : vector<2x16x16xf32>
    %217 = tpu.matmul %214, %215, %cst_95 {dimension_numbers = #tpu.dot_dimension_numbers<[2], [2], [1], [1], [0, 0, 0, 1, 1, 1], [0], [0]>} : vector<2x16x8xf32>, vector<2x16x8xf32>, vector<2x16x16xf32> -> vector<2x16x16xf32>
    "tpu.trace_stop"() : () -> ()
    %cst_96 = arith.constant dense<0xFF800000> : vector<2x16xf32>
    %218 = vector.multi_reduction <maximumf>, %217, %cst_96 [2] : vector<2x16x16xf32> to vector<2x16xf32>
    %219 = vector.shape_cast %218 : vector<2x16xf32> to vector<2x16x1xf32>
    %220 = vector.broadcast %219 : vector<2x16x1xf32> to vector<2x16x16xf32>
    %221 = arith.subf %217, %220 : vector<2x16x16xf32>
    %222 = math.exp %221 : vector<2x16x16xf32>
    %cst_97 = arith.constant dense<0.000000e+00> : vector<2x16xf32>
    %223 = vector.multi_reduction <add>, %222, %cst_97 [2] : vector<2x16x16xf32> to vector<2x16xf32>
    %224 = vector.shape_cast %223 : vector<2x16xf32> to vector<2x16x1xf32>
    %225 = vector.broadcast %224 : vector<2x16x1xf32> to vector<2x16x16xf32>
    %226 = arith.divf %222, %225 : vector<2x16x16xf32>
    "tpu.trace_start"() <{level = 10 : i32, message = "bqk,bkd->bqd"}> : () -> ()
    %cst_98 = arith.constant dense<0.000000e+00> : vector<2x16x8xf32>
    %227 = tpu.matmul %226, %216, %cst_98 {dimension_numbers = #tpu.dot_dimension_numbers<[2], [1], [1], [2], [0, 0, 0, 1, 1, 2], [0], [0]>} : vector<2x16x16xf32>, vector<2x16x8xf32>, vector<2x16x8xf32> -> vector<2x16x8xf32>
    "tpu.trace_stop"() : () -> ()
    %228 = vector.extract_strided_slice %211 {offsets = [0, 0, 8], sizes = [2, 16, 8], strides = [1, 1, 1]} : vector<2x16x96xf32> to vector<2x16x8xf32>
    %cst_99 = arith.constant 0.353553385 : f32
    %229 = vector.broadcast %cst_99 : f32 to vector<2x16x8xf32>
    %230 = arith.mulf %228, %229 : vector<2x16x8xf32>
    %231 = vector.extract_strided_slice %211 {offsets = [0, 0, 40], sizes = [2, 16, 8], strides = [1, 1, 1]} : vector<2x16x96xf32> to vector<2x16x8xf32>
    %232 = vector.extract_strided_slice %211 {offsets = [0, 0, 72], sizes = [2, 16, 8], strides = [1, 1, 1]} : vector<2x16x96xf32> to vector<2x16x8xf32>
    "tpu.trace_start"() <{level = 10 : i32, message = "bqd,bkd->bqk"}> : () -> ()
    %cst_100 = arith.constant dense<0.000000e+00> : vector<2x16x16xf32>
    %233 = tpu.matmul %230, %231, %cst_100 {dimension_numbers = #tpu.dot_dimension_numbers<[2], [2], [1], [1], [0, 0, 0, 1, 1, 1], [0], [0]>} : vector<2x16x8xf32>, vector<2x16x8xf32>, vector<2x16x16xf32> -> vector<2x16x16xf32>
    "tpu.trace_stop"() : () -> ()
    %cst_101 = arith.constant dense<0xFF800000> : vector<2x16xf32>
    %234 = vector.multi_reduction <maximumf>, %233, %cst_101 [2] : vector<2x16x16xf32> to vector<2x16xf32>
    %235 = vector.shape_cast %234 : vector<2x16xf32> to vector<2x16x1xf32>
    %236 = vector.broadcast %235 : vector<2x16x1xf32> to vector<2x16x16xf32>
    %237 = arith.subf %233, %236 : vector<2x16x16xf32>
    %238 = math.exp %237 : vector<2x16x16xf32>
    %cst_102 = arith.constant dense<0.000000e+00> : vector<2x16xf32>
    %239 = vector.multi_reduction <add>, %238, %cst_102 [2] : vector<2x16x16xf32> to vector<2x16xf32>
    %240 = vector.shape_cast %239 : vector<2x16xf32> to vector<2x16x1xf32>
    %241 = vector.broadcast %240 : vector<2x16x1xf32> to vector<2x16x16xf32>
    %242 = arith.divf %238, %241 : vector<2x16x16xf32>
    "tpu.trace_start"() <{level = 10 : i32, message = "bqk,bkd->bqd"}> : () -> ()
    %cst_103 = arith.constant dense<0.000000e+00> : vector<2x16x8xf32>
    %243 = tpu.matmul %242, %232, %cst_103 {dimension_numbers = #tpu.dot_dimension_numbers<[2], [1], [1], [2], [0, 0, 0, 1, 1, 2], [0], [0]>} : vector<2x16x16xf32>, vector<2x16x8xf32>, vector<2x16x8xf32> -> vector<2x16x8xf32>
    "tpu.trace_stop"() : () -> ()
    %244 = vector.extract_strided_slice %211 {offsets = [0, 0, 16], sizes = [2, 16, 8], strides = [1, 1, 1]} : vector<2x16x96xf32> to vector<2x16x8xf32>
    %cst_104 = arith.constant 0.353553385 : f32
    %245 = vector.broadcast %cst_104 : f32 to vector<2x16x8xf32>
    %246 = arith.mulf %244, %245 : vector<2x16x8xf32>
    %247 = vector.extract_strided_slice %211 {offsets = [0, 0, 48], sizes = [2, 16, 8], strides = [1, 1, 1]} : vector<2x16x96xf32> to vector<2x16x8xf32>
    %248 = vector.extract_strided_slice %211 {offsets = [0, 0, 80], sizes = [2, 16, 8], strides = [1, 1, 1]} : vector<2x16x96xf32> to vector<2x16x8xf32>
    "tpu.trace_start"() <{level = 10 : i32, message = "bqd,bkd->bqk"}> : () -> ()
    %cst_105 = arith.constant dense<0.000000e+00> : vector<2x16x16xf32>
    %249 = tpu.matmul %246, %247, %cst_105 {dimension_numbers = #tpu.dot_dimension_numbers<[2], [2], [1], [1], [0, 0, 0, 1, 1, 1], [0], [0]>} : vector<2x16x8xf32>, vector<2x16x8xf32>, vector<2x16x16xf32> -> vector<2x16x16xf32>
    "tpu.trace_stop"() : () -> ()
    %cst_106 = arith.constant dense<0xFF800000> : vector<2x16xf32>
    %250 = vector.multi_reduction <maximumf>, %249, %cst_106 [2] : vector<2x16x16xf32> to vector<2x16xf32>
    %251 = vector.shape_cast %250 : vector<2x16xf32> to vector<2x16x1xf32>
    %252 = vector.broadcast %251 : vector<2x16x1xf32> to vector<2x16x16xf32>
    %253 = arith.subf %249, %252 : vector<2x16x16xf32>
    %254 = math.exp %253 : vector<2x16x16xf32>
    %cst_107 = arith.constant dense<0.000000e+00> : vector<2x16xf32>
    %255 = vector.multi_reduction <add>, %254, %cst_107 [2] : vector<2x16x16xf32> to vector<2x16xf32>
    %256 = vector.shape_cast %255 : vector<2x16xf32> to vector<2x16x1xf32>
    %257 = vector.broadcast %256 : vector<2x16x1xf32> to vector<2x16x16xf32>
    %258 = arith.divf %254, %257 : vector<2x16x16xf32>
    "tpu.trace_start"() <{level = 10 : i32, message = "bqk,bkd->bqd"}> : () -> ()
    %cst_108 = arith.constant dense<0.000000e+00> : vector<2x16x8xf32>
    %259 = tpu.matmul %258, %248, %cst_108 {dimension_numbers = #tpu.dot_dimension_numbers<[2], [1], [1], [2], [0, 0, 0, 1, 1, 2], [0], [0]>} : vector<2x16x16xf32>, vector<2x16x8xf32>, vector<2x16x8xf32> -> vector<2x16x8xf32>
    "tpu.trace_stop"() : () -> ()
    %260 = vector.extract_strided_slice %211 {offsets = [0, 0, 24], sizes = [2, 16, 8], strides = [1, 1, 1]} : vector<2x16x96xf32> to vector<2x16x8xf32>
    %cst_109 = arith.constant 0.353553385 : f32
    %261 = vector.broadcast %cst_109 : f32 to vector<2x16x8xf32>
    %262 = arith.mulf %260, %261 : vector<2x16x8xf32>
    %263 = vector.extract_strided_slice %211 {offsets = [0, 0, 56], sizes = [2, 16, 8], strides = [1, 1, 1]} : vector<2x16x96xf32> to vector<2x16x8xf32>
    %264 = vector.extract_strided_slice %211 {offsets = [0, 0, 88], sizes = [2, 16, 8], strides = [1, 1, 1]} : vector<2x16x96xf32> to vector<2x16x8xf32>
    "tpu.trace_start"() <{level = 10 : i32, message = "bqd,bkd->bqk"}> : () -> ()
    %cst_110 = arith.constant dense<0.000000e+00> : vector<2x16x16xf32>
    %265 = tpu.matmul %262, %263, %cst_110 {dimension_numbers = #tpu.dot_dimension_numbers<[2], [2], [1], [1], [0, 0, 0, 1, 1, 1], [0], [0]>} : vector<2x16x8xf32>, vector<2x16x8xf32>, vector<2x16x16xf32> -> vector<2x16x16xf32>
    "tpu.trace_stop"() : () -> ()
    %cst_111 = arith.constant dense<0xFF800000> : vector<2x16xf32>
    %266 = vector.multi_reduction <maximumf>, %265, %cst_111 [2] : vector<2x16x16xf32> to vector<2x16xf32>
    %267 = vector.shape_cast %266 : vector<2x16xf32> to vector<2x16x1xf32>
    %268 = vector.broadcast %267 : vector<2x16x1xf32> to vector<2x16x16xf32>
    %269 = arith.subf %265, %268 : vector<2x16x16xf32>
    %270 = math.exp %269 : vector<2x16x16xf32>
    %cst_112 = arith.constant dense<0.000000e+00> : vector<2x16xf32>
    %271 = vector.multi_reduction <add>, %270, %cst_112 [2] : vector<2x16x16xf32> to vector<2x16xf32>
    %272 = vector.shape_cast %271 : vector<2x16xf32> to vector<2x16x1xf32>
    %273 = vector.broadcast %272 : vector<2x16x1xf32> to vector<2x16x16xf32>
    %274 = arith.divf %270, %273 : vector<2x16x16xf32>
    "tpu.trace_start"() <{level = 10 : i32, message = "bqk,bkd->bqd"}> : () -> ()
    %cst_113 = arith.constant dense<0.000000e+00> : vector<2x16x8xf32>
    %275 = tpu.matmul %274, %264, %cst_113 {dimension_numbers = #tpu.dot_dimension_numbers<[2], [1], [1], [2], [0, 0, 0, 1, 1, 2], [0], [0]>} : vector<2x16x16xf32>, vector<2x16x8xf32>, vector<2x16x8xf32> -> vector<2x16x8xf32>
    "tpu.trace_stop"() : () -> ()
    %276 = tpu.concatenate %227, %243, %259, %275 in 2 : vector<2x16x8xf32>, vector<2x16x8xf32>, vector<2x16x8xf32>, vector<2x16x8xf32> -> vector<2x16x32xf32>
    %277 = vector.shape_cast %276 : vector<2x16x32xf32> to vector<32x32xf32>
    %cst_114 = arith.constant dense<0.000000e+00> : vector<32x32xf32>
    %278 = tpu.matmul %277, %173, %cst_114 {dimension_numbers = #tpu.dot_dimension_numbers<[1], [0], [0], [1], [0, 0, 1, 1], [], []>} : vector<32x32xf32>, vector<32x32xf32>, vector<32x32xf32> -> vector<32x32xf32>
    %279 = arith.addf %169, %278 : vector<32x32xf32>
    %280 = vector.broadcast %181 : vector<1x32xf32> to vector<32x32xf32>
    %281 = arith.addf %279, %280 : vector<32x32xf32>
    %cst_115 = arith.constant dense<0.000000e+00> : vector<32xf32>
    %282 = vector.multi_reduction <add>, %281, %cst_115 [1] : vector<32x32xf32> to vector<32xf32>
    %283 = vector.shape_cast %282 : vector<32xf32> to vector<32x1xf32>
    %cst_116 = arith.constant 3.200000e+01 : f32
    %284 = vector.broadcast %cst_116 : f32 to vector<32x1xf32>
    %285 = arith.divf %283, %284 : vector<32x1xf32>
    %286 = vector.broadcast %285 : vector<32x1xf32> to vector<32x32xf32>
    %287 = arith.subf %281, %286 : vector<32x32xf32>
    %288 = arith.mulf %287, %287 : vector<32x32xf32>
    %cst_117 = arith.constant dense<0.000000e+00> : vector<32xf32>
    %289 = vector.multi_reduction <add>, %288, %cst_117 [1] : vector<32x32xf32> to vector<32xf32>
    %290 = vector.shape_cast %289 : vector<32xf32> to vector<32x1xf32>
    %cst_118 = arith.constant 3.200000e+01 : f32
    %291 = vector.broadcast %cst_118 : f32 to vector<32x1xf32>
    %292 = arith.divf %290, %291 : vector<32x1xf32>
    %293 = vector.broadcast %285 : vector<32x1xf32> to vector<32x32xf32>
    %294 = arith.subf %281, %293 : vector<32x32xf32>
    %cst_119 = arith.constant 9.99999974E-6 : f32
    %295 = vector.broadcast %cst_119 : f32 to vector<32x1xf32>
    %296 = arith.addf %292, %295 : vector<32x1xf32>
    %297 = math.rsqrt %296 : vector<32x1xf32>
    %298 = vector.broadcast %297 : vector<32x1xf32> to vector<32x32xf32>
    %299 = arith.mulf %294, %298 : vector<32x32xf32>
    %300 = vector.broadcast %182 : vector<1x32xf32> to vector<32x32xf32>
    %301 = arith.mulf %299, %300 : vector<32x32xf32>
    %302 = vector.broadcast %183 : vector<1x32xf32> to vector<32x32xf32>
    %303 = arith.addf %301, %302 : vector<32x32xf32>
    %cst_120 = arith.constant dense<0.000000e+00> : vector<32x64xf32>
    %304 = tpu.matmul %303, %175, %cst_120 {dimension_numbers = #tpu.dot_dimension_numbers<[1], [0], [0], [1], [0, 0, 1, 1], [], []>} : vector<32x32xf32>, vector<32x64xf32>, vector<32x64xf32> -> vector<32x64xf32>
    %305 = vector.broadcast %184 : vector<1x64xf32> to vector<32x64xf32>
    %306 = arith.addf %304, %305 : vector<32x64xf32>
    %307 = arith.mulf %306, %306 : vector<32x64xf32>
    %308 = arith.mulf %306, %307 : vector<32x64xf32>
    %cst_121 = arith.constant 4.471500e-02 : f32
    %309 = vector.broadcast %cst_121 : f32 to vector<32x64xf32>
    %310 = arith.mulf %309, %308 : vector<32x64xf32>
    %311 = arith.addf %306, %310 : vector<32x64xf32>
    %cst_122 = arith.constant 0.797884583 : f32
    %312 = vector.broadcast %cst_122 : f32 to vector<32x64xf32>
    %313 = arith.mulf %312, %311 : vector<32x64xf32>
    %314 = math.tanh %313 : vector<32x64xf32>
    %cst_123 = arith.constant 1.000000e+00 : f32
    %315 = vector.broadcast %cst_123 : f32 to vector<32x64xf32>
    %316 = arith.addf %315, %314 : vector<32x64xf32>
    %cst_124 = arith.constant 5.000000e-01 : f32
    %317 = vector.broadcast %cst_124 : f32 to vector<32x64xf32>
    %318 = arith.mulf %317, %316 : vector<32x64xf32>
    %319 = arith.mulf %306, %318 : vector<32x64xf32>
    %cst_125 = arith.constant dense<0.000000e+00> : vector<32x32xf32>
    %320 = tpu.matmul %319, %177, %cst_125 {dimension_numbers = #tpu.dot_dimension_numbers<[1], [0], [0], [1], [0, 0, 1, 1], [], []>} : vector<32x64xf32>, vector<64x32xf32>, vector<32x32xf32> -> vector<32x32xf32>
    %321 = vector.broadcast %185 : vector<1x32xf32> to vector<32x32xf32>
    %322 = arith.addf %320, %321 : vector<32x32xf32>
    %323 = arith.addf %281, %322 : vector<32x32xf32>
    %c9_126 = arith.constant 9 : index
    %c0_127 = arith.constant 0 : index
    %c0_128 = arith.constant 0 : index
    %324 = vector.load %arg2[%c9_126, %c0_127, %c0_128] : memref<23x64x128xf32, #tpu.memory_space<vmem>>, vector<1x32x16xf32>
    %325 = vector.shape_cast %324 : vector<1x32x16xf32> to vector<32x16xf32>
    %cst_129 = arith.constant dense<0.000000e+00> : vector<32x16xf32>
    %326 = tpu.matmul %323, %325, %cst_129 {dimension_numbers = #tpu.dot_dimension_numbers<[1], [0], [0], [1], [0, 0, 1, 1], [], []>} : vector<32x32xf32>, vector<32x16xf32>, vector<32x16xf32> -> vector<32x16xf32>
    %c17 = arith.constant 17 : index
    %c0_130 = arith.constant 0 : index
    %327 = vector.load %arg3[%c17, %c0_130] : memref<36x128xf32, #tpu.memory_space<vmem>>, vector<1x16xf32>
    %328 = vector.broadcast %327 : vector<1x16xf32> to vector<32x16xf32>
    %329 = arith.addf %326, %328 : vector<32x16xf32>
    %c11_131 = arith.constant 11 : index
    %c0_132 = arith.constant 0 : index
    %c0_133 = arith.constant 0 : index
    %330 = vector.load %arg2[%c11_131, %c0_132, %c0_133] : memref<23x64x128xf32, #tpu.memory_space<vmem>>, vector<1x32x16xf32>
    %331 = vector.shape_cast %330 : vector<1x32x16xf32> to vector<32x16xf32>
    %332 = arith.mulf %329, %329 : vector<32x16xf32>
    %cst_134 = arith.constant dense<0.000000e+00> : vector<32xf32>
    %333 = vector.multi_reduction <add>, %332, %cst_134 [1] : vector<32x16xf32> to vector<32xf32>
    %334 = vector.shape_cast %333 : vector<32xf32> to vector<32x1xf32>
    %335 = arith.mulf %331, %331 : vector<32x16xf32>
    %cst_135 = arith.constant dense<0.000000e+00> : vector<32xf32>
    %336 = vector.multi_reduction <add>, %335, %cst_135 [1] : vector<32x16xf32> to vector<32xf32>
    %337 = vector.shape_cast %336 : vector<32xf32> to vector<1x32xf32>
    %338 = vector.broadcast %334 : vector<32x1xf32> to vector<32x32xf32>
    %339 = vector.broadcast %337 : vector<1x32xf32> to vector<32x32xf32>
    %340 = arith.addf %338, %339 : vector<32x32xf32>
    "tpu.trace_start"() <{level = 10 : i32, message = "me,ne->mn"}> : () -> ()
    %cst_136 = arith.constant dense<0.000000e+00> : vector<32x32xf32>
    %341 = tpu.matmul %329, %331, %cst_136 {dimension_numbers = #tpu.dot_dimension_numbers<[1], [1], [0], [0], [0, 0, 1, 0], [], []>} : vector<32x16xf32>, vector<32x16xf32>, vector<32x32xf32> -> vector<32x32xf32>
    "tpu.trace_stop"() : () -> ()
    %cst_137 = arith.constant 2.000000e+00 : f32
    %342 = vector.broadcast %cst_137 : f32 to vector<32x32xf32>
    %343 = arith.mulf %342, %341 : vector<32x32xf32>
    %344 = arith.subf %340, %343 : vector<32x32xf32>
    %345 = tpu.iota {dimensions = array<i32: 1>} : vector<32x32xi32>
    %cst_138 = arith.constant dense<0x7F800000> : vector<32xf32>
    %346 = vector.multi_reduction <minimumf>, %344, %cst_138 [1] : vector<32x32xf32> to vector<32xf32>
    %347 = vector.shape_cast %346 : vector<32xf32> to vector<32x1xf32>
    %348 = vector.broadcast %347 : vector<32x1xf32> to vector<32x32xf32>
    %349 = arith.cmpf ole, %344, %348 : vector<32x32xf32>
    %c32_i32 = arith.constant 32 : i32
    %350 = vector.broadcast %c32_i32 : i32 to vector<32x32xi32>
    %351 = arith.select %349, %345, %350 : vector<32x32xi1>, vector<32x32xi32>
    %cst_139 = arith.constant dense<2147483647> : vector<32xi32>
    %352 = vector.multi_reduction <minsi>, %351, %cst_139 [1] : vector<32x32xi32> to vector<32xi32>
    %353 = vector.shape_cast %352 : vector<32xi32> to vector<32x1xi32>
    %354 = vector.broadcast %353 : vector<32x1xi32> to vector<32x32xi32>
    %355 = arith.cmpi eq, %345, %354 : vector<32x32xi32>
    %356 = arith.extui %355 : vector<32x32xi1> to vector<32x32xi32>
    %357 = arith.sitofp %356 : vector<32x32xi32> to vector<32x32xf32>
    %cst_140 = arith.constant dense<0.000000e+00> : vector<32x16xf32>
    %358 = tpu.matmul %357, %331, %cst_140 {dimension_numbers = #tpu.dot_dimension_numbers<[1], [0], [0], [1], [0, 0, 1, 1], [], []>} : vector<32x32xf32>, vector<32x16xf32>, vector<32x16xf32> -> vector<32x16xf32>
    %c12_141 = arith.constant 12 : index
    %c0_142 = arith.constant 0 : index
    %c0_143 = arith.constant 0 : index
    %359 = vector.load %arg2[%c12_141, %c0_142, %c0_143] : memref<23x64x128xf32, #tpu.memory_space<vmem>>, vector<1x16x32xf32>
    %360 = vector.shape_cast %359 : vector<1x16x32xf32> to vector<16x32xf32>
    %cst_144 = arith.constant dense<0.000000e+00> : vector<32x32xf32>
    %361 = tpu.matmul %358, %360, %cst_144 {dimension_numbers = #tpu.dot_dimension_numbers<[1], [0], [0], [1], [0, 0, 1, 1], [], []>} : vector<32x16xf32>, vector<16x32xf32>, vector<32x32xf32> -> vector<32x32xf32>
    %c18 = arith.constant 18 : index
    %c0_145 = arith.constant 0 : index
    %362 = vector.load %arg3[%c18, %c0_145] : memref<36x128xf32, #tpu.memory_space<vmem>>, vector<1x32xf32>
    %363 = vector.broadcast %362 : vector<1x32xf32> to vector<32x32xf32>
    %364 = arith.addf %361, %363 : vector<32x32xf32>
    %c22 = arith.constant 22 : index
    %c0_146 = arith.constant 0 : index
    %c0_147 = arith.constant 0 : index
    %365 = vector.load %arg2[%c22, %c0_146, %c0_147] : memref<23x64x128xf32, #tpu.memory_space<vmem>>, vector<1x16x32xf32>
    %366 = vector.shape_cast %365 : vector<1x16x32xf32> to vector<16x32xf32>
    %367 = vector.shape_cast %364 : vector<32x32xf32> to vector<2x16x32xf32>
    %368 = vector.shape_cast %366 : vector<16x32xf32> to vector<1x16x32xf32>
    %369 = vector.broadcast %368 : vector<1x16x32xf32> to vector<2x16x32xf32>
    %370 = arith.addf %367, %369 : vector<2x16x32xf32>
    %371 = vector.shape_cast %370 : vector<2x16x32xf32> to vector<32x32xf32>
    %c13_148 = arith.constant 13 : index
    %c0_149 = arith.constant 0 : index
    %c0_150 = arith.constant 0 : index
    %372 = vector.load %arg2[%c13_148, %c0_149, %c0_150] : memref<23x64x128xf32, #tpu.memory_space<vmem>>, vector<1x32x96xf32>
    %373 = vector.shape_cast %372 : vector<1x32x96xf32> to vector<32x96xf32>
    %c14_151 = arith.constant 14 : index
    %c0_152 = arith.constant 0 : index
    %c0_153 = arith.constant 0 : index
    %374 = vector.load %arg2[%c14_151, %c0_152, %c0_153] : memref<23x64x128xf32, #tpu.memory_space<vmem>>, vector<1x32x32xf32>
    %375 = vector.shape_cast %374 : vector<1x32x32xf32> to vector<32x32xf32>
    %c15_154 = arith.constant 15 : index
    %c0_155 = arith.constant 0 : index
    %c0_156 = arith.constant 0 : index
    %376 = vector.load %arg2[%c15_154, %c0_155, %c0_156] : memref<23x64x128xf32, #tpu.memory_space<vmem>>, vector<1x32x64xf32>
    %377 = vector.shape_cast %376 : vector<1x32x64xf32> to vector<32x64xf32>
    %c16_157 = arith.constant 16 : index
    %c0_158 = arith.constant 0 : index
    %c0_159 = arith.constant 0 : index
    %378 = vector.load %arg2[%c16_157, %c0_158, %c0_159] : memref<23x64x128xf32, #tpu.memory_space<vmem>>, vector<1x64x32xf32>
    %379 = vector.shape_cast %378 : vector<1x64x32xf32> to vector<64x32xf32>
    %c19 = arith.constant 19 : index
    %c0_160 = arith.constant 0 : index
    %380 = vector.load %arg3[%c19, %c0_160] : memref<36x128xf32, #tpu.memory_space<vmem>>, vector<1x32xf32>
    %c20 = arith.constant 20 : index
    %c0_161 = arith.constant 0 : index
    %381 = vector.load %arg3[%c20, %c0_161] : memref<36x128xf32, #tpu.memory_space<vmem>>, vector<1x32xf32>
    %c21 = arith.constant 21 : index
    %c0_162 = arith.constant 0 : index
    %382 = vector.load %arg3[%c21, %c0_162] : memref<36x128xf32, #tpu.memory_space<vmem>>, vector<1x96xf32>
    %c22_163 = arith.constant 22 : index
    %c0_164 = arith.constant 0 : index
    %383 = vector.load %arg3[%c22_163, %c0_164] : memref<36x128xf32, #tpu.memory_space<vmem>>, vector<1x32xf32>
    %c23 = arith.constant 23 : index
    %c0_165 = arith.constant 0 : index
    %384 = vector.load %arg3[%c23, %c0_165] : memref<36x128xf32, #tpu.memory_space<vmem>>, vector<1x32xf32>
    %c24 = arith.constant 24 : index
    %c0_166 = arith.constant 0 : index
    %385 = vector.load %arg3[%c24, %c0_166] : memref<36x128xf32, #tpu.memory_space<vmem>>, vector<1x32xf32>
    %c25 = arith.constant 25 : index
    %c0_167 = arith.constant 0 : index
    %386 = vector.load %arg3[%c25, %c0_167] : memref<36x128xf32, #tpu.memory_space<vmem>>, vector<1x64xf32>
    %c26 = arith.constant 26 : index
    %c0_168 = arith.constant 0 : index
    %387 = vector.load %arg3[%c26, %c0_168] : memref<36x128xf32, #tpu.memory_space<vmem>>, vector<1x32xf32>
    %cst_169 = arith.constant dense<0.000000e+00> : vector<32xf32>
    %388 = vector.multi_reduction <add>, %371, %cst_169 [1] : vector<32x32xf32> to vector<32xf32>
    %389 = vector.shape_cast %388 : vector<32xf32> to vector<32x1xf32>
    %cst_170 = arith.constant 3.200000e+01 : f32
    %390 = vector.broadcast %cst_170 : f32 to vector<32x1xf32>
    %391 = arith.divf %389, %390 : vector<32x1xf32>
    %392 = vector.broadcast %391 : vector<32x1xf32> to vector<32x32xf32>
    %393 = arith.subf %371, %392 : vector<32x32xf32>
    %394 = arith.mulf %393, %393 : vector<32x32xf32>
    %cst_171 = arith.constant dense<0.000000e+00> : vector<32xf32>
    %395 = vector.multi_reduction <add>, %394, %cst_171 [1] : vector<32x32xf32> to vector<32xf32>
    %396 = vector.shape_cast %395 : vector<32xf32> to vector<32x1xf32>
    %cst_172 = arith.constant 3.200000e+01 : f32
    %397 = vector.broadcast %cst_172 : f32 to vector<32x1xf32>
    %398 = arith.divf %396, %397 : vector<32x1xf32>
    %399 = vector.broadcast %391 : vector<32x1xf32> to vector<32x32xf32>
    %400 = arith.subf %371, %399 : vector<32x32xf32>
    %cst_173 = arith.constant 9.99999974E-6 : f32
    %401 = vector.broadcast %cst_173 : f32 to vector<32x1xf32>
    %402 = arith.addf %398, %401 : vector<32x1xf32>
    %403 = math.rsqrt %402 : vector<32x1xf32>
    %404 = vector.broadcast %403 : vector<32x1xf32> to vector<32x32xf32>
    %405 = arith.mulf %400, %404 : vector<32x32xf32>
    %406 = vector.broadcast %380 : vector<1x32xf32> to vector<32x32xf32>
    %407 = arith.mulf %405, %406 : vector<32x32xf32>
    %408 = vector.broadcast %381 : vector<1x32xf32> to vector<32x32xf32>
    %409 = arith.addf %407, %408 : vector<32x32xf32>
    %cst_174 = arith.constant dense<0.000000e+00> : vector<32x96xf32>
    %410 = tpu.matmul %409, %373, %cst_174 {dimension_numbers = #tpu.dot_dimension_numbers<[1], [0], [0], [1], [0, 0, 1, 1], [], []>} : vector<32x32xf32>, vector<32x96xf32>, vector<32x96xf32> -> vector<32x96xf32>
    %411 = vector.broadcast %382 : vector<1x96xf32> to vector<32x96xf32>
    %412 = arith.addf %410, %411 : vector<32x96xf32>
    %413 = vector.shape_cast %412 : vector<32x96xf32> to vector<2x16x96xf32>
    %414 = vector.extract_strided_slice %413 {offsets = [0, 0, 0], sizes = [2, 16, 8], strides = [1, 1, 1]} : vector<2x16x96xf32> to vector<2x16x8xf32>
    %cst_175 = arith.constant 0.353553385 : f32
    %415 = vector.broadcast %cst_175 : f32 to vector<2x16x8xf32>
    %416 = arith.mulf %414, %415 : vector<2x16x8xf32>
    %417 = vector.extract_strided_slice %413 {offsets = [0, 0, 32], sizes = [2, 16, 8], strides = [1, 1, 1]} : vector<2x16x96xf32> to vector<2x16x8xf32>
    %418 = vector.extract_strided_slice %413 {offsets = [0, 0, 64], sizes = [2, 16, 8], strides = [1, 1, 1]} : vector<2x16x96xf32> to vector<2x16x8xf32>
    "tpu.trace_start"() <{level = 10 : i32, message = "bqd,bkd->bqk"}> : () -> ()
    %cst_176 = arith.constant dense<0.000000e+00> : vector<2x16x16xf32>
    %419 = tpu.matmul %416, %417, %cst_176 {dimension_numbers = #tpu.dot_dimension_numbers<[2], [2], [1], [1], [0, 0, 0, 1, 1, 1], [0], [0]>} : vector<2x16x8xf32>, vector<2x16x8xf32>, vector<2x16x16xf32> -> vector<2x16x16xf32>
    "tpu.trace_stop"() : () -> ()
    %cst_177 = arith.constant dense<0xFF800000> : vector<2x16xf32>
    %420 = vector.multi_reduction <maximumf>, %419, %cst_177 [2] : vector<2x16x16xf32> to vector<2x16xf32>
    %421 = vector.shape_cast %420 : vector<2x16xf32> to vector<2x16x1xf32>
    %422 = vector.broadcast %421 : vector<2x16x1xf32> to vector<2x16x16xf32>
    %423 = arith.subf %419, %422 : vector<2x16x16xf32>
    %424 = math.exp %423 : vector<2x16x16xf32>
    %cst_178 = arith.constant dense<0.000000e+00> : vector<2x16xf32>
    %425 = vector.multi_reduction <add>, %424, %cst_178 [2] : vector<2x16x16xf32> to vector<2x16xf32>
    %426 = vector.shape_cast %425 : vector<2x16xf32> to vector<2x16x1xf32>
    %427 = vector.broadcast %426 : vector<2x16x1xf32> to vector<2x16x16xf32>
    %428 = arith.divf %424, %427 : vector<2x16x16xf32>
    "tpu.trace_start"() <{level = 10 : i32, message = "bqk,bkd->bqd"}> : () -> ()
    %cst_179 = arith.constant dense<0.000000e+00> : vector<2x16x8xf32>
    %429 = tpu.matmul %428, %418, %cst_179 {dimension_numbers = #tpu.dot_dimension_numbers<[2], [1], [1], [2], [0, 0, 0, 1, 1, 2], [0], [0]>} : vector<2x16x16xf32>, vector<2x16x8xf32>, vector<2x16x8xf32> -> vector<2x16x8xf32>
    "tpu.trace_stop"() : () -> ()
    %430 = vector.extract_strided_slice %413 {offsets = [0, 0, 8], sizes = [2, 16, 8], strides = [1, 1, 1]} : vector<2x16x96xf32> to vector<2x16x8xf32>
    %cst_180 = arith.constant 0.353553385 : f32
    %431 = vector.broadcast %cst_180 : f32 to vector<2x16x8xf32>
    %432 = arith.mulf %430, %431 : vector<2x16x8xf32>
    %433 = vector.extract_strided_slice %413 {offsets = [0, 0, 40], sizes = [2, 16, 8], strides = [1, 1, 1]} : vector<2x16x96xf32> to vector<2x16x8xf32>
    %434 = vector.extract_strided_slice %413 {offsets = [0, 0, 72], sizes = [2, 16, 8], strides = [1, 1, 1]} : vector<2x16x96xf32> to vector<2x16x8xf32>
    "tpu.trace_start"() <{level = 10 : i32, message = "bqd,bkd->bqk"}> : () -> ()
    %cst_181 = arith.constant dense<0.000000e+00> : vector<2x16x16xf32>
    %435 = tpu.matmul %432, %433, %cst_181 {dimension_numbers = #tpu.dot_dimension_numbers<[2], [2], [1], [1], [0, 0, 0, 1, 1, 1], [0], [0]>} : vector<2x16x8xf32>, vector<2x16x8xf32>, vector<2x16x16xf32> -> vector<2x16x16xf32>
    "tpu.trace_stop"() : () -> ()
    %cst_182 = arith.constant dense<0xFF800000> : vector<2x16xf32>
    %436 = vector.multi_reduction <maximumf>, %435, %cst_182 [2] : vector<2x16x16xf32> to vector<2x16xf32>
    %437 = vector.shape_cast %436 : vector<2x16xf32> to vector<2x16x1xf32>
    %438 = vector.broadcast %437 : vector<2x16x1xf32> to vector<2x16x16xf32>
    %439 = arith.subf %435, %438 : vector<2x16x16xf32>
    %440 = math.exp %439 : vector<2x16x16xf32>
    %cst_183 = arith.constant dense<0.000000e+00> : vector<2x16xf32>
    %441 = vector.multi_reduction <add>, %440, %cst_183 [2] : vector<2x16x16xf32> to vector<2x16xf32>
    %442 = vector.shape_cast %441 : vector<2x16xf32> to vector<2x16x1xf32>
    %443 = vector.broadcast %442 : vector<2x16x1xf32> to vector<2x16x16xf32>
    %444 = arith.divf %440, %443 : vector<2x16x16xf32>
    "tpu.trace_start"() <{level = 10 : i32, message = "bqk,bkd->bqd"}> : () -> ()
    %cst_184 = arith.constant dense<0.000000e+00> : vector<2x16x8xf32>
    %445 = tpu.matmul %444, %434, %cst_184 {dimension_numbers = #tpu.dot_dimension_numbers<[2], [1], [1], [2], [0, 0, 0, 1, 1, 2], [0], [0]>} : vector<2x16x16xf32>, vector<2x16x8xf32>, vector<2x16x8xf32> -> vector<2x16x8xf32>
    "tpu.trace_stop"() : () -> ()
    %446 = vector.extract_strided_slice %413 {offsets = [0, 0, 16], sizes = [2, 16, 8], strides = [1, 1, 1]} : vector<2x16x96xf32> to vector<2x16x8xf32>
    %cst_185 = arith.constant 0.353553385 : f32
    %447 = vector.broadcast %cst_185 : f32 to vector<2x16x8xf32>
    %448 = arith.mulf %446, %447 : vector<2x16x8xf32>
    %449 = vector.extract_strided_slice %413 {offsets = [0, 0, 48], sizes = [2, 16, 8], strides = [1, 1, 1]} : vector<2x16x96xf32> to vector<2x16x8xf32>
    %450 = vector.extract_strided_slice %413 {offsets = [0, 0, 80], sizes = [2, 16, 8], strides = [1, 1, 1]} : vector<2x16x96xf32> to vector<2x16x8xf32>
    "tpu.trace_start"() <{level = 10 : i32, message = "bqd,bkd->bqk"}> : () -> ()
    %cst_186 = arith.constant dense<0.000000e+00> : vector<2x16x16xf32>
    %451 = tpu.matmul %448, %449, %cst_186 {dimension_numbers = #tpu.dot_dimension_numbers<[2], [2], [1], [1], [0, 0, 0, 1, 1, 1], [0], [0]>} : vector<2x16x8xf32>, vector<2x16x8xf32>, vector<2x16x16xf32> -> vector<2x16x16xf32>
    "tpu.trace_stop"() : () -> ()
    %cst_187 = arith.constant dense<0xFF800000> : vector<2x16xf32>
    %452 = vector.multi_reduction <maximumf>, %451, %cst_187 [2] : vector<2x16x16xf32> to vector<2x16xf32>
    %453 = vector.shape_cast %452 : vector<2x16xf32> to vector<2x16x1xf32>
    %454 = vector.broadcast %453 : vector<2x16x1xf32> to vector<2x16x16xf32>
    %455 = arith.subf %451, %454 : vector<2x16x16xf32>
    %456 = math.exp %455 : vector<2x16x16xf32>
    %cst_188 = arith.constant dense<0.000000e+00> : vector<2x16xf32>
    %457 = vector.multi_reduction <add>, %456, %cst_188 [2] : vector<2x16x16xf32> to vector<2x16xf32>
    %458 = vector.shape_cast %457 : vector<2x16xf32> to vector<2x16x1xf32>
    %459 = vector.broadcast %458 : vector<2x16x1xf32> to vector<2x16x16xf32>
    %460 = arith.divf %456, %459 : vector<2x16x16xf32>
    "tpu.trace_start"() <{level = 10 : i32, message = "bqk,bkd->bqd"}> : () -> ()
    %cst_189 = arith.constant dense<0.000000e+00> : vector<2x16x8xf32>
    %461 = tpu.matmul %460, %450, %cst_189 {dimension_numbers = #tpu.dot_dimension_numbers<[2], [1], [1], [2], [0, 0, 0, 1, 1, 2], [0], [0]>} : vector<2x16x16xf32>, vector<2x16x8xf32>, vector<2x16x8xf32> -> vector<2x16x8xf32>
    "tpu.trace_stop"() : () -> ()
    %462 = vector.extract_strided_slice %413 {offsets = [0, 0, 24], sizes = [2, 16, 8], strides = [1, 1, 1]} : vector<2x16x96xf32> to vector<2x16x8xf32>
    %cst_190 = arith.constant 0.353553385 : f32
    %463 = vector.broadcast %cst_190 : f32 to vector<2x16x8xf32>
    %464 = arith.mulf %462, %463 : vector<2x16x8xf32>
    %465 = vector.extract_strided_slice %413 {offsets = [0, 0, 56], sizes = [2, 16, 8], strides = [1, 1, 1]} : vector<2x16x96xf32> to vector<2x16x8xf32>
    %466 = vector.extract_strided_slice %413 {offsets = [0, 0, 88], sizes = [2, 16, 8], strides = [1, 1, 1]} : vector<2x16x96xf32> to vector<2x16x8xf32>
    "tpu.trace_start"() <{level = 10 : i32, message = "bqd,bkd->bqk"}> : () -> ()
    %cst_191 = arith.constant dense<0.000000e+00> : vector<2x16x16xf32>
    %467 = tpu.matmul %464, %465, %cst_191 {dimension_numbers = #tpu.dot_dimension_numbers<[2], [2], [1], [1], [0, 0, 0, 1, 1, 1], [0], [0]>} : vector<2x16x8xf32>, vector<2x16x8xf32>, vector<2x16x16xf32> -> vector<2x16x16xf32>
    "tpu.trace_stop"() : () -> ()
    %cst_192 = arith.constant dense<0xFF800000> : vector<2x16xf32>
    %468 = vector.multi_reduction <maximumf>, %467, %cst_192 [2] : vector<2x16x16xf32> to vector<2x16xf32>
    %469 = vector.shape_cast %468 : vector<2x16xf32> to vector<2x16x1xf32>
    %470 = vector.broadcast %469 : vector<2x16x1xf32> to vector<2x16x16xf32>
    %471 = arith.subf %467, %470 : vector<2x16x16xf32>
    %472 = math.exp %471 : vector<2x16x16xf32>
    %cst_193 = arith.constant dense<0.000000e+00> : vector<2x16xf32>
    %473 = vector.multi_reduction <add>, %472, %cst_193 [2] : vector<2x16x16xf32> to vector<2x16xf32>
    %474 = vector.shape_cast %473 : vector<2x16xf32> to vector<2x16x1xf32>
    %475 = vector.broadcast %474 : vector<2x16x1xf32> to vector<2x16x16xf32>
    %476 = arith.divf %472, %475 : vector<2x16x16xf32>
    "tpu.trace_start"() <{level = 10 : i32, message = "bqk,bkd->bqd"}> : () -> ()
    %cst_194 = arith.constant dense<0.000000e+00> : vector<2x16x8xf32>
    %477 = tpu.matmul %476, %466, %cst_194 {dimension_numbers = #tpu.dot_dimension_numbers<[2], [1], [1], [2], [0, 0, 0, 1, 1, 2], [0], [0]>} : vector<2x16x16xf32>, vector<2x16x8xf32>, vector<2x16x8xf32> -> vector<2x16x8xf32>
    "tpu.trace_stop"() : () -> ()
    %478 = tpu.concatenate %429, %445, %461, %477 in 2 : vector<2x16x8xf32>, vector<2x16x8xf32>, vector<2x16x8xf32>, vector<2x16x8xf32> -> vector<2x16x32xf32>
    %479 = vector.shape_cast %478 : vector<2x16x32xf32> to vector<32x32xf32>
    %cst_195 = arith.constant dense<0.000000e+00> : vector<32x32xf32>
    %480 = tpu.matmul %479, %375, %cst_195 {dimension_numbers = #tpu.dot_dimension_numbers<[1], [0], [0], [1], [0, 0, 1, 1], [], []>} : vector<32x32xf32>, vector<32x32xf32>, vector<32x32xf32> -> vector<32x32xf32>
    %481 = arith.addf %371, %480 : vector<32x32xf32>
    %482 = vector.broadcast %383 : vector<1x32xf32> to vector<32x32xf32>
    %483 = arith.addf %481, %482 : vector<32x32xf32>
    %cst_196 = arith.constant dense<0.000000e+00> : vector<32xf32>
    %484 = vector.multi_reduction <add>, %483, %cst_196 [1] : vector<32x32xf32> to vector<32xf32>
    %485 = vector.shape_cast %484 : vector<32xf32> to vector<32x1xf32>
    %cst_197 = arith.constant 3.200000e+01 : f32
    %486 = vector.broadcast %cst_197 : f32 to vector<32x1xf32>
    %487 = arith.divf %485, %486 : vector<32x1xf32>
    %488 = vector.broadcast %487 : vector<32x1xf32> to vector<32x32xf32>
    %489 = arith.subf %483, %488 : vector<32x32xf32>
    %490 = arith.mulf %489, %489 : vector<32x32xf32>
    %cst_198 = arith.constant dense<0.000000e+00> : vector<32xf32>
    %491 = vector.multi_reduction <add>, %490, %cst_198 [1] : vector<32x32xf32> to vector<32xf32>
    %492 = vector.shape_cast %491 : vector<32xf32> to vector<32x1xf32>
    %cst_199 = arith.constant 3.200000e+01 : f32
    %493 = vector.broadcast %cst_199 : f32 to vector<32x1xf32>
    %494 = arith.divf %492, %493 : vector<32x1xf32>
    %495 = vector.broadcast %487 : vector<32x1xf32> to vector<32x32xf32>
    %496 = arith.subf %483, %495 : vector<32x32xf32>
    %cst_200 = arith.constant 9.99999974E-6 : f32
    %497 = vector.broadcast %cst_200 : f32 to vector<32x1xf32>
    %498 = arith.addf %494, %497 : vector<32x1xf32>
    %499 = math.rsqrt %498 : vector<32x1xf32>
    %500 = vector.broadcast %499 : vector<32x1xf32> to vector<32x32xf32>
    %501 = arith.mulf %496, %500 : vector<32x32xf32>
    %502 = vector.broadcast %384 : vector<1x32xf32> to vector<32x32xf32>
    %503 = arith.mulf %501, %502 : vector<32x32xf32>
    %504 = vector.broadcast %385 : vector<1x32xf32> to vector<32x32xf32>
    %505 = arith.addf %503, %504 : vector<32x32xf32>
    %cst_201 = arith.constant dense<0.000000e+00> : vector<32x64xf32>
    %506 = tpu.matmul %505, %377, %cst_201 {dimension_numbers = #tpu.dot_dimension_numbers<[1], [0], [0], [1], [0, 0, 1, 1], [], []>} : vector<32x32xf32>, vector<32x64xf32>, vector<32x64xf32> -> vector<32x64xf32>
    %507 = vector.broadcast %386 : vector<1x64xf32> to vector<32x64xf32>
    %508 = arith.addf %506, %507 : vector<32x64xf32>
    %509 = arith.mulf %508, %508 : vector<32x64xf32>
    %510 = arith.mulf %508, %509 : vector<32x64xf32>
    %cst_202 = arith.constant 4.471500e-02 : f32
    %511 = vector.broadcast %cst_202 : f32 to vector<32x64xf32>
    %512 = arith.mulf %511, %510 : vector<32x64xf32>
    %513 = arith.addf %508, %512 : vector<32x64xf32>
    %cst_203 = arith.constant 0.797884583 : f32
    %514 = vector.broadcast %cst_203 : f32 to vector<32x64xf32>
    %515 = arith.mulf %514, %513 : vector<32x64xf32>
    %516 = math.tanh %515 : vector<32x64xf32>
    %cst_204 = arith.constant 1.000000e+00 : f32
    %517 = vector.broadcast %cst_204 : f32 to vector<32x64xf32>
    %518 = arith.addf %517, %516 : vector<32x64xf32>
    %cst_205 = arith.constant 5.000000e-01 : f32
    %519 = vector.broadcast %cst_205 : f32 to vector<32x64xf32>
    %520 = arith.mulf %519, %518 : vector<32x64xf32>
    %521 = arith.mulf %508, %520 : vector<32x64xf32>
    %cst_206 = arith.constant dense<0.000000e+00> : vector<32x32xf32>
    %522 = tpu.matmul %521, %379, %cst_206 {dimension_numbers = #tpu.dot_dimension_numbers<[1], [0], [0], [1], [0, 0, 1, 1], [], []>} : vector<32x64xf32>, vector<64x32xf32>, vector<32x32xf32> -> vector<32x32xf32>
    %523 = vector.broadcast %387 : vector<1x32xf32> to vector<32x32xf32>
    %524 = arith.addf %522, %523 : vector<32x32xf32>
    %525 = arith.addf %483, %524 : vector<32x32xf32>
    %c17_207 = arith.constant 17 : index
    %c0_208 = arith.constant 0 : index
    %c0_209 = arith.constant 0 : index
    %526 = vector.load %arg2[%c17_207, %c0_208, %c0_209] : memref<23x64x128xf32, #tpu.memory_space<vmem>>, vector<1x32x96xf32>
    %527 = vector.shape_cast %526 : vector<1x32x96xf32> to vector<32x96xf32>
    %c18_210 = arith.constant 18 : index
    %c0_211 = arith.constant 0 : index
    %c0_212 = arith.constant 0 : index
    %528 = vector.load %arg2[%c18_210, %c0_211, %c0_212] : memref<23x64x128xf32, #tpu.memory_space<vmem>>, vector<1x32x32xf32>
    %529 = vector.shape_cast %528 : vector<1x32x32xf32> to vector<32x32xf32>
    %c19_213 = arith.constant 19 : index
    %c0_214 = arith.constant 0 : index
    %c0_215 = arith.constant 0 : index
    %530 = vector.load %arg2[%c19_213, %c0_214, %c0_215] : memref<23x64x128xf32, #tpu.memory_space<vmem>>, vector<1x32x64xf32>
    %531 = vector.shape_cast %530 : vector<1x32x64xf32> to vector<32x64xf32>
    %c20_216 = arith.constant 20 : index
    %c0_217 = arith.constant 0 : index
    %c0_218 = arith.constant 0 : index
    %532 = vector.load %arg2[%c20_216, %c0_217, %c0_218] : memref<23x64x128xf32, #tpu.memory_space<vmem>>, vector<1x64x32xf32>
    %533 = vector.shape_cast %532 : vector<1x64x32xf32> to vector<64x32xf32>
    %c27 = arith.constant 27 : index
    %c0_219 = arith.constant 0 : index
    %534 = vector.load %arg3[%c27, %c0_219] : memref<36x128xf32, #tpu.memory_space<vmem>>, vector<1x32xf32>
    %c28 = arith.constant 28 : index
    %c0_220 = arith.constant 0 : index
    %535 = vector.load %arg3[%c28, %c0_220] : memref<36x128xf32, #tpu.memory_space<vmem>>, vector<1x32xf32>
    %c29 = arith.constant 29 : index
    %c0_221 = arith.constant 0 : index
    %536 = vector.load %arg3[%c29, %c0_221] : memref<36x128xf32, #tpu.memory_space<vmem>>, vector<1x96xf32>
    %c30 = arith.constant 30 : index
    %c0_222 = arith.constant 0 : index
    %537 = vector.load %arg3[%c30, %c0_222] : memref<36x128xf32, #tpu.memory_space<vmem>>, vector<1x32xf32>
    %c31 = arith.constant 31 : index
    %c0_223 = arith.constant 0 : index
    %538 = vector.load %arg3[%c31, %c0_223] : memref<36x128xf32, #tpu.memory_space<vmem>>, vector<1x32xf32>
    %c32 = arith.constant 32 : index
    %c0_224 = arith.constant 0 : index
    %539 = vector.load %arg3[%c32, %c0_224] : memref<36x128xf32, #tpu.memory_space<vmem>>, vector<1x32xf32>
    %c33 = arith.constant 33 : index
    %c0_225 = arith.constant 0 : index
    %540 = vector.load %arg3[%c33, %c0_225] : memref<36x128xf32, #tpu.memory_space<vmem>>, vector<1x64xf32>
    %c34 = arith.constant 34 : index
    %c0_226 = arith.constant 0 : index
    %541 = vector.load %arg3[%c34, %c0_226] : memref<36x128xf32, #tpu.memory_space<vmem>>, vector<1x32xf32>
    %cst_227 = arith.constant dense<0.000000e+00> : vector<32xf32>
    %542 = vector.multi_reduction <add>, %525, %cst_227 [1] : vector<32x32xf32> to vector<32xf32>
    %543 = vector.shape_cast %542 : vector<32xf32> to vector<32x1xf32>
    %cst_228 = arith.constant 3.200000e+01 : f32
    %544 = vector.broadcast %cst_228 : f32 to vector<32x1xf32>
    %545 = arith.divf %543, %544 : vector<32x1xf32>
    %546 = vector.broadcast %545 : vector<32x1xf32> to vector<32x32xf32>
    %547 = arith.subf %525, %546 : vector<32x32xf32>
    %548 = arith.mulf %547, %547 : vector<32x32xf32>
    %cst_229 = arith.constant dense<0.000000e+00> : vector<32xf32>
    %549 = vector.multi_reduction <add>, %548, %cst_229 [1] : vector<32x32xf32> to vector<32xf32>
    %550 = vector.shape_cast %549 : vector<32xf32> to vector<32x1xf32>
    %cst_230 = arith.constant 3.200000e+01 : f32
    %551 = vector.broadcast %cst_230 : f32 to vector<32x1xf32>
    %552 = arith.divf %550, %551 : vector<32x1xf32>
    %553 = vector.broadcast %545 : vector<32x1xf32> to vector<32x32xf32>
    %554 = arith.subf %525, %553 : vector<32x32xf32>
    %cst_231 = arith.constant 9.99999974E-6 : f32
    %555 = vector.broadcast %cst_231 : f32 to vector<32x1xf32>
    %556 = arith.addf %552, %555 : vector<32x1xf32>
    %557 = math.rsqrt %556 : vector<32x1xf32>
    %558 = vector.broadcast %557 : vector<32x1xf32> to vector<32x32xf32>
    %559 = arith.mulf %554, %558 : vector<32x32xf32>
    %560 = vector.broadcast %534 : vector<1x32xf32> to vector<32x32xf32>
    %561 = arith.mulf %559, %560 : vector<32x32xf32>
    %562 = vector.broadcast %535 : vector<1x32xf32> to vector<32x32xf32>
    %563 = arith.addf %561, %562 : vector<32x32xf32>
    %cst_232 = arith.constant dense<0.000000e+00> : vector<32x96xf32>
    %564 = tpu.matmul %563, %527, %cst_232 {dimension_numbers = #tpu.dot_dimension_numbers<[1], [0], [0], [1], [0, 0, 1, 1], [], []>} : vector<32x32xf32>, vector<32x96xf32>, vector<32x96xf32> -> vector<32x96xf32>
    %565 = vector.broadcast %536 : vector<1x96xf32> to vector<32x96xf32>
    %566 = arith.addf %564, %565 : vector<32x96xf32>
    %567 = vector.shape_cast %566 : vector<32x96xf32> to vector<2x16x96xf32>
    %568 = vector.extract_strided_slice %567 {offsets = [0, 0, 0], sizes = [2, 16, 8], strides = [1, 1, 1]} : vector<2x16x96xf32> to vector<2x16x8xf32>
    %cst_233 = arith.constant 0.353553385 : f32
    %569 = vector.broadcast %cst_233 : f32 to vector<2x16x8xf32>
    %570 = arith.mulf %568, %569 : vector<2x16x8xf32>
    %571 = vector.extract_strided_slice %567 {offsets = [0, 0, 32], sizes = [2, 16, 8], strides = [1, 1, 1]} : vector<2x16x96xf32> to vector<2x16x8xf32>
    %572 = vector.extract_strided_slice %567 {offsets = [0, 0, 64], sizes = [2, 16, 8], strides = [1, 1, 1]} : vector<2x16x96xf32> to vector<2x16x8xf32>
    "tpu.trace_start"() <{level = 10 : i32, message = "bqd,bkd->bqk"}> : () -> ()
    %cst_234 = arith.constant dense<0.000000e+00> : vector<2x16x16xf32>
    %573 = tpu.matmul %570, %571, %cst_234 {dimension_numbers = #tpu.dot_dimension_numbers<[2], [2], [1], [1], [0, 0, 0, 1, 1, 1], [0], [0]>} : vector<2x16x8xf32>, vector<2x16x8xf32>, vector<2x16x16xf32> -> vector<2x16x16xf32>
    "tpu.trace_stop"() : () -> ()
    %cst_235 = arith.constant dense<0xFF800000> : vector<2x16xf32>
    %574 = vector.multi_reduction <maximumf>, %573, %cst_235 [2] : vector<2x16x16xf32> to vector<2x16xf32>
    %575 = vector.shape_cast %574 : vector<2x16xf32> to vector<2x16x1xf32>
    %576 = vector.broadcast %575 : vector<2x16x1xf32> to vector<2x16x16xf32>
    %577 = arith.subf %573, %576 : vector<2x16x16xf32>
    %578 = math.exp %577 : vector<2x16x16xf32>
    %cst_236 = arith.constant dense<0.000000e+00> : vector<2x16xf32>
    %579 = vector.multi_reduction <add>, %578, %cst_236 [2] : vector<2x16x16xf32> to vector<2x16xf32>
    %580 = vector.shape_cast %579 : vector<2x16xf32> to vector<2x16x1xf32>
    %581 = vector.broadcast %580 : vector<2x16x1xf32> to vector<2x16x16xf32>
    %582 = arith.divf %578, %581 : vector<2x16x16xf32>
    "tpu.trace_start"() <{level = 10 : i32, message = "bqk,bkd->bqd"}> : () -> ()
    %cst_237 = arith.constant dense<0.000000e+00> : vector<2x16x8xf32>
    %583 = tpu.matmul %582, %572, %cst_237 {dimension_numbers = #tpu.dot_dimension_numbers<[2], [1], [1], [2], [0, 0, 0, 1, 1, 2], [0], [0]>} : vector<2x16x16xf32>, vector<2x16x8xf32>, vector<2x16x8xf32> -> vector<2x16x8xf32>
    "tpu.trace_stop"() : () -> ()
    %584 = vector.extract_strided_slice %567 {offsets = [0, 0, 8], sizes = [2, 16, 8], strides = [1, 1, 1]} : vector<2x16x96xf32> to vector<2x16x8xf32>
    %cst_238 = arith.constant 0.353553385 : f32
    %585 = vector.broadcast %cst_238 : f32 to vector<2x16x8xf32>
    %586 = arith.mulf %584, %585 : vector<2x16x8xf32>
    %587 = vector.extract_strided_slice %567 {offsets = [0, 0, 40], sizes = [2, 16, 8], strides = [1, 1, 1]} : vector<2x16x96xf32> to vector<2x16x8xf32>
    %588 = vector.extract_strided_slice %567 {offsets = [0, 0, 72], sizes = [2, 16, 8], strides = [1, 1, 1]} : vector<2x16x96xf32> to vector<2x16x8xf32>
    "tpu.trace_start"() <{level = 10 : i32, message = "bqd,bkd->bqk"}> : () -> ()
    %cst_239 = arith.constant dense<0.000000e+00> : vector<2x16x16xf32>
    %589 = tpu.matmul %586, %587, %cst_239 {dimension_numbers = #tpu.dot_dimension_numbers<[2], [2], [1], [1], [0, 0, 0, 1, 1, 1], [0], [0]>} : vector<2x16x8xf32>, vector<2x16x8xf32>, vector<2x16x16xf32> -> vector<2x16x16xf32>
    "tpu.trace_stop"() : () -> ()
    %cst_240 = arith.constant dense<0xFF800000> : vector<2x16xf32>
    %590 = vector.multi_reduction <maximumf>, %589, %cst_240 [2] : vector<2x16x16xf32> to vector<2x16xf32>
    %591 = vector.shape_cast %590 : vector<2x16xf32> to vector<2x16x1xf32>
    %592 = vector.broadcast %591 : vector<2x16x1xf32> to vector<2x16x16xf32>
    %593 = arith.subf %589, %592 : vector<2x16x16xf32>
    %594 = math.exp %593 : vector<2x16x16xf32>
    %cst_241 = arith.constant dense<0.000000e+00> : vector<2x16xf32>
    %595 = vector.multi_reduction <add>, %594, %cst_241 [2] : vector<2x16x16xf32> to vector<2x16xf32>
    %596 = vector.shape_cast %595 : vector<2x16xf32> to vector<2x16x1xf32>
    %597 = vector.broadcast %596 : vector<2x16x1xf32> to vector<2x16x16xf32>
    %598 = arith.divf %594, %597 : vector<2x16x16xf32>
    "tpu.trace_start"() <{level = 10 : i32, message = "bqk,bkd->bqd"}> : () -> ()
    %cst_242 = arith.constant dense<0.000000e+00> : vector<2x16x8xf32>
    %599 = tpu.matmul %598, %588, %cst_242 {dimension_numbers = #tpu.dot_dimension_numbers<[2], [1], [1], [2], [0, 0, 0, 1, 1, 2], [0], [0]>} : vector<2x16x16xf32>, vector<2x16x8xf32>, vector<2x16x8xf32> -> vector<2x16x8xf32>
    "tpu.trace_stop"() : () -> ()
    %600 = vector.extract_strided_slice %567 {offsets = [0, 0, 16], sizes = [2, 16, 8], strides = [1, 1, 1]} : vector<2x16x96xf32> to vector<2x16x8xf32>
    %cst_243 = arith.constant 0.353553385 : f32
    %601 = vector.broadcast %cst_243 : f32 to vector<2x16x8xf32>
    %602 = arith.mulf %600, %601 : vector<2x16x8xf32>
    %603 = vector.extract_strided_slice %567 {offsets = [0, 0, 48], sizes = [2, 16, 8], strides = [1, 1, 1]} : vector<2x16x96xf32> to vector<2x16x8xf32>
    %604 = vector.extract_strided_slice %567 {offsets = [0, 0, 80], sizes = [2, 16, 8], strides = [1, 1, 1]} : vector<2x16x96xf32> to vector<2x16x8xf32>
    "tpu.trace_start"() <{level = 10 : i32, message = "bqd,bkd->bqk"}> : () -> ()
    %cst_244 = arith.constant dense<0.000000e+00> : vector<2x16x16xf32>
    %605 = tpu.matmul %602, %603, %cst_244 {dimension_numbers = #tpu.dot_dimension_numbers<[2], [2], [1], [1], [0, 0, 0, 1, 1, 1], [0], [0]>} : vector<2x16x8xf32>, vector<2x16x8xf32>, vector<2x16x16xf32> -> vector<2x16x16xf32>
    "tpu.trace_stop"() : () -> ()
    %cst_245 = arith.constant dense<0xFF800000> : vector<2x16xf32>
    %606 = vector.multi_reduction <maximumf>, %605, %cst_245 [2] : vector<2x16x16xf32> to vector<2x16xf32>
    %607 = vector.shape_cast %606 : vector<2x16xf32> to vector<2x16x1xf32>
    %608 = vector.broadcast %607 : vector<2x16x1xf32> to vector<2x16x16xf32>
    %609 = arith.subf %605, %608 : vector<2x16x16xf32>
    %610 = math.exp %609 : vector<2x16x16xf32>
    %cst_246 = arith.constant dense<0.000000e+00> : vector<2x16xf32>
    %611 = vector.multi_reduction <add>, %610, %cst_246 [2] : vector<2x16x16xf32> to vector<2x16xf32>
    %612 = vector.shape_cast %611 : vector<2x16xf32> to vector<2x16x1xf32>
    %613 = vector.broadcast %612 : vector<2x16x1xf32> to vector<2x16x16xf32>
    %614 = arith.divf %610, %613 : vector<2x16x16xf32>
    "tpu.trace_start"() <{level = 10 : i32, message = "bqk,bkd->bqd"}> : () -> ()
    %cst_247 = arith.constant dense<0.000000e+00> : vector<2x16x8xf32>
    %615 = tpu.matmul %614, %604, %cst_247 {dimension_numbers = #tpu.dot_dimension_numbers<[2], [1], [1], [2], [0, 0, 0, 1, 1, 2], [0], [0]>} : vector<2x16x16xf32>, vector<2x16x8xf32>, vector<2x16x8xf32> -> vector<2x16x8xf32>
    "tpu.trace_stop"() : () -> ()
    %616 = vector.extract_strided_slice %567 {offsets = [0, 0, 24], sizes = [2, 16, 8], strides = [1, 1, 1]} : vector<2x16x96xf32> to vector<2x16x8xf32>
    %cst_248 = arith.constant 0.353553385 : f32
    %617 = vector.broadcast %cst_248 : f32 to vector<2x16x8xf32>
    %618 = arith.mulf %616, %617 : vector<2x16x8xf32>
    %619 = vector.extract_strided_slice %567 {offsets = [0, 0, 56], sizes = [2, 16, 8], strides = [1, 1, 1]} : vector<2x16x96xf32> to vector<2x16x8xf32>
    %620 = vector.extract_strided_slice %567 {offsets = [0, 0, 88], sizes = [2, 16, 8], strides = [1, 1, 1]} : vector<2x16x96xf32> to vector<2x16x8xf32>
    "tpu.trace_start"() <{level = 10 : i32, message = "bqd,bkd->bqk"}> : () -> ()
    %cst_249 = arith.constant dense<0.000000e+00> : vector<2x16x16xf32>
    %621 = tpu.matmul %618, %619, %cst_249 {dimension_numbers = #tpu.dot_dimension_numbers<[2], [2], [1], [1], [0, 0, 0, 1, 1, 1], [0], [0]>} : vector<2x16x8xf32>, vector<2x16x8xf32>, vector<2x16x16xf32> -> vector<2x16x16xf32>
    "tpu.trace_stop"() : () -> ()
    %cst_250 = arith.constant dense<0xFF800000> : vector<2x16xf32>
    %622 = vector.multi_reduction <maximumf>, %621, %cst_250 [2] : vector<2x16x16xf32> to vector<2x16xf32>
    %623 = vector.shape_cast %622 : vector<2x16xf32> to vector<2x16x1xf32>
    %624 = vector.broadcast %623 : vector<2x16x1xf32> to vector<2x16x16xf32>
    %625 = arith.subf %621, %624 : vector<2x16x16xf32>
    %626 = math.exp %625 : vector<2x16x16xf32>
    %cst_251 = arith.constant dense<0.000000e+00> : vector<2x16xf32>
    %627 = vector.multi_reduction <add>, %626, %cst_251 [2] : vector<2x16x16xf32> to vector<2x16xf32>
    %628 = vector.shape_cast %627 : vector<2x16xf32> to vector<2x16x1xf32>
    %629 = vector.broadcast %628 : vector<2x16x1xf32> to vector<2x16x16xf32>
    %630 = arith.divf %626, %629 : vector<2x16x16xf32>
    "tpu.trace_start"() <{level = 10 : i32, message = "bqk,bkd->bqd"}> : () -> ()
    %cst_252 = arith.constant dense<0.000000e+00> : vector<2x16x8xf32>
    %631 = tpu.matmul %630, %620, %cst_252 {dimension_numbers = #tpu.dot_dimension_numbers<[2], [1], [1], [2], [0, 0, 0, 1, 1, 2], [0], [0]>} : vector<2x16x16xf32>, vector<2x16x8xf32>, vector<2x16x8xf32> -> vector<2x16x8xf32>
    "tpu.trace_stop"() : () -> ()
    %632 = tpu.concatenate %583, %599, %615, %631 in 2 : vector<2x16x8xf32>, vector<2x16x8xf32>, vector<2x16x8xf32>, vector<2x16x8xf32> -> vector<2x16x32xf32>
    %633 = vector.shape_cast %632 : vector<2x16x32xf32> to vector<32x32xf32>
    %cst_253 = arith.constant dense<0.000000e+00> : vector<32x32xf32>
    %634 = tpu.matmul %633, %529, %cst_253 {dimension_numbers = #tpu.dot_dimension_numbers<[1], [0], [0], [1], [0, 0, 1, 1], [], []>} : vector<32x32xf32>, vector<32x32xf32>, vector<32x32xf32> -> vector<32x32xf32>
    %635 = arith.addf %525, %634 : vector<32x32xf32>
    %636 = vector.broadcast %537 : vector<1x32xf32> to vector<32x32xf32>
    %637 = arith.addf %635, %636 : vector<32x32xf32>
    %cst_254 = arith.constant dense<0.000000e+00> : vector<32xf32>
    %638 = vector.multi_reduction <add>, %637, %cst_254 [1] : vector<32x32xf32> to vector<32xf32>
    %639 = vector.shape_cast %638 : vector<32xf32> to vector<32x1xf32>
    %cst_255 = arith.constant 3.200000e+01 : f32
    %640 = vector.broadcast %cst_255 : f32 to vector<32x1xf32>
    %641 = arith.divf %639, %640 : vector<32x1xf32>
    %642 = vector.broadcast %641 : vector<32x1xf32> to vector<32x32xf32>
    %643 = arith.subf %637, %642 : vector<32x32xf32>
    %644 = arith.mulf %643, %643 : vector<32x32xf32>
    %cst_256 = arith.constant dense<0.000000e+00> : vector<32xf32>
    %645 = vector.multi_reduction <add>, %644, %cst_256 [1] : vector<32x32xf32> to vector<32xf32>
    %646 = vector.shape_cast %645 : vector<32xf32> to vector<32x1xf32>
    %cst_257 = arith.constant 3.200000e+01 : f32
    %647 = vector.broadcast %cst_257 : f32 to vector<32x1xf32>
    %648 = arith.divf %646, %647 : vector<32x1xf32>
    %649 = vector.broadcast %641 : vector<32x1xf32> to vector<32x32xf32>
    %650 = arith.subf %637, %649 : vector<32x32xf32>
    %cst_258 = arith.constant 9.99999974E-6 : f32
    %651 = vector.broadcast %cst_258 : f32 to vector<32x1xf32>
    %652 = arith.addf %648, %651 : vector<32x1xf32>
    %653 = math.rsqrt %652 : vector<32x1xf32>
    %654 = vector.broadcast %653 : vector<32x1xf32> to vector<32x32xf32>
    %655 = arith.mulf %650, %654 : vector<32x32xf32>
    %656 = vector.broadcast %538 : vector<1x32xf32> to vector<32x32xf32>
    %657 = arith.mulf %655, %656 : vector<32x32xf32>
    %658 = vector.broadcast %539 : vector<1x32xf32> to vector<32x32xf32>
    %659 = arith.addf %657, %658 : vector<32x32xf32>
    %cst_259 = arith.constant dense<0.000000e+00> : vector<32x64xf32>
    %660 = tpu.matmul %659, %531, %cst_259 {dimension_numbers = #tpu.dot_dimension_numbers<[1], [0], [0], [1], [0, 0, 1, 1], [], []>} : vector<32x32xf32>, vector<32x64xf32>, vector<32x64xf32> -> vector<32x64xf32>
    %661 = vector.broadcast %540 : vector<1x64xf32> to vector<32x64xf32>
    %662 = arith.addf %660, %661 : vector<32x64xf32>
    %663 = arith.mulf %662, %662 : vector<32x64xf32>
    %664 = arith.mulf %662, %663 : vector<32x64xf32>
    %cst_260 = arith.constant 4.471500e-02 : f32
    %665 = vector.broadcast %cst_260 : f32 to vector<32x64xf32>
    %666 = arith.mulf %665, %664 : vector<32x64xf32>
    %667 = arith.addf %662, %666 : vector<32x64xf32>
    %cst_261 = arith.constant 0.797884583 : f32
    %668 = vector.broadcast %cst_261 : f32 to vector<32x64xf32>
    %669 = arith.mulf %668, %667 : vector<32x64xf32>
    %670 = math.tanh %669 : vector<32x64xf32>
    %cst_262 = arith.constant 1.000000e+00 : f32
    %671 = vector.broadcast %cst_262 : f32 to vector<32x64xf32>
    %672 = arith.addf %671, %670 : vector<32x64xf32>
    %cst_263 = arith.constant 5.000000e-01 : f32
    %673 = vector.broadcast %cst_263 : f32 to vector<32x64xf32>
    %674 = arith.mulf %673, %672 : vector<32x64xf32>
    %675 = arith.mulf %662, %674 : vector<32x64xf32>
    %cst_264 = arith.constant dense<0.000000e+00> : vector<32x32xf32>
    %676 = tpu.matmul %675, %533, %cst_264 {dimension_numbers = #tpu.dot_dimension_numbers<[1], [0], [0], [1], [0, 0, 1, 1], [], []>} : vector<32x64xf32>, vector<64x32xf32>, vector<32x32xf32> -> vector<32x32xf32>
    %677 = vector.broadcast %541 : vector<1x32xf32> to vector<32x32xf32>
    %678 = arith.addf %676, %677 : vector<32x32xf32>
    %679 = arith.addf %637, %678 : vector<32x32xf32>
    %c21_265 = arith.constant 21 : index
    %c0_266 = arith.constant 0 : index
    %c0_267 = arith.constant 0 : index
    %680 = vector.load %arg2[%c21_265, %c0_266, %c0_267] : memref<23x64x128xf32, #tpu.memory_space<vmem>>, vector<1x32x48xf32>
    %681 = vector.shape_cast %680 : vector<1x32x48xf32> to vector<32x48xf32>
    %cst_268 = arith.constant dense<0.000000e+00> : vector<32x48xf32>
    %682 = tpu.matmul %679, %681, %cst_268 {dimension_numbers = #tpu.dot_dimension_numbers<[1], [0], [0], [1], [0, 0, 1, 1], [], []>} : vector<32x32xf32>, vector<32x48xf32>, vector<32x48xf32> -> vector<32x48xf32>
    %c35 = arith.constant 35 : index
    %c0_269 = arith.constant 0 : index
    %683 = vector.load %arg3[%c35, %c0_269] : memref<36x128xf32, #tpu.memory_space<vmem>>, vector<1x48xf32>
    %684 = vector.broadcast %683 : vector<1x48xf32> to vector<32x48xf32>
    %685 = arith.addf %682, %684 : vector<32x48xf32>
    %cst_270 = arith.constant 1.500000e+00 : f32
    %686 = vector.broadcast %cst_270 : f32 to vector<32x48xf32>
    %687 = arith.addf %685, %686 : vector<32x48xf32>
    %cst_271 = arith.constant 0.000000e+00 : f32
    %688 = vector.broadcast %cst_271 : f32 to vector<32x48xf32>
    %689 = tpu.concatenate %687, %329, %358, %688 in 1 : vector<32x48xf32>, vector<32x16xf32>, vector<32x16xf32>, vector<32x48xf32> -> vector<32x128xf32>
    %c0_272 = arith.constant 0 : index
    %c0_273 = arith.constant 0 : index
    %690 = vector.load %arg4[%c0_272, %c0_273] : memref<32x128xf32, #tpu.memory_space<vmem>>, vector<32x128xf32>
    tpu.vector_store %arg4[%c0_272, %c0_273], %689 {strides = array<i32>} : memref<32x128xf32, #tpu.memory_space<vmem>>, vector<32x128xf32>,
    return
  }
  func.func @transform_0(%arg0: i32) -> (i32, i32) {
    %c0_i32 = arith.constant 0 : i32
    %c0_i32_0 = arith.constant 0 : i32
    return %arg0, %c0_i32 : i32, i32
  }
  func.func @transform_1(%arg0: i32) -> (i32, i32, i32) {
    %c0_i32 = arith.constant 0 : i32
    %c0_i32_0 = arith.constant 0 : i32
    %c0_i32_1 = arith.constant 0 : i32
    %c0_i32_2 = arith.constant 0 : i32
    return %c0_i32, %c0_i32_0, %c0_i32_1 : i32, i32, i32
  }
  func.func @transform_2(%arg0: i32) -> (i32, i32) {
    %c0_i32 = arith.constant 0 : i32
    %c0_i32_0 = arith.constant 0 : i32
    %c0_i32_1 = arith.constant 0 : i32
    return %c0_i32, %c0_i32_0 : i32, i32
  }
  func.func @transform_3(%arg0: i32) -> (i32, i32) {
    %c0_i32 = arith.constant 0 : i32
    %c0_i32_0 = arith.constant 0 : i32
    return %arg0, %c0_i32 : i32, i32
  }
}

</mosaic_0001>

<bundles_post_ra>
// kernel: vitvqvae_forward.1
= control target key start
LH: loop header
LB: loop body
LE: loop exit
PB: predicated region body
PF: predicated region fallthrough
CT: control target
= control target key end

     0   :  { %vm33_vm0 = vcmask 392192   ;;  %vm170_vm1 = vcmask 261120   ;;  %s12075_s24 = smov 96   ;;  %vm351_vm2 = vcmask 64512   ;;  %vm528_vm3 = vcmask 130048   ;;  %s12076_s25 = smov 64   ;;  %s14000_s1 = inlined_call_operand.vmem [shape: f32[23,64,128], index: 1, kind: input, shape index: {}]   ;;  %s14001_s0 = inlined_call_operand.vmem [shape: f32[32,48], index: 0, kind: input, shape index: {}]   ;;  %s14002_s2 = inlined_call_operand.vmem [shape: f32[36,128], index: 2, kind: input, shape index: {}]   ;;  %s14003_s3 = inlined_call_operand.vmem [shape: f32[32,128], index: 3, kind: output, shape index: {}]  }
   0x1   :  { %v27_v0 = vld [vmem:[%s14000_s1 + $0x28] sm:$0xff]  ;;  %v26_v1 = vld [vmem:[%s14000_s1 + $0x20] sm:$0xff]  ;;  %v25_v2 = vld [vmem:[%s14000_s1 + $0x18] sm:$0xff]  ;;  %s12077_s26 = smov 88   ;;  %s12078_s27 = smov 120   ;;  %vm2003_vm4 = vcmask 195584  }
   0x2   :  { %10920 = vmatprep.subr.mxu0 %v27_v0  ;;  %v14_v3 = vld [vmem:[%s14001_s0] sm:$0xff]  ;;  %v24_v5 = vld [vmem:[%s14000_s1 + $0x10] sm:$0xff]  ;;  %v23_v6 = vld [vmem:[%s14000_s1 + $0x8] sm:$0xff]  ;;  %s12079_s28 = smov 56   ;;  %s12080_s29 = smov 80   ;;  %vm2326_vm5 = vcmask 523264  }
   0x3   :  { %10921 = vmatpush3.msra.mxu0 %v27_v0  ;;  %v10046_v4 = vadd.f32 -1.5, %v14_v3  ;;  %v15_v7 = vld [vmem:[%s14001_s0 + $0x8] sm:$0xff]  ;;  %v16_v8 = vld [vmem:[%s14001_s0 + $0x10] sm:$0xff]  ;;  %v22_v9 = vld [vmem:[%s14000_s1] sm:$0xff]  ;;  %s12081_s30 = smov 112   ;;  %s12082_s4 = smov 48  }
   0x4   :  { %10922 = vmatprep.subr.mxu0 %v26_v1  ;;  %v10047_v10 = vadd.f32 -1.5, %v15_v7  ;;  %v10048_v11 = vadd.f32 -1.5, %v16_v8  ;;  %v17_v12 = vld [vmem:[%s14001_s0 + $0x18] sm:$0xff]  ;;  %v10050_v15 = vld [vmem:[%s14002_s2] ss:$0 sm:$0xff]  ;;  %v10056_v20 = vld [vmem:[%s14000_s1 + $0x288] sm:$0xff] }
   0x5   :  { %10923 = vmatpush3.msra.mxu0 %v26_v1  ;;  %10932 = vmatprep.mubr.msk.f32.mxu0 %vm33_vm0, %v10046_v4  ;;  %v10049_v13 = vadd.f32 -1.5, %v17_v12  ;;  %v10055_v17 = vld [vmem:[%s14000_s1 + $0x280] sm:$0xff]  ;;  %v10060_v53 = vld [vmem:[%s14000_s1 + $0x58] sm:$0xff]  ;;  %v10059_v54 = vld [vmem:[%s14000_s1 + $0x50] sm:$0xff]  ;;  %s12083_s5 = smov 72   ;;  %s12084_s6 = smov 104  }
   0x6   :  { %10924 = vmatprep.subr.mxu0 %v25_v2  ;;  %10938 = vmatprep.subr.mxu1 %v10060_v53  ;;  %v10058_v55 = vld [vmem:[%s14000_s1 + $0x48] sm:$0xff]  ;;  %v10057_v56 = vld [vmem:[%s14000_s1 + $0x40] sm:$0xff]  ;;  %s12085_s7 = smov 40   ;;  %s12086_s8 = smov 8   ;;  %vm4871_vm6 = vcmask 130112   ;;  %vm4878_vm7 = vcmask 195712  }
   0x7   :  { %10925 = vmatpush3.msra.mxu0 %v25_v2  ;;  %10939 = vmatpush3.msra.mxu1 %v10060_v53  ;;  %v10078_v8 = vld [vmem:[%s14002_s2 + $0x2] ss:$0 sm:$0xff]  ;;  %s12087_s0 = smov 16   ;;  %s12088_s17 = smov 24   ;;  %vm4885_vm8 = vcmask 261312  }
   0x8   :  { %10926 = vmatprep.subr.mxu0 %v24_v5  ;;  %10940 = vmatprep.subr.mxu1 %v10059_v54 }
   0x9   :  { %10927 = vmatpush3.msra.mxu0 %v24_v5  ;;  %10941 = vmatpush3.msra.mxu1 %v10059_v54 }
   0xa   :  { %10928 = vmatprep.subr.mxu0 %v23_v6  ;;  %10942 = vmatprep.subr.mxu1 %v10058_v55 }
   0xb   :  { %10929 = vmatpush3.msra.mxu0 %v23_v6  ;;  %10943 = vmatpush3.msra.mxu1 %v10058_v55  ;;  %v10077_v6 = vld [vmem:[%s14002_s2 + $0x1] ss:$0 sm:$0xff] }
   0xc   :  { %10930 = vmatprep.subr.mxu0 %v22_v9  ;;  %10944 = vmatprep.subr.mxu1 %v10057_v56 }
   0xd   :  { %10931 = vmatpush3.msra.mxu0 %v22_v9  ;;  %10945 = vmatpush3.msra.mxu1 %v10057_v56 }
   0xe   :  { %10933 = vmatmul.mubr.msk.f32.vlgmr.msra.gmra.mxu0 %vm33_vm0, %v10047_v10 }
   0xf   :  { %10935 = vmatprep.mubr.msk.f32.mxu0 %vm33_vm0, %v10048_v11 }
  0x12   :  { %10936 = vmatmul.mubr.msk.f32.gmra.mxu0 %vm33_vm0, %v10049_v13 }
  0xce   :  { %v10934_v14 = vpop.f32.mrf.mxu0 }
  0xcf   :  { %v118_v18 = vadd.f32 %v10934_v14, %v10050_v15 }
  0xd0   :  { %v112_v16 = vpop.f32.mrf.mxu0 }
  0xd1   :  { %v113_v19 = vadd.f32 %v10050_v15, %v112_v16  ;;  %v12155_v24 = vadd.f32 %v10056_v20, %v118_v18 }
  0xd2   :  { %v10937_v21 = vpop.f32.mrf.mxu0 }
  0xd3   :  { %v12153_v22 = vadd.f32 %v10055_v17, %v113_v19  ;;  %v128_v25 = vadd.f32 %v10937_v21, %v10050_v15  ;;  %v174_v31 = vsel %vm170_vm1, %v12155_v24, 0.0 }
  0xd4   :  { %v122_v23 = vpop.f32.mrf.mxu0 }
  0xd5   :  { %v123_v26 = vadd.f32 %v10050_v15, %v122_v23  ;;  %v171_v27 = vsel %vm170_vm1, %v12153_v22, 0.0  ;;  %v12161_v29 = vadd.f32 %v10056_v20, %v128_v25  ;;  %v10079_v25 = vld [vmem:[%s14002_s2 + $0x3] ss:$0 sm:$0xff] }
  0xd6   :  { %172 = vadd.xlane.f32.xlu0 %v171_v27 }
  0xd7   :  { %v12159_v28 = vadd.f32 %v10055_v17, %v123_v26  ;;  %v180_v32 = vsel %vm170_vm1, %v12161_v29, 0.0 }
  0xd9   :  { %v177_v30 = vsel %vm170_vm1, %v12159_v28, 0.0 }
  0xda   :  { %178 = vadd.xlane.f32.xlu1 %v177_v30  ;;  %175 = vadd.xlane.f32.xlu0 %v174_v31 }
  0xde   :  { %181 = vadd.xlane.f32.xlu1 %v180_v32 }
 0x15f   :  { %v173_v33 = vpop.xlane.xlu0 %172 }
 0x160   :  { %v184_v34 = vmul.f32 0.03125, %v173_v33 }
 0x162   :  { %v188_v35 = vsub.f32 %v12153_v22, %v184_v34 }
 0x163   :  { %v179_v36 = vpop.xlane.xlu1 %178  ;;  %v176_v37 = vpop.xlane.xlu0 %175 }
 0x164   :  { %v186_v38 = vmul.f32 0.03125, %v179_v36  ;;  %v185_v39 = vmul.f32 0.03125, %v176_v37  ;;  %v192_v40 = vmul.f32 %v188_v35, %v188_v35 }
 0x166   :  { %v190_v41 = vsub.f32 %v12159_v28, %v186_v38  ;;  %v189_v42 = vsub.f32 %v12155_v24, %v185_v39  ;;  %v196_v43 = vsel %vm170_vm1, %v192_v40, 0.0 }
 0x167   :  { %v182_v44 = vpop.xlane.xlu1 %181  ;;  %197 = vadd.xlane.f32.xlu0 %v196_v43 }
 0x168   :  { %v187_v45 = vmul.f32 0.03125, %v182_v44  ;;  %v194_v46 = vmul.f32 %v190_v41, %v190_v41  ;;  %v193_v47 = vmul.f32 %v189_v42, %v189_v42 }
 0x16a   :  { %v191_v48 = vsub.f32 %v12161_v29, %v187_v45  ;;  %v202_v49 = vsel %vm170_vm1, %v194_v46, 0.0  ;;  %v199_v50 = vsel %vm170_vm1, %v193_v47, 0.0 }
 0x16b   :  { %203 = vadd.xlane.f32.xlu0 %v202_v49  ;;  %200 = vadd.xlane.f32.xlu1 %v199_v50 }
 0x16c   :  { %v195_v51 = vmul.f32 %v191_v48, %v191_v48 }
 0x16e   :  { %v205_v52 = vsel %vm170_vm1, %v195_v51, 0.0 }
 0x16f   :  { %206 = vadd.xlane.f32.xlu1 %v205_v52 }
 0x1f0   :  { %v198_v57 = vpop.xlane.xlu0 %197 }
 0x1f1   :  { %v208_v58 = vmul.f32 0.03125, %v198_v57 }
 0x1f3   :  { %v212_v59 = vadd.f32 1e-05, %v208_v58 }
 0x1f4   :  { %v201_v60 = vpop.xlane.xlu1 %200  ;;  %v204_v61 = vpop.xlane.xlu0 %203 }
 0x1f5   :  { %11723 = vrsqrt.f32 %v212_v59  ;;  %v209_v62 = vmul.f32 0.03125, %v201_v60  ;;  %v210_v63 = vmul.f32 0.03125, %v204_v61 }
 0x1f7   :  { %v213_v0 = vadd.f32 1e-05, %v209_v62  ;;  %v214_v1 = vadd.f32 1e-05, %v210_v63 }
 0x1f8   :  { %v207_v2 = vpop.xlane.xlu1 %206 }
 0x1f9   :  { %11725 = vrsqrt.f32 %v213_v0  ;;  %v211_v3 = vmul.f32 0.03125, %v207_v2 }
 0x1fa   :  { %11727 = vrsqrt.f32 %v214_v1 }
 0x1fb   :  { %v215_v4 = vadd.f32 1e-05, %v211_v3 }
 0x1fd   :  { %11729 = vrsqrt.f32 %v215_v4 }
 0x202   :  { %v11724_v5 = vpop.eup %11723 }
 0x203   :  { %v220_v7 = vmul.f32 %v11724_v5, %v188_v35 }
 0x205   :  { %v228_v9 = vmul.f32 %v10077_v6, %v220_v7 }
 0x206   :  { %v11726_v10 = vpop.eup %11725 }
 0x207   :  { %v11728_v11 = vpop.eup %11727  ;;  %v236_v12 = vadd.f32 %v10078_v8, %v228_v9  ;;  %v221_v13 = vmul.f32 %v11726_v10, %v189_v42 }
 0x208   :  { %v222_v14 = vmul.f32 %v11728_v11, %v190_v41 }
 0x209   :  { %10946 = vmatprep.mubr.msk.f32.mxu1 %vm170_vm1, %v236_v12  ;;  %v229_v15 = vmul.f32 %v10077_v6, %v221_v13 }
 0x20a   :  { %v11730_v16 = vpop.eup %11729  ;;  %v230_v17 = vmul.f32 %v10077_v6, %v222_v14 }
 0x20b   :  { %v237_v18 = vadd.f32 %v10078_v8, %v229_v15  ;;  %v223_v19 = vmul.f32 %v11730_v16, %v191_v48 }
 0x20c   :  { %v238_v20 = vadd.f32 %v10078_v8, %v230_v17 }
 0x20d   :  { %10947 = vmatmul.mubr.msk.f32.vlgmr.msra.gmra.mxu1 %vm170_vm1, %v237_v18  ;;  %v231_v21 = vmul.f32 %v10077_v6, %v223_v19 }
 0x20e   :  { %10949 = vmatprep.mubr.msk.f32.mxu1 %vm170_vm1, %v238_v20 }
 0x20f   :  { %v239_v23 = vadd.f32 %v10078_v8, %v231_v21 }
 0x211   :  { %10950 = vmatmul.mubr.msk.f32.gmra.mxu1 %vm170_vm1, %v239_v23 }
 0x2cd   :  { %v10948_v26 = vpop.f32.mrf.mxu1 }
 0x2ce   :  { %v12202_v27 = vadd.f32 %v10948_v26, %v10079_v25 }
 0x2cf   :  { %v322_v30 = vpop.f32.mrf.mxu1 }
 0x2d0   :  { %v12204_v31 = vadd.f32 %v10079_v25, %v322_v30  ;;  %349 = vrot.lane.b32.xlu0 %v12202_v27, %s12075_s24  ;;  %v12234_v41 = vmul.f32 0.35355338, %v12202_v27 }
 0x2d1   :  { %v10951_v32 = vpop.f32.mrf.mxu1 }
 0x2d2   :  { %347 = vrot.lane.b32.xlu1 %v12204_v31, %s12075_s24  ;;  %v12211_v33 = vmul.f32 0.35355338, %v12204_v31  ;;  %v12213_v35 = vadd.f32 %v10951_v32, %v10079_v25 }
 0x2d3   :  { %v332_v34 = vpop.f32.mrf.mxu1 }
 0x2d4   :  { %v12215_v36 = vadd.f32 %v10079_v25, %v332_v34  ;;  %10956 = vmatprep.mubr.msk.f32.mxu1 %vm351_vm2, %v12211_v33  ;;  %v12242_v43 = vmul.f32 0.35355338, %v12213_v35 }
 0x2d6   :  { %441 = vrot.lane.b32.xlu1 %v12213_v35, %s12075_s24  ;;  %v12222_v37 = vmul.f32 0.35355338, %v12215_v36 }
 0x2d8   :  { %10963 = vmatprep.mubr.msk.f32.mxu0 %vm351_vm2, %v12222_v37 }
 0x2da   :  { %439 = vrot.lane.b32.xlu1 %v12215_v36, %s12075_s24 }
 0x342   :  { %v350_v38 = vpop.permute.xlu0 %349 }
 0x343   :  { %10952 = vmatprep.subr.msk.mxu1 %vm351_vm2, %v350_v38 }
 0x344   :  { %v348_v39 = vpop.permute.xlu1 %347  ;;  %10953 = vmatpush3.xpose.msk.msra.mxu1 %vm351_vm2, %v350_v38 }
 0x345   :  { %10954 = vmatprep.subr.msk.mxu1 %vm351_vm2, %v348_v39 }
 0x348   :  { %v442_v40 = vpop.permute.xlu1 %441  ;;  %10955 = vmatpush3.xpose.msk.msra.mxu1 %vm351_vm2, %v348_v39 }
 0x349   :  { %10959 = vmatprep.subr.msk.mxu0 %vm351_vm2, %v442_v40 }
 0x34a   :  { %10960 = vmatpush3.xpose.msk.msra.mxu0 %vm351_vm2, %v442_v40 }
 0x34b   :  { %10957 = vmatmul.mubr.msk.f32.vlgmr.msra.gmra.mxu1 %vm351_vm2, %v12234_v41 }
 0x34c   :  { %v440_v42 = vpop.permute.xlu1 %439 }
 0x34d   :  { %10961 = vmatprep.subr.msk.mxu0 %vm351_vm2, %v440_v42 }
 0x34e   :  { %10962 = vmatpush3.xpose.msk.msra.mxu0 %vm351_vm2, %v440_v42 }
 0x351   :  { %10964 = vmatmul.mubr.msk.f32.vlgmr.msra.gmra.mxu0 %vm351_vm2, %v12242_v43 }
 0x40b   :  { %v10958_v44 = vpop.f32.mrf.mxu1 }
 0x40c   :  { %v532_v45 = vsel %vm528_vm3, %v10958_v44, -inf }
 0x40d   :  { %533 = vmax.xlane.f32.xlu1 %v532_v45  ;;  %v428_v46 = vpop.f32.mrf.mxu1 }
 0x40e   :  { %v529_v47 = vsel %vm528_vm3, %v428_v46, -inf }
 0x40f   :  { %530 = vmax.xlane.f32.xlu0 %v529_v47 }
 0x411   :  { %v10965_v48 = vpop.f32.mrf.mxu0 }
 0x412   :  { %v538_v51 = vsel %vm528_vm3, %v10965_v48, -inf }
 0x413   :  { %v519_v49 = vpop.f32.mrf.mxu0 }
 0x414   :  { %v535_v50 = vsel %vm528_vm3, %v519_v49, -inf }
 0x415   :  { %536 = vmax.xlane.f32.xlu0 %v535_v50 }
 0x419   :  { %539 = vmax.xlane.f32.xlu0 %v538_v51 }
 0x41e   :  { %573 = vrot.lane.b32.xlu1 %v12204_v31, %s12076_s25 }
 0x422   :  { %662 = vrot.lane.b32.xlu1 %v12213_v35, %s12076_s25 }
 0x426   :  { %753 = vrot.lane.b32.xlu1 %v12202_v27, %s12077_s26 }
 0x42a   :  { %751 = vrot.lane.b32.xlu1 %v12204_v31, %s12077_s26 }
 0x42e   :  { %747 = vrot.lane.b32.xlu1 %v12211_v33, %s12078_s27 }
 0x42f   :  { %575 = vrot.lane.b32.xlu0 %v12202_v27, %s12076_s25 }
 0x433   :  { %660 = vrot.lane.b32.xlu0 %v12215_v36, %s12076_s25 }
 0x437   :  { %844 = vrot.lane.b32.xlu0 %v12213_v35, %s12077_s26 }
 0x496   :  { %v534_v52 = vpop.xlane.xlu1 %533 }
 0x497   :  { %v542_v53 = vsub.f32 %v10958_v44, %v534_v52 }
 0x498   :  { %v531_v54 = vpop.xlane.xlu0 %530 }
 0x499   :  { %v547_v55 = vmul.f32 1.442695, %v542_v53  ;;  %v541_v56 = vsub.f32 %v428_v46, %v531_v54 }
 0x49a   :  { %v574_v57 = vpop.permute.xlu1 %573 }
 0x49b   :  { %11731 = vpow2.f32 %v547_v55  ;;  %v545_v58 = vmul.f32 1.442695, %v541_v56 }
 0x49d   :  { %11733 = vpow2.f32 %v545_v58 }
 0x49e   :  { %v663_v59 = vpop.permute.xlu1 %662  ;;  %v537_v60 = vpop.xlane.xlu0 %536 }
 0x49f   :  { %v543_v61 = vsub.f32 %v519_v49, %v537_v60  ;;  %10973 = vmatprep.subr.mxu0 %v663_v59 }
 0x4a0   :  { %10974 = vmatpush3.msra.mxu0 %v663_v59 }
 0x4a1   :  { %v549_v62 = vmul.f32 1.442695, %v543_v61 }
 0x4a2   :  { %v540_v63 = vpop.xlane.xlu0 %539  ;;  %v754_v6 = vpop.permute.xlu1 %753 }
 0x4a3   :  { %11735 = vpow2.f32 %v549_v62  ;;  %v544_v0 = vsub.f32 %v10965_v48, %v540_v63 }
 0x4a5   :  { %v551_v1 = vmul.f32 1.442695, %v544_v0 }
 0x4a6   :  { %v576_v2 = vpop.permute.xlu0 %575  ;;  %v752_v14 = vpop.permute.xlu1 %751 }
 0x4a7   :  { %11737 = vpow2.f32 %v551_v1  ;;  %10966 = vmatprep.subr.mxu1 %v576_v2 }
 0x4a8   :  { %v11732_v3 = vpop.eup %11731  ;;  %10967 = vmatpush3.msra.mxu1 %v576_v2 }
 0x4a9   :  { %10968 = vmatprep.subr.mxu1 %v574_v57  ;;  %v556_v4 = vsel %vm528_vm3, %v11732_v3, 0.0 }
 0x4aa   :  { %v11734_v5 = vpop.eup %11733  ;;  %557 = vadd.xlane.f32.xlu1 %v556_v4  ;;  %10969 = vmatpush3.msra.mxu1 %v574_v57  ;;  %v661_v7 = vpop.permute.xlu0 %660 }
 0x4ab   :  { %10975 = vmatprep.subr.mxu0 %v661_v7  ;;  %10980 = vmatprep.subr.msk.mxu1 %vm351_vm2, %v754_v6  ;;  %v553_v8 = vsel %vm528_vm3, %v11734_v5, 0.0  ;;  %v748_v15 = vpop.permute.xlu1 %747 }
 0x4ac   :  { %554 = vadd.xlane.f32.xlu0 %v553_v8  ;;  %10976 = vmatpush3.msra.mxu0 %v661_v7 }
 0x4ae   :  { %v845_v9 = vpop.permute.xlu0 %844 }
 0x4af   :  { %10987 = vmatprep.subr.msk.mxu0 %vm351_vm2, %v845_v9 }
 0x4b0   :  { %v11736_v10 = vpop.eup %11735 }
 0x4b1   :  { %v559_v11 = vsel %vm528_vm3, %v11736_v10, 0.0 }
 0x4b2   :  { %560 = vadd.xlane.f32.xlu0 %v559_v11 }
 0x4b4   :  { %v11738_v12 = vpop.eup %11737 }
 0x4b5   :  { %v562_v13 = vsel %vm528_vm3, %v11738_v12, 0.0 }
 0x4b6   :  { %563 = vadd.xlane.f32.xlu1 %v562_v13 }
 0x4c7   :  { %842 = vrot.lane.b32.xlu1 %v12215_v36, %s12077_s26 }
 0x4c8   :  { %749 = vrot.lane.b32.xlu0 %v12234_v41, %s12078_s27 }
 0x4cb   :  { %840 = vrot.lane.b32.xlu1 %v12242_v43, %s12078_s27 }
 0x4cc   :  { %838 = vrot.lane.b32.xlu0 %v12222_v37, %s12078_s27 }
 0x533   :  { %v558_v16 = vpop.xlane.xlu1 %557 }
 0x534   :  { %11739 = vrcp.f32 %v558_v16 }
 0x535   :  { %v555_v17 = vpop.xlane.xlu0 %554 }
 0x536   :  { %11741 = vrcp.f32 %v555_v17 }
 0x53b   :  { %v561_v18 = vpop.xlane.xlu0 %560 }
 0x53c   :  { %11743 = vrcp.f32 %v561_v18 }
 0x53f   :  { %v564_v19 = vpop.xlane.xlu1 %563  ;;  %v750_v30 = vpop.permute.xlu0 %749 }
 0x540   :  { %11745 = vrcp.f32 %v564_v19 }
 0x541   :  { %v11740_v20 = vpop.eup %11739 }
 0x542   :  { %v568_v25 = vmul.f32 %v11740_v20, %v11732_v3 }
 0x543   :  { %v11742_v21 = vpop.eup %11741  ;;  %v839_v39 = vpop.permute.xlu0 %838 }
 0x544   :  { %v566_v23 = vmul.f32 %v11742_v21, %v11734_v5  ;;  %v843_v40 = vpop.permute.xlu1 %842 }
 0x546   :  { %10970 = vmatprep.mubr.msk.f32.mxu1 %vm528_vm3, %v566_v23 }
 0x547   :  { %10971 = vmatmul.mubr.msk.f32.vlgmr.msra.gmra.mxu1 %vm528_vm3, %v568_v25 }
 0x548   :  { %10981 = vmatpush3.xpose.msk.msra.mxu1 %vm351_vm2, %v754_v6  ;;  %10984 = vmatprep.mubr.msk.f32.mxu1 %vm351_vm2, %v748_v15  ;;  %v841_v42 = vpop.permute.xlu1 %840 }
 0x549   :  { %v11744_v26 = vpop.eup %11743  ;;  %10982 = vmatprep.subr.msk.mxu1 %vm351_vm2, %v752_v14 }
 0x54a   :  { %v570_v32 = vmul.f32 %v11744_v26, %v11736_v10 }
 0x54c   :  { %10983 = vmatpush3.xpose.msk.msra.mxu1 %vm351_vm2, %v752_v14  ;;  %10977 = vmatprep.mubr.msk.f32.mxu0 %vm528_vm3, %v570_v32 }
 0x54d   :  { %v11746_v34 = vpop.eup %11745 }
 0x54e   :  { %v572_v38 = vmul.f32 %v11746_v34, %v11738_v12 }
 0x54f   :  { %10985 = vmatmul.mubr.msk.f32.vlgmr.msra.gmra.mxu1 %vm351_vm2, %v750_v30 }
 0x550   :  { %10978 = vmatmul.mubr.msk.f32.vlgmr.msra.gmra.mxu0 %vm528_vm3, %v572_v38 }
 0x551   :  { %10988 = vmatpush3.xpose.msk.msra.mxu0 %vm351_vm2, %v845_v9  ;;  %10991 = vmatprep.mubr.msk.f32.mxu0 %vm351_vm2, %v839_v39 }
 0x552   :  { %10989 = vmatprep.subr.msk.mxu0 %vm351_vm2, %v843_v40 }
 0x555   :  { %10990 = vmatpush3.xpose.msk.msra.mxu0 %vm351_vm2, %v843_v40 }
 0x558   :  { %10992 = vmatmul.mubr.msk.f32.vlgmr.msra.gmra.mxu0 %vm351_vm2, %v841_v42 }
 0x607   :  { %v12294_v44 = vpop.f32.mrf.mxu1 }
 0x609   :  { %v12296_v45 = vpop.f32.mrf.mxu1 }
 0x60f   :  { %v10986_v46 = vpop.f32.mrf.mxu1 }
 0x610   :  { %v932_v47 = vsel %vm528_vm3, %v10986_v46, -inf  ;;  %v12299_v49 = vpop.f32.mrf.mxu0 }
 0x611   :  { %933 = vmax.xlane.f32.xlu1 %v932_v47  ;;  %v829_v48 = vpop.f32.mrf.mxu1 }
 0x612   :  { %v929_v50 = vsel %vm528_vm3, %v829_v48, -inf  ;;  %v12302_v51 = vpop.f32.mrf.mxu0 }
 0x613   :  { %930 = vmax.xlane.f32.xlu0 %v929_v50 }
 0x618   :  { %v10993_v52 = vpop.f32.mrf.mxu0 }
 0x619   :  { %v938_v55 = vsel %vm528_vm3, %v10993_v52, -inf }
 0x61a   :  { %v920_v53 = vpop.f32.mrf.mxu0 }
 0x61b   :  { %v935_v54 = vsel %vm528_vm3, %v920_v53, -inf }
 0x61c   :  { %936 = vmax.xlane.f32.xlu0 %v935_v54 }
 0x620   :  { %939 = vmax.xlane.f32.xlu0 %v938_v55 }
 0x622   :  { %973 = vrot.lane.b32.xlu1 %v12204_v31, %s12079_s28 }
 0x626   :  { %1062 = vrot.lane.b32.xlu1 %v12213_v35, %s12079_s28 }
 0x62a   :  { %1153 = vrot.lane.b32.xlu1 %v12202_v27, %s12080_s29 }
 0x62e   :  { %1151 = vrot.lane.b32.xlu1 %v12204_v31, %s12080_s29 }
 0x632   :  { %1147 = vrot.lane.b32.xlu1 %v12211_v33, %s12081_s30 }
 0x636   :  { %975 = vrot.lane.b32.xlu0 %v12202_v27, %s12079_s28 }
 0x63a   :  { %1060 = vrot.lane.b32.xlu0 %v12215_v36, %s12079_s28 }
 0x63e   :  { %1244 = vrot.lane.b32.xlu0 %v12213_v35, %s12080_s29 }
 0x69a   :  { %v934_v56 = vpop.xlane.xlu1 %933 }
 0x69b   :  { %v942_v57 = vsub.f32 %v10986_v46, %v934_v56 }
 0x69c   :  { %v931_v58 = vpop.xlane.xlu0 %930 }
 0x69d   :  { %v947_v59 = vmul.f32 1.442695, %v942_v57  ;;  %v941_v60 = vsub.f32 %v829_v48, %v931_v58 }
 0x69e   :  { %v974_v61 = vpop.permute.xlu1 %973 }
 0x69f   :  { %11747 = vpow2.f32 %v947_v59  ;;  %v945_v62 = vmul.f32 1.442695, %v941_v60 }
 0x6a1   :  { %11749 = vpow2.f32 %v945_v62 }
 0x6a2   :  { %v1063_v63 = vpop.permute.xlu1 %1062 }
 0x6a3   :  { %11001 = vmatprep.subr.mxu0 %v1063_v63 }
 0x6a4   :  { %11002 = vmatpush3.msra.mxu0 %v1063_v63 }
 0x6a5   :  { %v937_v0 = vpop.xlane.xlu0 %936 }
 0x6a6   :  { %v943_v1 = vsub.f32 %v920_v53, %v937_v0  ;;  %v1154_v11 = vpop.permute.xlu1 %1153 }
 0x6a8   :  { %v949_v2 = vmul.f32 1.442695, %v943_v1 }
 0x6a9   :  { %v940_v3 = vpop.xlane.xlu0 %939 }
 0x6aa   :  { %11751 = vpow2.f32 %v949_v2  ;;  %v944_v4 = vsub.f32 %v10993_v52, %v940_v3  ;;  %v1152_v18 = vpop.permute.xlu1 %1151 }
 0x6ac   :  { %v11748_v5 = vpop.eup %11747  ;;  %v951_v6 = vmul.f32 1.442695, %v944_v4 }
 0x6ad   :  { %v976_v7 = vpop.permute.xlu0 %975  ;;  %v956_v8 = vsel %vm528_vm3, %v11748_v5, 0.0 }
 0x6ae   :  { %v11750_v9 = vpop.eup %11749  ;;  %11753 = vpow2.f32 %v951_v6  ;;  %957 = vadd.xlane.f32.xlu1 %v956_v8  ;;  %10994 = vmatprep.subr.mxu1 %v976_v7  ;;  %v1148_v19 = vpop.permute.xlu1 %1147 }
 0x6af   :  { %10995 = vmatpush3.msra.mxu1 %v976_v7  ;;  %v953_v10 = vsel %vm528_vm3, %v11750_v9, 0.0 }
 0x6b0   :  { %954 = vadd.xlane.f32.xlu0 %v953_v10  ;;  %10996 = vmatprep.subr.mxu1 %v974_v61 }
 0x6b1   :  { %10997 = vmatpush3.msra.mxu1 %v974_v61  ;;  %v1061_v12 = vpop.permute.xlu0 %1060 }
 0x6b2   :  { %11003 = vmatprep.subr.mxu0 %v1061_v12  ;;  %11008 = vmatprep.subr.msk.mxu1 %vm351_vm2, %v1154_v11 }
 0x6b3   :  { %11004 = vmatpush3.msra.mxu0 %v1061_v12 }
 0x6b5   :  { %v1245_v13 = vpop.permute.xlu0 %1244 }
 0x6b6   :  { %11015 = vmatprep.subr.msk.mxu0 %vm351_vm2, %v1245_v13 }
 0x6b7   :  { %v11752_v14 = vpop.eup %11751 }
 0x6b8   :  { %v959_v15 = vsel %vm528_vm3, %v11752_v14, 0.0 }
 0x6b9   :  { %960 = vadd.xlane.f32.xlu0 %v959_v15 }
 0x6bb   :  { %v11754_v16 = vpop.eup %11753 }
 0x6bc   :  { %v962_v17 = vsel %vm528_vm3, %v11754_v16, 0.0 }
 0x6bd   :  { %963 = vadd.xlane.f32.xlu1 %v962_v17 }
 0x6ce   :  { %1242 = vrot.lane.b32.xlu1 %v12215_v36, %s12080_s29 }
 0x6cf   :  { %1149 = vrot.lane.b32.xlu0 %v12234_v41, %s12081_s30 }
 0x6d2   :  { %1240 = vrot.lane.b32.xlu1 %v12242_v43, %s12081_s30 }
 0x6d3   :  { %1238 = vrot.lane.b32.xlu0 %v12222_v37, %s12081_s30 }
 0x737   :  { %v958_v20 = vpop.xlane.xlu1 %957 }
 0x738   :  { %11755 = vrcp.f32 %v958_v20 }
 0x739   :  { %v955_v21 = vpop.xlane.xlu0 %954 }
 0x73a   :  { %11757 = vrcp.f32 %v955_v21 }
 0x742   :  { %v961_v23 = vpop.xlane.xlu0 %960 }
 0x743   :  { %11759 = vrcp.f32 %v961_v23 }
 0x745   :  { %v11756_v25 = vpop.eup %11755 }
 0x746   :  { %v964_v26 = vpop.xlane.xlu1 %963  ;;  %v968_v34 = vmul.f32 %v11756_v25, %v11748_v5  ;;  %v1150_v39 = vpop.permute.xlu0 %1149 }
 0x747   :  { %v11758_v30 = vpop.eup %11757  ;;  %11761 = vrcp.f32 %v964_v26 }
 0x748   :  { %v966_v32 = vmul.f32 %v11758_v30, %v11750_v9 }
 0x74a   :  { %10998 = vmatprep.mubr.msk.f32.mxu1 %vm528_vm3, %v966_v32  ;;  %v1239_v47 = vpop.permute.xlu0 %1238  ;;  %v1243_v48 = vpop.permute.xlu1 %1242 }
 0x74b   :  { %10999 = vmatmul.mubr.msk.f32.vlgmr.msra.gmra.mxu1 %vm528_vm3, %v968_v34 }
 0x74c   :  { %11009 = vmatpush3.xpose.msk.msra.mxu1 %vm351_vm2, %v1154_v11  ;;  %11012 = vmatprep.mubr.msk.f32.mxu1 %vm351_vm2, %v1148_v19 }
 0x74d   :  { %11010 = vmatprep.subr.msk.mxu1 %vm351_vm2, %v1152_v18 }
 0x74e   :  { %v1241_v50 = vpop.permute.xlu1 %1240 }
 0x750   :  { %v11760_v38 = vpop.eup %11759  ;;  %11011 = vmatpush3.xpose.msk.msra.mxu1 %vm351_vm2, %v1152_v18 }
 0x751   :  { %v970_v40 = vmul.f32 %v11760_v38, %v11752_v14 }
 0x753   :  { %11013 = vmatmul.mubr.msk.f32.vlgmr.msra.gmra.mxu1 %vm351_vm2, %v1150_v39  ;;  %11005 = vmatprep.mubr.msk.f32.mxu0 %vm528_vm3, %v970_v40 }
 0x754   :  { %v11762_v42 = vpop.eup %11761 }
 0x755   :  { %v972_v46 = vmul.f32 %v11762_v42, %v11754_v16 }
 0x757   :  { %11006 = vmatmul.mubr.msk.f32.vlgmr.msra.gmra.mxu0 %vm528_vm3, %v972_v46 }
 0x758   :  { %11016 = vmatpush3.xpose.msk.msra.mxu0 %vm351_vm2, %v1245_v13  ;;  %11019 = vmatprep.mubr.msk.f32.mxu0 %vm351_vm2, %v1239_v47 }
 0x759   :  { %11017 = vmatprep.subr.msk.mxu0 %vm351_vm2, %v1243_v48 }
 0x75c   :  { %11018 = vmatpush3.xpose.msk.msra.mxu0 %vm351_vm2, %v1243_v48 }
 0x75f   :  { %11020 = vmatmul.mubr.msk.f32.vlgmr.msra.gmra.mxu0 %vm351_vm2, %v1241_v50 }
 0x80b   :  { %v12350_v52 = vpop.f32.mrf.mxu1 }
 0x80d   :  { %v12352_v53 = vpop.f32.mrf.mxu1 }
 0x813   :  { %v11014_v54 = vpop.f32.mrf.mxu1 }
 0x814   :  { %v1332_v55 = vsel %vm528_vm3, %v11014_v54, -inf }
 0x815   :  { %1333 = vmax.xlane.f32.xlu1 %v1332_v55  ;;  %v1229_v56 = vpop.f32.mrf.mxu1 }
 0x816   :  { %v1329_v57 = vsel %vm528_vm3, %v1229_v56, -inf }
 0x817   :  { %1330 = vmax.xlane.f32.xlu0 %v1329_v57  ;;  %v12356_v58 = vpop.f32.mrf.mxu0 }
 0x819   :  { %v12358_v59 = vpop.f32.mrf.mxu0 }
 0x81f   :  { %v11021_v60 = vpop.f32.mrf.mxu0 }
 0x820   :  { %v1338_v63 = vsel %vm528_vm3, %v11021_v60, -inf }
 0x821   :  { %v1320_v61 = vpop.f32.mrf.mxu0 }
 0x822   :  { %v1335_v62 = vsel %vm528_vm3, %v1320_v61, -inf }
 0x823   :  { %1336 = vmax.xlane.f32.xlu0 %v1335_v62 }
 0x826   :  { %1373 = vrot.lane.b32.xlu1 %v12204_v31, %s12082_s4 }
 0x827   :  { %1339 = vmax.xlane.f32.xlu0 %v1338_v63 }
 0x82a   :  { %1462 = vrot.lane.b32.xlu1 %v12213_v35, %s12082_s4 }
 0x82e   :  { %1553 = vrot.lane.b32.xlu1 %v12202_v27, %s12083_s5 }
 0x832   :  { %1551 = vrot.lane.b32.xlu1 %v12204_v31, %s12083_s5 }
 0x836   :  { %1547 = vrot.lane.b32.xlu1 %v12211_v33, %s12084_s6 }
 0x83d   :  { %1375 = vrot.lane.b32.xlu0 %v12202_v27, %s12082_s4 }
 0x841   :  { %1460 = vrot.lane.b32.xlu0 %v12215_v36, %s12082_s4 }
 0x845   :  { %1644 = vrot.lane.b32.xlu0 %v12213_v35, %s12083_s5 }
 0x89e   :  { %v1334_v0 = vpop.xlane.xlu1 %1333 }
 0x89f   :  { %v1342_v1 = vsub.f32 %v11014_v54, %v1334_v0 }
 0x8a0   :  { %v1331_v2 = vpop.xlane.xlu0 %1330 }
 0x8a1   :  { %v1347_v3 = vmul.f32 1.442695, %v1342_v1  ;;  %v1341_v4 = vsub.f32 %v1229_v56, %v1331_v2 }
 0x8a2   :  { %v1374_v5 = vpop.permute.xlu1 %1373 }
 0x8a3   :  { %11763 = vpow2.f32 %v1347_v3  ;;  %v1345_v6 = vmul.f32 1.442695, %v1341_v4 }
 0x8a5   :  { %11765 = vpow2.f32 %v1345_v6 }
 0x8a6   :  { %v1463_v7 = vpop.permute.xlu1 %1462 }
 0x8a7   :  { %11029 = vmatprep.subr.mxu0 %v1463_v7 }
 0x8a8   :  { %11030 = vmatpush3.msra.mxu0 %v1463_v7 }
 0x8aa   :  { %v1554_v18 = vpop.permute.xlu1 %1553 }
 0x8ac   :  { %v1337_v33 = vpop.xlane.xlu0 %1336 }
 0x8ad   :  { %v1343_v8 = vsub.f32 %v1320_v61, %v1337_v33 }
 0x8ae   :  { %v1552_v30 = vpop.permute.xlu1 %1551 }
 0x8af   :  { %v1349_v9 = vmul.f32 1.442695, %v1343_v8 }
 0x8b0   :  { %v11764_v10 = vpop.eup %11763  ;;  %v1340_v11 = vpop.xlane.xlu0 %1339 }
 0x8b1   :  { %11767 = vpow2.f32 %v1349_v9  ;;  %v1344_v12 = vsub.f32 %v11021_v60, %v1340_v11  ;;  %v1356_v13 = vsel %vm528_vm3, %v11764_v10, 0.0 }
 0x8b2   :  { %v11766_v14 = vpop.eup %11765  ;;  %1357 = vadd.xlane.f32.xlu1 %v1356_v13  ;;  %v1548_v32 = vpop.permute.xlu1 %1547 }
 0x8b3   :  { %v1351_v15 = vmul.f32 1.442695, %v1344_v12  ;;  %v1353_v16 = vsel %vm528_vm3, %v11766_v14, 0.0 }
 0x8b4   :  { %1354 = vadd.xlane.f32.xlu0 %v1353_v16  ;;  %v1376_v17 = vpop.permute.xlu0 %1375 }
 0x8b5   :  { %11769 = vpow2.f32 %v1351_v15  ;;  %11022 = vmatprep.subr.mxu1 %v1376_v17 }
 0x8b6   :  { %11023 = vmatpush3.msra.mxu1 %v1376_v17 }
 0x8b7   :  { %11024 = vmatprep.subr.mxu1 %v1374_v5 }
 0x8b8   :  { %11025 = vmatpush3.msra.mxu1 %v1374_v5  ;;  %v1461_v19 = vpop.permute.xlu0 %1460 }
 0x8b9   :  { %11031 = vmatprep.subr.mxu0 %v1461_v19  ;;  %11036 = vmatprep.subr.msk.mxu1 %vm351_vm2, %v1554_v18 }
 0x8ba   :  { %11032 = vmatpush3.msra.mxu0 %v1461_v19 }
 0x8bc   :  { %v1645_v20 = vpop.permute.xlu0 %1644 }
 0x8bd   :  { %11043 = vmatprep.subr.msk.mxu0 %vm351_vm2, %v1645_v20 }
 0x8be   :  { %v11768_v21 = vpop.eup %11767 }
 0x8bf   :  { %v1359_v23 = vsel %vm528_vm3, %v11768_v21, 0.0 }
 0x8c0   :  { %1360 = vadd.xlane.f32.xlu0 %v1359_v23 }
 0x8c2   :  { %v11770_v25 = vpop.eup %11769 }
 0x8c3   :  { %v1362_v26 = vsel %vm528_vm3, %v11770_v25, 0.0 }
 0x8c4   :  { %1363 = vadd.xlane.f32.xlu1 %v1362_v26 }
 0x8d5   :  { %1642 = vrot.lane.b32.xlu1 %v12215_v36, %s12083_s5 }
 0x8d6   :  { %1549 = vrot.lane.b32.xlu0 %v12234_v41, %s12084_s6 }
 0x8d9   :  { %1640 = vrot.lane.b32.xlu1 %v12242_v43, %s12084_s6 }
 0x8da   :  { %1638 = vrot.lane.b32.xlu0 %v12222_v37, %s12084_s6 }
 0x93b   :  { %v1358_v34 = vpop.xlane.xlu1 %1357 }
 0x93c   :  { %11771 = vrcp.f32 %v1358_v34 }
 0x93d   :  { %v1355_v38 = vpop.xlane.xlu0 %1354 }
 0x93e   :  { %11773 = vrcp.f32 %v1355_v38 }
 0x949   :  { %v1361_v39 = vpop.xlane.xlu0 %1360  ;;  %v11772_v40 = vpop.eup %11771 }
 0x94a   :  { %11775 = vrcp.f32 %v1361_v39  ;;  %v1368_v48 = vmul.f32 %v11772_v40, %v11764_v10 }
 0x94b   :  { %v11774_v42 = vpop.eup %11773 }
 0x94c   :  { %v1366_v46 = vmul.f32 %v11774_v42, %v11766_v14 }
 0x94d   :  { %v1364_v47 = vpop.xlane.xlu1 %1363  ;;  %v1550_v37 = vpop.permute.xlu0 %1549 }
 0x94e   :  { %11777 = vrcp.f32 %v1364_v47  ;;  %11026 = vmatprep.mubr.msk.f32.mxu1 %vm528_vm3, %v1366_v46 }
 0x94f   :  { %11027 = vmatmul.mubr.msk.f32.vlgmr.msra.gmra.mxu1 %vm528_vm3, %v1368_v48 }
 0x950   :  { %11037 = vmatpush3.xpose.msk.msra.mxu1 %vm351_vm2, %v1554_v18  ;;  %11040 = vmatprep.mubr.msk.f32.mxu1 %vm351_vm2, %v1548_v32 }
 0x951   :  { %11038 = vmatprep.subr.msk.mxu1 %vm351_vm2, %v1552_v30  ;;  %v1639_v55 = vpop.permute.xlu0 %1638  ;;  %v1643_v56 = vpop.permute.xlu1 %1642 }
 0x954   :  { %11039 = vmatpush3.xpose.msk.msra.mxu1 %vm351_vm2, %v1552_v30 }
 0x955   :  { %v1641_v57 = vpop.permute.xlu1 %1640 }
 0x957   :  { %v11776_v41 = vpop.eup %11775  ;;  %11041 = vmatmul.mubr.msk.f32.vlgmr.msra.gmra.mxu1 %vm351_vm2, %v1550_v37  ;;  %v10064_v37 = vld [vmem:[%s14000_s1 + $0x98] sm:$0xff] }
 0x958   :  { %v1370_v43 = vmul.f32 %v11776_v41, %v11768_v21  ;;  %v10063_v41 = vld [vmem:[%s14000_s1 + $0x90] sm:$0xff] }
 0x95a   :  { %11033 = vmatprep.mubr.msk.f32.mxu0 %vm528_vm3, %v1370_v43  ;;  %v10062_v43 = vld [vmem:[%s14000_s1 + $0x88] sm:$0xff] }
 0x95b   :  { %v11778_v50 = vpop.eup %11777 }
 0x95c   :  { %v1372_v54 = vmul.f32 %v11778_v50, %v11770_v25  ;;  %v10061_v50 = vld [vmem:[%s14000_s1 + $0x80] sm:$0xff] }
 0x95e   :  { %11034 = vmatmul.mubr.msk.f32.vlgmr.msra.gmra.mxu0 %vm528_vm3, %v1372_v54 }
 0x95f   :  { %11044 = vmatpush3.xpose.msk.msra.mxu0 %vm351_vm2, %v1645_v20  ;;  %11047 = vmatprep.mubr.msk.f32.mxu0 %vm351_vm2, %v1639_v55 }
 0x960   :  { %11045 = vmatprep.subr.msk.mxu0 %vm351_vm2, %v1643_v56 }
 0x963   :  { %11046 = vmatpush3.xpose.msk.msra.mxu0 %vm351_vm2, %v1643_v56 }
 0x966   :  { %11048 = vmatmul.mubr.msk.f32.vlgmr.msra.gmra.mxu0 %vm351_vm2, %v1641_v57 }
 0xa0f   :  { %v11028_v60 = vpop.f32.mrf.mxu1 }
 0xa11   :  { %v1451_v61 = vpop.f32.mrf.mxu1 }
 0xa17   :  { %v11042_v62 = vpop.f32.mrf.mxu1 }
 0xa18   :  { %v1732_v63 = vsel %vm528_vm3, %v11042_v62, -inf }
 0xa19   :  { %1733 = vmax.xlane.f32.xlu1 %v1732_v63  ;;  %v1629_v0 = vpop.f32.mrf.mxu1 }
 0xa1a   :  { %v1729_v1 = vsel %vm528_vm3, %v1629_v0, -inf }
 0xa1b   :  { %1730 = vmax.xlane.f32.xlu0 %v1729_v1 }
 0xa1e   :  { %v11035_v2 = vpop.f32.mrf.mxu0 }
 0xa20   :  { %v1538_v3 = vpop.f32.mrf.mxu0 }
 0xa26   :  { %v11049_v4 = vpop.f32.mrf.mxu0 }
 0xa27   :  { %v1738_v7 = vsel %vm528_vm3, %v11049_v4, -inf }
 0xa28   :  { %v1720_v5 = vpop.f32.mrf.mxu0 }
 0xa29   :  { %v1735_v6 = vsel %vm528_vm3, %v1720_v5, -inf }
 0xa2a   :  { %1736 = vmax.xlane.f32.xlu0 %v1735_v6 }
 0xa2e   :  { %1739 = vmax.xlane.f32.xlu0 %v1738_v7 }
 0xaa2   :  { %v1734_v33 = vpop.xlane.xlu1 %1733 }
 0xaa3   :  { %v1742_v8 = vsub.f32 %v11042_v62, %v1734_v33 }
 0xaa4   :  { %v1731_v9 = vpop.xlane.xlu0 %1730 }
 0xaa5   :  { %v1747_v10 = vmul.f32 1.442695, %v1742_v8  ;;  %v1741_v11 = vsub.f32 %v1629_v0, %v1731_v9 }
 0xaa7   :  { %11779 = vpow2.f32 %v1747_v10  ;;  %v1745_v12 = vmul.f32 1.442695, %v1741_v11 }
 0xaa9   :  { %11781 = vpow2.f32 %v1745_v12 }
 0xab3   :  { %v1737_v13 = vpop.xlane.xlu0 %1736 }
 0xab4   :  { %v11780_v14 = vpop.eup %11779  ;;  %v1743_v15 = vsub.f32 %v1720_v5, %v1737_v13 }
 0xab5   :  { %v1756_v16 = vsel %vm528_vm3, %v11780_v14, 0.0 }
 0xab6   :  { %v11782_v17 = vpop.eup %11781  ;;  %v1749_v18 = vmul.f32 1.442695, %v1743_v15  ;;  %1757 = vadd.xlane.f32.xlu1 %v1756_v16 }
 0xab7   :  { %v1740_v19 = vpop.xlane.xlu0 %1739  ;;  %v1753_v20 = vsel %vm528_vm3, %v11782_v17, 0.0 }
 0xab8   :  { %11783 = vpow2.f32 %v1749_v18  ;;  %v1744_v21 = vsub.f32 %v11049_v4, %v1740_v19  ;;  %1754 = vadd.xlane.f32.xlu0 %v1753_v20 }
 0xaba   :  { %v1751_v23 = vmul.f32 1.442695, %v1744_v21 }
 0xabc   :  { %11785 = vpow2.f32 %v1751_v23 }
 0xac5   :  { %v11784_v25 = vpop.eup %11783 }
 0xac6   :  { %v1759_v26 = vsel %vm528_vm3, %v11784_v25, 0.0 }
 0xac7   :  { %1760 = vadd.xlane.f32.xlu0 %v1759_v26 }
 0xac9   :  { %v11786_v30 = vpop.eup %11785 }
 0xaca   :  { %v1762_v32 = vsel %vm528_vm3, %v11786_v30, 0.0 }
 0xacb   :  { %1763 = vadd.xlane.f32.xlu1 %v1762_v32 }
 0xadc   :  { %1773 = vrot.lane.b32.xlu1 %v12204_v31, %s12085_s7 }
 0xadd   :  { %1775 = vrot.lane.b32.xlu0 %v12202_v27, %s12085_s7 }
 0xae0   :  { %1862 = vrot.lane.b32.xlu1 %v12213_v35, %s12085_s7 }
 0xae1   :  { %1951 = vrot.lane.b32.xlu0 %v12352_v53, %s12086_s8 }
 0xae4   :  { %1860 = vrot.lane.b32.xlu1 %v12215_v36, %s12085_s7 }
 0xae5   :  { %1967 = vrot.lane.b32.xlu0 %v1451_v61, %s12087_s0 }
 0xae8   :  { %1953 = vrot.lane.b32.xlu1 %v12350_v52, %s12086_s8 }
 0xae9   :  { %1955 = vrot.lane.b32.xlu0 %v12358_v59, %s12086_s8 }
 0xaec   :  { %1969 = vrot.lane.b32.xlu1 %v11028_v60, %s12087_s0 }
 0xaed   :  { %1971 = vrot.lane.b32.xlu0 %v1538_v3, %s12087_s0 }
 0xaf0   :  { %1957 = vrot.lane.b32.xlu1 %v12356_v58, %s12086_s8 }
 0xaf4   :  { %1973 = vrot.lane.b32.xlu1 %v11035_v2, %s12087_s0 }
 0xb3f   :  { %v1758_v31 = vpop.xlane.xlu1 %1757 }
 0xb41   :  { %v1755_v27 = vpop.xlane.xlu0 %1754 }
 0xb42   :  { %11787 = vrcp.f32 %v1755_v27 }
 0xb43   :  { %11789 = vrcp.f32 %v1758_v31 }
 0xb4f   :  { %v11788_v35 = vpop.eup %11787 }
 0xb50   :  { %v1761_v36 = vpop.xlane.xlu0 %1760  ;;  %v1766_v53 = vmul.f32 %v11788_v35, %v11782_v17  ;;  %v11790_v34 = vpop.eup %11789 }
 0xb51   :  { %11791 = vrcp.f32 %v1761_v36  ;;  %v1768_v58 = vmul.f32 %v11790_v34, %v11780_v14 }
 0xb52   :  { %11054 = vmatprep.mubr.msk.f32.mxu1 %vm528_vm3, %v1766_v53 }
 0xb54   :  { %v1764_v52 = vpop.xlane.xlu1 %1763  ;;  %v1776_v59 = vpop.permute.xlu0 %1775 }
 0xb55   :  { %11793 = vrcp.f32 %v1764_v52  ;;  %11050 = vmatprep.subr.mxu1 %v1776_v59 }
 0xb56   :  { %11051 = vmatpush3.msra.mxu1 %v1776_v59 }
 0xb58   :  { %v1774_v38 = vpop.permute.xlu1 %1773  ;;  %v1952_v61 = vpop.permute.xlu0 %1951 }
 0xb59   :  { %11052 = vmatprep.subr.mxu1 %v1774_v38  ;;  %v1995_v4 = vsel %vm351_vm2, %v12296_v45, %v1952_v61 }
 0xb5a   :  { %11053 = vmatpush3.msra.mxu1 %v1774_v38 }
 0xb5b   :  { %11055 = vmatmul.mubr.msk.f32.vlgmr.msra.gmra.mxu1 %vm528_vm3, %v1768_v58  ;;  %11064 = vmatprep.subr.mxu1 %v10064_v37 }
 0xb5c   :  { %v1863_v39 = vpop.permute.xlu1 %1862  ;;  %11065 = vmatpush3.msra.mxu1 %v10064_v37  ;;  %v1968_v63 = vpop.permute.xlu0 %1967 }
 0xb5d   :  { %11057 = vmatprep.subr.mxu0 %v1863_v39  ;;  %11066 = vmatprep.subr.mxu1 %v10063_v41  ;;  %v1999_v6 = vsel %vm528_vm3, %v1995_v4, %v1968_v63 }
 0xb5e   :  { %v11792_v40 = vpop.eup %11791  ;;  %11058 = vmatpush3.msra.mxu0 %v1863_v39  ;;  %11067 = vmatpush3.msra.mxu1 %v10063_v41 }
 0xb5f   :  { %v1770_v42 = vmul.f32 %v11792_v40, %v11784_v25  ;;  %11068 = vmatprep.subr.mxu1 %v10062_v43 }
 0xb60   :  { %v1861_v46 = vpop.permute.xlu1 %1860  ;;  %11069 = vmatpush3.msra.mxu1 %v10062_v43  ;;  %v1956_v1 = vpop.permute.xlu0 %1955 }
 0xb61   :  { %11059 = vmatprep.subr.mxu0 %v1861_v46  ;;  %11061 = vmatprep.mubr.msk.f32.mxu0 %vm528_vm3, %v1770_v42  ;;  %v1997_v45 = vsel %vm351_vm2, %v12302_v51, %v1956_v1  ;;  %v10136_v51 = vld [vmem:[%s14002_s2 + $0x4] ss:$0 sm:$0xff] }
 0xb62   :  { %v11794_v47 = vpop.eup %11793  ;;  %11060 = vmatpush3.msra.mxu0 %v1861_v46  ;;  %11070 = vmatprep.subr.mxu1 %v10061_v50 }
 0xb63   :  { %v1772_v48 = vmul.f32 %v11794_v47, %v11786_v30  ;;  %11071 = vmatpush3.msra.mxu1 %v10061_v50 }
 0xb64   :  { %v1954_v60 = vpop.permute.xlu1 %1953  ;;  %v1972_v3 = vpop.permute.xlu0 %1971 }
 0xb65   :  { %11062 = vmatmul.mubr.msk.f32.vlgmr.msra.gmra.mxu0 %vm528_vm3, %v1772_v48  ;;  %v1996_v7 = vsel %vm351_vm2, %v12294_v44, %v1954_v60  ;;  %v2001_v12 = vsel %vm528_vm3, %v1997_v45, %v1972_v3  ;;  %v10065_v60 = vld [vmem:[%s14000_s1 + $0xc0] sm:$0xff] }
 0xb68   :  { %v1970_v62 = vpop.permute.xlu1 %1969 }
 0xb69   :  { %v2000_v8 = vsel %vm528_vm3, %v1996_v7, %v1970_v62 }
 0xb6c   :  { %v1958_v0 = vpop.permute.xlu1 %1957 }
 0xb6d   :  { %v1998_v44 = vsel %vm351_vm2, %v12299_v49, %v1958_v0 }
 0xb70   :  { %v1974_v2 = vpop.permute.xlu1 %1973 }
 0xb71   :  { %v2002_v14 = vsel %vm528_vm3, %v1998_v44, %v1974_v2  ;;  %v10138_v44 = vld [vmem:[%s14002_s2 + $0x6] ss:$0 sm:$0xff] }
 0xc1b   :  { %v11056_v54 = vpop.f32.mrf.mxu1 }
 0xc1c   :  { %1985 = vrot.lane.b32.xlu1 %v11056_v54, %s12088_s17 }
 0xc1d   :  { %v1851_v55 = vpop.f32.mrf.mxu1 }
 0xc1e   :  { %1983 = vrot.lane.b32.xlu0 %v1851_v55, %s12088_s17  ;;  %v10068_v55 = vld [vmem:[%s14000_s1 + $0xd8] sm:$0xff] }
 0xc1f   :  { %11078 = vmatprep.subr.mxu0 %v10068_v55 }
 0xc20   :  { %11079 = vmatpush3.msra.mxu0 %v10068_v55 }
 0xc25   :  { %v11063_v56 = vpop.f32.mrf.mxu0 }
 0xc26   :  { %1989 = vrot.lane.b32.xlu1 %v11063_v56, %s12088_s17  ;;  %v10067_v56 = vld [vmem:[%s14000_s1 + $0xd0] sm:$0xff] }
 0xc27   :  { %v1938_v57 = vpop.f32.mrf.mxu0  ;;  %11080 = vmatprep.subr.mxu0 %v10067_v56 }
 0xc28   :  { %1987 = vrot.lane.b32.xlu0 %v1938_v57, %s12088_s17  ;;  %v10066_v57 = vld [vmem:[%s14000_s1 + $0xc8] sm:$0xff]  ;;  %11081 = vmatpush3.msra.mxu0 %v10067_v56 }
 0xc29   :  { %11082 = vmatprep.subr.mxu0 %v10066_v57 }
 0xc2a   :  { %11083 = vmatpush3.msra.mxu0 %v10066_v57 }
 0xc2b   :  { %11084 = vmatprep.subr.mxu0 %v10065_v60 }
 0xc2c   :  { %11085 = vmatpush3.msra.mxu0 %v10065_v60 }
 0xc8e   :  { %v1986_v5 = vpop.permute.xlu1 %1985 }
 0xc8f   :  { %v2005_v10 = vsel %vm2003_vm4, %v2000_v8, %v1986_v5 }
 0xc90   :  { %v1984_v33 = vpop.permute.xlu0 %1983 }
 0xc91   :  { %v2004_v9 = vsel %vm2003_vm4, %v1999_v6, %v1984_v33 }
 0xc92   :  { %11072 = vmatprep.mubr.msk.f32.mxu1 %vm170_vm1, %v2004_v9  ;;  %v10137_v9 = vld [vmem:[%s14002_s2 + $0x5] ss:$0 sm:$0xff] }
 0xc93   :  { %11073 = vmatmul.mubr.msk.f32.vlgmr.msra.gmra.mxu1 %vm170_vm1, %v2005_v10 }
 0xc98   :  { %v1990_v11 = vpop.permute.xlu1 %1989 }
 0xc99   :  { %v2007_v16 = vsel %vm2003_vm4, %v2002_v14, %v1990_v11 }
 0xc9a   :  { %v1988_v13 = vpop.permute.xlu0 %1987 }
 0xc9b   :  { %v2006_v15 = vsel %vm2003_vm4, %v2001_v12, %v1988_v13 }
 0xc9c   :  { %11075 = vmatprep.mubr.msk.f32.mxu1 %vm170_vm1, %v2006_v15 }
 0xc9d   :  { %11076 = vmatmul.mubr.msk.f32.gmra.mxu1 %vm170_vm1, %v2007_v16 }
 0xd53   :  { %v11074_v17 = vpop.f32.mrf.mxu1 }
 0xd54   :  { %v2106_v18 = vadd.f32 %v11074_v17, %v12155_v24 }
 0xd55   :  { %v2086_v19 = vpop.f32.mrf.mxu1 }
 0xd56   :  { %v12478_v49 = vadd.f32 %v10136_v51, %v2106_v18  ;;  %v2105_v20 = vadd.f32 %v2086_v19, %v12153_v22 }
 0xd58   :  { %v12481_v21 = vadd.f32 %v10136_v51, %v2105_v20  ;;  %v2120_v23 = vsel %vm170_vm1, %v12478_v49, 0.0 }
 0xd59   :  { %2121 = vadd.xlane.f32.xlu1 %v2120_v23 }
 0xd5a   :  { %v2117_v25 = vsel %vm170_vm1, %v12481_v21, 0.0 }
 0xd5b   :  { %2118 = vadd.xlane.f32.xlu0 %v2117_v25 }
 0xd5d   :  { %v11077_v26 = vpop.f32.mrf.mxu1 }
 0xd5e   :  { %v2108_v32 = vadd.f32 %v11077_v26, %v12161_v29  ;;  %v10076_v26 = vld [vmem:[%s14000_s1 + $0x138] sm:$0xff] }
 0xd5f   :  { %v2096_v30 = vpop.f32.mrf.mxu1  ;;  %11092 = vmatprep.subr.mxu1 %v10076_v26 }
 0xd60   :  { %v2107_v24 = vadd.f32 %v2096_v30, %v12159_v28  ;;  %v12491_v31 = vadd.f32 %v10136_v51, %v2108_v32  ;;  %11093 = vmatpush3.msra.mxu1 %v10076_v26  ;;  %v10075_v30 = vld [vmem:[%s14000_s1 + $0x130] sm:$0xff]  ;;  %v10074_v32 = vld [vmem:[%s14000_s1 + $0x128] sm:$0xff] }
 0xd61   :  { %11094 = vmatprep.subr.mxu1 %v10075_v30 }
 0xd62   :  { %v12489_v27 = vadd.f32 %v10136_v51, %v2107_v24  ;;  %v2126_v35 = vsel %vm170_vm1, %v12491_v31, 0.0  ;;  %11095 = vmatpush3.msra.mxu1 %v10075_v30  ;;  %v10073_v24 = vld [vmem:[%s14000_s1 + $0x120] sm:$0xff] }
 0xd63   :  { %11096 = vmatprep.subr.mxu1 %v10074_v32 }
 0xd64   :  { %v2123_v22 = vsel %vm170_vm1, %v12489_v27, 0.0  ;;  %11097 = vmatpush3.msra.mxu1 %v10074_v32 }
 0xd65   :  { %2124 = vadd.xlane.f32.xlu0 %v2123_v22  ;;  %11098 = vmatprep.subr.mxu1 %v10073_v24  ;;  %v10072_v22 = vld [vmem:[%s14000_s1 + $0x118] sm:$0xff] }
 0xd66   :  { %11099 = vmatpush3.msra.mxu1 %v10073_v24 }
 0xd67   :  { %11100 = vmatprep.subr.mxu1 %v10072_v22 }
 0xd68   :  { %11101 = vmatpush3.msra.mxu1 %v10072_v22 }
 0xd69   :  { %2127 = vadd.xlane.f32.xlu0 %v2126_v35  ;;  %v10071_v35 = vld [vmem:[%s14000_s1 + $0x110] sm:$0xff] }
 0xd6a   :  { %11102 = vmatprep.subr.mxu1 %v10071_v35 }
 0xd6b   :  { %11103 = vmatpush3.msra.mxu1 %v10071_v35 }
 0xde2   :  { %v2122_v36 = vpop.xlane.xlu1 %2121 }
 0xde3   :  { %v2130_v53 = vmul.f32 0.03125, %v2122_v36  ;;  %v10070_v36 = vld [vmem:[%s14000_s1 + $0x108] sm:$0xff] }
 0xde4   :  { %v2119_v52 = vpop.xlane.xlu0 %2118  ;;  %11104 = vmatprep.subr.mxu1 %v10070_v36 }
 0xde5   :  { %v2134_v59 = vsub.f32 %v12478_v49, %v2130_v53  ;;  %v2129_v29 = vmul.f32 0.03125, %v2119_v52  ;;  %v10069_v53 = vld [vmem:[%s14000_s1 + $0x100] sm:$0xff]  ;;  %11105 = vmatpush3.msra.mxu1 %v10070_v36 }
 0xde6   :  { %11106 = vmatprep.subr.mxu1 %v10069_v53  ;;  %v10139_v52 = vld [vmem:[%s14002_s2 + $0x7] ss:$0 sm:$0xff] }
 0xde7   :  { %v2133_v28 = vsub.f32 %v12481_v21, %v2129_v29  ;;  %v2138_v34 = vmul.f32 %v2134_v59, %v2134_v59  ;;  %11107 = vmatpush3.msra.mxu1 %v10069_v53 }
 0xde9   :  { %v2144_v38 = vsel %vm170_vm1, %v2138_v34, 0.0  ;;  %v2137_v58 = vmul.f32 %v2133_v28, %v2133_v28 }
 0xdea   :  { %2145 = vadd.xlane.f32.xlu1 %v2144_v38 }
 0xdeb   :  { %v2141_v39 = vsel %vm170_vm1, %v2137_v58, 0.0 }
 0xdec   :  { %2142 = vadd.xlane.f32.xlu0 %v2141_v39 }
 0xdee   :  { %v2125_v40 = vpop.xlane.xlu0 %2124 }
 0xdef   :  { %v2131_v42 = vmul.f32 0.03125, %v2125_v40 }
 0xdf1   :  { %v2135_v46 = vsub.f32 %v12489_v27, %v2131_v42 }
 0xdf2   :  { %v2128_v47 = vpop.xlane.xlu0 %2127 }
 0xdf3   :  { %v2132_v48 = vmul.f32 0.03125, %v2128_v47  ;;  %v2139_v37 = vmul.f32 %v2135_v46, %v2135_v46 }
 0xdf5   :  { %v2136_v41 = vsub.f32 %v12491_v31, %v2132_v48  ;;  %v2147_v43 = vsel %vm170_vm1, %v2139_v37, 0.0 }
 0xdf6   :  { %2148 = vadd.xlane.f32.xlu0 %v2147_v43 }
 0xdf7   :  { %v2140_v50 = vmul.f32 %v2136_v41, %v2136_v41 }
 0xdf9   :  { %v2150_v54 = vsel %vm170_vm1, %v2140_v50, 0.0 }
 0xdfa   :  { %2151 = vadd.xlane.f32.xlu1 %v2150_v54 }
 0xe73   :  { %v2146_v61 = vpop.xlane.xlu1 %2145 }
 0xe74   :  { %v2154_v62 = vmul.f32 0.03125, %v2146_v61 }
 0xe75   :  { %v2143_v63 = vpop.xlane.xlu0 %2142 }
 0xe76   :  { %v2158_v0 = vadd.f32 1e-05, %v2154_v62  ;;  %v2153_v1 = vmul.f32 0.03125, %v2143_v63 }
 0xe78   :  { %11795 = vrsqrt.f32 %v2158_v0  ;;  %v2157_v2 = vadd.f32 1e-05, %v2153_v1 }
 0xe7a   :  { %11797 = vrsqrt.f32 %v2157_v2 }
 0xe7f   :  { %v2149_v3 = vpop.xlane.xlu0 %2148 }
 0xe80   :  { %v2155_v4 = vmul.f32 0.03125, %v2149_v3 }
 0xe82   :  { %v2159_v5 = vadd.f32 1e-05, %v2155_v4 }
 0xe83   :  { %v2152_v6 = vpop.xlane.xlu1 %2151 }
 0xe84   :  { %11799 = vrsqrt.f32 %v2159_v5  ;;  %v2156_v7 = vmul.f32 0.03125, %v2152_v6 }
 0xe85   :  { %v11796_v33 = vpop.eup %11795 }
 0xe86   :  { %v2160_v8 = vadd.f32 1e-05, %v2156_v7  ;;  %v2166_v10 = vmul.f32 %v11796_v33, %v2134_v59 }
 0xe87   :  { %v11798_v45 = vpop.eup %11797 }
 0xe88   :  { %11801 = vrsqrt.f32 %v2160_v8  ;;  %v2165_v11 = vmul.f32 %v11798_v45, %v2133_v28  ;;  %v2174_v12 = vmul.f32 %v10137_v9, %v2166_v10 }
 0xe8a   :  { %v2173_v13 = vmul.f32 %v10137_v9, %v2165_v11  ;;  %v2182_v15 = vadd.f32 %v10138_v44, %v2174_v12 }
 0xe8c   :  { %v2181_v14 = vadd.f32 %v10138_v44, %v2173_v13 }
 0xe8e   :  { %11086 = vmatprep.mubr.msk.f32.mxu0 %vm170_vm1, %v2181_v14 }
 0xe8f   :  { %11087 = vmatmul.mubr.msk.f32.vlgmr.msra.gmra.mxu0 %vm170_vm1, %v2182_v15 }
 0xe91   :  { %v11800_v16 = vpop.eup %11799 }
 0xe92   :  { %v2167_v51 = vmul.f32 %v11800_v16, %v2135_v46 }
 0xe94   :  { %v2175_v17 = vmul.f32 %v10137_v9, %v2167_v51  ;;  %v10144_v51 = vld [vmem:[%s14002_s2 + $0x8] ss:$0 sm:$0xff] }
 0xe95   :  { %v11802_v18 = vpop.eup %11801 }
 0xe96   :  { %v2183_v19 = vadd.f32 %v10138_v44, %v2175_v17  ;;  %v2168_v20 = vmul.f32 %v11802_v18, %v2136_v41 }
 0xe98   :  { %11089 = vmatprep.mubr.msk.f32.mxu0 %vm170_vm1, %v2183_v19  ;;  %v2176_v23 = vmul.f32 %v10137_v9, %v2168_v20 }
 0xe9a   :  { %v2184_v25 = vadd.f32 %v10138_v44, %v2176_v23 }
 0xe9c   :  { %11090 = vmatmul.mubr.msk.f32.gmra.mxu0 %vm170_vm1, %v2184_v25 }
 0xf4f   :  { %v11088_v59 = vpop.f32.mrf.mxu0 }
 0xf50   :  { %v2273_v29 = vadd.f32 %v11088_v59, %v10139_v52 }
 0xf51   :  { %v2267_v28 = vpop.f32.mrf.mxu0 }
 0xf52   :  { %v2287_v34 = vmul.f32 %v2273_v29, %v2273_v29  ;;  %v2268_v38 = vadd.f32 %v10139_v52, %v2267_v28 }
 0xf54   :  { %v2291_v58 = vmul.f32 %v2287_v34, %v2273_v29  ;;  %v2286_v39 = vmul.f32 %v2268_v38, %v2268_v38 }
 0xf56   :  { %v2295_v40 = vmul.f32 0.044715, %v2291_v58  ;;  %v2290_v42 = vmul.f32 %v2286_v39, %v2268_v38 }
 0xf58   :  { %v2299_v46 = vadd.f32 %v2295_v40, %v2273_v29  ;;  %v2294_v47 = vmul.f32 0.044715, %v2290_v42 }
 0xf5a   :  { %v2303_v48 = vmul.f32 0.7978846, %v2299_v46  ;;  %v2298_v37 = vadd.f32 %v2294_v47, %v2268_v38 }
 0xf5c   :  { %11803 = vtanh.f32 %v2303_v48  ;;  %v2302_v41 = vmul.f32 0.7978846, %v2298_v37  ;;  %v11091_v43 = vpop.f32.mrf.mxu0 }
 0xf5d   :  { %v2283_v50 = vadd.f32 %v11091_v43, %v10139_v52 }
 0xf5e   :  { %11805 = vtanh.f32 %v2302_v41  ;;  %v2277_v54 = vpop.f32.mrf.mxu0 }
 0xf5f   :  { %v2289_v55 = vmul.f32 %v2283_v50, %v2283_v50  ;;  %v2278_v56 = vadd.f32 %v10139_v52, %v2277_v54 }
 0xf61   :  { %v2293_v57 = vmul.f32 %v2289_v55, %v2283_v50  ;;  %v2288_v60 = vmul.f32 %v2278_v56, %v2278_v56  ;;  %v10152_v55 = vld [vmem:[%s14000_s1 + $0x158] sm:$0xff] }
 0xf62   :  { %11114 = vmatprep.subr.mxu0 %v10152_v55 }
 0xf63   :  { %v2297_v61 = vmul.f32 0.044715, %v2293_v57  ;;  %v2292_v62 = vmul.f32 %v2288_v60, %v2278_v56  ;;  %11115 = vmatpush3.msra.mxu0 %v10152_v55  ;;  %v10150_v57 = vld [vmem:[%s14000_s1 + $0x148] sm:$0xff]  ;;  %v10149_v60 = vld [vmem:[%s14000_s1 + $0x140] sm:$0xff] }
 0xf65   :  { %v2301_v63 = vadd.f32 %v2297_v61, %v2283_v50  ;;  %v2296_v0 = vmul.f32 0.044715, %v2292_v62 }
 0xf67   :  { %v2305_v1 = vmul.f32 0.7978846, %v2301_v63  ;;  %v2300_v2 = vadd.f32 %v2296_v0, %v2278_v56 }
 0xf69   :  { %v11804_v3 = vpop.eup %11803  ;;  %11807 = vtanh.f32 %v2305_v1  ;;  %v2304_v4 = vmul.f32 0.7978846, %v2300_v2 }
 0xf6a   :  { %v2311_v5 = vadd.f32 1.0, %v11804_v3 }
 0xf6b   :  { %v11806_v6 = vpop.eup %11805  ;;  %11809 = vtanh.f32 %v2304_v4 }
 0xf6c   :  { %v2310_v7 = vadd.f32 1.0, %v11806_v6  ;;  %v2315_v33 = vmul.f32 0.5, %v2311_v5 }
 0xf6e   :  { %v2314_v8 = vmul.f32 0.5, %v2310_v7  ;;  %v2319_v10 = vmul.f32 %v2315_v33, %v2273_v29 }
 0xf70   :  { %v2318_v9 = vmul.f32 %v2314_v8, %v2268_v38 }
 0xf72   :  { %11108 = vmatprep.mubr.msk.f32.mxu1 %vm2326_vm5, %v2318_v9 }
 0xf73   :  { %11109 = vmatmul.mubr.msk.f32.vlgmr.msra.gmra.mxu1 %vm2326_vm5, %v2319_v10  ;;  %v10169_v10 = vld [vmem:[%s14002_s2 + $0x9] ss:$0 sm:$0xff] }
 0xf76   :  { %v11808_v45 = vpop.eup %11807 }
 0xf77   :  { %v2313_v11 = vadd.f32 1.0, %v11808_v45 }
 0xf78   :  { %v11810_v12 = vpop.eup %11809 }
 0xf79   :  { %v2312_v44 = vadd.f32 1.0, %v11810_v12  ;;  %v2317_v13 = vmul.f32 0.5, %v2313_v11 }
 0xf7b   :  { %v2316_v14 = vmul.f32 0.5, %v2312_v44  ;;  %v2321_v16 = vmul.f32 %v2317_v13, %v2283_v50  ;;  %v10170_v44 = vld [vmem:[%s14002_s2 + $0xa] ss:$0 sm:$0xff] }
 0xf7d   :  { %v2320_v15 = vmul.f32 %v2316_v14, %v2278_v56  ;;  %v10151_v56 = vld [vmem:[%s14000_s1 + $0x150] sm:$0xff] }
 0xf7e   :  { %11116 = vmatprep.subr.mxu0 %v10151_v56 }
 0xf7f   :  { %11111 = vmatprep.mubr.msk.f32.mxu1 %vm2326_vm5, %v2320_v15  ;;  %11117 = vmatpush3.msra.mxu0 %v10151_v56 }
 0xf80   :  { %11112 = vmatmul.mubr.msk.f32.gmra.mxu1 %vm2326_vm5, %v2321_v16  ;;  %11118 = vmatprep.subr.mxu0 %v10150_v57 }
 0xf81   :  { %11119 = vmatpush3.msra.mxu0 %v10150_v57 }
 0xf82   :  { %11120 = vmatprep.subr.mxu0 %v10149_v60 }
 0xf83   :  { %11121 = vmatpush3.msra.mxu0 %v10149_v60 }
0x1033   :  { %v11110_v17 = vpop.f32.mrf.mxu1 }
0x1034   :  { %v2411_v18 = vadd.f32 %v11110_v17, %v10144_v51 }
0x1035   :  { %v2405_v19 = vpop.f32.mrf.mxu1 }
0x1036   :  { %v12562_v20 = vadd.f32 %v2411_v18, %v12478_v49  ;;  %v2406_v23 = vadd.f32 %v10144_v51, %v2405_v19 }
0x1038   :  { %v12565_v25 = vadd.f32 %v2406_v23, %v12481_v21  ;;  %v2463_v26 = vsel %vm170_vm1, %v12562_v20, 0.0 }
0x1039   :  { %2464 = vadd.xlane.f32.xlu1 %v2463_v26 }
0x103a   :  { %v2460_v30 = vsel %vm170_vm1, %v12565_v25, 0.0 }
0x103b   :  { %2461 = vadd.xlane.f32.xlu0 %v2460_v30 }
0x1040   :  { %v11113_v32 = vpop.f32.mrf.mxu1 }
0x1041   :  { %v2421_v24 = vadd.f32 %v11113_v32, %v10144_v51  ;;  %v10171_v32 = vld [vmem:[%s14002_s2 + $0xb] ss:$0 sm:$0xff] }
0x1042   :  { %v2415_v22 = vpop.f32.mrf.mxu1 }
0x1043   :  { %v12572_v35 = vadd.f32 %v2421_v24, %v12491_v31  ;;  %v2416_v49 = vadd.f32 %v10144_v51, %v2415_v22 }
0x1045   :  { %v12575_v36 = vadd.f32 %v2416_v49, %v12489_v27  ;;  %v2469_v21 = vsel %vm170_vm1, %v12572_v35, 0.0 }
0x1046   :  { %2470 = vadd.xlane.f32.xlu1 %v2469_v21 }
0x1047   :  { %v2466_v53 = vsel %vm170_vm1, %v12575_v36, 0.0 }
0x1048   :  { %2467 = vadd.xlane.f32.xlu0 %v2466_v53 }
0x10c2   :  { %v2465_v52 = vpop.xlane.xlu1 %2464 }
0x10c3   :  { %v2473_v59 = vmul.f32 0.03125, %v2465_v52 }
0x10c4   :  { %v2462_v29 = vpop.xlane.xlu0 %2461 }
0x10c5   :  { %v2477_v28 = vsub.f32 %v12562_v20, %v2473_v59  ;;  %v2472_v34 = vmul.f32 0.03125, %v2462_v29 }
0x10c7   :  { %v2476_v31 = vsub.f32 %v12565_v25, %v2472_v34  ;;  %v2481_v38 = vmul.f32 %v2477_v28, %v2477_v28 }
0x10c9   :  { %v2487_v27 = vsel %vm170_vm1, %v2481_v38, 0.0  ;;  %v2480_v58 = vmul.f32 %v2476_v31, %v2476_v31 }
0x10ca   :  { %2488 = vadd.xlane.f32.xlu1 %v2487_v27 }
0x10cb   :  { %v2484_v39 = vsel %vm170_vm1, %v2480_v58, 0.0 }
0x10cc   :  { %2485 = vadd.xlane.f32.xlu0 %v2484_v39 }
0x10cf   :  { %v2471_v40 = vpop.xlane.xlu1 %2470 }
0x10d0   :  { %v2475_v42 = vmul.f32 0.03125, %v2471_v40 }
0x10d1   :  { %v2468_v46 = vpop.xlane.xlu0 %2467 }
0x10d2   :  { %v2479_v47 = vsub.f32 %v12572_v35, %v2475_v42  ;;  %v2474_v48 = vmul.f32 0.03125, %v2468_v46 }
0x10d4   :  { %v2478_v37 = vsub.f32 %v12575_v36, %v2474_v48  ;;  %v2483_v41 = vmul.f32 %v2479_v47, %v2479_v47 }
0x10d6   :  { %v2493_v43 = vsel %vm170_vm1, %v2483_v41, 0.0  ;;  %v2482_v50 = vmul.f32 %v2478_v37, %v2478_v37 }
0x10d7   :  { %2494 = vadd.xlane.f32.xlu1 %v2493_v43 }
0x10d8   :  { %v2490_v54 = vsel %vm170_vm1, %v2482_v50, 0.0 }
0x10d9   :  { %2491 = vadd.xlane.f32.xlu0 %v2490_v54 }
0x1153   :  { %v2489_v61 = vpop.xlane.xlu1 %2488 }
0x1154   :  { %v2497_v62 = vmul.f32 0.03125, %v2489_v61 }
0x1155   :  { %v2486_v63 = vpop.xlane.xlu0 %2485 }
0x1156   :  { %v2501_v0 = vadd.f32 1e-05, %v2497_v62  ;;  %v2496_v1 = vmul.f32 0.03125, %v2486_v63 }
0x1158   :  { %11811 = vrsqrt.f32 %v2501_v0  ;;  %v2500_v2 = vadd.f32 1e-05, %v2496_v1 }
0x115a   :  { %11813 = vrsqrt.f32 %v2500_v2 }
0x1160   :  { %v2495_v3 = vpop.xlane.xlu1 %2494 }
0x1161   :  { %v2499_v4 = vmul.f32 0.03125, %v2495_v3 }
0x1162   :  { %v2492_v5 = vpop.xlane.xlu0 %2491 }
0x1163   :  { %v2503_v6 = vadd.f32 1e-05, %v2499_v4  ;;  %v2498_v7 = vmul.f32 0.03125, %v2492_v5 }
0x1165   :  { %v11812_v33 = vpop.eup %11811  ;;  %11815 = vrsqrt.f32 %v2503_v6  ;;  %v2502_v8 = vadd.f32 1e-05, %v2498_v7 }
0x1166   :  { %v2509_v9 = vmul.f32 %v11812_v33, %v2477_v28 }
0x1167   :  { %v11814_v45 = vpop.eup %11813  ;;  %11817 = vrsqrt.f32 %v2502_v8 }
0x1168   :  { %v2508_v11 = vmul.f32 %v11814_v45, %v2476_v31  ;;  %v2517_v12 = vmul.f32 %v10169_v10, %v2509_v9 }
0x116a   :  { %v2516_v13 = vmul.f32 %v10169_v10, %v2508_v11  ;;  %v2525_v15 = vadd.f32 %v10170_v44, %v2517_v12 }
0x116c   :  { %v2524_v14 = vadd.f32 %v10170_v44, %v2516_v13 }
0x116e   :  { %11122 = vmatprep.mubr.msk.f32.mxu0 %vm170_vm1, %v2524_v14 }
0x116f   :  { %11123 = vmatmul.mubr.msk.f32.vlgmr.msra.gmra.mxu0 %vm170_vm1, %v2525_v15 }
0x1172   :  { %v11816_v16 = vpop.eup %11815 }
0x1173   :  { %v2511_v51 = vmul.f32 %v11816_v16, %v2479_v47 }
0x1174   :  { %v11818_v17 = vpop.eup %11817 }
0x1175   :  { %v2510_v18 = vmul.f32 %v11818_v17, %v2478_v37  ;;  %v2519_v19 = vmul.f32 %v10169_v10, %v2511_v51 }
0x1177   :  { %v2518_v23 = vmul.f32 %v10169_v10, %v2510_v18  ;;  %v2527_v30 = vadd.f32 %v10170_v44, %v2519_v19 }
0x1179   :  { %v2526_v26 = vadd.f32 %v10170_v44, %v2518_v23 }
0x117b   :  { %11125 = vmatprep.mubr.msk.f32.mxu0 %vm170_vm1, %v2526_v26 }
0x117c   :  { %11126 = vmatmul.mubr.msk.f32.gmra.mxu0 %vm170_vm1, %v2527_v30 }
0x122f   :  { %v11124_v24 = vpop.f32.mrf.mxu0 }
0x1230   :  { %v12614_v22 = vadd.f32 %v11124_v24, %v10171_v32 }
0x1231   :  { %v2610_v49 = vpop.f32.mrf.mxu0 }
0x1232   :  { %v12616_v21 = vadd.f32 %v10171_v32, %v2610_v49  ;;  %2637 = vrot.lane.b32.xlu0 %v12614_v22, %s12075_s24  ;;  %v12645_v27 = vmul.f32 0.35355338, %v12614_v22 }
0x1234   :  { %2635 = vrot.lane.b32.xlu1 %v12616_v21, %s12075_s24  ;;  %v12623_v53 = vmul.f32 0.35355338, %v12616_v21 }
0x1236   :  { %11132 = vmatprep.mubr.msk.f32.mxu0 %vm351_vm2, %v12623_v53 }
0x123c   :  { %v11127_v52 = vpop.f32.mrf.mxu0 }
0x123d   :  { %v12627_v59 = vadd.f32 %v11127_v52, %v10171_v32 }
0x123e   :  { %v2620_v29 = vpop.f32.mrf.mxu0 }
0x123f   :  { %v12629_v28 = vadd.f32 %v10171_v32, %v2620_v29  ;;  %2728 = vrot.lane.b32.xlu1 %v12627_v59, %s12075_s24  ;;  %v12654_v40 = vmul.f32 0.35355338, %v12627_v59 }
0x1241   :  { %v12634_v34 = vmul.f32 0.35355338, %v12629_v28 }
0x1243   :  { %2726 = vrot.lane.b32.xlu1 %v12629_v28, %s12075_s24  ;;  %11139 = vmatprep.mubr.msk.f32.mxu1 %vm351_vm2, %v12634_v34 }
0x12a4   :  { %v2638_v31 = vpop.permute.xlu0 %2637 }
0x12a5   :  { %11128 = vmatprep.subr.msk.mxu0 %vm351_vm2, %v2638_v31 }
0x12a6   :  { %v2636_v38 = vpop.permute.xlu1 %2635  ;;  %11129 = vmatpush3.xpose.msk.msra.mxu0 %vm351_vm2, %v2638_v31 }
0x12a7   :  { %11130 = vmatprep.subr.msk.mxu0 %vm351_vm2, %v2636_v38 }
0x12aa   :  { %11131 = vmatpush3.xpose.msk.msra.mxu0 %vm351_vm2, %v2636_v38 }
0x12ad   :  { %11133 = vmatmul.mubr.msk.f32.vlgmr.msra.gmra.mxu0 %vm351_vm2, %v12645_v27 }
0x12b1   :  { %v2729_v58 = vpop.permute.xlu1 %2728 }
0x12b2   :  { %11135 = vmatprep.subr.msk.mxu1 %vm351_vm2, %v2729_v58 }
0x12b3   :  { %11136 = vmatpush3.xpose.msk.msra.mxu1 %vm351_vm2, %v2729_v58 }
0x12b5   :  { %v2727_v39 = vpop.permute.xlu1 %2726 }
0x12b6   :  { %11137 = vmatprep.subr.msk.mxu1 %vm351_vm2, %v2727_v39 }
0x12b7   :  { %11138 = vmatpush3.xpose.msk.msra.mxu1 %vm351_vm2, %v2727_v39 }
0x12ba   :  { %11140 = vmatmul.mubr.msk.f32.vlgmr.msra.gmra.mxu1 %vm351_vm2, %v12654_v40 }
0x136d   :  { %v11134_v42 = vpop.f32.mrf.mxu0 }
0x136e   :  { %v2818_v46 = vsel %vm528_vm3, %v11134_v42, -inf }
0x136f   :  { %2819 = vmax.xlane.f32.xlu1 %v2818_v46  ;;  %v2715_v47 = vpop.f32.mrf.mxu0 }
0x1370   :  { %v2815_v48 = vsel %vm528_vm3, %v2715_v47, -inf }
0x1371   :  { %2816 = vmax.xlane.f32.xlu0 %v2815_v48 }
0x137a   :  { %v11141_v37 = vpop.f32.mrf.mxu1 }
0x137b   :  { %v2824_v50 = vsel %vm528_vm3, %v11141_v37, -inf }
0x137c   :  { %v2806_v41 = vpop.f32.mrf.mxu1 }
0x137d   :  { %v2821_v43 = vsel %vm528_vm3, %v2806_v41, -inf }
0x137e   :  { %2822 = vmax.xlane.f32.xlu0 %v2821_v43 }
0x1380   :  { %2859 = vrot.lane.b32.xlu1 %v12616_v21, %s12076_s25 }
0x1382   :  { %2825 = vmax.xlane.f32.xlu0 %v2824_v50 }
0x1384   :  { %2948 = vrot.lane.b32.xlu1 %v12627_v59, %s12076_s25 }
0x1388   :  { %3039 = vrot.lane.b32.xlu1 %v12614_v22, %s12077_s26 }
0x138c   :  { %3037 = vrot.lane.b32.xlu1 %v12616_v21, %s12077_s26 }
0x1390   :  { %3033 = vrot.lane.b32.xlu1 %v12623_v53, %s12078_s27 }
0x1398   :  { %2861 = vrot.lane.b32.xlu0 %v12614_v22, %s12076_s25 }
0x139c   :  { %2946 = vrot.lane.b32.xlu0 %v12629_v28, %s12076_s25 }
0x13a0   :  { %3130 = vrot.lane.b32.xlu0 %v12627_v59, %s12077_s26 }
0x13f8   :  { %v2820_v54 = vpop.xlane.xlu1 %2819 }
0x13f9   :  { %v2828_v55 = vsub.f32 %v11134_v42, %v2820_v54 }
0x13fa   :  { %v2817_v56 = vpop.xlane.xlu0 %2816 }
0x13fb   :  { %v2833_v57 = vmul.f32 1.442695, %v2828_v55  ;;  %v2827_v60 = vsub.f32 %v2715_v47, %v2817_v56 }
0x13fc   :  { %v2860_v61 = vpop.permute.xlu1 %2859 }
0x13fd   :  { %11819 = vpow2.f32 %v2833_v57  ;;  %v2831_v62 = vmul.f32 1.442695, %v2827_v60 }
0x13ff   :  { %11821 = vpow2.f32 %v2831_v62 }
0x1400   :  { %v2949_v63 = vpop.permute.xlu1 %2948 }
0x1404   :  { %v3040_v0 = vpop.permute.xlu1 %3039 }
0x1405   :  { %11156 = vmatprep.subr.msk.mxu1 %vm351_vm2, %v3040_v0 }
0x1406   :  { %11157 = vmatpush3.xpose.msk.msra.mxu1 %vm351_vm2, %v3040_v0 }
0x1407   :  { %v2823_v1 = vpop.xlane.xlu0 %2822 }
0x1408   :  { %v2829_v2 = vsub.f32 %v2806_v41, %v2823_v1  ;;  %v3038_v3 = vpop.permute.xlu1 %3037 }
0x1409   :  { %11158 = vmatprep.subr.msk.mxu1 %vm351_vm2, %v3038_v3 }
0x140a   :  { %v11820_v4 = vpop.eup %11819  ;;  %v2835_v5 = vmul.f32 1.442695, %v2829_v2  ;;  %11159 = vmatpush3.xpose.msk.msra.mxu1 %vm351_vm2, %v3038_v3 }
0x140b   :  { %v2826_v6 = vpop.xlane.xlu0 %2825  ;;  %v2842_v7 = vsel %vm528_vm3, %v11820_v4, 0.0 }
0x140c   :  { %v11822_v33 = vpop.eup %11821  ;;  %11823 = vpow2.f32 %v2835_v5  ;;  %v2830_v8 = vsub.f32 %v11141_v37, %v2826_v6  ;;  %2843 = vadd.xlane.f32.xlu1 %v2842_v7  ;;  %v3034_v9 = vpop.permute.xlu1 %3033 }
0x140d   :  { %11160 = vmatprep.mubr.msk.f32.mxu1 %vm351_vm2, %v3034_v9  ;;  %v2839_v10 = vsel %vm528_vm3, %v11822_v33, 0.0 }
0x140e   :  { %v2837_v45 = vmul.f32 1.442695, %v2830_v8  ;;  %2840 = vadd.xlane.f32.xlu0 %v2839_v10 }
0x140f   :  { %v2862_v11 = vpop.permute.xlu0 %2861 }
0x1410   :  { %11825 = vpow2.f32 %v2837_v45  ;;  %11142 = vmatprep.subr.mxu0 %v2862_v11 }
0x1411   :  { %11143 = vmatpush3.msra.mxu0 %v2862_v11 }
0x1412   :  { %11144 = vmatprep.subr.mxu0 %v2860_v61 }
0x1413   :  { %11145 = vmatpush3.msra.mxu0 %v2860_v61  ;;  %v2947_v15 = vpop.permute.xlu0 %2946 }
0x1414   :  { %11149 = vmatprep.subr.mxu0 %v2949_v63 }
0x1417   :  { %v3131_v16 = vpop.permute.xlu0 %3130 }
0x1419   :  { %v11824_v12 = vpop.eup %11823 }
0x141a   :  { %v2845_v44 = vsel %vm528_vm3, %v11824_v12, 0.0 }
0x141b   :  { %2846 = vadd.xlane.f32.xlu0 %v2845_v44 }
0x141d   :  { %v11826_v13 = vpop.eup %11825 }
0x141e   :  { %v2848_v14 = vsel %vm528_vm3, %v11826_v13, 0.0 }
0x141f   :  { %2849 = vadd.xlane.f32.xlu1 %v2848_v14 }
0x1430   :  { %3128 = vrot.lane.b32.xlu1 %v12629_v28, %s12077_s26 }
0x1431   :  { %3035 = vrot.lane.b32.xlu0 %v12645_v27, %s12078_s27 }
0x1434   :  { %3126 = vrot.lane.b32.xlu1 %v12654_v40, %s12078_s27 }
0x1435   :  { %3124 = vrot.lane.b32.xlu0 %v12634_v34, %s12078_s27 }
0x1495   :  { %v2844_v51 = vpop.xlane.xlu1 %2843 }
0x1496   :  { %11827 = vrcp.f32 %v2844_v51 }
0x1497   :  { %v2841_v17 = vpop.xlane.xlu0 %2840 }
0x1498   :  { %11829 = vrcp.f32 %v2841_v17 }
0x14a3   :  { %v11828_v18 = vpop.eup %11827 }
0x14a4   :  { %v2847_v19 = vpop.xlane.xlu0 %2846  ;;  %v2854_v30 = vmul.f32 %v11828_v18, %v11820_v4 }
0x14a5   :  { %v11830_v23 = vpop.eup %11829  ;;  %11831 = vrcp.f32 %v2847_v19 }
0x14a6   :  { %v2852_v26 = vmul.f32 %v11830_v23, %v11822_v33 }
0x14a8   :  { %v2850_v32 = vpop.xlane.xlu1 %2849  ;;  %11146 = vmatprep.mubr.msk.f32.mxu0 %vm528_vm3, %v2852_v26  ;;  %v3036_v24 = vpop.permute.xlu0 %3035 }
0x14a9   :  { %11833 = vrcp.f32 %v2850_v32  ;;  %11147 = vmatmul.mubr.msk.f32.vlgmr.msra.gmra.mxu0 %vm528_vm3, %v2854_v30  ;;  %11161 = vmatmul.mubr.msk.f32.vlgmr.msra.gmra.mxu1 %vm351_vm2, %v3036_v24 }
0x14aa   :  { %11150 = vmatpush3.msra.mxu0 %v2949_v63 }
0x14ab   :  { %11151 = vmatprep.subr.mxu0 %v2947_v15 }
0x14ac   :  { %11152 = vmatpush3.msra.mxu0 %v2947_v15  ;;  %v3125_v38 = vpop.permute.xlu0 %3124  ;;  %v3129_v58 = vpop.permute.xlu1 %3128 }
0x14ad   :  { %11163 = vmatprep.subr.msk.mxu0 %vm351_vm2, %v3131_v16 }
0x14b0   :  { %v3127_v39 = vpop.permute.xlu1 %3126 }
0x14b2   :  { %v11832_v49 = vpop.eup %11831 }
0x14b3   :  { %v2856_v52 = vmul.f32 %v11832_v49, %v11824_v12 }
0x14b5   :  { %11153 = vmatprep.mubr.msk.f32.mxu0 %vm528_vm3, %v2856_v52 }
0x14b6   :  { %v11834_v29 = vpop.eup %11833 }
0x14b7   :  { %v2858_v31 = vmul.f32 %v11834_v29, %v11826_v13 }
0x14b9   :  { %11154 = vmatmul.mubr.msk.f32.vlgmr.msra.gmra.mxu0 %vm528_vm3, %v2858_v31 }
0x14ba   :  { %11164 = vmatpush3.xpose.msk.msra.mxu0 %vm351_vm2, %v3131_v16  ;;  %11167 = vmatprep.mubr.msk.f32.mxu0 %vm351_vm2, %v3125_v38 }
0x14bb   :  { %11165 = vmatprep.subr.msk.mxu0 %vm351_vm2, %v3129_v58 }
0x14be   :  { %11166 = vmatpush3.xpose.msk.msra.mxu0 %vm351_vm2, %v3129_v58 }
0x14c1   :  { %11168 = vmatmul.mubr.msk.f32.vlgmr.msra.gmra.mxu0 %vm351_vm2, %v3127_v39 }
0x1569   :  { %v11162_v42 = vpop.f32.mrf.mxu1  ;;  %v12708_v37 = vpop.f32.mrf.mxu0 }
0x156a   :  { %v3218_v46 = vsel %vm528_vm3, %v11162_v42, -inf }
0x156b   :  { %3219 = vmax.xlane.f32.xlu1 %v3218_v46  ;;  %v3115_v47 = vpop.f32.mrf.mxu1  ;;  %v12710_v41 = vpop.f32.mrf.mxu0 }
0x156c   :  { %v3215_v48 = vsel %vm528_vm3, %v3115_v47, -inf }
0x156d   :  { %3216 = vmax.xlane.f32.xlu0 %v3215_v48 }
0x1579   :  { %v12712_v43 = vpop.f32.mrf.mxu0 }
0x157b   :  { %v12714_v50 = vpop.f32.mrf.mxu0 }
0x1581   :  { %v11169_v54 = vpop.f32.mrf.mxu0 }
0x1582   :  { %v3224_v57 = vsel %vm528_vm3, %v11169_v54, -inf }
0x1583   :  { %v3206_v55 = vpop.f32.mrf.mxu0 }
0x1584   :  { %v3221_v56 = vsel %vm528_vm3, %v3206_v55, -inf }
0x1585   :  { %3222 = vmax.xlane.f32.xlu0 %v3221_v56 }
0x1589   :  { %3225 = vmax.xlane.f32.xlu0 %v3224_v57 }
0x15f4   :  { %v3220_v60 = vpop.xlane.xlu1 %3219 }
0x15f5   :  { %v3228_v61 = vsub.f32 %v11162_v42, %v3220_v60 }
0x15f6   :  { %v3217_v62 = vpop.xlane.xlu0 %3216 }
0x15f7   :  { %v3233_v63 = vmul.f32 1.442695, %v3228_v61  ;;  %v3227_v0 = vsub.f32 %v3115_v47, %v3217_v62 }
0x15f9   :  { %11835 = vpow2.f32 %v3233_v63  ;;  %v3231_v1 = vmul.f32 1.442695, %v3227_v0 }
0x15fb   :  { %11837 = vpow2.f32 %v3231_v1 }
0x1606   :  { %v11836_v2 = vpop.eup %11835 }
0x1607   :  { %v3242_v3 = vsel %vm528_vm3, %v11836_v2, 0.0 }
0x1608   :  { %v11838_v4 = vpop.eup %11837  ;;  %3243 = vadd.xlane.f32.xlu1 %v3242_v3 }
0x1609   :  { %v3239_v5 = vsel %vm528_vm3, %v11838_v4, 0.0 }
0x160a   :  { %3240 = vadd.xlane.f32.xlu0 %v3239_v5 }
0x160e   :  { %v3223_v6 = vpop.xlane.xlu0 %3222 }
0x160f   :  { %v3229_v7 = vsub.f32 %v3206_v55, %v3223_v6 }
0x1611   :  { %v3235_v8 = vmul.f32 1.442695, %v3229_v7 }
0x1612   :  { %v3226_v33 = vpop.xlane.xlu0 %3225 }
0x1613   :  { %v3230_v9 = vsub.f32 %v11169_v54, %v3226_v33  ;;  %11839 = vpow2.f32 %v3235_v8 }
0x1615   :  { %v3237_v10 = vmul.f32 1.442695, %v3230_v9 }
0x1617   :  { %11841 = vpow2.f32 %v3237_v10 }
0x1619   :  { %3259 = vrot.lane.b32.xlu1 %v12616_v21, %s12079_s28 }
0x161d   :  { %3348 = vrot.lane.b32.xlu1 %v12627_v59, %s12079_s28 }
0x1620   :  { %3261 = vrot.lane.b32.xlu0 %v12614_v22, %s12079_s28  ;;  %v11840_v45 = vpop.eup %11839 }
0x1621   :  { %3439 = vrot.lane.b32.xlu1 %v12614_v22, %s12080_s29  ;;  %v3245_v11 = vsel %vm528_vm3, %v11840_v45, 0.0 }
0x1624   :  { %3346 = vrot.lane.b32.xlu0 %v12629_v28, %s12079_s28  ;;  %v11842_v12 = vpop.eup %11841 }
0x1625   :  { %3437 = vrot.lane.b32.xlu1 %v12616_v21, %s12080_s29  ;;  %v3248_v44 = vsel %vm528_vm3, %v11842_v12, 0.0 }
0x1628   :  { %3530 = vrot.lane.b32.xlu0 %v12627_v59, %s12080_s29 }
0x1629   :  { %3433 = vrot.lane.b32.xlu1 %v12623_v53, %s12081_s30 }
0x1647   :  { %3246 = vadd.xlane.f32.xlu0 %v3245_v11 }
0x164d   :  { %3249 = vadd.xlane.f32.xlu1 %v3248_v44 }
0x165d   :  { %3435 = vrot.lane.b32.xlu0 %v12645_v27, %s12081_s30 }
0x165e   :  { %3528 = vrot.lane.b32.xlu1 %v12629_v28, %s12080_s29 }
0x1661   :  { %3524 = vrot.lane.b32.xlu0 %v12634_v34, %s12081_s30 }
0x1662   :  { %3526 = vrot.lane.b32.xlu1 %v12654_v40, %s12081_s30 }
0x1691   :  { %v3244_v13 = vpop.xlane.xlu1 %3243 }
0x1692   :  { %11843 = vrcp.f32 %v3244_v13 }
0x1693   :  { %v3241_v14 = vpop.xlane.xlu0 %3240 }
0x1694   :  { %11845 = vrcp.f32 %v3241_v14 }
0x1695   :  { %v3260_v15 = vpop.permute.xlu1 %3259 }
0x1697   :  { %v3262_v16 = vpop.permute.xlu0 %3261 }
0x1698   :  { %11170 = vmatprep.subr.mxu1 %v3262_v16 }
0x1699   :  { %v3349_v51 = vpop.permute.xlu1 %3348  ;;  %11171 = vmatpush3.msra.mxu1 %v3262_v16 }
0x169a   :  { %11172 = vmatprep.subr.mxu1 %v3260_v15  ;;  %11177 = vmatprep.subr.mxu0 %v3349_v51 }
0x169b   :  { %11173 = vmatpush3.msra.mxu1 %v3260_v15  ;;  %11178 = vmatpush3.msra.mxu0 %v3349_v51  ;;  %v3347_v17 = vpop.permute.xlu0 %3346 }
0x169c   :  { %11179 = vmatprep.subr.mxu0 %v3347_v17 }
0x169d   :  { %v3440_v18 = vpop.permute.xlu1 %3439  ;;  %11180 = vmatpush3.msra.mxu0 %v3347_v17 }
0x169e   :  { %11184 = vmatprep.subr.msk.mxu1 %vm351_vm2, %v3440_v18 }
0x169f   :  { %v3531_v19 = vpop.permute.xlu0 %3530  ;;  %v11844_v23 = vpop.eup %11843 }
0x16a0   :  { %11191 = vmatprep.subr.msk.mxu0 %vm351_vm2, %v3531_v19  ;;  %v3254_v24 = vmul.f32 %v11844_v23, %v11836_v2 }
0x16a1   :  { %v11846_v26 = vpop.eup %11845  ;;  %v3438_v30 = vpop.permute.xlu1 %3437 }
0x16a2   :  { %v3252_v32 = vmul.f32 %v11846_v26, %v11838_v4 }
0x16a4   :  { %11174 = vmatprep.mubr.msk.f32.mxu1 %vm528_vm3, %v3252_v32 }
0x16a5   :  { %v3434_v49 = vpop.permute.xlu1 %3433  ;;  %11175 = vmatmul.mubr.msk.f32.vlgmr.msra.gmra.mxu1 %vm528_vm3, %v3254_v24 }
0x16a6   :  { %11185 = vmatpush3.xpose.msk.msra.mxu1 %vm351_vm2, %v3440_v18  ;;  %11188 = vmatprep.mubr.msk.f32.mxu1 %vm351_vm2, %v3434_v49 }
0x16a7   :  { %11186 = vmatprep.subr.msk.mxu1 %vm351_vm2, %v3438_v30 }
0x16aa   :  { %11187 = vmatpush3.xpose.msk.msra.mxu1 %vm351_vm2, %v3438_v30 }
0x16d0   :  { %v3247_v52 = vpop.xlane.xlu0 %3246 }
0x16d1   :  { %11847 = vrcp.f32 %v3247_v52 }
0x16d4   :  { %v3436_v29 = vpop.permute.xlu0 %3435 }
0x16d5   :  { %11189 = vmatmul.mubr.msk.f32.vlgmr.msra.gmra.mxu1 %vm351_vm2, %v3436_v29 }
0x16d6   :  { %v3250_v31 = vpop.xlane.xlu1 %3249 }
0x16d7   :  { %11849 = vrcp.f32 %v3250_v31 }
0x16d8   :  { %v3525_v46 = vpop.permute.xlu0 %3524 }
0x16da   :  { %v3529_v47 = vpop.permute.xlu1 %3528 }
0x16de   :  { %v11848_v38 = vpop.eup %11847  ;;  %v3527_v48 = vpop.permute.xlu1 %3526 }
0x16df   :  { %v3256_v58 = vmul.f32 %v11848_v38, %v11840_v45 }
0x16e1   :  { %11181 = vmatprep.mubr.msk.f32.mxu0 %vm528_vm3, %v3256_v58 }
0x16e4   :  { %v11850_v39 = vpop.eup %11849 }
0x16e5   :  { %v3258_v42 = vmul.f32 %v11850_v39, %v11842_v12 }
0x16e7   :  { %11182 = vmatmul.mubr.msk.f32.vlgmr.msra.gmra.mxu0 %vm528_vm3, %v3258_v42 }
0x16e8   :  { %11192 = vmatpush3.xpose.msk.msra.mxu0 %vm351_vm2, %v3531_v19  ;;  %11195 = vmatprep.mubr.msk.f32.mxu0 %vm351_vm2, %v3525_v46 }
0x16e9   :  { %11193 = vmatprep.subr.msk.mxu0 %vm351_vm2, %v3529_v47 }
0x16ec   :  { %11194 = vmatpush3.xpose.msk.msra.mxu0 %vm351_vm2, %v3529_v47 }
0x16ef   :  { %11196 = vmatmul.mubr.msk.f32.vlgmr.msra.gmra.mxu0 %vm351_vm2, %v3527_v48 }
0x1765   :  { %v12762_v54 = vpop.f32.mrf.mxu1 }
0x1767   :  { %v12764_v55 = vpop.f32.mrf.mxu1 }
0x1795   :  { %v11190_v56 = vpop.f32.mrf.mxu1 }
0x1796   :  { %v3618_v57 = vsel %vm528_vm3, %v11190_v56, -inf }
0x1797   :  { %3619 = vmax.xlane.f32.xlu1 %v3618_v57  ;;  %v3515_v60 = vpop.f32.mrf.mxu1 }
0x1798   :  { %v3615_v61 = vsel %vm528_vm3, %v3515_v60, -inf }
0x1799   :  { %3616 = vmax.xlane.f32.xlu0 %v3615_v61 }
0x17a7   :  { %v12768_v62 = vpop.f32.mrf.mxu0 }
0x17a9   :  { %v12770_v63 = vpop.f32.mrf.mxu0 }
0x17af   :  { %v11197_v0 = vpop.f32.mrf.mxu0 }
0x17b0   :  { %v3624_v3 = vsel %vm528_vm3, %v11197_v0, -inf }
0x17b1   :  { %v3606_v1 = vpop.f32.mrf.mxu0 }
0x17b2   :  { %v3621_v2 = vsel %vm528_vm3, %v3606_v1, -inf }
0x17b3   :  { %3622 = vmax.xlane.f32.xlu0 %v3621_v2 }
0x17b7   :  { %3625 = vmax.xlane.f32.xlu0 %v3624_v3 }
0x1820   :  { %v3620_v4 = vpop.xlane.xlu1 %3619 }
0x1821   :  { %v3628_v5 = vsub.f32 %v11190_v56, %v3620_v4 }
0x1822   :  { %v3617_v6 = vpop.xlane.xlu0 %3616 }
0x1823   :  { %v3633_v7 = vmul.f32 1.442695, %v3628_v5  ;;  %v3627_v33 = vsub.f32 %v3515_v60, %v3617_v6 }
0x1825   :  { %11851 = vpow2.f32 %v3633_v7  ;;  %v3631_v8 = vmul.f32 1.442695, %v3627_v33 }
0x1827   :  { %11853 = vpow2.f32 %v3631_v8 }
0x1832   :  { %v11852_v9 = vpop.eup %11851 }
0x1833   :  { %v3642_v10 = vsel %vm528_vm3, %v11852_v9, 0.0 }
0x1834   :  { %v11854_v45 = vpop.eup %11853  ;;  %3643 = vadd.xlane.f32.xlu1 %v3642_v10 }
0x1835   :  { %v3639_v11 = vsel %vm528_vm3, %v11854_v45, 0.0 }
0x1836   :  { %3640 = vadd.xlane.f32.xlu0 %v3639_v11 }
0x183c   :  { %v3623_v12 = vpop.xlane.xlu0 %3622 }
0x183d   :  { %v3629_v44 = vsub.f32 %v3606_v1, %v3623_v12 }
0x183f   :  { %v3635_v14 = vmul.f32 1.442695, %v3629_v44 }
0x1840   :  { %v3626_v13 = vpop.xlane.xlu0 %3625 }
0x1841   :  { %v3630_v15 = vsub.f32 %v11197_v0, %v3626_v13  ;;  %11855 = vpow2.f32 %v3635_v14 }
0x1843   :  { %v3637_v16 = vmul.f32 1.442695, %v3630_v15 }
0x1845   :  { %3659 = vrot.lane.b32.xlu1 %v12616_v21, %s12082_s4  ;;  %11857 = vpow2.f32 %v3637_v16 }
0x1849   :  { %3748 = vrot.lane.b32.xlu1 %v12627_v59, %s12082_s4 }
0x184c   :  { %3661 = vrot.lane.b32.xlu0 %v12614_v22, %s12082_s4 }
0x184d   :  { %3839 = vrot.lane.b32.xlu1 %v12614_v22, %s12083_s5 }
0x184e   :  { %v11856_v51 = vpop.eup %11855 }
0x184f   :  { %v3645_v17 = vsel %vm528_vm3, %v11856_v51, 0.0 }
0x1850   :  { %3746 = vrot.lane.b32.xlu0 %v12629_v28, %s12082_s4 }
0x1851   :  { %3837 = vrot.lane.b32.xlu1 %v12616_v21, %s12083_s5 }
0x1852   :  { %v11858_v18 = vpop.eup %11857 }
0x1853   :  { %v3648_v19 = vsel %vm528_vm3, %v11858_v18, 0.0 }
0x1854   :  { %3930 = vrot.lane.b32.xlu0 %v12627_v59, %s12083_s5 }
0x1855   :  { %3833 = vrot.lane.b32.xlu1 %v12623_v53, %s12084_s6 }
0x1873   :  { %3646 = vadd.xlane.f32.xlu0 %v3645_v17 }
0x1879   :  { %3649 = vadd.xlane.f32.xlu1 %v3648_v19 }
0x1889   :  { %3835 = vrot.lane.b32.xlu0 %v12645_v27, %s12084_s6 }
0x188a   :  { %3928 = vrot.lane.b32.xlu1 %v12629_v28, %s12083_s5 }
0x188d   :  { %3924 = vrot.lane.b32.xlu0 %v12634_v34, %s12084_s6 }
0x188e   :  { %3926 = vrot.lane.b32.xlu1 %v12654_v40, %s12084_s6 }
0x18bd   :  { %v3644_v53 = vpop.xlane.xlu1 %3643 }
0x18be   :  { %11859 = vrcp.f32 %v3644_v53 }
0x18bf   :  { %v3641_v23 = vpop.xlane.xlu0 %3640 }
0x18c0   :  { %11861 = vrcp.f32 %v3641_v23 }
0x18c1   :  { %v3660_v26 = vpop.permute.xlu1 %3659 }
0x18c3   :  { %v3662_v30 = vpop.permute.xlu0 %3661 }
0x18c4   :  { %11198 = vmatprep.subr.mxu1 %v3662_v30 }
0x18c5   :  { %v3749_v32 = vpop.permute.xlu1 %3748  ;;  %11199 = vmatpush3.msra.mxu1 %v3662_v30 }
0x18c6   :  { %11200 = vmatprep.subr.mxu1 %v3660_v26  ;;  %11205 = vmatprep.subr.mxu0 %v3749_v32 }
0x18c7   :  { %11201 = vmatpush3.msra.mxu1 %v3660_v26  ;;  %11206 = vmatpush3.msra.mxu0 %v3749_v32  ;;  %v3747_v27 = vpop.permute.xlu0 %3746 }
0x18c8   :  { %11207 = vmatprep.subr.mxu0 %v3747_v27 }
0x18c9   :  { %v3840_v24 = vpop.permute.xlu1 %3839  ;;  %11208 = vmatpush3.msra.mxu0 %v3747_v27 }
0x18ca   :  { %11212 = vmatprep.subr.msk.mxu1 %vm351_vm2, %v3840_v24 }
0x18cb   :  { %v3931_v34 = vpop.permute.xlu0 %3930  ;;  %v11860_v40 = vpop.eup %11859 }
0x18cc   :  { %11219 = vmatprep.subr.msk.mxu0 %vm351_vm2, %v3931_v34  ;;  %v3654_v31 = vmul.f32 %v11860_v40, %v11852_v9 }
0x18cd   :  { %v11862_v49 = vpop.eup %11861  ;;  %v3838_v52 = vpop.permute.xlu1 %3837 }
0x18ce   :  { %v3652_v29 = vmul.f32 %v11862_v49, %v11854_v45 }
0x18d0   :  { %11202 = vmatprep.mubr.msk.f32.mxu1 %vm528_vm3, %v3652_v29 }
0x18d1   :  { %v3834_v38 = vpop.permute.xlu1 %3833  ;;  %11203 = vmatmul.mubr.msk.f32.vlgmr.msra.gmra.mxu1 %vm528_vm3, %v3654_v31 }
0x18d2   :  { %11213 = vmatpush3.xpose.msk.msra.mxu1 %vm351_vm2, %v3840_v24  ;;  %11216 = vmatprep.mubr.msk.f32.mxu1 %vm351_vm2, %v3834_v38 }
0x18d3   :  { %11214 = vmatprep.subr.msk.mxu1 %vm351_vm2, %v3838_v52 }
0x18d6   :  { %11215 = vmatpush3.xpose.msk.msra.mxu1 %vm351_vm2, %v3838_v52 }
0x18fc   :  { %v3647_v58 = vpop.xlane.xlu0 %3646 }
0x18fd   :  { %11863 = vrcp.f32 %v3647_v58 }
0x1900   :  { %v3836_v39 = vpop.permute.xlu0 %3835 }
0x1901   :  { %11217 = vmatmul.mubr.msk.f32.vlgmr.msra.gmra.mxu1 %vm351_vm2, %v3836_v39 }
0x1902   :  { %v3650_v42 = vpop.xlane.xlu1 %3649 }
0x1903   :  { %11865 = vrcp.f32 %v3650_v42 }
0x1904   :  { %v3925_v57 = vpop.permute.xlu0 %3924 }
0x1906   :  { %v3929_v60 = vpop.permute.xlu1 %3928 }
0x190a   :  { %v11864_v46 = vpop.eup %11863  ;;  %v3927_v61 = vpop.permute.xlu1 %3926 }
0x190b   :  { %v3656_v47 = vmul.f32 %v11864_v46, %v11856_v51 }
0x190d   :  { %11209 = vmatprep.mubr.msk.f32.mxu0 %vm528_vm3, %v3656_v47  ;;  %v10156_v47 = vld [vmem:[%s14000_s1 + $0x198] sm:$0xff] }
0x1910   :  { %v11866_v48 = vpop.eup %11865 }
0x1911   :  { %v3658_v56 = vmul.f32 %v11866_v48, %v11858_v18  ;;  %v10155_v48 = vld [vmem:[%s14000_s1 + $0x190] sm:$0xff] }
0x1913   :  { %11210 = vmatmul.mubr.msk.f32.vlgmr.msra.gmra.mxu0 %vm528_vm3, %v3658_v56  ;;  %v10154_v56 = vld [vmem:[%s14000_s1 + $0x188] sm:$0xff] }
0x1914   :  { %11220 = vmatpush3.xpose.msk.msra.mxu0 %vm351_vm2, %v3931_v34  ;;  %11223 = vmatprep.mubr.msk.f32.mxu0 %vm351_vm2, %v3925_v57  ;;  %v10153_v57 = vld [vmem:[%s14000_s1 + $0x180] sm:$0xff] }
0x1915   :  { %11221 = vmatprep.subr.msk.mxu0 %vm351_vm2, %v3929_v60 }
0x1918   :  { %11222 = vmatpush3.xpose.msk.msra.mxu0 %vm351_vm2, %v3929_v60 }
0x191b   :  { %11224 = vmatmul.mubr.msk.f32.vlgmr.msra.gmra.mxu0 %vm351_vm2, %v3927_v61 }
0x1991   :  { %v11204_v0 = vpop.f32.mrf.mxu1 }
0x1993   :  { %v3737_v1 = vpop.f32.mrf.mxu1 }
0x19c1   :  { %v11218_v2 = vpop.f32.mrf.mxu1 }
0x19c2   :  { %v4018_v3 = vsel %vm528_vm3, %v11218_v2, -inf }
0x19c3   :  { %4019 = vmax.xlane.f32.xlu1 %v4018_v3  ;;  %v3915_v4 = vpop.f32.mrf.mxu1 }
0x19c4   :  { %v4015_v5 = vsel %vm528_vm3, %v3915_v4, -inf }
0x19c5   :  { %4016 = vmax.xlane.f32.xlu0 %v4015_v5 }
0x19d3   :  { %v12820_v6 = vpop.f32.mrf.mxu0 }
0x19d5   :  { %v12822_v7 = vpop.f32.mrf.mxu0 }
0x19db   :  { %v11225_v33 = vpop.f32.mrf.mxu0 }
0x19dc   :  { %v4024_v10 = vsel %vm528_vm3, %v11225_v33, -inf }
0x19dd   :  { %v4006_v8 = vpop.f32.mrf.mxu0 }
0x19de   :  { %v4021_v9 = vsel %vm528_vm3, %v4006_v8, -inf }
0x19df   :  { %4022 = vmax.xlane.f32.xlu0 %v4021_v9 }
0x19e3   :  { %4025 = vmax.xlane.f32.xlu0 %v4024_v10 }
0x1a4c   :  { %v4020_v45 = vpop.xlane.xlu1 %4019 }
0x1a4d   :  { %v4028_v11 = vsub.f32 %v11218_v2, %v4020_v45 }
0x1a4e   :  { %v4017_v12 = vpop.xlane.xlu0 %4016 }
0x1a4f   :  { %v4033_v44 = vmul.f32 1.442695, %v4028_v11  ;;  %v4027_v13 = vsub.f32 %v3915_v4, %v4017_v12 }
0x1a51   :  { %11867 = vpow2.f32 %v4033_v44  ;;  %v4031_v14 = vmul.f32 1.442695, %v4027_v13 }
0x1a53   :  { %11869 = vpow2.f32 %v4031_v14 }
0x1a5e   :  { %v11868_v15 = vpop.eup %11867 }
0x1a5f   :  { %v4042_v16 = vsel %vm528_vm3, %v11868_v15, 0.0 }
0x1a60   :  { %v11870_v51 = vpop.eup %11869  ;;  %4043 = vadd.xlane.f32.xlu1 %v4042_v16 }
0x1a61   :  { %v4039_v17 = vsel %vm528_vm3, %v11870_v51, 0.0 }
0x1a62   :  { %4040 = vadd.xlane.f32.xlu0 %v4039_v17 }
0x1a68   :  { %v4023_v18 = vpop.xlane.xlu0 %4022 }
0x1a69   :  { %v4029_v19 = vsub.f32 %v4006_v8, %v4023_v18 }
0x1a6b   :  { %v4035_v53 = vmul.f32 1.442695, %v4029_v19 }
0x1a6c   :  { %v4026_v23 = vpop.xlane.xlu0 %4025 }
0x1a6d   :  { %11871 = vpow2.f32 %v4035_v53  ;;  %v4030_v26 = vsub.f32 %v11225_v33, %v4026_v23 }
0x1a6f   :  { %v4037_v30 = vmul.f32 1.442695, %v4030_v26 }
0x1a71   :  { %11873 = vpow2.f32 %v4037_v30 }
0x1a7a   :  { %v11872_v32 = vpop.eup %11871 }
0x1a7b   :  { %v4045_v27 = vsel %vm528_vm3, %v11872_v32, 0.0 }
0x1a7c   :  { %4046 = vadd.xlane.f32.xlu0 %v4045_v27 }
0x1a7e   :  { %v11874_v24 = vpop.eup %11873 }
0x1a7f   :  { %v4048_v34 = vsel %vm528_vm3, %v11874_v24, 0.0 }
0x1a80   :  { %4049 = vadd.xlane.f32.xlu1 %v4048_v34 }
0x1a91   :  { %4059 = vrot.lane.b32.xlu1 %v12616_v21, %s12085_s7 }
0x1a92   :  { %4061 = vrot.lane.b32.xlu0 %v12614_v22, %s12085_s7 }
0x1a95   :  { %4148 = vrot.lane.b32.xlu1 %v12627_v59, %s12085_s7 }
0x1a96   :  { %4237 = vrot.lane.b32.xlu0 %v12764_v55, %s12086_s8 }
0x1a99   :  { %4146 = vrot.lane.b32.xlu1 %v12629_v28, %s12085_s7 }
0x1a9a   :  { %4253 = vrot.lane.b32.xlu0 %v3737_v1, %s12087_s0 }
0x1a9d   :  { %4239 = vrot.lane.b32.xlu1 %v12762_v54, %s12086_s8 }
0x1aa1   :  { %4255 = vrot.lane.b32.xlu1 %v11204_v0, %s12087_s0 }
0x1ae9   :  { %v4044_v49 = vpop.xlane.xlu1 %4043 }
0x1aeb   :  { %v4041_v21 = vpop.xlane.xlu0 %4040 }
0x1aec   :  { %11875 = vrcp.f32 %v4041_v21 }
0x1aed   :  { %11877 = vrcp.f32 %v4044_v49 }
0x1af9   :  { %v11876_v40 = vpop.eup %11875 }
0x1afa   :  { %v4052_v22 = vmul.f32 %v11876_v40, %v11870_v51  ;;  %v11878_v28 = vpop.eup %11877 }
0x1afb   :  { %v4054_v54 = vmul.f32 %v11878_v28, %v11868_v15 }
0x1afc   :  { %11230 = vmatprep.mubr.msk.f32.mxu1 %vm528_vm3, %v4052_v22 }
0x1b05   :  { %v4047_v59 = vpop.xlane.xlu0 %4046 }
0x1b06   :  { %11879 = vrcp.f32 %v4047_v59 }
0x1b09   :  { %v4050_v55 = vpop.xlane.xlu1 %4049  ;;  %v4062_v52 = vpop.permute.xlu0 %4061 }
0x1b0a   :  { %11881 = vrcp.f32 %v4050_v55  ;;  %11226 = vmatprep.subr.mxu1 %v4062_v52 }
0x1b0b   :  { %11227 = vmatpush3.msra.mxu1 %v4062_v52 }
0x1b0d   :  { %v4060_v29 = vpop.permute.xlu1 %4059  ;;  %v4238_v3 = vpop.permute.xlu0 %4237 }
0x1b0e   :  { %11228 = vmatprep.subr.mxu1 %v4060_v29 }
0x1b0f   :  { %11229 = vmatpush3.msra.mxu1 %v4060_v29 }
0x1b10   :  { %11231 = vmatmul.mubr.msk.f32.vlgmr.msra.gmra.mxu1 %vm528_vm3, %v4054_v54  ;;  %11240 = vmatprep.subr.mxu1 %v10156_v47 }
0x1b11   :  { %v4149_v31 = vpop.permute.xlu1 %4148  ;;  %11241 = vmatpush3.msra.mxu1 %v10156_v47  ;;  %v4254_v5 = vpop.permute.xlu0 %4253 }
0x1b12   :  { %11233 = vmatprep.subr.mxu0 %v4149_v31  ;;  %11242 = vmatprep.subr.mxu1 %v10155_v48 }
0x1b13   :  { %v11880_v38 = vpop.eup %11879  ;;  %11234 = vmatpush3.msra.mxu0 %v4149_v31  ;;  %11243 = vmatpush3.msra.mxu1 %v10155_v48 }
0x1b14   :  { %v4056_v58 = vmul.f32 %v11880_v38, %v11872_v32  ;;  %11244 = vmatprep.subr.mxu1 %v10154_v56 }
0x1b15   :  { %v4147_v39 = vpop.permute.xlu1 %4146  ;;  %11245 = vmatpush3.msra.mxu1 %v10154_v56 }
0x1b16   :  { %11235 = vmatprep.subr.mxu0 %v4147_v39  ;;  %11237 = vmatprep.mubr.msk.f32.mxu0 %vm528_vm3, %v4056_v58 }
0x1b17   :  { %v11882_v42 = vpop.eup %11881  ;;  %11236 = vmatpush3.msra.mxu0 %v4147_v39  ;;  %11246 = vmatprep.subr.mxu1 %v10153_v57 }
0x1b18   :  { %v4058_v46 = vmul.f32 %v11882_v42, %v11874_v24  ;;  %11247 = vmatpush3.msra.mxu1 %v10153_v57 }
0x1b19   :  { %v4240_v2 = vpop.permute.xlu1 %4239 }
0x1b1a   :  { %11238 = vmatmul.mubr.msk.f32.vlgmr.msra.gmra.mxu0 %vm528_vm3, %v4058_v46 }
0x1b1d   :  { %v4256_v4 = vpop.permute.xlu1 %4255 }
0x1bd0   :  { %v11232_v60 = vpop.f32.mrf.mxu1 }
0x1bd1   :  { %4271 = vrot.lane.b32.xlu1 %v11232_v60, %s12088_s17 }
0x1bd2   :  { %v4137_v61 = vpop.f32.mrf.mxu1 }
0x1bd3   :  { %4269 = vrot.lane.b32.xlu0 %v4137_v61, %s12088_s17  ;;  %v10160_v61 = vld [vmem:[%s14000_s1 + $0x1d8] sm:$0xff] }
0x1bd4   :  { %11254 = vmatprep.subr.mxu0 %v10160_v61 }
0x1bd5   :  { %4243 = vrot.lane.b32.xlu1 %v12768_v62, %s12086_s8  ;;  %11255 = vmatpush3.msra.mxu0 %v10160_v61 }
0x1bd7   :  { %4241 = vrot.lane.b32.xlu0 %v12770_v63, %s12086_s8  ;;  %v4281_v63 = vsel %vm351_vm2, %v12710_v41, %v4238_v3 }
0x1bd8   :  { %v4285_v33 = vsel %vm528_vm3, %v4281_v63, %v4254_v5 }
0x1bd9   :  { %4259 = vrot.lane.b32.xlu1 %v12820_v6, %s12087_s0  ;;  %v4282_v6 = vsel %vm351_vm2, %v12708_v37, %v4240_v2  ;;  %v10157_v2 = vld [vmem:[%s14000_s1 + $0x1c0] sm:$0xff] }
0x1bda   :  { %v11239_v0 = vpop.f32.mrf.mxu0 }
0x1bdb   :  { %4257 = vrot.lane.b32.xlu0 %v12822_v7, %s12087_s0  ;;  %v4286_v7 = vsel %vm528_vm3, %v4282_v6, %v4256_v4 }
0x1bdc   :  { %v4224_v1 = vpop.f32.mrf.mxu0 }
0x1bdd   :  { %4275 = vrot.lane.b32.xlu1 %v11239_v0, %s12088_s17  ;;  %v10159_v0 = vld [vmem:[%s14000_s1 + $0x1d0] sm:$0xff] }
0x1bde   :  { %11256 = vmatprep.subr.mxu0 %v10159_v0 }
0x1bdf   :  { %4273 = vrot.lane.b32.xlu0 %v4224_v1, %s12088_s17  ;;  %11257 = vmatpush3.msra.mxu0 %v10159_v0  ;;  %v10158_v1 = vld [vmem:[%s14000_s1 + $0x1c8] sm:$0xff] }
0x1be0   :  { %11258 = vmatprep.subr.mxu0 %v10158_v1 }
0x1be1   :  { %11259 = vmatpush3.msra.mxu0 %v10158_v1 }
0x1be2   :  { %11260 = vmatprep.subr.mxu0 %v10157_v2 }
0x1be3   :  { %11261 = vmatpush3.msra.mxu0 %v10157_v2 }
0x1c43   :  { %v4272_v62 = vpop.permute.xlu1 %4271 }
0x1c44   :  { %v4290_v10 = vsel %vm2003_vm4, %v4286_v7, %v4272_v62 }
0x1c45   :  { %v4270_v8 = vpop.permute.xlu0 %4269 }
0x1c46   :  { %v4289_v9 = vsel %vm2003_vm4, %v4285_v33, %v4270_v8 }
0x1c47   :  { %v4244_v45 = vpop.permute.xlu1 %4243  ;;  %11248 = vmatprep.mubr.msk.f32.mxu1 %vm170_vm1, %v4289_v9 }
0x1c48   :  { %11249 = vmatmul.mubr.msk.f32.vlgmr.msra.gmra.mxu1 %vm170_vm1, %v4290_v10  ;;  %v4284_v37 = vsel %vm351_vm2, %v12712_v43, %v4244_v45 }
0x1c49   :  { %v4242_v11 = vpop.permute.xlu0 %4241 }
0x1c4a   :  { %v4283_v44 = vsel %vm351_vm2, %v12714_v50, %v4242_v11  ;;  %v10228_v50 = vld [vmem:[%s14002_s2 + $0xc] ss:$0 sm:$0xff]  ;;  %v10229_v11 = vld [vmem:[%s14002_s2 + $0xd] ss:$0 sm:$0xff] }
0x1c4b   :  { %v4260_v12 = vpop.permute.xlu1 %4259 }
0x1c4c   :  { %v4288_v16 = vsel %vm528_vm3, %v4284_v37, %v4260_v12 }
0x1c4d   :  { %v4258_v41 = vpop.permute.xlu0 %4257 }
0x1c4e   :  { %v4287_v14 = vsel %vm528_vm3, %v4283_v44, %v4258_v41 }
0x1c4f   :  { %v4276_v13 = vpop.permute.xlu1 %4275 }
0x1c50   :  { %v4292_v17 = vsel %vm2003_vm4, %v4288_v16, %v4276_v13 }
0x1c51   :  { %v4274_v15 = vpop.permute.xlu0 %4273 }
0x1c52   :  { %v4291_v51 = vsel %vm2003_vm4, %v4287_v14, %v4274_v15  ;;  %v10230_v14 = vld [vmem:[%s14002_s2 + $0xe] ss:$0 sm:$0xff] }
0x1c53   :  { %11251 = vmatprep.mubr.msk.f32.mxu1 %vm170_vm1, %v4291_v51 }
0x1c54   :  { %11252 = vmatmul.mubr.msk.f32.gmra.mxu1 %vm170_vm1, %v4292_v17 }
0x1d08   :  { %v11250_v18 = vpop.f32.mrf.mxu1 }
0x1d09   :  { %v4391_v43 = vadd.f32 %v11250_v18, %v12562_v20 }
0x1d0a   :  { %v4371_v19 = vpop.f32.mrf.mxu1 }
0x1d0b   :  { %v12896_v53 = vadd.f32 %v10228_v50, %v4391_v43  ;;  %v4390_v23 = vadd.f32 %v4371_v19, %v12565_v25 }
0x1d0d   :  { %v12899_v26 = vadd.f32 %v10228_v50, %v4390_v23  ;;  %v4405_v30 = vsel %vm170_vm1, %v12896_v53, 0.0 }
0x1d0e   :  { %4406 = vadd.xlane.f32.xlu1 %v4405_v30 }
0x1d0f   :  { %v4402_v32 = vsel %vm170_vm1, %v12899_v26, 0.0 }
0x1d10   :  { %4403 = vadd.xlane.f32.xlu0 %v4402_v32 }
0x1d14   :  { %v11253_v27 = vpop.f32.mrf.mxu1 }
0x1d15   :  { %v4393_v34 = vadd.f32 %v11253_v27, %v12572_v35  ;;  %v10168_v27 = vld [vmem:[%s14000_s1 + $0x238] sm:$0xff] }
0x1d16   :  { %v4381_v24 = vpop.f32.mrf.mxu1  ;;  %11268 = vmatprep.subr.mxu1 %v10168_v27 }
0x1d17   :  { %v4392_v20 = vadd.f32 %v4381_v24, %v12575_v36  ;;  %v12909_v40 = vadd.f32 %v10228_v50, %v4393_v34  ;;  %11269 = vmatpush3.msra.mxu1 %v10168_v27  ;;  %v10167_v24 = vld [vmem:[%s14000_s1 + $0x230] sm:$0xff]  ;;  %v10166_v34 = vld [vmem:[%s14000_s1 + $0x228] sm:$0xff] }
0x1d18   :  { %11270 = vmatprep.subr.mxu1 %v10167_v24  ;;  %v10251_v27 = vld [vmem:[%s14000_s1 + $0x2c8] sm:$0xff] }
0x1d19   :  { %v12907_v21 = vadd.f32 %v10228_v50, %v4392_v20  ;;  %v4411_v22 = vsel %vm170_vm1, %v12909_v40, 0.0  ;;  %11271 = vmatpush3.msra.mxu1 %v10167_v24  ;;  %v10165_v20 = vld [vmem:[%s14000_s1 + $0x220] sm:$0xff]  ;;  %v10252_v24 = vld [vmem:[%s14000_s1 + $0x2d0] sm:$0xff] }
0x1d1a   :  { %11272 = vmatprep.subr.mxu1 %v10166_v34 }
0x1d1b   :  { %v4408_v25 = vsel %vm170_vm1, %v12907_v21, 0.0  ;;  %11273 = vmatpush3.msra.mxu1 %v10166_v34  ;;  %v4841_v34 = vmul.f32 %v10251_v27, %v10251_v27 }
0x1d1c   :  { %4409 = vadd.xlane.f32.xlu0 %v4408_v25  ;;  %11274 = vmatprep.subr.mxu1 %v10165_v20  ;;  %v10164_v25 = vld [vmem:[%s14000_s1 + $0x218] sm:$0xff] }
0x1d1d   :  { %11275 = vmatpush3.msra.mxu1 %v10165_v20 }
0x1d1e   :  { %11276 = vmatprep.subr.mxu1 %v10164_v25 }
0x1d1f   :  { %11277 = vmatpush3.msra.mxu1 %v10164_v25  ;;  %v4847_v25 = vsel %vm528_vm3, %v4841_v34, 0.0 }
0x1d20   :  { %4412 = vadd.xlane.f32.xlu0 %v4411_v22  ;;  %v10163_v22 = vld [vmem:[%s14000_s1 + $0x210] sm:$0xff] }
0x1d21   :  { %11278 = vmatprep.subr.mxu1 %v10163_v22 }
0x1d22   :  { %11279 = vmatpush3.msra.mxu1 %v10163_v22  ;;  %v10236_v22 = vld [vmem:[%s14002_s2 + $0x10] ss:$0 sm:$0xff] }
0x1d97   :  { %v4407_v49 = vpop.xlane.xlu1 %4406 }
0x1d98   :  { %v4415_v59 = vmul.f32 0.03125, %v4407_v49  ;;  %v10162_v49 = vld [vmem:[%s14000_s1 + $0x208] sm:$0xff] }
0x1d99   :  { %v4404_v55 = vpop.xlane.xlu0 %4403  ;;  %11280 = vmatprep.subr.mxu1 %v10162_v49 }
0x1d9a   :  { %v4419_v52 = vsub.f32 %v12896_v53, %v4415_v59  ;;  %v4414_v35 = vmul.f32 0.03125, %v4404_v55  ;;  %v10161_v59 = vld [vmem:[%s14000_s1 + $0x200] sm:$0xff]  ;;  %11281 = vmatpush3.msra.mxu1 %v10162_v49  ;;  %v10231_v55 = vld [vmem:[%s14002_s2 + $0xf] ss:$0 sm:$0xff] }
0x1d9b   :  { %11282 = vmatprep.subr.mxu1 %v10161_v59 }
0x1d9c   :  { %v4418_v36 = vsub.f32 %v12899_v26, %v4414_v35  ;;  %v4423_v28 = vmul.f32 %v4419_v52, %v4419_v52  ;;  %11283 = vmatpush3.msra.mxu1 %v10161_v59 }
0x1d9e   :  { %v4429_v29 = vsel %vm170_vm1, %v4423_v28, 0.0  ;;  %v4422_v54 = vmul.f32 %v4418_v36, %v4418_v36 }
0x1d9f   :  { %4430 = vadd.xlane.f32.xlu1 %v4429_v29 }
0x1da0   :  { %v4426_v31 = vsel %vm170_vm1, %v4422_v54, 0.0 }
0x1da1   :  { %4427 = vadd.xlane.f32.xlu0 %v4426_v31 }
0x1da5   :  { %v4410_v38 = vpop.xlane.xlu0 %4409 }
0x1da6   :  { %v4416_v58 = vmul.f32 0.03125, %v4410_v38 }
0x1da8   :  { %v4420_v39 = vsub.f32 %v12907_v21, %v4416_v58 }
0x1da9   :  { %v4413_v42 = vpop.xlane.xlu0 %4412 }
0x1daa   :  { %v4417_v46 = vmul.f32 0.03125, %v4413_v42  ;;  %v4424_v47 = vmul.f32 %v4420_v39, %v4420_v39 }
0x1dac   :  { %v4421_v48 = vsub.f32 %v12909_v40, %v4417_v46  ;;  %v4432_v56 = vsel %vm170_vm1, %v4424_v47, 0.0 }
0x1dad   :  { %4433 = vadd.xlane.f32.xlu0 %v4432_v56 }
0x1dae   :  { %v4425_v57 = vmul.f32 %v4421_v48, %v4421_v48 }
0x1db0   :  { %v4435_v60 = vsel %vm170_vm1, %v4425_v57, 0.0 }
0x1db1   :  { %4436 = vadd.xlane.f32.xlu1 %v4435_v60 }
0x1db5   :  { %4848 = vadd.xlane.f32.xlu1 %v4847_v25 }
0x1e28   :  { %v4431_v3 = vpop.xlane.xlu1 %4430 }
0x1e29   :  { %v4439_v4 = vmul.f32 0.03125, %v4431_v3 }
0x1e2a   :  { %v4428_v5 = vpop.xlane.xlu0 %4427 }
0x1e2b   :  { %v4443_v62 = vadd.f32 1e-05, %v4439_v4  ;;  %v4438_v63 = vmul.f32 0.03125, %v4428_v5 }
0x1e2d   :  { %11883 = vrsqrt.f32 %v4443_v62  ;;  %v4442_v33 = vadd.f32 1e-05, %v4438_v63 }
0x1e2f   :  { %11885 = vrsqrt.f32 %v4442_v33 }
0x1e36   :  { %v4434_v6 = vpop.xlane.xlu0 %4433 }
0x1e37   :  { %v4440_v8 = vmul.f32 0.03125, %v4434_v6 }
0x1e39   :  { %v4444_v7 = vadd.f32 1e-05, %v4440_v8 }
0x1e3a   :  { %v11884_v9 = vpop.eup %11883  ;;  %v4437_v10 = vpop.xlane.xlu1 %4436 }
0x1e3b   :  { %11887 = vrsqrt.f32 %v4444_v7  ;;  %v4441_v45 = vmul.f32 0.03125, %v4437_v10  ;;  %v4451_v12 = vmul.f32 %v11884_v9, %v4419_v52 }
0x1e3c   :  { %v11886_v41 = vpop.eup %11885 }
0x1e3d   :  { %v4445_v44 = vadd.f32 1e-05, %v4441_v45  ;;  %v4450_v13 = vmul.f32 %v11886_v41, %v4418_v36  ;;  %v4459_v37 = vmul.f32 %v10229_v11, %v4451_v12 }
0x1e3f   :  { %11889 = vrsqrt.f32 %v4445_v44  ;;  %v4458_v15 = vmul.f32 %v10229_v11, %v4450_v13  ;;  %v4467_v51 = vadd.f32 %v10230_v14, %v4459_v37 }
0x1e41   :  { %v4466_v16 = vadd.f32 %v10230_v14, %v4458_v15 }
0x1e43   :  { %11262 = vmatprep.mubr.msk.f32.mxu0 %vm170_vm1, %v4466_v16 }
0x1e44   :  { %11263 = vmatmul.mubr.msk.f32.vlgmr.msra.gmra.mxu0 %vm170_vm1, %v4467_v51 }
0x1e48   :  { %v11888_v17 = vpop.eup %11887 }
0x1e49   :  { %v4452_v50 = vmul.f32 %v11888_v17, %v4420_v39 }
0x1e4b   :  { %v4460_v18 = vmul.f32 %v10229_v11, %v4452_v50  ;;  %v10244_v50 = vld [vmem:[%s14000_s1 + $0x258] sm:$0xff] }
0x1e4c   :  { %v11890_v43 = vpop.eup %11889  ;;  %11290 = vmatprep.subr.mxu0 %v10244_v50 }
0x1e4d   :  { %v4468_v19 = vadd.f32 %v10230_v14, %v4460_v18  ;;  %v4453_v23 = vmul.f32 %v11890_v43, %v4421_v48  ;;  %11291 = vmatpush3.msra.mxu0 %v10244_v50  ;;  %v10243_v18 = vld [vmem:[%s14000_s1 + $0x250] sm:$0xff]  ;;  %v10242_v43 = vld [vmem:[%s14000_s1 + $0x248] sm:$0xff] }
0x1e4e   :  { %11292 = vmatprep.subr.mxu0 %v10243_v18 }
0x1e4f   :  { %11265 = vmatprep.mubr.msk.f32.mxu0 %vm170_vm1, %v4468_v19  ;;  %v4461_v30 = vmul.f32 %v10229_v11, %v4453_v23  ;;  %11293 = vmatpush3.msra.mxu0 %v10243_v18  ;;  %v10241_v19 = vld [vmem:[%s14000_s1 + $0x240] sm:$0xff]  ;;  %v10253_v23 = vld [vmem:[%s14000_s1 + $0x2d8] sm:$0xff] }
0x1e50   :  { %11294 = vmatprep.subr.mxu0 %v10242_v43  ;;  %11318 = vmatprep.subr.mxu1 %v10253_v23 }
0x1e51   :  { %v4469_v32 = vadd.f32 %v10230_v14, %v4461_v30  ;;  %11295 = vmatpush3.msra.mxu0 %v10242_v43  ;;  %v10250_v30 = vld [vmem:[%s14000_s1 + $0x2c0] sm:$0xff] }
0x1e52   :  { %11296 = vmatprep.subr.mxu0 %v10241_v19 }
0x1e53   :  { %11266 = vmatmul.mubr.msk.f32.gmra.mxu0 %vm170_vm1, %v4469_v32  ;;  %v4840_v32 = vmul.f32 %v10250_v30, %v10250_v30 }
0x1e54   :  { %11297 = vmatpush3.msra.mxu0 %v10241_v19 }
0x1e55   :  { %11304 = vmatprep.subr.msk.mxu0 %vm528_vm3, %v10253_v23  ;;  %v4844_v20 = vsel %vm528_vm3, %v4840_v32, 0.0 }
0x1e56   :  { %4845 = vadd.xlane.f32.xlu0 %v4844_v20 }
0x1f04   :  { %v11264_v52 = vpop.f32.mrf.mxu0 }
0x1f05   :  { %v4558_v35 = vadd.f32 %v11264_v52, %v10231_v55 }
0x1f06   :  { %v4552_v36 = vpop.f32.mrf.mxu0 }
0x1f07   :  { %v4572_v28 = vmul.f32 %v4558_v35, %v4558_v35  ;;  %v4553_v29 = vadd.f32 %v10231_v55, %v4552_v36 }
0x1f09   :  { %v4576_v54 = vmul.f32 %v4572_v28, %v4558_v35  ;;  %v4571_v31 = vmul.f32 %v4553_v29, %v4553_v29 }
0x1f0b   :  { %v4580_v38 = vmul.f32 0.044715, %v4576_v54  ;;  %v4575_v58 = vmul.f32 %v4571_v31, %v4553_v29 }
0x1f0d   :  { %v4584_v39 = vadd.f32 %v4580_v38, %v4558_v35  ;;  %v4579_v42 = vmul.f32 0.044715, %v4575_v58  ;;  %v4842_v38 = vmul.f32 %v10252_v24, %v10252_v24  ;;  %v4843_v58 = vmul.f32 %v10253_v23, %v10253_v23 }
0x1f0f   :  { %v4588_v46 = vmul.f32 0.7978846, %v4584_v39  ;;  %v4583_v47 = vadd.f32 %v4579_v42, %v4553_v29  ;;  %v4850_v39 = vsel %vm528_vm3, %v4842_v38, 0.0  ;;  %v4853_v42 = vsel %vm528_vm3, %v4843_v58, 0.0 }
0x1f10   :  { %4851 = vadd.xlane.f32.xlu0 %v4850_v39  ;;  %4854 = vadd.xlane.f32.xlu1 %v4853_v42 }
0x1f11   :  { %11891 = vtanh.f32 %v4588_v46  ;;  %v4587_v48 = vmul.f32 0.7978846, %v4583_v47 }
0x1f13   :  { %11893 = vtanh.f32 %v4587_v48  ;;  %v11267_v56 = vpop.f32.mrf.mxu0 }
0x1f14   :  { %v4568_v57 = vadd.f32 %v11267_v56, %v10231_v55 }
0x1f15   :  { %v4562_v60 = vpop.f32.mrf.mxu0 }
0x1f16   :  { %v4574_v61 = vmul.f32 %v4568_v57, %v4568_v57  ;;  %v4563_v0 = vadd.f32 %v10231_v55, %v4562_v60 }
0x1f18   :  { %v4578_v1 = vmul.f32 %v4574_v61, %v4568_v57  ;;  %v4573_v2 = vmul.f32 %v4563_v0, %v4563_v0 }
0x1f1a   :  { %v4582_v3 = vmul.f32 0.044715, %v4578_v1  ;;  %v4577_v4 = vmul.f32 %v4573_v2, %v4563_v0 }
0x1f1c   :  { %v4586_v5 = vadd.f32 %v4582_v3, %v4568_v57  ;;  %v4581_v62 = vmul.f32 0.044715, %v4577_v4 }
0x1f1e   :  { %v11892_v63 = vpop.eup %11891  ;;  %v4590_v33 = vmul.f32 0.7978846, %v4586_v5  ;;  %v4585_v6 = vadd.f32 %v4581_v62, %v4563_v0 }
0x1f1f   :  { %v4596_v8 = vadd.f32 1.0, %v11892_v63 }
0x1f20   :  { %v11894_v7 = vpop.eup %11893  ;;  %11895 = vtanh.f32 %v4590_v33  ;;  %v4589_v9 = vmul.f32 0.7978846, %v4585_v6  ;;  %v4860_v33 = vlaneseq }
0x1f21   :  { %v4595_v10 = vadd.f32 1.0, %v11894_v7  ;;  %v4600_v45 = vmul.f32 0.5, %v4596_v8 }
0x1f22   :  { %11897 = vtanh.f32 %v4589_v9  ;;  %v13054_v6 = vand.u32 127, %v4860_v33  ;;  %v4863_v8 = vshrl.u32 %v4860_v33, 7  ;;  %v4846_v9 = vpop.xlane.xlu0 %4845 }
0x1f23   :  { %v4599_v11 = vmul.f32 0.5, %v4595_v10  ;;  %v4604_v41 = vmul.f32 %v4600_v45, %v4558_v35 }
0x1f24   :  { %v4866_v7 = vadd.s32 4294967288, %v13054_v6  ;;  %v4873_v10 = vadd.s32 4294967280, %v13054_v6 }
0x1f25   :  { %v4603_v12 = vmul.f32 %v4599_v11, %v4553_v29  ;;  %v4864_v11 = vsub.s32 %v13054_v6, %v4863_v8 }
0x1f26   :  { %v4869_v45 = vsub.s32 %v4866_v7, %v4863_v8 }
0x1f27   :  { %11284 = vmatprep.mubr.msk.f32.mxu1 %vm2326_vm5, %v4603_v12  ;;  %v4849_v12 = vpop.xlane.xlu1 %4848 }
0x1f28   :  { %11285 = vmatmul.mubr.msk.f32.vlgmr.msra.gmra.mxu1 %vm2326_vm5, %v4604_v41  ;;  %v4880_v41 = vadd.s32 4294967272, %v13054_v6 }
0x1f29   :  { %11319 = vmatpush3.msra.mxu1 %v10253_v23 }
0x1f2a   :  { %11320 = vmatprep.subr.mxu1 %v10252_v24 }
0x1f2b   :  { %11321 = vmatpush3.msra.mxu1 %v10252_v24 }
0x1f2c   :  { %11322 = vmatprep.subr.mxu1 %v10251_v27 }
0x1f2d   :  { %v11896_v44 = vpop.eup %11895  ;;  %11323 = vmatpush3.msra.mxu1 %v10251_v27 }
0x1f2e   :  { %v4598_v13 = vadd.f32 1.0, %v11896_v44  ;;  %11324 = vmatprep.subr.mxu1 %v10250_v30  ;;  %v4876_v44 = vsub.s32 %v4873_v10, %v4863_v8 }
0x1f2f   :  { %v11898_v37 = vpop.eup %11897  ;;  %11325 = vmatpush3.msra.mxu1 %v10250_v30 }
0x1f30   :  { %v4597_v14 = vadd.f32 1.0, %v11898_v37  ;;  %v4602_v15 = vmul.f32 0.5, %v4598_v13  ;;  %v4870_v13 = vrot.slane %v4849_v12, %v4869_v45  ;;  %v4865_v37 = vrot.slane %v4846_v9, %v4864_v11 }
0x1f32   :  { %v4601_v16 = vmul.f32 0.5, %v4597_v14  ;;  %v4606_v17 = vmul.f32 %v4602_v15, %v4568_v57  ;;  %v4883_v15 = vsub.s32 %v4880_v41, %v4863_v8 }
0x1f34   :  { %v4605_v51 = vmul.f32 %v4601_v16, %v4563_v0 }
0x1f36   :  { %11287 = vmatprep.mubr.msk.f32.mxu1 %vm2326_vm5, %v4605_v51 }
0x1f37   :  { %11288 = vmatmul.mubr.msk.f32.gmra.mxu1 %vm2326_vm5, %v4606_v17  ;;  %v4872_v17 = vsel %vm4871_vm6, %v4870_v13, %v4865_v37 }
0x1f99   :  { %v4852_v14 = vpop.xlane.xlu0 %4851  ;;  %v4855_v16 = vpop.xlane.xlu1 %4854 }
0x1f9a   :  { %v4877_v51 = vrot.slane %v4852_v14, %v4876_v44  ;;  %v4884_v50 = vrot.slane %v4855_v16, %v4883_v15 }
0x1f9c   :  { %v4879_v18 = vsel %vm4878_vm7, %v4877_v51, %v4872_v17 }
0x1f9d   :  { %v4886_v19 = vsel %vm4885_vm8, %v4884_v50, %v4879_v18 }
0x1fe8   :  { %v11286_v49 = vpop.f32.mrf.mxu1 }
0x1fe9   :  { %v4695_v59 = vadd.f32 %v11286_v49, %v10236_v22 }
0x1fea   :  { %v4689_v55 = vpop.f32.mrf.mxu1 }
0x1feb   :  { %v4690_v52 = vadd.f32 %v10236_v22, %v4689_v55  ;;  %v4709_v36 = vadd.f32 %v4695_v59, %v12896_v53 }
0x1fed   :  { %v4708_v35 = vadd.f32 %v4690_v52, %v12899_v26 }
0x1fef   :  { %11298 = vmatprep.mubr.msk.f32.mxu0 %vm170_vm1, %v4708_v35 }
0x1ff0   :  { %11299 = vmatmul.mubr.msk.f32.vlgmr.msra.gmra.mxu0 %vm170_vm1, %v4709_v36 }
0x1ff1   :  { %11305 = vmatpush3.xpose.msk.msra.mxu0 %vm528_vm3, %v10253_v23 }
0x1ff2   :  { %11306 = vmatprep.subr.msk.mxu0 %vm528_vm3, %v10252_v24 }
0x1ff5   :  { %11307 = vmatpush3.xpose.msk.msra.mxu0 %vm528_vm3, %v10252_v24 }
0x1ff6   :  { %11308 = vmatprep.subr.msk.mxu0 %vm528_vm3, %v10251_v27 }
0x1ff7   :  { %v11289_v28 = vpop.f32.mrf.mxu1 }
0x1ff8   :  { %v4705_v29 = vadd.f32 %v11289_v28, %v10236_v22 }
0x1ff9   :  { %v4699_v54 = vpop.f32.mrf.mxu1  ;;  %11309 = vmatpush3.xpose.msk.msra.mxu0 %vm528_vm3, %v10251_v27 }
0x1ffa   :  { %v4700_v26 = vadd.f32 %v10236_v22, %v4699_v54  ;;  %11310 = vmatprep.subr.msk.mxu0 %vm528_vm3, %v10250_v30  ;;  %v4711_v31 = vadd.f32 %v4705_v29, %v12909_v40 }
0x1ffc   :  { %v4710_v53 = vadd.f32 %v4700_v26, %v12907_v21  ;;  %v10245_v21 = vld [vmem:[%s14002_s2 + $0x11] ss:$0 sm:$0xff] }
0x1ffd   :  { %11311 = vmatpush3.xpose.msk.msra.mxu0 %vm528_vm3, %v10250_v30 }
0x1ffe   :  { %11301 = vmatprep.mubr.msk.f32.mxu0 %vm170_vm1, %v4710_v53 }
0x1fff   :  { %11302 = vmatmul.mubr.msk.f32.gmra.mxu0 %vm170_vm1, %v4711_v31 }
0x20b0   :  { %v11300_v46 = vpop.f32.mrf.mxu0 }
0x20b1   :  { %v13026_v40 = vadd.f32 %v11300_v46, %v10245_v21 }
0x20b2   :  { %v4800_v47 = vpop.f32.mrf.mxu0 }
0x20b3   :  { %v13028_v48 = vadd.f32 %v10245_v21, %v4800_v47  ;;  %v4825_v56 = vmul.f32 %v13026_v40, %v13026_v40 }
0x20b5   :  { %11312 = vmatprep.mubr.msk.f32.mxu0 %vm528_vm3, %v13028_v48  ;;  %v4831_v57 = vsel %vm528_vm3, %v4825_v56, 0.0  ;;  %v4824_v60 = vmul.f32 %v13028_v48, %v13028_v48 }
0x20b6   :  { %4832 = vadd.xlane.f32.xlu1 %v4831_v57  ;;  %11313 = vmatmul.mubr.msk.f32.vlgmr.msra.gmra.mxu0 %vm528_vm3, %v13026_v40 }
0x20b7   :  { %v4828_v61 = vsel %vm528_vm3, %v4824_v60, 0.0 }
0x20b8   :  { %4829 = vadd.xlane.f32.xlu0 %v4828_v61 }
0x20bf   :  { %v11303_v0 = vpop.f32.mrf.mxu0 }
0x20c0   :  { %v13040_v1 = vadd.f32 %v11303_v0, %v10245_v21 }
0x20c1   :  { %v4810_v2 = vpop.f32.mrf.mxu0 }
0x20c2   :  { %v13042_v3 = vadd.f32 %v10245_v21, %v4810_v2  ;;  %v4827_v4 = vmul.f32 %v13040_v1, %v13040_v1 }
0x20c4   :  { %11315 = vmatprep.mubr.msk.f32.mxu0 %vm528_vm3, %v13042_v3  ;;  %v4837_v5 = vsel %vm528_vm3, %v4827_v4, 0.0  ;;  %v4826_v62 = vmul.f32 %v13042_v3, %v13042_v3 }
0x20c5   :  { %4838 = vadd.xlane.f32.xlu1 %v4837_v5  ;;  %11316 = vmatmul.mubr.msk.f32.gmra.mxu0 %vm528_vm3, %v13040_v1 }
0x20c6   :  { %v4834_v63 = vsel %vm528_vm3, %v4826_v62, 0.0 }
0x20c7   :  { %4835 = vadd.xlane.f32.xlu0 %v4834_v63 }
0x213f   :  { %v4833_v43 = vpop.xlane.xlu1 %4832 }
0x2140   :  { %v4901_v32 = vadd.f32 %v4886_v19, %v4833_v43 }
0x2141   :  { %v4830_v23 = vpop.xlane.xlu0 %4829 }
0x2142   :  { %v4900_v34 = vadd.f32 %v4886_v19, %v4830_v23  ;;  %v10271_v23 = vld [vmem:[%s14000_s1 + $0x308] sm:$0xff] }
0x2143   :  { %11332 = vmatprep.subr.mxu1 %v10271_v23 }
0x214e   :  { %v4839_v55 = vpop.xlane.xlu1 %4838 }
0x214f   :  { %v4903_v36 = vadd.f32 %v4886_v19, %v4839_v55  ;;  %v12089_v55 = vmov 0.0  }
0x2150   :  { %v4836_v52 = vpop.xlane.xlu0 %4835 }
0x2151   :  { %v4902_v54 = vadd.f32 %v4886_v19, %v4836_v52 }
0x2176   :  { %v11314_v30 = vpop.f32.mrf.mxu0 }
0x2177   :  { %v5014_v27 = vmul.f32 2.0, %v11314_v30 }
0x2178   :  { %v4994_v24 = vpop.f32.mrf.mxu0 }
0x2179   :  { %v5018_v20 = vsub.f32 %v4901_v32, %v5014_v27  ;;  %v5013_v25 = vmul.f32 2.0, %v4994_v24 }
0x217b   :  { %v5017_v22 = vsub.f32 %v4900_v34, %v5013_v25  ;;  %v5024_v49 = vsel %vm170_vm1, %v5018_v20, inf }
0x217c   :  { %5025 = vmin.xlane.f32.xlu1 %v5024_v49 }
0x217d   :  { %v5021_v59 = vsel %vm170_vm1, %v5017_v22, inf }
0x217e   :  { %5022 = vmin.xlane.f32.xlu0 %v5021_v59 }
0x2185   :  { %v11317_v35 = vpop.f32.mrf.mxu0 }
0x2186   :  { %v5016_v28 = vmul.f32 2.0, %v11317_v35 }
0x2187   :  { %v5004_v29 = vpop.f32.mrf.mxu0 }
0x2188   :  { %v5020_v26 = vsub.f32 %v4903_v36, %v5016_v28  ;;  %v5015_v53 = vmul.f32 2.0, %v5004_v29 }
0x218a   :  { %v5019_v31 = vsub.f32 %v4902_v54, %v5015_v53  ;;  %v5030_v38 = vsel %vm170_vm1, %v5020_v26, inf }
0x218b   :  { %5031 = vmin.xlane.f32.xlu1 %v5030_v38 }
0x218c   :  { %v5027_v58 = vsel %vm170_vm1, %v5019_v31, inf }
0x218d   :  { %5028 = vmin.xlane.f32.xlu0 %v5027_v58 }
0x2205   :  { %v5026_v39 = vpop.xlane.xlu1 %5025 }
0x2206   :  { %vm5034_vm9 = vcmp.le.f32.partialorder %v5018_v20, %v5026_v39 }
0x2207   :  { %v5038_v42 = vsel %vm5034_vm9, %v13054_v6, 32  ;;  %v5023_v21 = vpop.xlane.xlu0 %5022 }
0x2208   :  { %v5056_v46 = vsel %vm170_vm1, %v5038_v42, 2147483647  ;;  %vm5033_vm10 = vcmp.le.f32.partialorder %v5017_v22, %v5023_v21 }
0x2209   :  { %v5037_v47 = vsel %vm5033_vm10, %v13054_v6, 32  ;;  %v5058_v56 = vshra.s32 %v5056_v46, 16  ;;  %v5057_v45 = vand.u32 65535, %v5056_v46  ;;  %v10270_v46 = vld [vmem:[%s14000_s1 + $0x300] sm:$0xff] }
0x220a   :  { %v5041_v57 = vsel %vm170_vm1, %v5037_v47, 2147483647 }
0x220b   :  { %v5060_v60 = vcvt.s32.f32 %v5058_v56  ;;  %v5043_v61 = vshra.s32 %v5041_v57, 16  ;;  %v5042_v11 = vand.u32 65535, %v5041_v57  ;;  %v5059_v41 = vcvt.s32.f32 %v5057_v45 }
0x220d   :  { %5061 = vmin.xlane.f32.xlu1 %v5060_v60  ;;  %v5045_v0 = vcvt.s32.f32 %v5043_v61  ;;  %v5044_v37 = vcvt.s32.f32 %v5042_v11 }
0x220f   :  { %5046 = vmin.xlane.f32.xlu0 %v5045_v0 }
0x2214   :  { %v5032_v2 = vpop.xlane.xlu1 %5031 }
0x2215   :  { %vm5036_vm11 = vcmp.le.f32.partialorder %v5020_v26, %v5032_v2 }
0x2216   :  { %v5040_v4 = vsel %vm5036_vm11, %v13054_v6, 32  ;;  %v5029_v5 = vpop.xlane.xlu0 %5028 }
0x2217   :  { %v5086_v62 = vsel %vm170_vm1, %v5040_v4, 2147483647  ;;  %vm5035_vm12 = vcmp.le.f32.partialorder %v5019_v31, %v5029_v5  ;;  %v10277_v5 = vld [vmem:[%s14000_s1 + $0x580] sm:$0xff] }
0x2218   :  { %v5039_v63 = vsel %vm5035_vm12, %v13054_v6, 32  ;;  %v5088_v33 = vshra.s32 %v5086_v62, 16  ;;  %v5087_v15 = vand.u32 65535, %v5086_v62 }
0x2219   :  { %v5071_v8 = vsel %vm170_vm1, %v5039_v63, 2147483647 }
0x221a   :  { %v5090_v7 = vcvt.s32.f32 %v5088_v33  ;;  %v5073_v9 = vshra.s32 %v5071_v8, 16  ;;  %v5072_v16 = vand.u32 65535, %v5071_v8  ;;  %v5089_v17 = vcvt.s32.f32 %v5087_v15 }
0x221c   :  { %5091 = vmin.xlane.f32.xlu1 %v5090_v7  ;;  %v5075_v10 = vcvt.s32.f32 %v5073_v9  ;;  %v5074_v43 = vcvt.s32.f32 %v5072_v16 }
0x221e   :  { %5076 = vmin.xlane.f32.xlu0 %v5075_v10 }
0x2296   :  { %v5062_v12 = vpop.xlane.xlu1 %5061 }
0x2297   :  { %vm5063_vm13 = vcmp.eq.f32.partialorder %v5060_v60, %v5062_v12  ;;  %v5068_v30 = vcvt.f32.s32 %v5062_v12  ;;  %v10272_v60 = vld [vmem:[%s14002_s2 + $0x12] ss:$0 sm:$0xff] }
0x2298   :  { %v5047_v44 = vpop.xlane.xlu0 %5046  ;;  %v5064_v13 = vsel %vm5063_vm13, %v5059_v41, inf }
0x2299   :  { %5065 = vmin.xlane.f32.xlu1 %v5064_v13  ;;  %vm5048_vm14 = vcmp.eq.f32.partialorder %v5045_v0, %v5047_v44  ;;  %v5053_v32 = vcvt.f32.s32 %v5047_v44  ;;  %v5069_v24 = vshll.u32 %v5068_v30, 16  ;;  %v10278_v0 = vld [vmem:[%s14000_s1 + $0x588] sm:$0xff] }
0x229a   :  { %v5049_v14 = vsel %vm5048_vm14, %v5044_v37, inf }
0x229b   :  { %5050 = vmin.xlane.f32.xlu0 %v5049_v14  ;;  %v5054_v25 = vshll.u32 %v5053_v32, 16 }
0x22a5   :  { %v5092_v51 = vpop.xlane.xlu1 %5091 }
0x22a6   :  { %vm5093_vm15 = vcmp.eq.f32.partialorder %v5090_v7, %v5092_v51  ;;  %v5098_v36 = vcvt.f32.s32 %v5092_v51 }
0x22a7   :  { %v5077_v50 = vpop.xlane.xlu0 %5076  ;;  %v5094_v18 = vsel %vm5093_vm15, %v5089_v17, inf }
0x22a8   :  { %5095 = vmin.xlane.f32.xlu1 %v5094_v18  ;;  %vm5078_vm6 = vcmp.eq.f32.partialorder %v5075_v10, %v5077_v50  ;;  %v5083_v28 = vcvt.f32.s32 %v5077_v50  ;;  %v5099_v54 = vshll.u32 %v5098_v36, 16 }
0x22a9   :  { %v5079_v19 = vsel %vm5078_vm6, %v5074_v43, inf }
0x22aa   :  { %5080 = vmin.xlane.f32.xlu0 %v5079_v19  ;;  %v5084_v31 = vshll.u32 %v5083_v28, 16 }
0x2322   :  { %v5066_v27 = vpop.xlane.xlu1 %5065 }
0x2323   :  { %v5067_v34 = vcvt.f32.s32 %v5066_v27 }
0x2324   :  { %v5051_v20 = vpop.xlane.xlu0 %5050 }
0x2325   :  { %v5070_v22 = vadd.s32 %v5069_v24, %v5067_v34  ;;  %v5052_v49 = vcvt.f32.s32 %v5051_v20 }
0x2327   :  { %v5055_v59 = vadd.s32 %v5054_v25, %v5052_v49  ;;  %vm5102_vm7 = vcmp.eq.s32.totalorder %v13054_v6, %v5070_v22 }
0x2328   :  { %v10263_v35 = vsel %vm5102_vm7, 1.0, %v12089_v55 }
0x2329   :  { %vm5101_vm8 = vcmp.eq.s32.totalorder %v13054_v6, %v5055_v59  ;;  %v10282_v59 = vld [vmem:[%s14000_s1 + $0x358] sm:$0xff] }
0x232a   :  { %v10262_v52 = vsel %vm5101_vm8, 1.0, %v12089_v55  ;;  %11342 = vmatprep.subr.mxu0 %v10282_v59 }
0x232b   :  { %11326 = vmatprep.mubr.msk.f32.mxu1 %vm170_vm1, %v10262_v52  ;;  %11343 = vmatpush3.msra.mxu0 %v10282_v59  ;;  %v10280_v52 = vld [vmem:[%s14000_s1 + $0x348] sm:$0xff] }
0x232c   :  { %11327 = vmatmul.mubr.msk.f32.vlgmr.msra.gmra.mxu1 %vm170_vm1, %v10263_v35  ;;  %v10279_v35 = vld [vmem:[%s14000_s1 + $0x340] sm:$0xff] }
0x232d   :  { %11333 = vmatpush3.msra.mxu1 %v10271_v23 }
0x232e   :  { %11334 = vmatprep.subr.mxu1 %v10270_v46 }
0x232f   :  { %11335 = vmatpush3.msra.mxu1 %v10270_v46 }
0x2331   :  { %v5096_v29 = vpop.xlane.xlu1 %5095 }
0x2332   :  { %v5097_v26 = vcvt.f32.s32 %v5096_v29 }
0x2333   :  { %v5081_v53 = vpop.xlane.xlu0 %5080 }
0x2334   :  { %v5100_v38 = vadd.s32 %v5099_v54, %v5097_v26  ;;  %v5082_v58 = vcvt.f32.s32 %v5081_v53 }
0x2336   :  { %v5085_v39 = vadd.s32 %v5084_v31, %v5082_v58  ;;  %vm5104_vm9 = vcmp.eq.s32.totalorder %v13054_v6, %v5100_v38 }
0x2337   :  { %v10265_v21 = vsel %vm5104_vm9, 1.0, %v12089_v55 }
0x2338   :  { %vm5103_vm10 = vcmp.eq.s32.totalorder %v13054_v6, %v5085_v39 }
0x2339   :  { %v10264_v42 = vsel %vm5103_vm10, 1.0, %v12089_v55  ;;  %v10281_v55 = vld [vmem:[%s14000_s1 + $0x350] sm:$0xff] }
0x233a   :  { %11329 = vmatprep.mubr.msk.f32.mxu1 %vm170_vm1, %v10264_v42  ;;  %11344 = vmatprep.subr.mxu0 %v10281_v55 }
0x233b   :  { %11330 = vmatmul.mubr.msk.f32.gmra.mxu1 %vm170_vm1, %v10265_v21  ;;  %11345 = vmatpush3.msra.mxu0 %v10281_v55 }
0x233c   :  { %11346 = vmatprep.subr.mxu0 %v10280_v52 }
0x233d   :  { %11347 = vmatpush3.msra.mxu0 %v10280_v52 }
0x233e   :  { %11348 = vmatprep.subr.mxu0 %v10279_v35 }
0x233f   :  { %11349 = vmatpush3.msra.mxu0 %v10279_v35 }
0x23ec   :  { %v13086_v47 = vpop.f32.mrf.mxu1 }
0x23ee   :  { %v13088_v56 = vpop.f32.mrf.mxu1 }
0x23ef   :  { %11336 = vmatprep.mubr.msk.f32.mxu1 %vm528_vm3, %v13088_v56 }
0x23f0   :  { %11337 = vmatmul.mubr.msk.f32.vlgmr.msra.gmra.mxu1 %vm528_vm3, %v13086_v47 }
0x23fb   :  { %v13094_v6 = vpop.f32.mrf.mxu1 }
0x23fd   :  { %v13096_v57 = vpop.f32.mrf.mxu1 }
0x23fe   :  { %11339 = vmatprep.mubr.msk.f32.mxu1 %vm528_vm3, %v13096_v57 }
0x23ff   :  { %11340 = vmatmul.mubr.msk.f32.gmra.mxu1 %vm528_vm3, %v13094_v6 }
0x24b0   :  { %v11338_v61 = vpop.f32.mrf.mxu1 }
0x24b1   :  { %v5302_v2 = vadd.f32 %v11338_v61, %v10272_v60 }
0x24b2   :  { %v5296_v4 = vpop.f32.mrf.mxu1 }
0x24b3   :  { %v13111_v62 = vadd.f32 %v10278_v0, %v5302_v2  ;;  %v5297_v63 = vadd.f32 %v10272_v60, %v5296_v4 }
0x24b5   :  { %v13113_v33 = vadd.f32 %v10277_v5, %v5297_v63  ;;  %v5357_v8 = vsel %vm170_vm1, %v13111_v62, 0.0 }
0x24b6   :  { %5358 = vadd.xlane.f32.xlu1 %v5357_v8 }
0x24b7   :  { %v5354_v7 = vsel %vm170_vm1, %v13113_v33, 0.0 }
0x24b8   :  { %5355 = vadd.xlane.f32.xlu0 %v5354_v7 }
0x24bf   :  { %v11341_v9 = vpop.f32.mrf.mxu1 }
0x24c0   :  { %v5312_v10 = vadd.f32 %v11341_v9, %v10272_v60 }
0x24c1   :  { %v5306_v45 = vpop.f32.mrf.mxu1 }
0x24c2   :  { %v13119_v11 = vadd.f32 %v10278_v0, %v5312_v10  ;;  %v5307_v12 = vadd.f32 %v10272_v60, %v5306_v45  ;;  %v10299_v60 = vld [vmem:[%s14002_s2 + $0x13] ss:$0 sm:$0xff] }
0x24c4   :  { %v13121_v41 = vadd.f32 %v10277_v5, %v5307_v12  ;;  %v5363_v44 = vsel %vm170_vm1, %v13119_v11, 0.0  ;;  %v10300_v5 = vld [vmem:[%s14002_s2 + $0x14] ss:$0 sm:$0xff] }
0x24c5   :  { %5364 = vadd.xlane.f32.xlu1 %v5363_v44 }
0x24c6   :  { %v5360_v13 = vsel %vm170_vm1, %v13121_v41, 0.0 }
0x24c7   :  { %5361 = vadd.xlane.f32.xlu0 %v5360_v13 }
0x253f   :  { %v5359_v37 = vpop.xlane.xlu1 %5358 }
0x2540   :  { %v5367_v14 = vmul.f32 0.03125, %v5359_v37 }
0x2541   :  { %v5356_v15 = vpop.xlane.xlu0 %5355 }
0x2542   :  { %v5371_v16 = vsub.f32 %v13111_v62, %v5367_v14  ;;  %v5366_v51 = vmul.f32 0.03125, %v5356_v15  ;;  %v10301_v15 = vld [vmem:[%s14002_s2 + $0x15] ss:$0 sm:$0xff] }
0x2544   :  { %v5370_v17 = vsub.f32 %v13113_v33, %v5366_v51  ;;  %v5375_v50 = vmul.f32 %v5371_v16, %v5371_v16 }
0x2546   :  { %v5381_v18 = vsel %vm170_vm1, %v5375_v50, 0.0  ;;  %v5374_v43 = vmul.f32 %v5370_v17, %v5370_v17 }
0x2547   :  { %5382 = vadd.xlane.f32.xlu1 %v5381_v18 }
0x2548   :  { %v5378_v19 = vsel %vm170_vm1, %v5374_v43, 0.0 }
0x2549   :  { %5379 = vadd.xlane.f32.xlu0 %v5378_v19 }
0x254e   :  { %v5365_v23 = vpop.xlane.xlu1 %5364 }
0x254f   :  { %v5369_v30 = vmul.f32 0.03125, %v5365_v23 }
0x2550   :  { %v5362_v32 = vpop.xlane.xlu0 %5361 }
0x2551   :  { %v5373_v27 = vsub.f32 %v13119_v11, %v5369_v30  ;;  %v5368_v24 = vmul.f32 0.03125, %v5362_v32 }
0x2553   :  { %v5372_v34 = vsub.f32 %v13121_v41, %v5368_v24  ;;  %v5377_v20 = vmul.f32 %v5373_v27, %v5373_v27 }
0x2555   :  { %v5387_v25 = vsel %vm170_vm1, %v5377_v20, 0.0  ;;  %v5376_v22 = vmul.f32 %v5372_v34, %v5372_v34 }
0x2556   :  { %5388 = vadd.xlane.f32.xlu1 %v5387_v25 }
0x2557   :  { %v5384_v49 = vsel %vm170_vm1, %v5376_v22, 0.0 }
0x2558   :  { %5385 = vadd.xlane.f32.xlu0 %v5384_v49 }
0x25d0   :  { %v5383_v36 = vpop.xlane.xlu1 %5382 }
0x25d1   :  { %v5391_v28 = vmul.f32 0.03125, %v5383_v36 }
0x25d2   :  { %v5380_v29 = vpop.xlane.xlu0 %5379 }
0x25d3   :  { %v5395_v54 = vadd.f32 1e-05, %v5391_v28  ;;  %v5390_v26 = vmul.f32 0.03125, %v5380_v29 }
0x25d5   :  { %11899 = vrsqrt.f32 %v5395_v54  ;;  %v5394_v53 = vadd.f32 1e-05, %v5390_v26 }
0x25d7   :  { %11901 = vrsqrt.f32 %v5394_v53 }
0x25df   :  { %v5389_v31 = vpop.xlane.xlu1 %5388 }
0x25e0   :  { %v5393_v38 = vmul.f32 0.03125, %v5389_v31 }
0x25e1   :  { %v5386_v58 = vpop.xlane.xlu0 %5385 }
0x25e2   :  { %v11900_v39 = vpop.eup %11899  ;;  %v5397_v42 = vadd.f32 1e-05, %v5393_v38  ;;  %v5392_v21 = vmul.f32 0.03125, %v5386_v58 }
0x25e3   :  { %v5403_v46 = vmul.f32 %v11900_v39, %v5371_v16 }
0x25e4   :  { %v11902_v61 = vpop.eup %11901  ;;  %11903 = vrsqrt.f32 %v5397_v42  ;;  %v5396_v0 = vadd.f32 1e-05, %v5392_v21 }
0x25e5   :  { %v5402_v2 = vmul.f32 %v11902_v61, %v5370_v17  ;;  %v5411_v4 = vmul.f32 %v10299_v60, %v5403_v46 }
0x25e6   :  { %11905 = vrsqrt.f32 %v5396_v0 }
0x25e7   :  { %v5410_v63 = vmul.f32 %v10299_v60, %v5402_v2  ;;  %v5419_v7 = vadd.f32 %v10300_v5, %v5411_v4 }
0x25e9   :  { %v5418_v8 = vadd.f32 %v10300_v5, %v5410_v63 }
0x25eb   :  { %11350 = vmatprep.mubr.msk.f32.mxu0 %vm170_vm1, %v5418_v8 }
0x25ec   :  { %11351 = vmatmul.mubr.msk.f32.vlgmr.msra.gmra.mxu0 %vm170_vm1, %v5419_v7 }
0x25f1   :  { %v11904_v9 = vpop.eup %11903 }
0x25f2   :  { %v5405_v10 = vmul.f32 %v11904_v9, %v5373_v27 }
0x25f3   :  { %v11906_v45 = vpop.eup %11905 }
0x25f4   :  { %v5404_v12 = vmul.f32 %v11906_v45, %v5372_v34  ;;  %v5413_v44 = vmul.f32 %v10299_v60, %v5405_v10 }
0x25f6   :  { %v5412_v13 = vmul.f32 %v10299_v60, %v5404_v12  ;;  %v5421_v14 = vadd.f32 %v10300_v5, %v5413_v44 }
0x25f8   :  { %v5420_v37 = vadd.f32 %v10300_v5, %v5412_v13 }
0x25fa   :  { %11353 = vmatprep.mubr.msk.f32.mxu0 %vm170_vm1, %v5420_v37 }
0x25fb   :  { %11354 = vmatmul.mubr.msk.f32.gmra.mxu0 %vm170_vm1, %v5421_v14 }
0x26ac   :  { %v11352_v16 = vpop.f32.mrf.mxu0 }
0x26ad   :  { %v13160_v51 = vadd.f32 %v11352_v16, %v10301_v15 }
0x26ae   :  { %v5504_v17 = vpop.f32.mrf.mxu0 }
0x26af   :  { %v13162_v50 = vadd.f32 %v10301_v15, %v5504_v17  ;;  %5531 = vrot.lane.b32.xlu0 %v13160_v51, %s12075_s24  ;;  %v13191_v34 = vmul.f32 0.35355338, %v13160_v51 }
0x26b1   :  { %5529 = vrot.lane.b32.xlu1 %v13162_v50, %s12075_s24  ;;  %v13169_v18 = vmul.f32 0.35355338, %v13162_v50 }
0x26b3   :  { %11360 = vmatprep.mubr.msk.f32.mxu1 %vm351_vm2, %v13169_v18 }
0x26bb   :  { %v11355_v43 = vpop.f32.mrf.mxu0 }
0x26bc   :  { %v13173_v19 = vadd.f32 %v11355_v43, %v10301_v15 }
0x26bd   :  { %v5514_v23 = vpop.f32.mrf.mxu0 }
0x26be   :  { %v13175_v30 = vadd.f32 %v10301_v15, %v5514_v23  ;;  %5622 = vrot.lane.b32.xlu1 %v13173_v19, %s12075_s24  ;;  %v13200_v22 = vmul.f32 0.35355338, %v13173_v19 }
0x26c0   :  { %v13180_v32 = vmul.f32 0.35355338, %v13175_v30 }
0x26c2   :  { %5620 = vrot.lane.b32.xlu1 %v13175_v30, %s12075_s24  ;;  %11367 = vmatprep.mubr.msk.f32.mxu0 %vm351_vm2, %v13180_v32 }
0x2721   :  { %v5532_v27 = vpop.permute.xlu0 %5531 }
0x2722   :  { %11356 = vmatprep.subr.msk.mxu1 %vm351_vm2, %v5532_v27 }
0x2723   :  { %v5530_v24 = vpop.permute.xlu1 %5529  ;;  %11357 = vmatpush3.xpose.msk.msra.mxu1 %vm351_vm2, %v5532_v27 }
0x2724   :  { %11358 = vmatprep.subr.msk.mxu1 %vm351_vm2, %v5530_v24 }
0x2727   :  { %11359 = vmatpush3.xpose.msk.msra.mxu1 %vm351_vm2, %v5530_v24 }
0x272a   :  { %11361 = vmatmul.mubr.msk.f32.vlgmr.msra.gmra.mxu1 %vm351_vm2, %v13191_v34 }
0x2730   :  { %v5623_v20 = vpop.permute.xlu1 %5622 }
0x2731   :  { %11363 = vmatprep.subr.msk.mxu0 %vm351_vm2, %v5623_v20 }
0x2732   :  { %11364 = vmatpush3.xpose.msk.msra.mxu0 %vm351_vm2, %v5623_v20 }
0x2734   :  { %v5621_v25 = vpop.permute.xlu1 %5620 }
0x2735   :  { %11365 = vmatprep.subr.msk.mxu0 %vm351_vm2, %v5621_v25 }
0x2736   :  { %11366 = vmatpush3.xpose.msk.msra.mxu0 %vm351_vm2, %v5621_v25 }
0x2739   :  { %11368 = vmatmul.mubr.msk.f32.vlgmr.msra.gmra.mxu0 %vm351_vm2, %v13200_v22 }
0x27ea   :  { %v11362_v49 = vpop.f32.mrf.mxu1 }
0x27eb   :  { %v5712_v59 = vsel %vm528_vm3, %v11362_v49, -inf }
0x27ec   :  { %5713 = vmax.xlane.f32.xlu1 %v5712_v59  ;;  %v5609_v55 = vpop.f32.mrf.mxu1 }
0x27ed   :  { %v5709_v52 = vsel %vm528_vm3, %v5609_v55, -inf }
0x27ee   :  { %5710 = vmax.xlane.f32.xlu0 %v5709_v52 }
0x27f9   :  { %v11369_v35 = vpop.f32.mrf.mxu0 }
0x27fa   :  { %v5718_v29 = vsel %vm528_vm3, %v11369_v35, -inf }
0x27fb   :  { %v5700_v36 = vpop.f32.mrf.mxu0 }
0x27fc   :  { %v5715_v28 = vsel %vm528_vm3, %v5700_v36, -inf }
0x27fd   :  { %5716 = vmax.xlane.f32.xlu0 %v5715_v28 }
0x2801   :  { %5719 = vmax.xlane.f32.xlu0 %v5718_v29 }
0x2875   :  { %v5714_v54 = vpop.xlane.xlu1 %5713 }
0x2876   :  { %v5722_v26 = vsub.f32 %v11362_v49, %v5714_v54 }
0x2877   :  { %v5711_v53 = vpop.xlane.xlu0 %5710 }
0x2878   :  { %v5727_v31 = vmul.f32 1.442695, %v5722_v26  ;;  %v5721_v38 = vsub.f32 %v5609_v55, %v5711_v53 }
0x287a   :  { %11907 = vpow2.f32 %v5727_v31  ;;  %v5725_v58 = vmul.f32 1.442695, %v5721_v38 }
0x287c   :  { %11909 = vpow2.f32 %v5725_v58 }
0x2886   :  { %v5717_v60 = vpop.xlane.xlu0 %5716 }
0x2887   :  { %v11908_v39 = vpop.eup %11907  ;;  %v5723_v61 = vsub.f32 %v5700_v36, %v5717_v60 }
0x2888   :  { %v5736_v42 = vsel %vm528_vm3, %v11908_v39, 0.0 }
0x2889   :  { %v11910_v21 = vpop.eup %11909  ;;  %5737 = vadd.xlane.f32.xlu1 %v5736_v42  ;;  %v5729_v2 = vmul.f32 1.442695, %v5723_v61 }
0x288a   :  { %v5733_v46 = vsel %vm528_vm3, %v11910_v21, 0.0  ;;  %v5720_v0 = vpop.xlane.xlu0 %5719 }
0x288b   :  { %5734 = vadd.xlane.f32.xlu0 %v5733_v46  ;;  %v5724_v4 = vsub.f32 %v11369_v35, %v5720_v0  ;;  %11911 = vpow2.f32 %v5729_v2 }
0x288d   :  { %v5731_v5 = vmul.f32 1.442695, %v5724_v4 }
0x288f   :  { %11913 = vpow2.f32 %v5731_v5 }
0x2898   :  { %v11912_v63 = vpop.eup %11911 }
0x2899   :  { %v5739_v8 = vsel %vm528_vm3, %v11912_v63, 0.0 }
0x289a   :  { %5753 = vrot.lane.b32.xlu1 %v13162_v50, %s12076_s25 }
0x289c   :  { %v11914_v7 = vpop.eup %11913 }
0x289d   :  { %v5742_v9 = vsel %vm528_vm3, %v11914_v7, 0.0 }
0x289e   :  { %5842 = vrot.lane.b32.xlu1 %v13173_v19, %s12076_s25 }
0x28a1   :  { %5755 = vrot.lane.b32.xlu0 %v13160_v51, %s12076_s25 }
0x28a2   :  { %5933 = vrot.lane.b32.xlu1 %v13160_v51, %s12077_s26 }
0x28a5   :  { %5840 = vrot.lane.b32.xlu0 %v13175_v30, %s12076_s25 }
0x28a6   :  { %5931 = vrot.lane.b32.xlu1 %v13162_v50, %s12077_s26 }
0x28a9   :  { %6024 = vrot.lane.b32.xlu0 %v13173_v19, %s12077_s26 }
0x28aa   :  { %5927 = vrot.lane.b32.xlu1 %v13169_v18, %s12078_s27 }
0x28c8   :  { %5740 = vadd.xlane.f32.xlu0 %v5739_v8 }
0x28ce   :  { %5743 = vadd.xlane.f32.xlu1 %v5742_v9 }
0x28de   :  { %5929 = vrot.lane.b32.xlu0 %v13191_v34, %s12078_s27 }
0x28df   :  { %6022 = vrot.lane.b32.xlu1 %v13175_v30, %s12077_s26 }
0x28e2   :  { %6018 = vrot.lane.b32.xlu0 %v13180_v32, %s12078_s27 }
0x28e3   :  { %6020 = vrot.lane.b32.xlu1 %v13200_v22, %s12078_s27 }
0x2912   :  { %v5738_v10 = vpop.xlane.xlu1 %5737 }
0x2913   :  { %11915 = vrcp.f32 %v5738_v10 }
0x2914   :  { %v5735_v45 = vpop.xlane.xlu0 %5734 }
0x2915   :  { %11917 = vrcp.f32 %v5735_v45 }
0x2916   :  { %v5754_v12 = vpop.permute.xlu1 %5753 }
0x2918   :  { %v5756_v44 = vpop.permute.xlu0 %5755 }
0x2919   :  { %11370 = vmatprep.subr.mxu1 %v5756_v44 }
0x291a   :  { %v5843_v13 = vpop.permute.xlu1 %5842  ;;  %11371 = vmatpush3.msra.mxu1 %v5756_v44 }
0x291b   :  { %11372 = vmatprep.subr.mxu1 %v5754_v12  ;;  %11377 = vmatprep.subr.mxu0 %v5843_v13 }
0x291c   :  { %11373 = vmatpush3.msra.mxu1 %v5754_v12  ;;  %11378 = vmatpush3.msra.mxu0 %v5843_v13  ;;  %v5841_v37 = vpop.permute.xlu0 %5840 }
0x291d   :  { %11379 = vmatprep.subr.mxu0 %v5841_v37 }
0x291e   :  { %v5934_v14 = vpop.permute.xlu1 %5933  ;;  %11380 = vmatpush3.msra.mxu0 %v5841_v37 }
0x291f   :  { %11384 = vmatprep.subr.msk.mxu1 %vm351_vm2, %v5934_v14 }
0x2920   :  { %v6025_v15 = vpop.permute.xlu0 %6024  ;;  %v11916_v16 = vpop.eup %11915 }
0x2921   :  { %11391 = vmatprep.subr.msk.mxu0 %vm351_vm2, %v6025_v15  ;;  %v5748_v27 = vmul.f32 %v11916_v16, %v11908_v39 }
0x2922   :  { %v11918_v17 = vpop.eup %11917  ;;  %v5932_v43 = vpop.permute.xlu1 %5931 }
0x2923   :  { %v5746_v23 = vmul.f32 %v11918_v17, %v11910_v21 }
0x2925   :  { %11374 = vmatprep.mubr.msk.f32.mxu1 %vm528_vm3, %v5746_v23 }
0x2926   :  { %v5928_v24 = vpop.permute.xlu1 %5927  ;;  %11375 = vmatmul.mubr.msk.f32.vlgmr.msra.gmra.mxu1 %vm528_vm3, %v5748_v27 }
0x2927   :  { %11385 = vmatpush3.xpose.msk.msra.mxu1 %vm351_vm2, %v5934_v14  ;;  %11388 = vmatprep.mubr.msk.f32.mxu1 %vm351_vm2, %v5928_v24 }
0x2928   :  { %11386 = vmatprep.subr.msk.mxu1 %vm351_vm2, %v5932_v43 }
0x292b   :  { %11387 = vmatpush3.xpose.msk.msra.mxu1 %vm351_vm2, %v5932_v43 }
0x2951   :  { %v5741_v20 = vpop.xlane.xlu0 %5740 }
0x2952   :  { %11919 = vrcp.f32 %v5741_v20 }
0x2955   :  { %v5930_v25 = vpop.permute.xlu0 %5929 }
0x2956   :  { %11389 = vmatmul.mubr.msk.f32.vlgmr.msra.gmra.mxu1 %vm351_vm2, %v5930_v25 }
0x2957   :  { %v5744_v49 = vpop.xlane.xlu1 %5743 }
0x2958   :  { %11921 = vrcp.f32 %v5744_v49 }
0x2959   :  { %v6019_v36 = vpop.permute.xlu0 %6018 }
0x295b   :  { %v6023_v28 = vpop.permute.xlu1 %6022 }
0x295f   :  { %v11920_v59 = vpop.eup %11919  ;;  %v6021_v29 = vpop.permute.xlu1 %6020 }
0x2960   :  { %v5750_v55 = vmul.f32 %v11920_v59, %v11912_v63 }
0x2962   :  { %11381 = vmatprep.mubr.msk.f32.mxu0 %vm528_vm3, %v5750_v55 }
0x2965   :  { %v11922_v52 = vpop.eup %11921 }
0x2966   :  { %v5752_v35 = vmul.f32 %v11922_v52, %v11914_v7 }
0x2968   :  { %11382 = vmatmul.mubr.msk.f32.vlgmr.msra.gmra.mxu0 %vm528_vm3, %v5752_v35 }
0x2969   :  { %11392 = vmatpush3.xpose.msk.msra.mxu0 %vm351_vm2, %v6025_v15  ;;  %11395 = vmatprep.mubr.msk.f32.mxu0 %vm351_vm2, %v6019_v36 }
0x296a   :  { %11393 = vmatprep.subr.msk.mxu0 %vm351_vm2, %v6023_v28 }
0x296d   :  { %11394 = vmatpush3.xpose.msk.msra.mxu0 %vm351_vm2, %v6023_v28 }
0x2970   :  { %11396 = vmatmul.mubr.msk.f32.vlgmr.msra.gmra.mxu0 %vm351_vm2, %v6021_v29 }
0x29e6   :  { %v13252_v54 = vpop.f32.mrf.mxu1 }
0x29e8   :  { %v13254_v26 = vpop.f32.mrf.mxu1 }
0x2a16   :  { %v11390_v53 = vpop.f32.mrf.mxu1 }
0x2a17   :  { %v6112_v31 = vsel %vm528_vm3, %v11390_v53, -inf }
0x2a18   :  { %6113 = vmax.xlane.f32.xlu1 %v6112_v31  ;;  %v6009_v38 = vpop.f32.mrf.mxu1 }
0x2a19   :  { %v6109_v58 = vsel %vm528_vm3, %v6009_v38, -inf }
0x2a1a   :  { %6110 = vmax.xlane.f32.xlu0 %v6109_v58 }
0x2a28   :  { %v13258_v39 = vpop.f32.mrf.mxu0 }
0x2a2a   :  { %v13260_v42 = vpop.f32.mrf.mxu0 }
0x2a30   :  { %v11397_v21 = vpop.f32.mrf.mxu0 }
0x2a31   :  { %v6118_v61 = vsel %vm528_vm3, %v11397_v21, -inf }
0x2a32   :  { %v6100_v46 = vpop.f32.mrf.mxu0 }
0x2a33   :  { %v6115_v60 = vsel %vm528_vm3, %v6100_v46, -inf }
0x2a34   :  { %6116 = vmax.xlane.f32.xlu0 %v6115_v60 }
0x2a38   :  { %6119 = vmax.xlane.f32.xlu0 %v6118_v61 }
0x2aa1   :  { %v6114_v0 = vpop.xlane.xlu1 %6113 }
0x2aa2   :  { %v6122_v2 = vsub.f32 %v11390_v53, %v6114_v0 }
0x2aa3   :  { %v6111_v4 = vpop.xlane.xlu0 %6110 }
0x2aa4   :  { %v6127_v5 = vmul.f32 1.442695, %v6122_v2  ;;  %v6121_v63 = vsub.f32 %v6009_v38, %v6111_v4 }
0x2aa6   :  { %11923 = vpow2.f32 %v6127_v5  ;;  %v6125_v8 = vmul.f32 1.442695, %v6121_v63 }
0x2aa8   :  { %11925 = vpow2.f32 %v6125_v8 }
0x2ab3   :  { %v11924_v7 = vpop.eup %11923 }
0x2ab4   :  { %v6136_v9 = vsel %vm528_vm3, %v11924_v7, 0.0 }
0x2ab5   :  { %v11926_v10 = vpop.eup %11925  ;;  %6137 = vadd.xlane.f32.xlu1 %v6136_v9 }
0x2ab6   :  { %v6133_v45 = vsel %vm528_vm3, %v11926_v10, 0.0 }
0x2ab7   :  { %6134 = vadd.xlane.f32.xlu0 %v6133_v45 }
0x2abd   :  { %v6117_v12 = vpop.xlane.xlu0 %6116 }
0x2abe   :  { %v6123_v44 = vsub.f32 %v6100_v46, %v6117_v12 }
0x2ac0   :  { %v6129_v37 = vmul.f32 1.442695, %v6123_v44 }
0x2ac1   :  { %v6120_v13 = vpop.xlane.xlu0 %6119 }
0x2ac2   :  { %v6124_v14 = vsub.f32 %v11397_v21, %v6120_v13  ;;  %11927 = vpow2.f32 %v6129_v37 }
0x2ac4   :  { %v6131_v15 = vmul.f32 1.442695, %v6124_v14 }
0x2ac6   :  { %6153 = vrot.lane.b32.xlu1 %v13162_v50, %s12079_s28  ;;  %11929 = vpow2.f32 %v6131_v15 }
0x2aca   :  { %6242 = vrot.lane.b32.xlu1 %v13173_v19, %s12079_s28 }
0x2acd   :  { %6155 = vrot.lane.b32.xlu0 %v13160_v51, %s12079_s28 }
0x2ace   :  { %6333 = vrot.lane.b32.xlu1 %v13160_v51, %s12080_s29 }
0x2acf   :  { %v11928_v16 = vpop.eup %11927 }
0x2ad0   :  { %v6139_v17 = vsel %vm528_vm3, %v11928_v16, 0.0 }
0x2ad1   :  { %6240 = vrot.lane.b32.xlu0 %v13175_v30, %s12079_s28 }
0x2ad2   :  { %6331 = vrot.lane.b32.xlu1 %v13162_v50, %s12080_s29 }
0x2ad3   :  { %v11930_v43 = vpop.eup %11929 }
0x2ad4   :  { %v6142_v23 = vsel %vm528_vm3, %v11930_v43, 0.0 }
0x2ad5   :  { %6424 = vrot.lane.b32.xlu0 %v13173_v19, %s12080_s29 }
0x2ad6   :  { %6327 = vrot.lane.b32.xlu1 %v13169_v18, %s12081_s30 }
0x2af4   :  { %6140 = vadd.xlane.f32.xlu0 %v6139_v17 }
0x2afa   :  { %6143 = vadd.xlane.f32.xlu1 %v6142_v23 }
0x2b0a   :  { %6329 = vrot.lane.b32.xlu0 %v13191_v34, %s12081_s30 }
0x2b0b   :  { %6422 = vrot.lane.b32.xlu1 %v13175_v30, %s12080_s29 }
0x2b0e   :  { %6418 = vrot.lane.b32.xlu0 %v13180_v32, %s12081_s30 }
0x2b0f   :  { %6420 = vrot.lane.b32.xlu1 %v13200_v22, %s12081_s30 }
0x2b3e   :  { %v6138_v27 = vpop.xlane.xlu1 %6137 }
0x2b3f   :  { %11931 = vrcp.f32 %v6138_v27 }
0x2b40   :  { %v6135_v24 = vpop.xlane.xlu0 %6134 }
0x2b41   :  { %11933 = vrcp.f32 %v6135_v24 }
0x2b42   :  { %v6154_v20 = vpop.permute.xlu1 %6153 }
0x2b44   :  { %v6156_v25 = vpop.permute.xlu0 %6155 }
0x2b45   :  { %11398 = vmatprep.subr.mxu1 %v6156_v25 }
0x2b46   :  { %v6243_v49 = vpop.permute.xlu1 %6242  ;;  %11399 = vmatpush3.msra.mxu1 %v6156_v25 }
0x2b47   :  { %11400 = vmatprep.subr.mxu1 %v6154_v20  ;;  %11405 = vmatprep.subr.mxu0 %v6243_v49 }
0x2b48   :  { %11401 = vmatpush3.msra.mxu1 %v6154_v20  ;;  %11406 = vmatpush3.msra.mxu0 %v6243_v49  ;;  %v6241_v59 = vpop.permute.xlu0 %6240 }
0x2b49   :  { %11407 = vmatprep.subr.mxu0 %v6241_v59 }
0x2b4a   :  { %v6334_v55 = vpop.permute.xlu1 %6333  ;;  %11408 = vmatpush3.msra.mxu0 %v6241_v59 }
0x2b4b   :  { %11412 = vmatprep.subr.msk.mxu1 %vm351_vm2, %v6334_v55 }
0x2b4c   :  { %v6425_v52 = vpop.permute.xlu0 %6424  ;;  %v11932_v35 = vpop.eup %11931 }
0x2b4d   :  { %11419 = vmatprep.subr.msk.mxu0 %vm351_vm2, %v6425_v52  ;;  %v6148_v53 = vmul.f32 %v11932_v35, %v11924_v7 }
0x2b4e   :  { %v11934_v36 = vpop.eup %11933  ;;  %v6332_v28 = vpop.permute.xlu1 %6331 }
0x2b4f   :  { %v6146_v29 = vmul.f32 %v11934_v36, %v11926_v10 }
0x2b51   :  { %11402 = vmatprep.mubr.msk.f32.mxu1 %vm528_vm3, %v6146_v29 }
0x2b52   :  { %v6328_v31 = vpop.permute.xlu1 %6327  ;;  %11403 = vmatmul.mubr.msk.f32.vlgmr.msra.gmra.mxu1 %vm528_vm3, %v6148_v53 }
0x2b53   :  { %11413 = vmatpush3.xpose.msk.msra.mxu1 %vm351_vm2, %v6334_v55  ;;  %11416 = vmatprep.mubr.msk.f32.mxu1 %vm351_vm2, %v6328_v31 }
0x2b54   :  { %11414 = vmatprep.subr.msk.mxu1 %vm351_vm2, %v6332_v28 }
0x2b57   :  { %11415 = vmatpush3.xpose.msk.msra.mxu1 %vm351_vm2, %v6332_v28 }
0x2b7d   :  { %v6141_v38 = vpop.xlane.xlu0 %6140 }
0x2b7e   :  { %11935 = vrcp.f32 %v6141_v38 }
0x2b81   :  { %v6330_v58 = vpop.permute.xlu0 %6329 }
0x2b82   :  { %11417 = vmatmul.mubr.msk.f32.vlgmr.msra.gmra.mxu1 %vm351_vm2, %v6330_v58 }
0x2b83   :  { %v6144_v21 = vpop.xlane.xlu1 %6143 }
0x2b84   :  { %11937 = vrcp.f32 %v6144_v21 }
0x2b85   :  { %v6419_v2 = vpop.permute.xlu0 %6418 }
0x2b87   :  { %v6423_v4 = vpop.permute.xlu1 %6422 }
0x2b8b   :  { %v11936_v46 = vpop.eup %11935  ;;  %v6421_v5 = vpop.permute.xlu1 %6420 }
0x2b8c   :  { %v6150_v60 = vmul.f32 %v11936_v46, %v11928_v16 }
0x2b8e   :  { %11409 = vmatprep.mubr.msk.f32.mxu0 %vm528_vm3, %v6150_v60 }
0x2b91   :  { %v11938_v61 = vpop.eup %11937 }
0x2b92   :  { %v6152_v0 = vmul.f32 %v11938_v61, %v11930_v43 }
0x2b94   :  { %11410 = vmatmul.mubr.msk.f32.vlgmr.msra.gmra.mxu0 %vm528_vm3, %v6152_v0 }
0x2b95   :  { %11420 = vmatpush3.xpose.msk.msra.mxu0 %vm351_vm2, %v6425_v52  ;;  %11423 = vmatprep.mubr.msk.f32.mxu0 %vm351_vm2, %v6419_v2 }
0x2b96   :  { %11421 = vmatprep.subr.msk.mxu0 %vm351_vm2, %v6423_v4 }
0x2b99   :  { %11422 = vmatpush3.xpose.msk.msra.mxu0 %vm351_vm2, %v6423_v4 }
0x2b9c   :  { %11424 = vmatmul.mubr.msk.f32.vlgmr.msra.gmra.mxu0 %vm351_vm2, %v6421_v5 }
0x2c12   :  { %v13308_v63 = vpop.f32.mrf.mxu1 }
0x2c14   :  { %v13310_v8 = vpop.f32.mrf.mxu1 }
0x2c42   :  { %v11418_v7 = vpop.f32.mrf.mxu1 }
0x2c43   :  { %v6512_v9 = vsel %vm528_vm3, %v11418_v7, -inf }
0x2c44   :  { %6513 = vmax.xlane.f32.xlu1 %v6512_v9  ;;  %v6409_v10 = vpop.f32.mrf.mxu1 }
0x2c45   :  { %v6509_v45 = vsel %vm528_vm3, %v6409_v10, -inf }
0x2c46   :  { %6510 = vmax.xlane.f32.xlu0 %v6509_v45 }
0x2c54   :  { %v13314_v12 = vpop.f32.mrf.mxu0 }
0x2c56   :  { %v13316_v44 = vpop.f32.mrf.mxu0 }
0x2c5c   :  { %v11425_v13 = vpop.f32.mrf.mxu0 }
0x2c5d   :  { %v6518_v15 = vsel %vm528_vm3, %v11425_v13, -inf }
0x2c5e   :  { %v6500_v37 = vpop.f32.mrf.mxu0 }
0x2c5f   :  { %v6515_v14 = vsel %vm528_vm3, %v6500_v37, -inf }
0x2c60   :  { %6516 = vmax.xlane.f32.xlu0 %v6515_v14 }
0x2c64   :  { %6519 = vmax.xlane.f32.xlu0 %v6518_v15 }
0x2ccd   :  { %v6514_v16 = vpop.xlane.xlu1 %6513 }
0x2cce   :  { %v6522_v17 = vsub.f32 %v11418_v7, %v6514_v16 }
0x2ccf   :  { %v6511_v43 = vpop.xlane.xlu0 %6510 }
0x2cd0   :  { %v6527_v23 = vmul.f32 1.442695, %v6522_v17  ;;  %v6521_v27 = vsub.f32 %v6409_v10, %v6511_v43 }
0x2cd2   :  { %11939 = vpow2.f32 %v6527_v23  ;;  %v6525_v24 = vmul.f32 1.442695, %v6521_v27 }
0x2cd4   :  { %11941 = vpow2.f32 %v6525_v24 }
0x2cdf   :  { %v11940_v20 = vpop.eup %11939 }
0x2ce0   :  { %v6536_v25 = vsel %vm528_vm3, %v11940_v20, 0.0 }
0x2ce1   :  { %v11942_v49 = vpop.eup %11941  ;;  %6537 = vadd.xlane.f32.xlu1 %v6536_v25 }
0x2ce2   :  { %v6533_v59 = vsel %vm528_vm3, %v11942_v49, 0.0 }
0x2ce3   :  { %6534 = vadd.xlane.f32.xlu0 %v6533_v59 }
0x2ce9   :  { %v6517_v55 = vpop.xlane.xlu0 %6516 }
0x2cea   :  { %v6523_v52 = vsub.f32 %v6500_v37, %v6517_v55 }
0x2cec   :  { %v6529_v36 = vmul.f32 1.442695, %v6523_v52 }
0x2ced   :  { %v6520_v35 = vpop.xlane.xlu0 %6519 }
0x2cee   :  { %v6524_v28 = vsub.f32 %v11425_v13, %v6520_v35  ;;  %11943 = vpow2.f32 %v6529_v36 }
0x2cf0   :  { %v6531_v29 = vmul.f32 1.442695, %v6524_v28 }
0x2cf2   :  { %6553 = vrot.lane.b32.xlu1 %v13162_v50, %s12082_s4  ;;  %11945 = vpow2.f32 %v6531_v29 }
0x2cf6   :  { %6642 = vrot.lane.b32.xlu1 %v13173_v19, %s12082_s4 }
0x2cf9   :  { %6555 = vrot.lane.b32.xlu0 %v13160_v51, %s12082_s4 }
0x2cfa   :  { %6733 = vrot.lane.b32.xlu1 %v13160_v51, %s12083_s5 }
0x2cfb   :  { %v11944_v53 = vpop.eup %11943 }
0x2cfc   :  { %v6539_v31 = vsel %vm528_vm3, %v11944_v53, 0.0 }
0x2cfd   :  { %6640 = vrot.lane.b32.xlu0 %v13175_v30, %s12082_s4 }
0x2cfe   :  { %6731 = vrot.lane.b32.xlu1 %v13162_v50, %s12083_s5 }
0x2cff   :  { %v11946_v38 = vpop.eup %11945 }
0x2d00   :  { %v6542_v58 = vsel %vm528_vm3, %v11946_v38, 0.0 }
0x2d01   :  { %6824 = vrot.lane.b32.xlu0 %v13173_v19, %s12083_s5 }
0x2d02   :  { %6727 = vrot.lane.b32.xlu1 %v13169_v18, %s12084_s6 }
0x2d20   :  { %6540 = vadd.xlane.f32.xlu0 %v6539_v31 }
0x2d26   :  { %6543 = vadd.xlane.f32.xlu1 %v6542_v58 }
0x2d36   :  { %6729 = vrot.lane.b32.xlu0 %v13191_v34, %s12084_s6 }
0x2d37   :  { %6822 = vrot.lane.b32.xlu1 %v13175_v30, %s12083_s5 }
0x2d3a   :  { %6818 = vrot.lane.b32.xlu0 %v13180_v32, %s12084_s6 }
0x2d3b   :  { %6820 = vrot.lane.b32.xlu1 %v13200_v22, %s12084_s6 }
0x2d6a   :  { %v6538_v18 = vpop.xlane.xlu1 %6537 }
0x2d6b   :  { %11947 = vrcp.f32 %v6538_v18 }
0x2d6c   :  { %v6535_v21 = vpop.xlane.xlu0 %6534 }
0x2d6d   :  { %11949 = vrcp.f32 %v6535_v21 }
0x2d6e   :  { %v6554_v46 = vpop.permute.xlu1 %6553 }
0x2d70   :  { %v6556_v60 = vpop.permute.xlu0 %6555 }
0x2d71   :  { %11426 = vmatprep.subr.mxu1 %v6556_v60 }
0x2d72   :  { %v6643_v61 = vpop.permute.xlu1 %6642  ;;  %11427 = vmatpush3.msra.mxu1 %v6556_v60 }
0x2d73   :  { %11428 = vmatprep.subr.mxu1 %v6554_v46  ;;  %11433 = vmatprep.subr.mxu0 %v6643_v61 }
0x2d74   :  { %11429 = vmatpush3.msra.mxu1 %v6554_v46  ;;  %11434 = vmatpush3.msra.mxu0 %v6643_v61  ;;  %v6641_v34 = vpop.permute.xlu0 %6640 }
0x2d75   :  { %11435 = vmatprep.subr.mxu0 %v6641_v34 }
0x2d76   :  { %v6734_v0 = vpop.permute.xlu1 %6733  ;;  %11436 = vmatpush3.msra.mxu0 %v6641_v34 }
0x2d77   :  { %11440 = vmatprep.subr.msk.mxu1 %vm351_vm2, %v6734_v0 }
0x2d78   :  { %v6825_v32 = vpop.permute.xlu0 %6824  ;;  %v11948_v22 = vpop.eup %11947 }
0x2d79   :  { %11447 = vmatprep.subr.msk.mxu0 %vm351_vm2, %v6825_v32  ;;  %v6548_v7 = vmul.f32 %v11948_v22, %v11940_v20 }
0x2d7a   :  { %v11950_v2 = vpop.eup %11949  ;;  %v6732_v4 = vpop.permute.xlu1 %6731 }
0x2d7b   :  { %v6546_v5 = vmul.f32 %v11950_v2, %v11942_v49 }
0x2d7d   :  { %11430 = vmatprep.mubr.msk.f32.mxu1 %vm528_vm3, %v6546_v5 }
0x2d7e   :  { %v6728_v9 = vpop.permute.xlu1 %6727  ;;  %11431 = vmatmul.mubr.msk.f32.vlgmr.msra.gmra.mxu1 %vm528_vm3, %v6548_v7 }
0x2d7f   :  { %11441 = vmatpush3.xpose.msk.msra.mxu1 %vm351_vm2, %v6734_v0  ;;  %11444 = vmatprep.mubr.msk.f32.mxu1 %vm351_vm2, %v6728_v9 }
0x2d80   :  { %11442 = vmatprep.subr.msk.mxu1 %vm351_vm2, %v6732_v4 }
0x2d83   :  { %11443 = vmatpush3.xpose.msk.msra.mxu1 %vm351_vm2, %v6732_v4 }
0x2da9   :  { %v6541_v10 = vpop.xlane.xlu0 %6540 }
0x2daa   :  { %11951 = vrcp.f32 %v6541_v10 }
0x2dad   :  { %v6730_v45 = vpop.permute.xlu0 %6729 }
0x2dae   :  { %11445 = vmatmul.mubr.msk.f32.vlgmr.msra.gmra.mxu1 %vm351_vm2, %v6730_v45 }
0x2daf   :  { %v6544_v13 = vpop.xlane.xlu1 %6543 }
0x2db0   :  { %11953 = vrcp.f32 %v6544_v13 }
0x2db1   :  { %v6819_v17 = vpop.permute.xlu0 %6818 }
0x2db3   :  { %v6823_v43 = vpop.permute.xlu1 %6822 }
0x2db7   :  { %v11952_v37 = vpop.eup %11951  ;;  %v6821_v23 = vpop.permute.xlu1 %6820 }
0x2db8   :  { %v6550_v14 = vmul.f32 %v11952_v37, %v11944_v53 }
0x2dba   :  { %11437 = vmatprep.mubr.msk.f32.mxu0 %vm528_vm3, %v6550_v14 }
0x2dbd   :  { %v11954_v15 = vpop.eup %11953 }
0x2dbe   :  { %v6552_v16 = vmul.f32 %v11954_v15, %v11946_v38 }
0x2dc0   :  { %11438 = vmatmul.mubr.msk.f32.vlgmr.msra.gmra.mxu0 %vm528_vm3, %v6552_v16 }
0x2dc1   :  { %11448 = vmatpush3.xpose.msk.msra.mxu0 %vm351_vm2, %v6825_v32  ;;  %11451 = vmatprep.mubr.msk.f32.mxu0 %vm351_vm2, %v6819_v17 }
0x2dc2   :  { %11449 = vmatprep.subr.msk.mxu0 %vm351_vm2, %v6823_v43 }
0x2dc5   :  { %11450 = vmatpush3.xpose.msk.msra.mxu0 %vm351_vm2, %v6823_v43 }
0x2dc8   :  { %11452 = vmatmul.mubr.msk.f32.vlgmr.msra.gmra.mxu0 %vm351_vm2, %v6821_v23 }
0x2e3e   :  { %v11432_v27 = vpop.f32.mrf.mxu1 }
0x2e40   :  { %v6631_v24 = vpop.f32.mrf.mxu1 }
0x2e6e   :  { %v11446_v20 = vpop.f32.mrf.mxu1 }
0x2e6f   :  { %v6912_v25 = vsel %vm528_vm3, %v11446_v20, -inf }
0x2e70   :  { %6913 = vmax.xlane.f32.xlu1 %v6912_v25  ;;  %v6809_v49 = vpop.f32.mrf.mxu1  ;;  %v10283_v25 = vld [vmem:[%s14000_s1 + $0x380] sm:$0xff] }
0x2e71   :  { %v6909_v59 = vsel %vm528_vm3, %v6809_v49, -inf }
0x2e72   :  { %6910 = vmax.xlane.f32.xlu0 %v6909_v59 }
0x2e80   :  { %v11439_v55 = vpop.f32.mrf.mxu0 }
0x2e82   :  { %v6718_v52 = vpop.f32.mrf.mxu0 }
0x2e88   :  { %v11453_v35 = vpop.f32.mrf.mxu0 }
0x2e89   :  { %v6918_v29 = vsel %vm528_vm3, %v11453_v35, -inf }
0x2e8a   :  { %v6900_v36 = vpop.f32.mrf.mxu0 }
0x2e8b   :  { %v6915_v28 = vsel %vm528_vm3, %v6900_v36, -inf }
0x2e8c   :  { %6916 = vmax.xlane.f32.xlu0 %v6915_v28 }
0x2e90   :  { %6919 = vmax.xlane.f32.xlu0 %v6918_v29 }
0x2ef9   :  { %v6914_v53 = vpop.xlane.xlu1 %6913 }
0x2efa   :  { %v6922_v31 = vsub.f32 %v11446_v20, %v6914_v53  ;;  %v10284_v20 = vld [vmem:[%s14000_s1 + $0x388] sm:$0xff] }
0x2efb   :  { %v6911_v38 = vpop.xlane.xlu0 %6910 }
0x2efc   :  { %v6927_v58 = vmul.f32 1.442695, %v6922_v31  ;;  %v6921_v18 = vsub.f32 %v6809_v49, %v6911_v38 }
0x2efe   :  { %11955 = vpow2.f32 %v6927_v58  ;;  %v6925_v21 = vmul.f32 1.442695, %v6921_v18 }
0x2f00   :  { %11957 = vpow2.f32 %v6925_v21 }
0x2f0b   :  { %v11956_v46 = vpop.eup %11955 }
0x2f0c   :  { %v6936_v60 = vsel %vm528_vm3, %v11956_v46, 0.0 }
0x2f0d   :  { %v11958_v61 = vpop.eup %11957  ;;  %6937 = vadd.xlane.f32.xlu1 %v6936_v60 }
0x2f0e   :  { %v6933_v34 = vsel %vm528_vm3, %v11958_v61, 0.0 }
0x2f0f   :  { %6934 = vadd.xlane.f32.xlu0 %v6933_v34 }
0x2f15   :  { %v6917_v0 = vpop.xlane.xlu0 %6916 }
0x2f16   :  { %v6923_v32 = vsub.f32 %v6900_v36, %v6917_v0 }
0x2f18   :  { %v6929_v22 = vmul.f32 1.442695, %v6923_v32 }
0x2f19   :  { %v6920_v2 = vpop.xlane.xlu0 %6919 }
0x2f1a   :  { %11959 = vpow2.f32 %v6929_v22  ;;  %v6924_v4 = vsub.f32 %v11453_v35, %v6920_v2 }
0x2f1c   :  { %v6931_v5 = vmul.f32 1.442695, %v6924_v4 }
0x2f1e   :  { %11961 = vpow2.f32 %v6931_v5 }
0x2f27   :  { %v11960_v7 = vpop.eup %11959 }
0x2f28   :  { %v6939_v9 = vsel %vm528_vm3, %v11960_v7, 0.0 }
0x2f29   :  { %6940 = vadd.xlane.f32.xlu0 %v6939_v9 }
0x2f2b   :  { %v11962_v10 = vpop.eup %11961 }
0x2f2c   :  { %v6942_v45 = vsel %vm528_vm3, %v11962_v10, 0.0 }
0x2f2d   :  { %6943 = vadd.xlane.f32.xlu1 %v6942_v45 }
0x2f3e   :  { %6953 = vrot.lane.b32.xlu1 %v13162_v50, %s12085_s7 }
0x2f3f   :  { %6955 = vrot.lane.b32.xlu0 %v13160_v51, %s12085_s7 }
0x2f42   :  { %7042 = vrot.lane.b32.xlu1 %v13173_v19, %s12085_s7 }
0x2f43   :  { %7131 = vrot.lane.b32.xlu0 %v13310_v8, %s12086_s8 }
0x2f46   :  { %7040 = vrot.lane.b32.xlu1 %v13175_v30, %s12085_s7 }
0x2f47   :  { %7147 = vrot.lane.b32.xlu0 %v6631_v24, %s12087_s0  ;;  %v10285_v24 = vld [vmem:[%s14000_s1 + $0x390] sm:$0xff] }
0x2f4a   :  { %7133 = vrot.lane.b32.xlu1 %v13308_v63, %s12086_s8 }
0x2f4b   :  { %7135 = vrot.lane.b32.xlu0 %v13316_v44, %s12086_s8 }
0x2f4e   :  { %7149 = vrot.lane.b32.xlu1 %v11432_v27, %s12087_s0  ;;  %v10286_v27 = vld [vmem:[%s14000_s1 + $0x398] sm:$0xff] }
0x2f4f   :  { %7151 = vrot.lane.b32.xlu0 %v6718_v52, %s12087_s0 }
0x2f52   :  { %7137 = vrot.lane.b32.xlu1 %v13314_v12, %s12086_s8 }
0x2f56   :  { %7153 = vrot.lane.b32.xlu1 %v11439_v55, %s12087_s0 }
0x2f96   :  { %v6938_v30 = vpop.xlane.xlu1 %6937 }
0x2f98   :  { %v6935_v51 = vpop.xlane.xlu0 %6934 }
0x2f99   :  { %11963 = vrcp.f32 %v6935_v51 }
0x2f9a   :  { %11965 = vrcp.f32 %v6938_v30 }
0x2fa6   :  { %v11964_v50 = vpop.eup %11963 }
0x2fa7   :  { %v6946_v19 = vmul.f32 %v11964_v50, %v11958_v61  ;;  %v11966_v13 = vpop.eup %11965 }
0x2fa8   :  { %v6948_v12 = vmul.f32 %v11966_v13, %v11956_v46 }
0x2fa9   :  { %11458 = vmatprep.mubr.msk.f32.mxu1 %vm528_vm3, %v6946_v19 }
0x2fb2   :  { %v6941_v63 = vpop.xlane.xlu0 %6940 }
0x2fb3   :  { %11967 = vrcp.f32 %v6941_v63 }
0x2fb6   :  { %v6944_v8 = vpop.xlane.xlu1 %6943  ;;  %v6956_v44 = vpop.permute.xlu0 %6955 }
0x2fb7   :  { %11969 = vrcp.f32 %v6944_v8  ;;  %11454 = vmatprep.subr.mxu1 %v6956_v44 }
0x2fb8   :  { %11455 = vmatpush3.msra.mxu1 %v6956_v44 }
0x2fba   :  { %v6954_v37 = vpop.permute.xlu1 %6953  ;;  %v7132_v36 = vpop.permute.xlu0 %7131 }
0x2fbb   :  { %11456 = vmatprep.subr.mxu1 %v6954_v37  ;;  %v7175_v18 = vsel %vm351_vm2, %v13254_v26, %v7132_v36 }
0x2fbc   :  { %11457 = vmatpush3.msra.mxu1 %v6954_v37 }
0x2fbd   :  { %11459 = vmatmul.mubr.msk.f32.vlgmr.msra.gmra.mxu1 %vm528_vm3, %v6948_v12  ;;  %11468 = vmatprep.subr.mxu1 %v10286_v27 }
0x2fbe   :  { %v7043_v14 = vpop.permute.xlu1 %7042  ;;  %11469 = vmatpush3.msra.mxu1 %v10286_v27  ;;  %v7148_v29 = vpop.permute.xlu0 %7147 }
0x2fbf   :  { %11461 = vmatprep.subr.mxu0 %v7043_v14  ;;  %11470 = vmatprep.subr.mxu1 %v10285_v24  ;;  %v7179_v46 = vsel %vm528_vm3, %v7175_v18, %v7148_v29  ;;  %v10287_v18 = vld [vmem:[%s14000_s1 + $0x3c0] sm:$0xff] }
0x2fc0   :  { %v11968_v15 = vpop.eup %11967  ;;  %11462 = vmatpush3.msra.mxu0 %v7043_v14  ;;  %11471 = vmatpush3.msra.mxu1 %v10285_v24 }
0x2fc1   :  { %v6950_v16 = vmul.f32 %v11968_v15, %v11960_v7  ;;  %11472 = vmatprep.subr.mxu1 %v10284_v20 }
0x2fc2   :  { %v7041_v17 = vpop.permute.xlu1 %7040  ;;  %11473 = vmatpush3.msra.mxu1 %v10284_v20  ;;  %v7136_v31 = vpop.permute.xlu0 %7135 }
0x2fc3   :  { %11463 = vmatprep.subr.mxu0 %v7041_v17  ;;  %11465 = vmatprep.mubr.msk.f32.mxu0 %vm528_vm3, %v6950_v16  ;;  %v7177_v26 = vsel %vm351_vm2, %v13260_v42, %v7136_v31  ;;  %v10358_v42 = vld [vmem:[%s14002_s2 + $0x16] ss:$0 sm:$0xff]  ;;  %v10290_v31 = vld [vmem:[%s14000_s1 + $0x3d8] sm:$0xff] }
0x2fc4   :  { %v11970_v43 = vpop.eup %11969  ;;  %11464 = vmatpush3.msra.mxu0 %v7041_v17  ;;  %11474 = vmatprep.subr.mxu1 %v10283_v25 }
0x2fc5   :  { %v6952_v23 = vmul.f32 %v11970_v43, %v11962_v10  ;;  %11475 = vmatpush3.msra.mxu1 %v10283_v25  ;;  %11482 = vmatprep.subr.mxu0 %v10290_v31 }
0x2fc6   :  { %v7134_v35 = vpop.permute.xlu1 %7133  ;;  %v7152_v58 = vpop.permute.xlu0 %7151 }
0x2fc7   :  { %11466 = vmatmul.mubr.msk.f32.vlgmr.msra.gmra.mxu0 %vm528_vm3, %v6952_v23  ;;  %v7176_v60 = vsel %vm351_vm2, %v13252_v54, %v7134_v35  ;;  %v7181_v2 = vsel %vm528_vm3, %v7177_v26, %v7152_v58  ;;  %v10288_v58 = vld [vmem:[%s14000_s1 + $0x3c8] sm:$0xff] }
0x2fc8   :  { %11483 = vmatpush3.msra.mxu0 %v10290_v31 }
0x2fca   :  { %v7150_v28 = vpop.permute.xlu1 %7149 }
0x2fcb   :  { %v7180_v34 = vsel %vm528_vm3, %v7176_v60, %v7150_v28 }
0x2fce   :  { %v7138_v53 = vpop.permute.xlu1 %7137 }
0x2fcf   :  { %v7178_v54 = vsel %vm351_vm2, %v13258_v39, %v7138_v53 }
0x2fd2   :  { %v7154_v38 = vpop.permute.xlu1 %7153 }
0x2fd3   :  { %v7182_v5 = vsel %vm528_vm3, %v7178_v54, %v7154_v38  ;;  %v10289_v38 = vld [vmem:[%s14000_s1 + $0x3d0] sm:$0xff] }
0x2fd4   :  { %11484 = vmatprep.subr.mxu0 %v10289_v38 }
0x2fd5   :  { %11485 = vmatpush3.msra.mxu0 %v10289_v38 }
0x2fd6   :  { %11486 = vmatprep.subr.mxu0 %v10288_v58 }
0x2fd7   :  { %11487 = vmatpush3.msra.mxu0 %v10288_v58 }
0x2fd8   :  { %11488 = vmatprep.subr.mxu0 %v10287_v18 }
0x2fd9   :  { %11489 = vmatpush3.msra.mxu0 %v10287_v18 }
0x307d   :  { %v11460_v49 = vpop.f32.mrf.mxu1 }
0x307e   :  { %7165 = vrot.lane.b32.xlu1 %v11460_v49, %s12088_s17 }
0x307f   :  { %v7031_v59 = vpop.f32.mrf.mxu1 }
0x3080   :  { %7163 = vrot.lane.b32.xlu0 %v7031_v59, %s12088_s17 }
0x3087   :  { %v11467_v55 = vpop.f32.mrf.mxu0 }
0x3088   :  { %7169 = vrot.lane.b32.xlu1 %v11467_v55, %s12088_s17 }
0x3089   :  { %v7118_v52 = vpop.f32.mrf.mxu0 }
0x308a   :  { %7167 = vrot.lane.b32.xlu0 %v7118_v52, %s12088_s17 }
0x30f0   :  { %v7166_v21 = vpop.permute.xlu1 %7165 }
0x30f1   :  { %v7184_v32 = vsel %vm2003_vm4, %v7180_v34, %v7166_v21 }
0x30f2   :  { %v7164_v61 = vpop.permute.xlu0 %7163 }
0x30f3   :  { %v7183_v0 = vsel %vm2003_vm4, %v7179_v46, %v7164_v61 }
0x30f4   :  { %11476 = vmatprep.mubr.msk.f32.mxu1 %vm170_vm1, %v7183_v0 }
0x30f5   :  { %11477 = vmatmul.mubr.msk.f32.vlgmr.msra.gmra.mxu1 %vm170_vm1, %v7184_v32 }
0x30fa   :  { %v7170_v22 = vpop.permute.xlu1 %7169 }
0x30fb   :  { %v7186_v9 = vsel %vm2003_vm4, %v7182_v5, %v7170_v22 }
0x30fc   :  { %v7168_v4 = vpop.permute.xlu0 %7167 }
0x30fd   :  { %v7185_v7 = vsel %vm2003_vm4, %v7181_v2, %v7168_v4 }
0x30fe   :  { %11479 = vmatprep.mubr.msk.f32.mxu1 %vm170_vm1, %v7185_v7  ;;  %v10359_v7 = vld [vmem:[%s14002_s2 + $0x17] ss:$0 sm:$0xff] }
0x30ff   :  { %11480 = vmatmul.mubr.msk.f32.gmra.mxu1 %vm170_vm1, %v7186_v9 }
0x31b5   :  { %v11478_v10 = vpop.f32.mrf.mxu1 }
0x31b6   :  { %v7285_v45 = vadd.f32 %v11478_v10, %v13111_v62 }
0x31b7   :  { %v7265_v51 = vpop.f32.mrf.mxu1 }
0x31b8   :  { %v13436_v39 = vadd.f32 %v10358_v42, %v7285_v45  ;;  %v7284_v50 = vadd.f32 %v7265_v51, %v13113_v33  ;;  %v10360_v51 = vld [vmem:[%s14002_s2 + $0x18] ss:$0 sm:$0xff] }
0x31ba   :  { %v13439_v19 = vadd.f32 %v10358_v42, %v7284_v50  ;;  %v7299_v30 = vsel %vm170_vm1, %v13436_v39, 0.0 }
0x31bb   :  { %7300 = vadd.xlane.f32.xlu1 %v7299_v30 }
0x31bc   :  { %v7296_v63 = vsel %vm170_vm1, %v13439_v19, 0.0 }
0x31bd   :  { %7297 = vadd.xlane.f32.xlu0 %v7296_v63 }
0x31bf   :  { %v11481_v8 = vpop.f32.mrf.mxu1 }
0x31c0   :  { %v7287_v13 = vadd.f32 %v11481_v8, %v13119_v11 }
0x31c1   :  { %v7275_v44 = vpop.f32.mrf.mxu1 }
0x31c2   :  { %v7286_v62 = vadd.f32 %v7275_v44, %v13121_v41  ;;  %v13449_v12 = vadd.f32 %v10358_v42, %v7287_v13 }
0x31c4   :  { %v13447_v37 = vadd.f32 %v10358_v42, %v7286_v62  ;;  %v7305_v14 = vsel %vm170_vm1, %v13449_v12, 0.0 }
0x31c6   :  { %v7302_v33 = vsel %vm170_vm1, %v13447_v37, 0.0 }
0x31c7   :  { %7303 = vadd.xlane.f32.xlu0 %v7302_v33 }
0x31cb   :  { %7306 = vadd.xlane.f32.xlu0 %v7305_v14 }
0x3244   :  { %v7301_v15 = vpop.xlane.xlu1 %7300 }
0x3245   :  { %v7309_v16 = vmul.f32 0.03125, %v7301_v15 }
0x3246   :  { %v7298_v17 = vpop.xlane.xlu0 %7297 }
0x3247   :  { %v7313_v43 = vsub.f32 %v13436_v39, %v7309_v16  ;;  %v7308_v11 = vmul.f32 0.03125, %v7298_v17  ;;  %v10298_v17 = vld [vmem:[%s14000_s1 + $0x438] sm:$0xff] }
0x3248   :  { %11496 = vmatprep.subr.mxu1 %v10298_v17 }
0x3249   :  { %v7312_v41 = vsub.f32 %v13439_v19, %v7308_v11  ;;  %v7317_v23 = vmul.f32 %v7313_v43, %v7313_v43  ;;  %11497 = vmatpush3.msra.mxu1 %v10298_v17  ;;  %v10296_v11 = vld [vmem:[%s14000_s1 + $0x428] sm:$0xff] }
0x324b   :  { %v7323_v27 = vsel %vm170_vm1, %v7317_v23, 0.0  ;;  %v7316_v24 = vmul.f32 %v7312_v41, %v7312_v41  ;;  %v10294_v23 = vld [vmem:[%s14000_s1 + $0x418] sm:$0xff] }
0x324c   :  { %7324 = vadd.xlane.f32.xlu1 %v7323_v27  ;;  %v10293_v27 = vld [vmem:[%s14000_s1 + $0x410] sm:$0xff] }
0x324d   :  { %v7320_v20 = vsel %vm170_vm1, %v7316_v24, 0.0  ;;  %v10292_v24 = vld [vmem:[%s14000_s1 + $0x408] sm:$0xff] }
0x324e   :  { %7321 = vadd.xlane.f32.xlu0 %v7320_v20  ;;  %v10291_v20 = vld [vmem:[%s14000_s1 + $0x400] sm:$0xff] }
0x3250   :  { %v7304_v25 = vpop.xlane.xlu0 %7303 }
0x3251   :  { %v7310_v49 = vmul.f32 0.03125, %v7304_v25  ;;  %v10361_v25 = vld [vmem:[%s14002_s2 + $0x19] ss:$0 sm:$0xff] }
0x3253   :  { %v7314_v59 = vsub.f32 %v13447_v37, %v7310_v49 }
0x3254   :  { %v7307_v55 = vpop.xlane.xlu0 %7306 }
0x3255   :  { %v7311_v52 = vmul.f32 0.03125, %v7307_v55  ;;  %v7318_v35 = vmul.f32 %v7314_v59, %v7314_v59 }
0x3257   :  { %v7315_v36 = vsub.f32 %v13449_v12, %v7311_v52  ;;  %v7326_v28 = vsel %vm170_vm1, %v7318_v35, 0.0 }
0x3258   :  { %7327 = vadd.xlane.f32.xlu0 %v7326_v28 }
0x3259   :  { %v7319_v29 = vmul.f32 %v7315_v36, %v7315_v36 }
0x325b   :  { %v7329_v53 = vsel %vm170_vm1, %v7319_v29, 0.0 }
0x325c   :  { %7330 = vadd.xlane.f32.xlu1 %v7329_v53 }
0x32d5   :  { %v7325_v21 = vpop.xlane.xlu1 %7324 }
0x32d6   :  { %v7333_v46 = vmul.f32 0.03125, %v7325_v21 }
0x32d7   :  { %v7322_v60 = vpop.xlane.xlu0 %7321 }
0x32d8   :  { %v7337_v61 = vadd.f32 1e-05, %v7333_v46  ;;  %v7332_v34 = vmul.f32 0.03125, %v7322_v60 }
0x32da   :  { %11971 = vrsqrt.f32 %v7337_v61  ;;  %v7336_v0 = vadd.f32 1e-05, %v7332_v34 }
0x32dc   :  { %11973 = vrsqrt.f32 %v7336_v0 }
0x32e1   :  { %v7328_v32 = vpop.xlane.xlu0 %7327 }
0x32e2   :  { %v7334_v26 = vmul.f32 0.03125, %v7328_v32 }
0x32e4   :  { %v7338_v22 = vadd.f32 1e-05, %v7334_v26 }
0x32e5   :  { %v7331_v2 = vpop.xlane.xlu1 %7330 }
0x32e6   :  { %11975 = vrsqrt.f32 %v7338_v22  ;;  %v7335_v54 = vmul.f32 0.03125, %v7331_v2 }
0x32e7   :  { %v11972_v4 = vpop.eup %11971 }
0x32e8   :  { %v7339_v5 = vadd.f32 1e-05, %v7335_v54  ;;  %v7345_v9 = vmul.f32 %v11972_v4, %v7313_v43  ;;  %v10297_v43 = vld [vmem:[%s14000_s1 + $0x430] sm:$0xff] }
0x32e9   :  { %v11974_v42 = vpop.eup %11973  ;;  %11498 = vmatprep.subr.mxu1 %v10297_v43 }
0x32ea   :  { %11977 = vrsqrt.f32 %v7339_v5  ;;  %v7344_v10 = vmul.f32 %v11974_v42, %v7312_v41  ;;  %v7353_v45 = vmul.f32 %v10359_v7, %v7345_v9  ;;  %11499 = vmatpush3.msra.mxu1 %v10297_v43  ;;  %v10295_v41 = vld [vmem:[%s14000_s1 + $0x420] sm:$0xff]  ;;  %v10366_v43 = vld [vmem:[%s14002_s2 + $0x1a] ss:$0 sm:$0xff] }
0x32eb   :  { %11500 = vmatprep.subr.mxu1 %v10296_v11 }
0x32ec   :  { %v7352_v50 = vmul.f32 %v10359_v7, %v7344_v10  ;;  %v7361_v63 = vadd.f32 %v10360_v51, %v7353_v45  ;;  %11501 = vmatpush3.msra.mxu1 %v10296_v11 }
0x32ed   :  { %11502 = vmatprep.subr.mxu1 %v10295_v41 }
0x32ee   :  { %v7360_v30 = vadd.f32 %v10360_v51, %v7352_v50  ;;  %11503 = vmatpush3.msra.mxu1 %v10295_v41 }
0x32ef   :  { %11504 = vmatprep.subr.mxu1 %v10294_v23 }
0x32f0   :  { %11490 = vmatprep.mubr.msk.f32.mxu0 %vm170_vm1, %v7360_v30  ;;  %11505 = vmatpush3.msra.mxu1 %v10294_v23 }
0x32f1   :  { %11491 = vmatmul.mubr.msk.f32.vlgmr.msra.gmra.mxu0 %vm170_vm1, %v7361_v63  ;;  %11506 = vmatprep.subr.mxu1 %v10293_v27 }
0x32f2   :  { %11507 = vmatpush3.msra.mxu1 %v10293_v27 }
0x32f3   :  { %v11976_v8 = vpop.eup %11975  ;;  %11508 = vmatprep.subr.mxu1 %v10292_v24 }
0x32f4   :  { %v7346_v44 = vmul.f32 %v11976_v8, %v7314_v59  ;;  %11509 = vmatpush3.msra.mxu1 %v10292_v24 }
0x32f5   :  { %11510 = vmatprep.subr.mxu1 %v10291_v20 }
0x32f6   :  { %v7354_v13 = vmul.f32 %v10359_v7, %v7346_v44  ;;  %11511 = vmatpush3.msra.mxu1 %v10291_v20 }
0x32f7   :  { %v11978_v62 = vpop.eup %11977 }
0x32f8   :  { %v7362_v33 = vadd.f32 %v10360_v51, %v7354_v13  ;;  %v7347_v14 = vmul.f32 %v11978_v62, %v7315_v36 }
0x32fa   :  { %11493 = vmatprep.mubr.msk.f32.mxu0 %vm170_vm1, %v7362_v33  ;;  %v7355_v15 = vmul.f32 %v10359_v7, %v7347_v14 }
0x32fc   :  { %v7363_v16 = vadd.f32 %v10360_v51, %v7355_v15 }
0x32fe   :  { %11494 = vmatmul.mubr.msk.f32.gmra.mxu0 %vm170_vm1, %v7363_v16 }
0x33b1   :  { %v11492_v49 = vpop.f32.mrf.mxu0 }
0x33b2   :  { %v7452_v59 = vadd.f32 %v11492_v49, %v10361_v25 }
0x33b3   :  { %v7446_v55 = vpop.f32.mrf.mxu0 }
0x33b4   :  { %v7466_v52 = vmul.f32 %v7452_v59, %v7452_v59  ;;  %v7447_v35 = vadd.f32 %v10361_v25, %v7446_v55 }
0x33b6   :  { %v7470_v36 = vmul.f32 %v7466_v52, %v7452_v59  ;;  %v7465_v28 = vmul.f32 %v7447_v35, %v7447_v35 }
0x33b8   :  { %v7474_v29 = vmul.f32 0.044715, %v7470_v36  ;;  %v7469_v53 = vmul.f32 %v7465_v28, %v7447_v35 }
0x33ba   :  { %v7478_v31 = vadd.f32 %v7474_v29, %v7452_v59  ;;  %v7473_v38 = vmul.f32 0.044715, %v7469_v53 }
0x33bc   :  { %v7482_v58 = vmul.f32 0.7978846, %v7478_v31  ;;  %v7477_v18 = vadd.f32 %v7473_v38, %v7447_v35 }
0x33be   :  { %11979 = vtanh.f32 %v7482_v58  ;;  %v7481_v21 = vmul.f32 0.7978846, %v7477_v18  ;;  %v11495_v46 = vpop.f32.mrf.mxu0 }
0x33bf   :  { %v7462_v60 = vadd.f32 %v11495_v46, %v10361_v25 }
0x33c0   :  { %11981 = vtanh.f32 %v7481_v21  ;;  %v7456_v61 = vpop.f32.mrf.mxu0 }
0x33c1   :  { %v7468_v34 = vmul.f32 %v7462_v60, %v7462_v60  ;;  %v7457_v0 = vadd.f32 %v10361_v25, %v7456_v61 }
0x33c3   :  { %v7472_v32 = vmul.f32 %v7468_v34, %v7462_v60  ;;  %v7467_v26 = vmul.f32 %v7457_v0, %v7457_v0 }
0x33c5   :  { %v7476_v22 = vmul.f32 0.044715, %v7472_v32  ;;  %v7471_v2 = vmul.f32 %v7467_v26, %v7457_v0 }
0x33c7   :  { %v7480_v54 = vadd.f32 %v7476_v22, %v7462_v60  ;;  %v7475_v4 = vmul.f32 0.044715, %v7471_v2 }
0x33c9   :  { %v7484_v5 = vmul.f32 0.7978846, %v7480_v54  ;;  %v7479_v7 = vadd.f32 %v7475_v4, %v7457_v0 }
0x33cb   :  { %v11980_v9 = vpop.eup %11979  ;;  %11983 = vtanh.f32 %v7484_v5  ;;  %v7483_v42 = vmul.f32 0.7978846, %v7479_v7  ;;  %v10374_v5 = vld [vmem:[%s14000_s1 + $0x458] sm:$0xff]  ;;  %v10373_v7 = vld [vmem:[%s14000_s1 + $0x450] sm:$0xff] }
0x33cc   :  { %v7490_v10 = vadd.f32 1.0, %v11980_v9  ;;  %11518 = vmatprep.subr.mxu0 %v10374_v5  ;;  %v10372_v9 = vld [vmem:[%s14000_s1 + $0x448] sm:$0xff] }
0x33cd   :  { %v11982_v45 = vpop.eup %11981  ;;  %11985 = vtanh.f32 %v7483_v42  ;;  %11519 = vmatpush3.msra.mxu0 %v10374_v5  ;;  %v10371_v42 = vld [vmem:[%s14000_s1 + $0x440] sm:$0xff] }
0x33ce   :  { %v7489_v51 = vadd.f32 1.0, %v11982_v45  ;;  %v7494_v50 = vmul.f32 0.5, %v7490_v10  ;;  %11520 = vmatprep.subr.mxu0 %v10373_v7 }
0x33cf   :  { %11521 = vmatpush3.msra.mxu0 %v10373_v7 }
0x33d0   :  { %v7493_v30 = vmul.f32 0.5, %v7489_v51  ;;  %v7498_v8 = vmul.f32 %v7494_v50, %v7452_v59  ;;  %11522 = vmatprep.subr.mxu0 %v10372_v9 }
0x33d1   :  { %11523 = vmatpush3.msra.mxu0 %v10372_v9 }
0x33d2   :  { %v7497_v63 = vmul.f32 %v7493_v30, %v7447_v35  ;;  %11524 = vmatprep.subr.mxu0 %v10371_v42 }
0x33d3   :  { %11525 = vmatpush3.msra.mxu0 %v10371_v42 }
0x33d4   :  { %11512 = vmatprep.mubr.msk.f32.mxu1 %vm2326_vm5, %v7497_v63 }
0x33d5   :  { %11513 = vmatmul.mubr.msk.f32.vlgmr.msra.gmra.mxu1 %vm2326_vm5, %v7498_v8 }
0x33d8   :  { %v11984_v44 = vpop.eup %11983 }
0x33d9   :  { %v7492_v13 = vadd.f32 1.0, %v11984_v44 }
0x33da   :  { %v11986_v62 = vpop.eup %11985 }
0x33db   :  { %v7491_v33 = vadd.f32 1.0, %v11986_v62  ;;  %v7496_v14 = vmul.f32 0.5, %v7492_v13 }
0x33dd   :  { %v7495_v15 = vmul.f32 0.5, %v7491_v33  ;;  %v7500_v17 = vmul.f32 %v7496_v14, %v7462_v60 }
0x33df   :  { %v7499_v16 = vmul.f32 %v7495_v15, %v7457_v0 }
0x33e1   :  { %11515 = vmatprep.mubr.msk.f32.mxu1 %vm2326_vm5, %v7499_v16 }
0x33e2   :  { %11516 = vmatmul.mubr.msk.f32.gmra.mxu1 %vm2326_vm5, %v7500_v17  ;;  %v10391_v17 = vld [vmem:[%s14002_s2 + $0x1b] ss:$0 sm:$0xff] }
0x3495   :  { %v11514_v11 = vpop.f32.mrf.mxu1 }
0x3496   :  { %v7589_v41 = vadd.f32 %v11514_v11, %v10366_v43 }
0x3497   :  { %v7583_v23 = vpop.f32.mrf.mxu1 }
0x3498   :  { %v13520_v27 = vadd.f32 %v7589_v41, %v13436_v39  ;;  %v7584_v24 = vadd.f32 %v10366_v43, %v7583_v23  ;;  %v10392_v23 = vld [vmem:[%s14002_s2 + $0x1c] ss:$0 sm:$0xff] }
0x349a   :  { %v13523_v20 = vadd.f32 %v7584_v24, %v13439_v19  ;;  %v7641_v25 = vsel %vm170_vm1, %v13520_v27, 0.0 }
0x349b   :  { %7642 = vadd.xlane.f32.xlu1 %v7641_v25 }
0x349c   :  { %v7638_v49 = vsel %vm170_vm1, %v13523_v20, 0.0 }
0x349d   :  { %7639 = vadd.xlane.f32.xlu0 %v7638_v49 }
0x34a2   :  { %v11517_v59 = vpop.f32.mrf.mxu1 }
0x34a3   :  { %v7599_v55 = vadd.f32 %v11517_v59, %v10366_v43 }
0x34a4   :  { %v7593_v52 = vpop.f32.mrf.mxu1 }
0x34a5   :  { %v13530_v35 = vadd.f32 %v7599_v55, %v13449_v12  ;;  %v7594_v39 = vadd.f32 %v10366_v43, %v7593_v52 }
0x34a7   :  { %v13533_v36 = vadd.f32 %v7594_v39, %v13447_v37  ;;  %v7647_v19 = vsel %vm170_vm1, %v13530_v35, 0.0 }
0x34a8   :  { %7648 = vadd.xlane.f32.xlu1 %v7647_v19 }
0x34a9   :  { %v7644_v28 = vsel %vm170_vm1, %v13533_v36, 0.0 }
0x34aa   :  { %7645 = vadd.xlane.f32.xlu0 %v7644_v28 }
0x3524   :  { %v7643_v29 = vpop.xlane.xlu1 %7642 }
0x3525   :  { %v7651_v53 = vmul.f32 0.03125, %v7643_v29 }
0x3526   :  { %v7640_v31 = vpop.xlane.xlu0 %7639 }
0x3527   :  { %v7655_v38 = vsub.f32 %v13520_v27, %v7651_v53  ;;  %v7650_v58 = vmul.f32 0.03125, %v7640_v31  ;;  %v10393_v31 = vld [vmem:[%s14002_s2 + $0x1d] ss:$0 sm:$0xff] }
0x3529   :  { %v7654_v12 = vsub.f32 %v13523_v20, %v7650_v58  ;;  %v7659_v18 = vmul.f32 %v7655_v38, %v7655_v38 }
0x352b   :  { %v7665_v37 = vsel %vm170_vm1, %v7659_v18, 0.0  ;;  %v7658_v21 = vmul.f32 %v7654_v12, %v7654_v12 }
0x352c   :  { %7666 = vadd.xlane.f32.xlu1 %v7665_v37 }
0x352d   :  { %v7662_v46 = vsel %vm170_vm1, %v7658_v21, 0.0 }
0x352e   :  { %7663 = vadd.xlane.f32.xlu0 %v7662_v46 }
0x3531   :  { %v7649_v60 = vpop.xlane.xlu1 %7648 }
0x3532   :  { %v7653_v61 = vmul.f32 0.03125, %v7649_v60 }
0x3533   :  { %v7646_v34 = vpop.xlane.xlu0 %7645 }
0x3534   :  { %v7657_v0 = vsub.f32 %v13530_v35, %v7653_v61  ;;  %v7652_v32 = vmul.f32 0.03125, %v7646_v34 }
0x3536   :  { %v7656_v26 = vsub.f32 %v13533_v36, %v7652_v32  ;;  %v7661_v22 = vmul.f32 %v7657_v0, %v7657_v0 }
0x3538   :  { %v7671_v2 = vsel %vm170_vm1, %v7661_v22, 0.0  ;;  %v7660_v54 = vmul.f32 %v7656_v26, %v7656_v26 }
0x3539   :  { %7672 = vadd.xlane.f32.xlu1 %v7671_v2 }
0x353a   :  { %v7668_v4 = vsel %vm170_vm1, %v7660_v54, 0.0 }
0x353b   :  { %7669 = vadd.xlane.f32.xlu0 %v7668_v4 }
0x35b5   :  { %v7667_v10 = vpop.xlane.xlu1 %7666 }
0x35b6   :  { %v7675_v45 = vmul.f32 0.03125, %v7667_v10 }
0x35b7   :  { %v7664_v51 = vpop.xlane.xlu0 %7663 }
0x35b8   :  { %v7679_v50 = vadd.f32 1e-05, %v7675_v45  ;;  %v7674_v30 = vmul.f32 0.03125, %v7664_v51 }
0x35ba   :  { %11987 = vrsqrt.f32 %v7679_v50  ;;  %v7678_v63 = vadd.f32 1e-05, %v7674_v30 }
0x35bc   :  { %11989 = vrsqrt.f32 %v7678_v63 }
0x35c2   :  { %v7673_v8 = vpop.xlane.xlu1 %7672 }
0x35c3   :  { %v7677_v44 = vmul.f32 0.03125, %v7673_v8 }
0x35c4   :  { %v7670_v13 = vpop.xlane.xlu0 %7669 }
0x35c5   :  { %v7681_v62 = vadd.f32 1e-05, %v7677_v44  ;;  %v7676_v33 = vmul.f32 0.03125, %v7670_v13 }
0x35c7   :  { %v11988_v14 = vpop.eup %11987  ;;  %11991 = vrsqrt.f32 %v7681_v62  ;;  %v7680_v15 = vadd.f32 1e-05, %v7676_v33 }
0x35c8   :  { %v7687_v16 = vmul.f32 %v11988_v14, %v7655_v38 }
0x35c9   :  { %v11990_v43 = vpop.eup %11989  ;;  %11993 = vrsqrt.f32 %v7680_v15 }
0x35ca   :  { %v7686_v11 = vmul.f32 %v11990_v43, %v7654_v12  ;;  %v7695_v41 = vmul.f32 %v10391_v17, %v7687_v16 }
0x35cc   :  { %v7694_v24 = vmul.f32 %v10391_v17, %v7686_v11  ;;  %v7703_v49 = vadd.f32 %v10392_v23, %v7695_v41 }
0x35ce   :  { %v7702_v25 = vadd.f32 %v10392_v23, %v7694_v24 }
0x35d0   :  { %11526 = vmatprep.mubr.msk.f32.mxu0 %vm170_vm1, %v7702_v25 }
0x35d1   :  { %11527 = vmatmul.mubr.msk.f32.vlgmr.msra.gmra.mxu0 %vm170_vm1, %v7703_v49 }
0x35d4   :  { %v11992_v59 = vpop.eup %11991 }
0x35d5   :  { %v7689_v55 = vmul.f32 %v11992_v59, %v7657_v0 }
0x35d6   :  { %v11994_v52 = vpop.eup %11993 }
0x35d7   :  { %v7688_v39 = vmul.f32 %v11994_v52, %v7656_v26  ;;  %v7697_v19 = vmul.f32 %v10391_v17, %v7689_v55 }
0x35d9   :  { %v7696_v28 = vmul.f32 %v10391_v17, %v7688_v39  ;;  %v7705_v53 = vadd.f32 %v10392_v23, %v7697_v19 }
0x35db   :  { %v7704_v29 = vadd.f32 %v10392_v23, %v7696_v28 }
0x35dd   :  { %11529 = vmatprep.mubr.msk.f32.mxu0 %vm170_vm1, %v7704_v29 }
0x35de   :  { %11530 = vmatmul.mubr.msk.f32.gmra.mxu0 %vm170_vm1, %v7705_v53 }
0x3691   :  { %v11528_v38 = vpop.f32.mrf.mxu0 }
0x3692   :  { %v13572_v58 = vadd.f32 %v11528_v38, %v10393_v31 }
0x3693   :  { %v7788_v12 = vpop.f32.mrf.mxu0 }
0x3694   :  { %v13574_v18 = vadd.f32 %v10393_v31, %v7788_v12  ;;  %7815 = vrot.lane.b32.xlu0 %v13572_v58, %s12075_s24  ;;  %v13603_v26 = vmul.f32 0.35355338, %v13572_v58 }
0x3696   :  { %7813 = vrot.lane.b32.xlu1 %v13574_v18, %s12075_s24  ;;  %v13581_v37 = vmul.f32 0.35355338, %v13574_v18 }
0x3698   :  { %11536 = vmatprep.mubr.msk.f32.mxu0 %vm351_vm2, %v13581_v37 }
0x369e   :  { %v11531_v21 = vpop.f32.mrf.mxu0 }
0x369f   :  { %v13585_v46 = vadd.f32 %v11531_v21, %v10393_v31 }
0x36a0   :  { %v7798_v60 = vpop.f32.mrf.mxu0 }
0x36a1   :  { %v13587_v61 = vadd.f32 %v10393_v31, %v7798_v60  ;;  %7906 = vrot.lane.b32.xlu1 %v13585_v46, %s12075_s24  ;;  %v13612_v54 = vmul.f32 0.35355338, %v13585_v46 }
0x36a3   :  { %v13592_v34 = vmul.f32 0.35355338, %v13587_v61 }
0x36a5   :  { %7904 = vrot.lane.b32.xlu1 %v13587_v61, %s12075_s24  ;;  %11543 = vmatprep.mubr.msk.f32.mxu1 %vm351_vm2, %v13592_v34 }
0x3706   :  { %v7816_v0 = vpop.permute.xlu0 %7815 }
0x3707   :  { %11532 = vmatprep.subr.msk.mxu0 %vm351_vm2, %v7816_v0 }
0x3708   :  { %v7814_v32 = vpop.permute.xlu1 %7813  ;;  %11533 = vmatpush3.xpose.msk.msra.mxu0 %vm351_vm2, %v7816_v0 }
0x3709   :  { %11534 = vmatprep.subr.msk.mxu0 %vm351_vm2, %v7814_v32 }
0x370c   :  { %11535 = vmatpush3.xpose.msk.msra.mxu0 %vm351_vm2, %v7814_v32 }
0x370f   :  { %11537 = vmatmul.mubr.msk.f32.vlgmr.msra.gmra.mxu0 %vm351_vm2, %v13603_v26 }
0x3713   :  { %v7907_v22 = vpop.permute.xlu1 %7906 }
0x3714   :  { %11539 = vmatprep.subr.msk.mxu1 %vm351_vm2, %v7907_v22 }
0x3715   :  { %11540 = vmatpush3.xpose.msk.msra.mxu1 %vm351_vm2, %v7907_v22 }
0x3717   :  { %v7905_v2 = vpop.permute.xlu1 %7904 }
0x3718   :  { %11541 = vmatprep.subr.msk.mxu1 %vm351_vm2, %v7905_v2 }
0x3719   :  { %11542 = vmatpush3.xpose.msk.msra.mxu1 %vm351_vm2, %v7905_v2 }
0x371c   :  { %11544 = vmatmul.mubr.msk.f32.vlgmr.msra.gmra.mxu1 %vm351_vm2, %v13612_v54 }
0x37cf   :  { %v11538_v4 = vpop.f32.mrf.mxu0 }
0x37d0   :  { %v7996_v5 = vsel %vm528_vm3, %v11538_v4, -inf }
0x37d1   :  { %7997 = vmax.xlane.f32.xlu1 %v7996_v5  ;;  %v7893_v7 = vpop.f32.mrf.mxu0 }
0x37d2   :  { %v7993_v9 = vsel %vm528_vm3, %v7893_v7, -inf }
0x37d3   :  { %7994 = vmax.xlane.f32.xlu0 %v7993_v9 }
0x37dc   :  { %v11545_v42 = vpop.f32.mrf.mxu1 }
0x37dd   :  { %v8002_v51 = vsel %vm528_vm3, %v11545_v42, -inf }
0x37de   :  { %v7984_v10 = vpop.f32.mrf.mxu1 }
0x37df   :  { %v7999_v45 = vsel %vm528_vm3, %v7984_v10, -inf }
0x37e0   :  { %8000 = vmax.xlane.f32.xlu0 %v7999_v45 }
0x37e4   :  { %8003 = vmax.xlane.f32.xlu0 %v8002_v51 }
0x385a   :  { %v7998_v50 = vpop.xlane.xlu1 %7997 }
0x385b   :  { %v8006_v30 = vsub.f32 %v11538_v4, %v7998_v50 }
0x385c   :  { %v7995_v63 = vpop.xlane.xlu0 %7994 }
0x385d   :  { %v8011_v8 = vmul.f32 1.442695, %v8006_v30  ;;  %v8005_v44 = vsub.f32 %v7893_v7, %v7995_v63 }
0x385f   :  { %11995 = vpow2.f32 %v8011_v8  ;;  %v8009_v13 = vmul.f32 1.442695, %v8005_v44 }
0x3861   :  { %11997 = vpow2.f32 %v8009_v13 }
0x3869   :  { %v8001_v16 = vpop.xlane.xlu0 %8000 }
0x386a   :  { %v8007_v17 = vsub.f32 %v7984_v10, %v8001_v16 }
0x386c   :  { %v11996_v62 = vpop.eup %11995  ;;  %v8013_v11 = vmul.f32 1.442695, %v8007_v17 }
0x386d   :  { %v8020_v33 = vsel %vm528_vm3, %v11996_v62, 0.0  ;;  %v8004_v43 = vpop.xlane.xlu0 %8003 }
0x386e   :  { %v11998_v14 = vpop.eup %11997  ;;  %8021 = vadd.xlane.f32.xlu1 %v8020_v33  ;;  %v8008_v41 = vsub.f32 %v11545_v42, %v8004_v43  ;;  %11999 = vpow2.f32 %v8013_v11 }
0x386f   :  { %v8017_v15 = vsel %vm528_vm3, %v11998_v14, 0.0 }
0x3870   :  { %8018 = vadd.xlane.f32.xlu0 %v8017_v15  ;;  %v8015_v23 = vmul.f32 1.442695, %v8008_v41 }
0x3872   :  { %12001 = vpow2.f32 %v8015_v23 }
0x387b   :  { %v12000_v24 = vpop.eup %11999 }
0x387c   :  { %v8023_v25 = vsel %vm528_vm3, %v12000_v24, 0.0 }
0x387f   :  { %8037 = vrot.lane.b32.xlu1 %v13574_v18, %s12076_s25  ;;  %v12002_v49 = vpop.eup %12001 }
0x3880   :  { %v8026_v59 = vsel %vm528_vm3, %v12002_v49, 0.0 }
0x3883   :  { %8126 = vrot.lane.b32.xlu1 %v13585_v46, %s12076_s25 }
0x3886   :  { %8039 = vrot.lane.b32.xlu0 %v13572_v58, %s12076_s25 }
0x3887   :  { %8217 = vrot.lane.b32.xlu1 %v13572_v58, %s12077_s26 }
0x388a   :  { %8124 = vrot.lane.b32.xlu0 %v13587_v61, %s12076_s25 }
0x388b   :  { %8215 = vrot.lane.b32.xlu1 %v13574_v18, %s12077_s26 }
0x388e   :  { %8308 = vrot.lane.b32.xlu0 %v13585_v46, %s12077_s26 }
0x388f   :  { %8211 = vrot.lane.b32.xlu1 %v13581_v37, %s12078_s27 }
0x38ad   :  { %8024 = vadd.xlane.f32.xlu0 %v8023_v25 }
0x38b3   :  { %8027 = vadd.xlane.f32.xlu1 %v8026_v59 }
0x38c3   :  { %8213 = vrot.lane.b32.xlu0 %v13603_v26, %s12078_s27 }
0x38c4   :  { %8306 = vrot.lane.b32.xlu1 %v13587_v61, %s12077_s26 }
0x38c7   :  { %8302 = vrot.lane.b32.xlu0 %v13592_v34, %s12078_s27 }
0x38c8   :  { %8304 = vrot.lane.b32.xlu1 %v13612_v54, %s12078_s27 }
0x38f7   :  { %v8022_v55 = vpop.xlane.xlu1 %8021 }
0x38f8   :  { %12003 = vrcp.f32 %v8022_v55 }
0x38f9   :  { %v8019_v52 = vpop.xlane.xlu0 %8018 }
0x38fa   :  { %12005 = vrcp.f32 %v8019_v52 }
0x38fb   :  { %v8038_v39 = vpop.permute.xlu1 %8037 }
0x38fd   :  { %v8040_v19 = vpop.permute.xlu0 %8039 }
0x38fe   :  { %11546 = vmatprep.subr.mxu0 %v8040_v19 }
0x38ff   :  { %v8127_v28 = vpop.permute.xlu1 %8126  ;;  %11547 = vmatpush3.msra.mxu0 %v8040_v19 }
0x3900   :  { %11548 = vmatprep.subr.mxu0 %v8038_v39 }
0x3901   :  { %11549 = vmatpush3.msra.mxu0 %v8038_v39  ;;  %v8125_v12 = vpop.permute.xlu0 %8124 }
0x3902   :  { %11553 = vmatprep.subr.mxu0 %v8127_v28 }
0x3903   :  { %v8218_v29 = vpop.permute.xlu1 %8217 }
0x3904   :  { %11560 = vmatprep.subr.msk.mxu1 %vm351_vm2, %v8218_v29 }
0x3905   :  { %11561 = vmatpush3.xpose.msk.msra.mxu1 %vm351_vm2, %v8218_v29  ;;  %v12004_v53 = vpop.eup %12003  ;;  %v8309_v32 = vpop.permute.xlu0 %8308 }
0x3906   :  { %v8032_v60 = vmul.f32 %v12004_v53, %v11996_v62 }
0x3907   :  { %v12006_v31 = vpop.eup %12005  ;;  %v8216_v38 = vpop.permute.xlu1 %8215 }
0x3908   :  { %11562 = vmatprep.subr.msk.mxu1 %vm351_vm2, %v8216_v38  ;;  %v8030_v21 = vmul.f32 %v12006_v31, %v11998_v14 }
0x3909   :  { %11563 = vmatpush3.xpose.msk.msra.mxu1 %vm351_vm2, %v8216_v38 }
0x390a   :  { %11550 = vmatprep.mubr.msk.f32.mxu0 %vm528_vm3, %v8030_v21 }
0x390b   :  { %v8212_v0 = vpop.permute.xlu1 %8211  ;;  %11551 = vmatmul.mubr.msk.f32.vlgmr.msra.gmra.mxu0 %vm528_vm3, %v8032_v60 }
0x390c   :  { %11554 = vmatpush3.msra.mxu0 %v8127_v28  ;;  %11564 = vmatprep.mubr.msk.f32.mxu1 %vm351_vm2, %v8212_v0 }
0x390d   :  { %11555 = vmatprep.subr.mxu0 %v8125_v12 }
0x390e   :  { %11556 = vmatpush3.msra.mxu0 %v8125_v12 }
0x390f   :  { %11567 = vmatprep.subr.msk.mxu0 %vm351_vm2, %v8309_v32 }
0x3936   :  { %v8025_v22 = vpop.xlane.xlu0 %8024 }
0x3937   :  { %12007 = vrcp.f32 %v8025_v22 }
0x393a   :  { %v8214_v2 = vpop.permute.xlu0 %8213 }
0x393b   :  { %11565 = vmatmul.mubr.msk.f32.vlgmr.msra.gmra.mxu1 %vm351_vm2, %v8214_v2 }
0x393c   :  { %v8028_v4 = vpop.xlane.xlu1 %8027 }
0x393d   :  { %12009 = vrcp.f32 %v8028_v4 }
0x393e   :  { %v8303_v10 = vpop.permute.xlu0 %8302 }
0x3940   :  { %v8307_v45 = vpop.permute.xlu1 %8306 }
0x3944   :  { %v12008_v5 = vpop.eup %12007  ;;  %v8305_v51 = vpop.permute.xlu1 %8304 }
0x3945   :  { %v8034_v7 = vmul.f32 %v12008_v5, %v12000_v24 }
0x3947   :  { %11557 = vmatprep.mubr.msk.f32.mxu0 %vm528_vm3, %v8034_v7 }
0x394a   :  { %v12010_v9 = vpop.eup %12009 }
0x394b   :  { %v8036_v42 = vmul.f32 %v12010_v9, %v12002_v49 }
0x394d   :  { %11558 = vmatmul.mubr.msk.f32.vlgmr.msra.gmra.mxu0 %vm528_vm3, %v8036_v42 }
0x394e   :  { %11568 = vmatpush3.xpose.msk.msra.mxu0 %vm351_vm2, %v8309_v32  ;;  %11571 = vmatprep.mubr.msk.f32.mxu0 %vm351_vm2, %v8303_v10 }
0x394f   :  { %11569 = vmatprep.subr.msk.mxu0 %vm351_vm2, %v8307_v45 }
0x3952   :  { %11570 = vmatpush3.xpose.msk.msra.mxu0 %vm351_vm2, %v8307_v45 }
0x3955   :  { %11572 = vmatmul.mubr.msk.f32.vlgmr.msra.gmra.mxu0 %vm351_vm2, %v8305_v51 }
0x39cb   :  { %v13666_v44 = vpop.f32.mrf.mxu0 }
0x39cd   :  { %v13668_v13 = vpop.f32.mrf.mxu0 }
0x39fb   :  { %v11566_v50 = vpop.f32.mrf.mxu1 }
0x39fc   :  { %v8396_v30 = vsel %vm528_vm3, %v11566_v50, -inf }
0x39fd   :  { %8397 = vmax.xlane.f32.xlu1 %v8396_v30  ;;  %v8293_v63 = vpop.f32.mrf.mxu1 }
0x39fe   :  { %v8393_v8 = vsel %vm528_vm3, %v8293_v63, -inf }
0x39ff   :  { %8394 = vmax.xlane.f32.xlu0 %v8393_v8 }
0x3a0d   :  { %v13670_v62 = vpop.f32.mrf.mxu0 }
0x3a0f   :  { %v13672_v33 = vpop.f32.mrf.mxu0 }
0x3a15   :  { %v11573_v14 = vpop.f32.mrf.mxu0 }
0x3a16   :  { %v8402_v17 = vsel %vm528_vm3, %v11573_v14, -inf }
0x3a17   :  { %v8384_v15 = vpop.f32.mrf.mxu0 }
0x3a18   :  { %v8399_v16 = vsel %vm528_vm3, %v8384_v15, -inf }
0x3a19   :  { %8400 = vmax.xlane.f32.xlu0 %v8399_v16 }
0x3a1d   :  { %8403 = vmax.xlane.f32.xlu0 %v8402_v17 }
0x3a86   :  { %v8398_v43 = vpop.xlane.xlu1 %8397 }
0x3a87   :  { %v8406_v11 = vsub.f32 %v11566_v50, %v8398_v43 }
0x3a88   :  { %v8395_v41 = vpop.xlane.xlu0 %8394 }
0x3a89   :  { %v8411_v23 = vmul.f32 1.442695, %v8406_v11  ;;  %v8405_v24 = vsub.f32 %v8293_v63, %v8395_v41 }
0x3a8b   :  { %12011 = vpow2.f32 %v8411_v23  ;;  %v8409_v25 = vmul.f32 1.442695, %v8405_v24 }
0x3a8d   :  { %12013 = vpow2.f32 %v8409_v25 }
0x3a98   :  { %v12012_v49 = vpop.eup %12011 }
0x3a99   :  { %v8420_v59 = vsel %vm528_vm3, %v12012_v49, 0.0 }
0x3a9a   :  { %v12014_v55 = vpop.eup %12013  ;;  %8421 = vadd.xlane.f32.xlu1 %v8420_v59 }
0x3a9b   :  { %v8417_v52 = vsel %vm528_vm3, %v12014_v55, 0.0 }
0x3a9c   :  { %8418 = vadd.xlane.f32.xlu0 %v8417_v52 }
0x3aa2   :  { %v8401_v39 = vpop.xlane.xlu0 %8400 }
0x3aa3   :  { %v8407_v19 = vsub.f32 %v8384_v15, %v8401_v39 }
0x3aa5   :  { %v8413_v29 = vmul.f32 1.442695, %v8407_v19 }
0x3aa6   :  { %v8404_v28 = vpop.xlane.xlu0 %8403 }
0x3aa7   :  { %v8408_v53 = vsub.f32 %v11573_v14, %v8404_v28  ;;  %12015 = vpow2.f32 %v8413_v29 }
0x3aa9   :  { %v8415_v31 = vmul.f32 1.442695, %v8408_v53 }
0x3aab   :  { %8437 = vrot.lane.b32.xlu1 %v13574_v18, %s12079_s28  ;;  %12017 = vpow2.f32 %v8415_v31 }
0x3aaf   :  { %8526 = vrot.lane.b32.xlu1 %v13585_v46, %s12079_s28 }
0x3ab2   :  { %8439 = vrot.lane.b32.xlu0 %v13572_v58, %s12079_s28 }
0x3ab3   :  { %8617 = vrot.lane.b32.xlu1 %v13572_v58, %s12080_s29 }
0x3ab4   :  { %v12016_v38 = vpop.eup %12015 }
0x3ab5   :  { %v8423_v12 = vsel %vm528_vm3, %v12016_v38, 0.0 }
0x3ab6   :  { %8524 = vrot.lane.b32.xlu0 %v13587_v61, %s12079_s28 }
0x3ab7   :  { %8615 = vrot.lane.b32.xlu1 %v13574_v18, %s12080_s29 }
0x3ab8   :  { %v12018_v21 = vpop.eup %12017 }
0x3ab9   :  { %v8426_v60 = vsel %vm528_vm3, %v12018_v21, 0.0 }
0x3aba   :  { %8708 = vrot.lane.b32.xlu0 %v13585_v46, %s12080_s29 }
0x3abb   :  { %8611 = vrot.lane.b32.xlu1 %v13581_v37, %s12081_s30 }
0x3ad9   :  { %8424 = vadd.xlane.f32.xlu0 %v8423_v12 }
0x3adf   :  { %8427 = vadd.xlane.f32.xlu1 %v8426_v60 }
0x3aef   :  { %8613 = vrot.lane.b32.xlu0 %v13603_v26, %s12081_s30 }
0x3af0   :  { %8706 = vrot.lane.b32.xlu1 %v13587_v61, %s12080_s29 }
0x3af3   :  { %8702 = vrot.lane.b32.xlu0 %v13592_v34, %s12081_s30 }
0x3af4   :  { %8704 = vrot.lane.b32.xlu1 %v13612_v54, %s12081_s30 }
0x3b23   :  { %v8422_v0 = vpop.xlane.xlu1 %8421 }
0x3b24   :  { %12019 = vrcp.f32 %v8422_v0 }
0x3b25   :  { %v8419_v32 = vpop.xlane.xlu0 %8418 }
0x3b26   :  { %12021 = vrcp.f32 %v8419_v32 }
0x3b27   :  { %v8438_v22 = vpop.permute.xlu1 %8437 }
0x3b29   :  { %v8440_v2 = vpop.permute.xlu0 %8439 }
0x3b2a   :  { %11574 = vmatprep.subr.mxu1 %v8440_v2 }
0x3b2b   :  { %v8527_v4 = vpop.permute.xlu1 %8526  ;;  %11575 = vmatpush3.msra.mxu1 %v8440_v2 }
0x3b2c   :  { %11576 = vmatprep.subr.mxu1 %v8438_v22  ;;  %11581 = vmatprep.subr.mxu0 %v8527_v4 }
0x3b2d   :  { %11577 = vmatpush3.msra.mxu1 %v8438_v22  ;;  %11582 = vmatpush3.msra.mxu0 %v8527_v4  ;;  %v8525_v5 = vpop.permute.xlu0 %8524 }
0x3b2e   :  { %11583 = vmatprep.subr.mxu0 %v8525_v5 }
0x3b2f   :  { %v8618_v7 = vpop.permute.xlu1 %8617  ;;  %11584 = vmatpush3.msra.mxu0 %v8525_v5 }
0x3b30   :  { %11588 = vmatprep.subr.msk.mxu1 %vm351_vm2, %v8618_v7 }
0x3b31   :  { %v8709_v9 = vpop.permute.xlu0 %8708  ;;  %v12020_v42 = vpop.eup %12019 }
0x3b32   :  { %11595 = vmatprep.subr.msk.mxu0 %vm351_vm2, %v8709_v9  ;;  %v8432_v50 = vmul.f32 %v12020_v42, %v12012_v49 }
0x3b33   :  { %v12022_v10 = vpop.eup %12021  ;;  %v8616_v45 = vpop.permute.xlu1 %8615 }
0x3b34   :  { %v8430_v51 = vmul.f32 %v12022_v10, %v12014_v55 }
0x3b36   :  { %11578 = vmatprep.mubr.msk.f32.mxu1 %vm528_vm3, %v8430_v51 }
0x3b37   :  { %v8612_v30 = vpop.permute.xlu1 %8611  ;;  %11579 = vmatmul.mubr.msk.f32.vlgmr.msra.gmra.mxu1 %vm528_vm3, %v8432_v50 }
0x3b38   :  { %11589 = vmatpush3.xpose.msk.msra.mxu1 %vm351_vm2, %v8618_v7  ;;  %11592 = vmatprep.mubr.msk.f32.mxu1 %vm351_vm2, %v8612_v30 }
0x3b39   :  { %11590 = vmatprep.subr.msk.mxu1 %vm351_vm2, %v8616_v45 }
0x3b3c   :  { %11591 = vmatpush3.xpose.msk.msra.mxu1 %vm351_vm2, %v8616_v45 }
0x3b62   :  { %v8425_v63 = vpop.xlane.xlu0 %8424 }
0x3b63   :  { %12023 = vrcp.f32 %v8425_v63 }
0x3b66   :  { %v8614_v8 = vpop.permute.xlu0 %8613 }
0x3b67   :  { %11593 = vmatmul.mubr.msk.f32.vlgmr.msra.gmra.mxu1 %vm351_vm2, %v8614_v8 }
0x3b68   :  { %v8428_v14 = vpop.xlane.xlu1 %8427 }
0x3b69   :  { %12025 = vrcp.f32 %v8428_v14 }
0x3b6a   :  { %v8703_v11 = vpop.permute.xlu0 %8702 }
0x3b6c   :  { %v8707_v41 = vpop.permute.xlu1 %8706 }
0x3b70   :  { %v12024_v15 = vpop.eup %12023  ;;  %v8705_v23 = vpop.permute.xlu1 %8704 }
0x3b71   :  { %v8434_v16 = vmul.f32 %v12024_v15, %v12016_v38 }
0x3b73   :  { %11585 = vmatprep.mubr.msk.f32.mxu0 %vm528_vm3, %v8434_v16 }
0x3b76   :  { %v12026_v17 = vpop.eup %12025 }
0x3b77   :  { %v8436_v43 = vmul.f32 %v12026_v17, %v12018_v21 }
0x3b79   :  { %11586 = vmatmul.mubr.msk.f32.vlgmr.msra.gmra.mxu0 %vm528_vm3, %v8436_v43 }
0x3b7a   :  { %11596 = vmatpush3.xpose.msk.msra.mxu0 %vm351_vm2, %v8709_v9  ;;  %11599 = vmatprep.mubr.msk.f32.mxu0 %vm351_vm2, %v8703_v11 }
0x3b7b   :  { %11597 = vmatprep.subr.msk.mxu0 %vm351_vm2, %v8707_v41 }
0x3b7e   :  { %11598 = vmatpush3.xpose.msk.msra.mxu0 %vm351_vm2, %v8707_v41 }
0x3b81   :  { %11600 = vmatmul.mubr.msk.f32.vlgmr.msra.gmra.mxu0 %vm351_vm2, %v8705_v23 }
0x3bf7   :  { %v13720_v24 = vpop.f32.mrf.mxu1 }
0x3bf9   :  { %v13722_v25 = vpop.f32.mrf.mxu1 }
0x3c27   :  { %v11594_v49 = vpop.f32.mrf.mxu1 }
0x3c28   :  { %v8796_v59 = vsel %vm528_vm3, %v11594_v49, -inf }
0x3c29   :  { %8797 = vmax.xlane.f32.xlu1 %v8796_v59  ;;  %v8693_v55 = vpop.f32.mrf.mxu1 }
0x3c2a   :  { %v8793_v52 = vsel %vm528_vm3, %v8693_v55, -inf }
0x3c2b   :  { %8794 = vmax.xlane.f32.xlu0 %v8793_v52 }
0x3c39   :  { %v13726_v39 = vpop.f32.mrf.mxu0 }
0x3c3b   :  { %v13728_v19 = vpop.f32.mrf.mxu0 }
0x3c41   :  { %v11601_v28 = vpop.f32.mrf.mxu0 }
0x3c42   :  { %v8802_v31 = vsel %vm528_vm3, %v11601_v28, -inf }
0x3c43   :  { %v8784_v29 = vpop.f32.mrf.mxu0 }
0x3c44   :  { %v8799_v53 = vsel %vm528_vm3, %v8784_v29, -inf }
0x3c45   :  { %8800 = vmax.xlane.f32.xlu0 %v8799_v53 }
0x3c49   :  { %8803 = vmax.xlane.f32.xlu0 %v8802_v31 }
0x3cb2   :  { %v8798_v38 = vpop.xlane.xlu1 %8797 }
0x3cb3   :  { %v8806_v12 = vsub.f32 %v11594_v49, %v8798_v38 }
0x3cb4   :  { %v8795_v21 = vpop.xlane.xlu0 %8794 }
0x3cb5   :  { %v8811_v60 = vmul.f32 1.442695, %v8806_v12  ;;  %v8805_v0 = vsub.f32 %v8693_v55, %v8795_v21 }
0x3cb7   :  { %12027 = vpow2.f32 %v8811_v60  ;;  %v8809_v32 = vmul.f32 1.442695, %v8805_v0 }
0x3cb9   :  { %12029 = vpow2.f32 %v8809_v32 }
0x3cc4   :  { %v12028_v22 = vpop.eup %12027 }
0x3cc5   :  { %v8820_v2 = vsel %vm528_vm3, %v12028_v22, 0.0 }
0x3cc6   :  { %v12030_v4 = vpop.eup %12029  ;;  %8821 = vadd.xlane.f32.xlu1 %v8820_v2 }
0x3cc7   :  { %v8817_v5 = vsel %vm528_vm3, %v12030_v4, 0.0 }
0x3cc8   :  { %8818 = vadd.xlane.f32.xlu0 %v8817_v5 }
0x3cce   :  { %v8801_v7 = vpop.xlane.xlu0 %8800 }
0x3ccf   :  { %v8807_v9 = vsub.f32 %v8784_v29, %v8801_v7 }
0x3cd1   :  { %v8813_v10 = vmul.f32 1.442695, %v8807_v9 }
0x3cd2   :  { %v8804_v42 = vpop.xlane.xlu0 %8803 }
0x3cd3   :  { %v8808_v45 = vsub.f32 %v11601_v28, %v8804_v42  ;;  %12031 = vpow2.f32 %v8813_v10 }
0x3cd5   :  { %v8815_v51 = vmul.f32 1.442695, %v8808_v45 }
0x3cd7   :  { %8837 = vrot.lane.b32.xlu1 %v13574_v18, %s12082_s4  ;;  %12033 = vpow2.f32 %v8815_v51 }
0x3cdb   :  { %8926 = vrot.lane.b32.xlu1 %v13585_v46, %s12082_s4 }
0x3cde   :  { %8839 = vrot.lane.b32.xlu0 %v13572_v58, %s12082_s4 }
0x3cdf   :  { %9017 = vrot.lane.b32.xlu1 %v13572_v58, %s12083_s5 }
0x3ce0   :  { %v12032_v50 = vpop.eup %12031 }
0x3ce1   :  { %v8823_v30 = vsel %vm528_vm3, %v12032_v50, 0.0 }
0x3ce2   :  { %8924 = vrot.lane.b32.xlu0 %v13587_v61, %s12082_s4 }
0x3ce3   :  { %9015 = vrot.lane.b32.xlu1 %v13574_v18, %s12083_s5 }
0x3ce4   :  { %v12034_v63 = vpop.eup %12033 }
0x3ce5   :  { %v8826_v8 = vsel %vm528_vm3, %v12034_v63, 0.0 }
0x3ce6   :  { %9108 = vrot.lane.b32.xlu0 %v13585_v46, %s12083_s5 }
0x3ce7   :  { %9011 = vrot.lane.b32.xlu1 %v13581_v37, %s12084_s6 }
0x3d05   :  { %8824 = vadd.xlane.f32.xlu0 %v8823_v30 }
0x3d0b   :  { %8827 = vadd.xlane.f32.xlu1 %v8826_v8 }
0x3d1b   :  { %9013 = vrot.lane.b32.xlu0 %v13603_v26, %s12084_s6 }
0x3d1c   :  { %9106 = vrot.lane.b32.xlu1 %v13587_v61, %s12083_s5 }
0x3d1f   :  { %9102 = vrot.lane.b32.xlu0 %v13592_v34, %s12084_s6 }
0x3d20   :  { %9104 = vrot.lane.b32.xlu1 %v13612_v54, %s12084_s6 }
0x3d4f   :  { %v8822_v37 = vpop.xlane.xlu1 %8821 }
0x3d50   :  { %12035 = vrcp.f32 %v8822_v37 }
0x3d51   :  { %v8819_v14 = vpop.xlane.xlu0 %8818 }
0x3d52   :  { %12037 = vrcp.f32 %v8819_v14 }
0x3d53   :  { %v8838_v15 = vpop.permute.xlu1 %8837 }
0x3d55   :  { %v8840_v16 = vpop.permute.xlu0 %8839 }
0x3d56   :  { %11602 = vmatprep.subr.mxu1 %v8840_v16 }
0x3d57   :  { %v8927_v17 = vpop.permute.xlu1 %8926  ;;  %11603 = vmatpush3.msra.mxu1 %v8840_v16 }
0x3d58   :  { %11604 = vmatprep.subr.mxu1 %v8838_v15  ;;  %11609 = vmatprep.subr.mxu0 %v8927_v17 }
0x3d59   :  { %11605 = vmatpush3.msra.mxu1 %v8838_v15  ;;  %11610 = vmatpush3.msra.mxu0 %v8927_v17  ;;  %v8925_v26 = vpop.permute.xlu0 %8924 }
0x3d5a   :  { %11611 = vmatprep.subr.mxu0 %v8925_v26 }
0x3d5b   :  { %v9018_v43 = vpop.permute.xlu1 %9017  ;;  %11612 = vmatpush3.msra.mxu0 %v8925_v26 }
0x3d5c   :  { %11616 = vmatprep.subr.msk.mxu1 %vm351_vm2, %v9018_v43 }
0x3d5d   :  { %v9109_v34 = vpop.permute.xlu0 %9108  ;;  %v12036_v54 = vpop.eup %12035 }
0x3d5e   :  { %11623 = vmatprep.subr.msk.mxu0 %vm351_vm2, %v9109_v34  ;;  %v8832_v49 = vmul.f32 %v12036_v54, %v12028_v22 }
0x3d5f   :  { %v12038_v11 = vpop.eup %12037  ;;  %v9016_v41 = vpop.permute.xlu1 %9015 }
0x3d60   :  { %v8830_v23 = vmul.f32 %v12038_v11, %v12030_v4 }
0x3d62   :  { %11606 = vmatprep.mubr.msk.f32.mxu1 %vm528_vm3, %v8830_v23 }
0x3d63   :  { %v9012_v59 = vpop.permute.xlu1 %9011  ;;  %11607 = vmatmul.mubr.msk.f32.vlgmr.msra.gmra.mxu1 %vm528_vm3, %v8832_v49 }
0x3d64   :  { %11617 = vmatpush3.xpose.msk.msra.mxu1 %vm351_vm2, %v9018_v43  ;;  %11620 = vmatprep.mubr.msk.f32.mxu1 %vm351_vm2, %v9012_v59 }
0x3d65   :  { %11618 = vmatprep.subr.msk.mxu1 %vm351_vm2, %v9016_v41 }
0x3d68   :  { %11619 = vmatpush3.xpose.msk.msra.mxu1 %vm351_vm2, %v9016_v41 }
0x3d8e   :  { %v8825_v55 = vpop.xlane.xlu0 %8824 }
0x3d8f   :  { %12039 = vrcp.f32 %v8825_v55 }
0x3d92   :  { %v9014_v52 = vpop.permute.xlu0 %9013 }
0x3d93   :  { %11621 = vmatmul.mubr.msk.f32.vlgmr.msra.gmra.mxu1 %vm351_vm2, %v9014_v52 }
0x3d94   :  { %v8828_v28 = vpop.xlane.xlu1 %8827 }
0x3d95   :  { %12041 = vrcp.f32 %v8828_v28 }
0x3d96   :  { %v9103_v12 = vpop.permute.xlu0 %9102 }
0x3d98   :  { %v9107_v21 = vpop.permute.xlu1 %9106 }
0x3d9c   :  { %v12040_v29 = vpop.eup %12039  ;;  %v9105_v60 = vpop.permute.xlu1 %9104 }
0x3d9d   :  { %v8834_v53 = vmul.f32 %v12040_v29, %v12032_v50 }
0x3d9f   :  { %11613 = vmatprep.mubr.msk.f32.mxu0 %vm528_vm3, %v8834_v53 }
0x3da2   :  { %v12042_v31 = vpop.eup %12041 }
0x3da3   :  { %v8836_v38 = vmul.f32 %v12042_v31, %v12034_v63 }
0x3da5   :  { %11614 = vmatmul.mubr.msk.f32.vlgmr.msra.gmra.mxu0 %vm528_vm3, %v8836_v38 }
0x3da6   :  { %11624 = vmatpush3.xpose.msk.msra.mxu0 %vm351_vm2, %v9109_v34  ;;  %11627 = vmatprep.mubr.msk.f32.mxu0 %vm351_vm2, %v9103_v12 }
0x3da7   :  { %11625 = vmatprep.subr.msk.mxu0 %vm351_vm2, %v9107_v21 }
0x3daa   :  { %11626 = vmatpush3.xpose.msk.msra.mxu0 %vm351_vm2, %v9107_v21 }
0x3dad   :  { %11628 = vmatmul.mubr.msk.f32.vlgmr.msra.gmra.mxu0 %vm351_vm2, %v9105_v60 }
0x3e23   :  { %v11608_v0 = vpop.f32.mrf.mxu1 }
0x3e25   :  { %v8915_v32 = vpop.f32.mrf.mxu1 }
0x3e53   :  { %v11622_v22 = vpop.f32.mrf.mxu1 }
0x3e54   :  { %v9196_v2 = vsel %vm528_vm3, %v11622_v22, -inf }
0x3e55   :  { %9197 = vmax.xlane.f32.xlu1 %v9196_v2  ;;  %v9093_v4 = vpop.f32.mrf.mxu1  ;;  %v10377_v2 = vld [vmem:[%s14000_s1 + $0x490] sm:$0xff] }
0x3e56   :  { %v9193_v5 = vsel %vm528_vm3, %v9093_v4, -inf }
0x3e57   :  { %9194 = vmax.xlane.f32.xlu0 %v9193_v5  ;;  %v10375_v5 = vld [vmem:[%s14000_s1 + $0x480] sm:$0xff] }
0x3e65   :  { %v13778_v7 = vpop.f32.mrf.mxu0 }
0x3e67   :  { %v13780_v9 = vpop.f32.mrf.mxu0 }
0x3e6d   :  { %v11629_v42 = vpop.f32.mrf.mxu0 }
0x3e6e   :  { %v9202_v51 = vsel %vm528_vm3, %v11629_v42, -inf }
0x3e6f   :  { %v9184_v10 = vpop.f32.mrf.mxu0 }
0x3e70   :  { %v9199_v45 = vsel %vm528_vm3, %v9184_v10, -inf }
0x3e71   :  { %9200 = vmax.xlane.f32.xlu0 %v9199_v45 }
0x3e75   :  { %9203 = vmax.xlane.f32.xlu0 %v9202_v51 }
0x3ede   :  { %v9198_v50 = vpop.xlane.xlu1 %9197 }
0x3edf   :  { %v9206_v30 = vsub.f32 %v11622_v22, %v9198_v50  ;;  %v10378_v22 = vld [vmem:[%s14000_s1 + $0x498] sm:$0xff] }
0x3ee0   :  { %v9195_v63 = vpop.xlane.xlu0 %9194 }
0x3ee1   :  { %v9211_v8 = vmul.f32 1.442695, %v9206_v30  ;;  %v9205_v37 = vsub.f32 %v9093_v4, %v9195_v63  ;;  %v10376_v4 = vld [vmem:[%s14000_s1 + $0x488] sm:$0xff] }
0x3ee3   :  { %12043 = vpow2.f32 %v9211_v8  ;;  %v9209_v14 = vmul.f32 1.442695, %v9205_v37 }
0x3ee5   :  { %12045 = vpow2.f32 %v9209_v14 }
0x3ef0   :  { %v12044_v15 = vpop.eup %12043 }
0x3ef1   :  { %v9220_v16 = vsel %vm528_vm3, %v12044_v15, 0.0 }
0x3ef2   :  { %v12046_v17 = vpop.eup %12045  ;;  %9221 = vadd.xlane.f32.xlu1 %v9220_v16 }
0x3ef3   :  { %v9217_v26 = vsel %vm528_vm3, %v12046_v17, 0.0 }
0x3ef4   :  { %9218 = vadd.xlane.f32.xlu0 %v9217_v26 }
0x3efa   :  { %v9201_v43 = vpop.xlane.xlu0 %9200 }
0x3efb   :  { %v9207_v34 = vsub.f32 %v9184_v10, %v9201_v43 }
0x3efd   :  { %v9213_v54 = vmul.f32 1.442695, %v9207_v34 }
0x3efe   :  { %v9204_v11 = vpop.xlane.xlu0 %9203 }
0x3eff   :  { %12047 = vpow2.f32 %v9213_v54  ;;  %v9208_v41 = vsub.f32 %v11629_v42, %v9204_v11 }
0x3f01   :  { %v9215_v23 = vmul.f32 1.442695, %v9208_v41 }
0x3f03   :  { %12049 = vpow2.f32 %v9215_v23 }
0x3f0c   :  { %v12048_v49 = vpop.eup %12047 }
0x3f0d   :  { %v9223_v59 = vsel %vm528_vm3, %v12048_v49, 0.0 }
0x3f0e   :  { %9224 = vadd.xlane.f32.xlu0 %v9223_v59 }
0x3f10   :  { %v12050_v55 = vpop.eup %12049 }
0x3f11   :  { %v9226_v52 = vsel %vm528_vm3, %v12050_v55, 0.0 }
0x3f12   :  { %9227 = vadd.xlane.f32.xlu1 %v9226_v52 }
0x3f23   :  { %9237 = vrot.lane.b32.xlu1 %v13574_v18, %s12085_s7 }
0x3f24   :  { %9239 = vrot.lane.b32.xlu0 %v13572_v58, %s12085_s7 }
0x3f27   :  { %9326 = vrot.lane.b32.xlu1 %v13585_v46, %s12085_s7 }
0x3f28   :  { %9415 = vrot.lane.b32.xlu0 %v13722_v25, %s12086_s8 }
0x3f2b   :  { %9324 = vrot.lane.b32.xlu1 %v13587_v61, %s12085_s7 }
0x3f2c   :  { %9431 = vrot.lane.b32.xlu0 %v8915_v32, %s12087_s0 }
0x3f2f   :  { %9417 = vrot.lane.b32.xlu1 %v13720_v24, %s12086_s8 }
0x3f33   :  { %9433 = vrot.lane.b32.xlu1 %v11608_v0, %s12087_s0 }
0x3f7b   :  { %v9222_v29 = vpop.xlane.xlu1 %9221 }
0x3f7d   :  { %v9219_v18 = vpop.xlane.xlu0 %9218 }
0x3f7e   :  { %12051 = vrcp.f32 %v9219_v18 }
0x3f7f   :  { %12053 = vrcp.f32 %v9222_v29 }
0x3f8b   :  { %v12052_v28 = vpop.eup %12051 }
0x3f8c   :  { %v9230_v58 = vmul.f32 %v12052_v28, %v12046_v17  ;;  %v12054_v61 = vpop.eup %12053 }
0x3f8d   :  { %v9232_v24 = vmul.f32 %v12054_v61, %v12044_v15 }
0x3f8e   :  { %11634 = vmatprep.mubr.msk.f32.mxu1 %vm528_vm3, %v9230_v58 }
0x3f97   :  { %v9225_v46 = vpop.xlane.xlu0 %9224 }
0x3f98   :  { %12055 = vrcp.f32 %v9225_v46 }
0x3f9b   :  { %v9228_v25 = vpop.xlane.xlu1 %9227  ;;  %v9240_v53 = vpop.permute.xlu0 %9239 }
0x3f9c   :  { %12057 = vrcp.f32 %v9228_v25  ;;  %11630 = vmatprep.subr.mxu1 %v9240_v53 }
0x3f9d   :  { %11631 = vmatpush3.msra.mxu1 %v9240_v53 }
0x3f9f   :  { %v9238_v31 = vpop.permute.xlu1 %9237  ;;  %v9416_v30 = vpop.permute.xlu0 %9415 }
0x3fa0   :  { %11632 = vmatprep.subr.mxu1 %v9238_v31 }
0x3fa1   :  { %11633 = vmatpush3.msra.mxu1 %v9238_v31 }
0x3fa2   :  { %11635 = vmatmul.mubr.msk.f32.vlgmr.msra.gmra.mxu1 %vm528_vm3, %v9232_v24  ;;  %11644 = vmatprep.subr.mxu1 %v10378_v22 }
0x3fa3   :  { %v9327_v38 = vpop.permute.xlu1 %9326  ;;  %11645 = vmatpush3.msra.mxu1 %v10378_v22  ;;  %v9432_v8 = vpop.permute.xlu0 %9431 }
0x3fa4   :  { %11637 = vmatprep.subr.mxu0 %v9327_v38  ;;  %11646 = vmatprep.subr.mxu1 %v10377_v2 }
0x3fa5   :  { %v12056_v12 = vpop.eup %12055  ;;  %11638 = vmatpush3.msra.mxu0 %v9327_v38  ;;  %11647 = vmatpush3.msra.mxu1 %v10377_v2 }
0x3fa6   :  { %v9234_v21 = vmul.f32 %v12056_v12, %v12048_v49  ;;  %11648 = vmatprep.subr.mxu1 %v10376_v4 }
0x3fa7   :  { %v9325_v60 = vpop.permute.xlu1 %9324  ;;  %11649 = vmatpush3.msra.mxu1 %v10376_v4 }
0x3fa8   :  { %11639 = vmatprep.subr.mxu0 %v9325_v60  ;;  %11641 = vmatprep.mubr.msk.f32.mxu0 %vm528_vm3, %v9234_v21 }
0x3fa9   :  { %v12058_v0 = vpop.eup %12057  ;;  %11640 = vmatpush3.msra.mxu0 %v9325_v60  ;;  %11650 = vmatprep.subr.mxu1 %v10375_v5 }
0x3faa   :  { %v9236_v32 = vmul.f32 %v12058_v0, %v12050_v55  ;;  %11651 = vmatpush3.msra.mxu1 %v10375_v5 }
0x3fab   :  { %v9418_v50 = vpop.permute.xlu1 %9417 }
0x3fac   :  { %11642 = vmatmul.mubr.msk.f32.vlgmr.msra.gmra.mxu0 %vm528_vm3, %v9236_v32 }
0x3faf   :  { %v9434_v63 = vpop.permute.xlu1 %9433 }
0x4062   :  { %v11636_v42 = vpop.f32.mrf.mxu1 }
0x4063   :  { %9449 = vrot.lane.b32.xlu1 %v11636_v42, %s12088_s17 }
0x4064   :  { %v9315_v10 = vpop.f32.mrf.mxu1 }
0x4065   :  { %9447 = vrot.lane.b32.xlu0 %v9315_v10, %s12088_s17 }
0x4067   :  { %9421 = vrot.lane.b32.xlu1 %v13726_v39, %s12086_s8 }
0x4069   :  { %9419 = vrot.lane.b32.xlu0 %v13728_v19, %s12086_s8  ;;  %v9459_v19 = vsel %vm351_vm2, %v13668_v13, %v9416_v30 }
0x406a   :  { %v9463_v37 = vsel %vm528_vm3, %v9459_v19, %v9432_v8  ;;  %v10382_v19 = vld [vmem:[%s14000_s1 + $0x4d8] sm:$0xff] }
0x406b   :  { %9437 = vrot.lane.b32.xlu1 %v13778_v7, %s12087_s0  ;;  %v9460_v7 = vsel %vm351_vm2, %v13666_v44, %v9418_v50  ;;  %11658 = vmatprep.subr.mxu0 %v10382_v19 }
0x406c   :  { %v11643_v45 = vpop.f32.mrf.mxu0  ;;  %11659 = vmatpush3.msra.mxu0 %v10382_v19 }
0x406d   :  { %9435 = vrot.lane.b32.xlu0 %v13780_v9, %s12087_s0  ;;  %v9464_v9 = vsel %vm528_vm3, %v9460_v7, %v9434_v63  ;;  %v10380_v7 = vld [vmem:[%s14000_s1 + $0x4c8] sm:$0xff] }
0x406e   :  { %v9402_v51 = vpop.f32.mrf.mxu0 }
0x406f   :  { %9453 = vrot.lane.b32.xlu1 %v11643_v45, %s12088_s17 }
0x4071   :  { %9451 = vrot.lane.b32.xlu0 %v9402_v51, %s12088_s17 }
0x40d5   :  { %v9450_v39 = vpop.permute.xlu1 %9449 }
0x40d6   :  { %v9468_v16 = vsel %vm2003_vm4, %v9464_v9, %v9450_v39 }
0x40d7   :  { %v9448_v14 = vpop.permute.xlu0 %9447 }
0x40d8   :  { %v9467_v15 = vsel %vm2003_vm4, %v9463_v37, %v9448_v14  ;;  %v10381_v37 = vld [vmem:[%s14000_s1 + $0x4d0] sm:$0xff]  ;;  %v10379_v14 = vld [vmem:[%s14000_s1 + $0x4c0] sm:$0xff] }
0x40d9   :  { %v9422_v17 = vpop.permute.xlu1 %9421  ;;  %11652 = vmatprep.mubr.msk.f32.mxu1 %vm170_vm1, %v9467_v15  ;;  %11660 = vmatprep.subr.mxu0 %v10381_v37 }
0x40da   :  { %11653 = vmatmul.mubr.msk.f32.vlgmr.msra.gmra.mxu1 %vm170_vm1, %v9468_v16  ;;  %v9462_v44 = vsel %vm351_vm2, %v13670_v62, %v9422_v17  ;;  %11661 = vmatpush3.msra.mxu0 %v10381_v37 }
0x40db   :  { %v9420_v26 = vpop.permute.xlu0 %9419  ;;  %11662 = vmatprep.subr.mxu0 %v10380_v7 }
0x40dc   :  { %v9461_v34 = vsel %vm351_vm2, %v13672_v33, %v9420_v26  ;;  %v10450_v33 = vld [vmem:[%s14002_s2 + $0x1e] ss:$0 sm:$0xff]  ;;  %11663 = vmatpush3.msra.mxu0 %v10380_v7  ;;  %vm10033_vm2 = vcmask 654336  }
0x40dd   :  { %v9438_v43 = vpop.permute.xlu1 %9437  ;;  %11664 = vmatprep.subr.mxu0 %v10379_v14 }
0x40de   :  { %v9466_v23 = vsel %vm528_vm3, %v9462_v44, %v9438_v43  ;;  %11665 = vmatpush3.msra.mxu0 %v10379_v14 }
0x40df   :  { %v9436_v13 = vpop.permute.xlu0 %9435 }
0x40e0   :  { %v9465_v11 = vsel %vm528_vm3, %v9461_v34, %v9436_v13 }
0x40e1   :  { %v9454_v54 = vpop.permute.xlu1 %9453 }
0x40e2   :  { %v9470_v59 = vsel %vm2003_vm4, %v9466_v23, %v9454_v54 }
0x40e3   :  { %v9452_v41 = vpop.permute.xlu0 %9451 }
0x40e4   :  { %v9469_v49 = vsel %vm2003_vm4, %v9465_v11, %v9452_v41  ;;  %v10452_v11 = vld [vmem:[%s14002_s2 + $0x20] ss:$0 sm:$0xff] }
0x40e5   :  { %11655 = vmatprep.mubr.msk.f32.mxu1 %vm170_vm1, %v9469_v49 }
0x40e6   :  { %11656 = vmatmul.mubr.msk.f32.gmra.mxu1 %vm170_vm1, %v9470_v59 }
0x419a   :  { %v11654_v55 = vpop.f32.mrf.mxu1 }
0x419b   :  { %v9569_v62 = vadd.f32 %v11654_v55, %v13520_v27 }
0x419c   :  { %v9549_v52 = vpop.f32.mrf.mxu1 }
0x419d   :  { %v13854_v18 = vadd.f32 %v10450_v33, %v9569_v62  ;;  %v9568_v28 = vadd.f32 %v9549_v52, %v13523_v20 }
0x419f   :  { %v13857_v58 = vadd.f32 %v10450_v33, %v9568_v28  ;;  %v9583_v29 = vsel %vm170_vm1, %v13854_v18, 0.0 }
0x41a0   :  { %9584 = vadd.xlane.f32.xlu1 %v9583_v29 }
0x41a1   :  { %v9580_v46 = vsel %vm170_vm1, %v13857_v58, 0.0 }
0x41a2   :  { %9581 = vadd.xlane.f32.xlu0 %v9580_v46 }
0x41a6   :  { %v11657_v25 = vpop.f32.mrf.mxu1 }
0x41a7   :  { %v9571_v61 = vadd.f32 %v11657_v25, %v13530_v35  ;;  %v10390_v25 = vld [vmem:[%s14000_s1 + $0x538] sm:$0xff] }
0x41a8   :  { %v9559_v53 = vpop.f32.mrf.mxu1  ;;  %11672 = vmatprep.subr.mxu1 %v10390_v25 }
0x41a9   :  { %v9570_v27 = vadd.f32 %v9559_v53, %v13533_v36  ;;  %v13867_v24 = vadd.f32 %v10450_v33, %v9571_v61  ;;  %11673 = vmatpush3.msra.mxu1 %v10390_v25  ;;  %v10389_v53 = vld [vmem:[%s14000_s1 + $0x530] sm:$0xff]  ;;  %v10388_v61 = vld [vmem:[%s14000_s1 + $0x528] sm:$0xff] }
0x41aa   :  { %11674 = vmatprep.subr.mxu1 %v10389_v53 }
0x41ab   :  { %v13865_v31 = vadd.f32 %v10450_v33, %v9570_v27  ;;  %v9589_v38 = vsel %vm170_vm1, %v13867_v24, 0.0  ;;  %11675 = vmatpush3.msra.mxu1 %v10389_v53  ;;  %v10387_v27 = vld [vmem:[%s14000_s1 + $0x520] sm:$0xff] }
0x41ac   :  { %11676 = vmatprep.subr.mxu1 %v10388_v61 }
0x41ad   :  { %v9586_v20 = vsel %vm170_vm1, %v13865_v31, 0.0  ;;  %11677 = vmatpush3.msra.mxu1 %v10388_v61 }
0x41ae   :  { %9587 = vadd.xlane.f32.xlu0 %v9586_v20  ;;  %11678 = vmatprep.subr.mxu1 %v10387_v27  ;;  %v10386_v20 = vld [vmem:[%s14000_s1 + $0x518] sm:$0xff] }
0x41af   :  { %11679 = vmatpush3.msra.mxu1 %v10387_v27 }
0x41b0   :  { %11680 = vmatprep.subr.mxu1 %v10386_v20 }
0x41b1   :  { %11681 = vmatpush3.msra.mxu1 %v10386_v20 }
0x41b2   :  { %9590 = vadd.xlane.f32.xlu0 %v9589_v38  ;;  %v10385_v38 = vld [vmem:[%s14000_s1 + $0x510] sm:$0xff] }
0x41b3   :  { %11682 = vmatprep.subr.mxu1 %v10385_v38 }
0x41b4   :  { %11683 = vmatpush3.msra.mxu1 %v10385_v38 }
0x4229   :  { %v9585_v12 = vpop.xlane.xlu1 %9584 }
0x422a   :  { %v9593_v21 = vmul.f32 0.03125, %v9585_v12  ;;  %v10384_v12 = vld [vmem:[%s14000_s1 + $0x508] sm:$0xff] }
0x422b   :  { %v9582_v60 = vpop.xlane.xlu0 %9581  ;;  %11684 = vmatprep.subr.mxu1 %v10384_v12 }
0x422c   :  { %v9597_v0 = vsub.f32 %v13854_v18, %v9593_v21  ;;  %v9592_v35 = vmul.f32 0.03125, %v9582_v60  ;;  %v10383_v21 = vld [vmem:[%s14000_s1 + $0x500] sm:$0xff]  ;;  %11685 = vmatpush3.msra.mxu1 %v10384_v12 }
0x422d   :  { %11686 = vmatprep.subr.mxu1 %v10383_v21  ;;  %v10453_v60 = vld [vmem:[%s14002_s2 + $0x21] ss:$0 sm:$0xff] }
0x422e   :  { %v9596_v36 = vsub.f32 %v13857_v58, %v9592_v35  ;;  %v9601_v32 = vmul.f32 %v9597_v0, %v9597_v0  ;;  %11687 = vmatpush3.msra.mxu1 %v10383_v21 }
0x4230   :  { %v9607_v22 = vsel %vm170_vm1, %v9601_v32, 0.0  ;;  %v9600_v2 = vmul.f32 %v9596_v36, %v9596_v36 }
0x4231   :  { %9608 = vadd.xlane.f32.xlu1 %v9607_v22 }
0x4232   :  { %v9604_v4 = vsel %vm170_vm1, %v9600_v2, 0.0 }
0x4233   :  { %9605 = vadd.xlane.f32.xlu0 %v9604_v4 }
0x4237   :  { %v9588_v5 = vpop.xlane.xlu0 %9587 }
0x4238   :  { %v9594_v42 = vmul.f32 0.03125, %v9588_v5 }
0x423a   :  { %v9598_v10 = vsub.f32 %v13865_v31, %v9594_v42 }
0x423b   :  { %v9591_v45 = vpop.xlane.xlu0 %9590 }
0x423c   :  { %v9595_v51 = vmul.f32 0.03125, %v9591_v45  ;;  %v9602_v50 = vmul.f32 %v9598_v10, %v9598_v10 }
0x423e   :  { %v9599_v30 = vsub.f32 %v13867_v24, %v9595_v51  ;;  %v9610_v63 = vsel %vm170_vm1, %v9602_v50, 0.0 }
0x423f   :  { %9611 = vadd.xlane.f32.xlu0 %v9610_v63 }
0x4240   :  { %v9603_v8 = vmul.f32 %v9599_v30, %v9599_v30 }
0x4242   :  { %v9613_v39 = vsel %vm170_vm1, %v9603_v8, 0.0 }
0x4243   :  { %9614 = vadd.xlane.f32.xlu1 %v9613_v39 }
0x4254   :  { %10003 = vrot.lane.b32.xlu1 %v13026_v40, %s12082_s4 }
0x4255   :  { %10001 = vrot.lane.b32.xlu0 %v13028_v48, %s12082_s4 }
0x4258   :  { %10005 = vrot.lane.b32.xlu1 %v13042_v3, %s12082_s4 }
0x4259   :  { %10013 = vrot.lane.b32.xlu0 %v13088_v56, %s12076_s25 }
0x425c   :  { %10007 = vrot.lane.b32.xlu1 %v13040_v1, %s12082_s4 }
0x425d   :  { %10017 = vrot.lane.b32.xlu0 %v13096_v57, %s12076_s25 }
0x4260   :  { %10015 = vrot.lane.b32.xlu1 %v13086_v47, %s12076_s25  ;;  %v10451_v47 = vld [vmem:[%s14002_s2 + $0x1f] ss:$0 sm:$0xff] }
0x4264   :  { %10019 = vrot.lane.b32.xlu1 %v13094_v6, %s12076_s25 }
0x42ba   :  { %v9609_v40 = vpop.xlane.xlu1 %9608 }
0x42bb   :  { %v9617_v48 = vmul.f32 0.03125, %v9609_v40 }
0x42bc   :  { %v9606_v9 = vpop.xlane.xlu0 %9605 }
0x42bd   :  { %v9621_v15 = vadd.f32 1e-05, %v9617_v48  ;;  %v9616_v3 = vmul.f32 0.03125, %v9606_v9 }
0x42bf   :  { %12059 = vrsqrt.f32 %v9621_v15  ;;  %v9620_v16 = vadd.f32 1e-05, %v9616_v3 }
0x42c1   :  { %12061 = vrsqrt.f32 %v9620_v16 }
0x42c8   :  { %v9612_v56 = vpop.xlane.xlu0 %9611 }
0x42c9   :  { %v9618_v17 = vmul.f32 0.03125, %v9612_v56 }
0x42cb   :  { %v9622_v1 = vadd.f32 1e-05, %v9618_v17 }
0x42cc   :  { %v12060_v26 = vpop.eup %12059  ;;  %v9615_v43 = vpop.xlane.xlu1 %9614 }
0x42cd   :  { %v9629_v57 = vmul.f32 %v12060_v26, %v9597_v0  ;;  %12063 = vrsqrt.f32 %v9622_v1  ;;  %v9619_v13 = vmul.f32 0.03125, %v9615_v43 }
0x42ce   :  { %v12062_v6 = vpop.eup %12061 }
0x42cf   :  { %v9623_v34 = vadd.f32 1e-05, %v9619_v13  ;;  %v9628_v54 = vmul.f32 %v12062_v6, %v9596_v36  ;;  %v9637_v44 = vmul.f32 %v10451_v47, %v9629_v57 }
0x42d1   :  { %12065 = vrsqrt.f32 %v9623_v34  ;;  %v9636_v41 = vmul.f32 %v10451_v47, %v9628_v54  ;;  %v9645_v49 = vadd.f32 %v10452_v11, %v9637_v44 }
0x42d3   :  { %v9644_v23 = vadd.f32 %v10452_v11, %v9636_v41 }
0x42d5   :  { %11666 = vmatprep.mubr.msk.f32.mxu0 %vm170_vm1, %v9644_v23 }
0x42d6   :  { %11667 = vmatmul.mubr.msk.f32.vlgmr.msra.gmra.mxu0 %vm170_vm1, %v9645_v49 }
0x42da   :  { %v12064_v59 = vpop.eup %12063 }
0x42db   :  { %v9630_v33 = vmul.f32 %v12064_v59, %v9598_v10 }
0x42dd   :  { %v9638_v55 = vmul.f32 %v10451_v47, %v9630_v33  ;;  %v10466_v33 = vld [vmem:[%s14000_s1 + $0x558] sm:$0xff] }
0x42de   :  { %v12066_v62 = vpop.eup %12065  ;;  %11694 = vmatprep.subr.mxu0 %v10466_v33 }
0x42df   :  { %v9646_v52 = vadd.f32 %v10452_v11, %v9638_v55  ;;  %v9631_v28 = vmul.f32 %v12066_v62, %v9599_v30  ;;  %11695 = vmatpush3.msra.mxu0 %v10466_v33  ;;  %v10465_v55 = vld [vmem:[%s14000_s1 + $0x550] sm:$0xff]  ;;  %v10464_v62 = vld [vmem:[%s14000_s1 + $0x548] sm:$0xff] }
0x42e0   :  { %11696 = vmatprep.subr.mxu0 %v10465_v55 }
0x42e1   :  { %11669 = vmatprep.mubr.msk.f32.mxu0 %vm170_vm1, %v9646_v52  ;;  %v9639_v29 = vmul.f32 %v10451_v47, %v9631_v28  ;;  %11697 = vmatpush3.msra.mxu0 %v10465_v55  ;;  %v10463_v52 = vld [vmem:[%s14000_s1 + $0x540] sm:$0xff] }
0x42e2   :  { %11698 = vmatprep.subr.mxu0 %v10464_v62  ;;  %v10458_v28 = vld [vmem:[%s14002_s2 + $0x22] ss:$0 sm:$0xff] }
0x42e3   :  { %v9647_v46 = vadd.f32 %v10452_v11, %v9639_v29  ;;  %11699 = vmatpush3.msra.mxu0 %v10464_v62 }
0x42e4   :  { %11700 = vmatprep.subr.mxu0 %v10463_v52 }
0x42e5   :  { %11670 = vmatmul.mubr.msk.f32.gmra.mxu0 %vm170_vm1, %v9647_v46 }
0x42e6   :  { %11701 = vmatpush3.msra.mxu0 %v10463_v52 }
0x4396   :  { %v11668_v0 = vpop.f32.mrf.mxu0 }
0x4397   :  { %v9736_v35 = vadd.f32 %v11668_v0, %v10453_v60 }
0x4398   :  { %v9730_v36 = vpop.f32.mrf.mxu0 }
0x4399   :  { %v9750_v32 = vmul.f32 %v9736_v35, %v9736_v35  ;;  %v9731_v22 = vadd.f32 %v10453_v60, %v9730_v36 }
0x439b   :  { %v9754_v2 = vmul.f32 %v9750_v32, %v9736_v35  ;;  %v9749_v4 = vmul.f32 %v9731_v22, %v9731_v22 }
0x439d   :  { %v9758_v5 = vmul.f32 0.044715, %v9754_v2  ;;  %v9753_v42 = vmul.f32 %v9749_v4, %v9731_v22 }
0x439f   :  { %v9762_v10 = vadd.f32 %v9758_v5, %v9736_v35  ;;  %v9757_v45 = vmul.f32 0.044715, %v9753_v42 }
0x43a1   :  { %v9766_v51 = vmul.f32 0.7978846, %v9762_v10  ;;  %v9761_v50 = vadd.f32 %v9757_v45, %v9731_v22 }
0x43a3   :  { %12067 = vtanh.f32 %v9766_v51  ;;  %v9765_v30 = vmul.f32 0.7978846, %v9761_v50 }
0x43a5   :  { %12069 = vtanh.f32 %v9765_v30  ;;  %v11671_v63 = vpop.f32.mrf.mxu0 }
0x43a6   :  { %v9746_v8 = vadd.f32 %v11671_v63, %v10453_v60 }
0x43a7   :  { %v9740_v39 = vpop.f32.mrf.mxu0 }
0x43a8   :  { %v9752_v19 = vmul.f32 %v9746_v8, %v9746_v8  ;;  %v9741_v37 = vadd.f32 %v10453_v60, %v9740_v39 }
0x43aa   :  { %v9756_v7 = vmul.f32 %v9752_v19, %v9746_v8  ;;  %v9751_v14 = vmul.f32 %v9741_v37, %v9741_v37 }
0x43ac   :  { %v9760_v40 = vmul.f32 0.044715, %v9756_v7  ;;  %v9755_v48 = vmul.f32 %v9751_v14, %v9741_v37 }
0x43ae   :  { %v9764_v9 = vadd.f32 %v9760_v40, %v9746_v8  ;;  %v9759_v15 = vmul.f32 0.044715, %v9755_v48 }
0x43b0   :  { %v12068_v3 = vpop.eup %12067  ;;  %v9768_v16 = vmul.f32 0.7978846, %v9764_v9  ;;  %v9763_v56 = vadd.f32 %v9759_v15, %v9741_v37 }
0x43b1   :  { %v9774_v17 = vadd.f32 1.0, %v12068_v3 }
0x43b2   :  { %v12070_v1 = vpop.eup %12069  ;;  %12071 = vtanh.f32 %v9768_v16  ;;  %v9767_v26 = vmul.f32 0.7978846, %v9763_v56 }
0x43b3   :  { %v9773_v43 = vadd.f32 1.0, %v12070_v1  ;;  %v9778_v57 = vmul.f32 0.5, %v9774_v17 }
0x43b4   :  { %12073 = vtanh.f32 %v9767_v26 }
0x43b5   :  { %v9777_v13 = vmul.f32 0.5, %v9773_v43  ;;  %v9782_v6 = vmul.f32 %v9778_v57, %v9736_v35  ;;  %v10004_v35 = vpop.permute.xlu1 %10003 }
0x43b7   :  { %v9781_v47 = vmul.f32 %v9777_v13, %v9731_v22  ;;  %v10002_v22 = vpop.permute.xlu0 %10001 }
0x43b9   :  { %11688 = vmatprep.mubr.msk.f32.mxu1 %vm2326_vm5, %v9781_v47 }
0x43ba   :  { %11689 = vmatmul.mubr.msk.f32.vlgmr.msra.gmra.mxu1 %vm2326_vm5, %v9782_v6 }
0x43bb   :  { %v10014_v51 = vpop.permute.xlu0 %10013 }
0x43bf   :  { %v12072_v34 = vpop.eup %12071  ;;  %v10018_v3 = vpop.permute.xlu0 %10017 }
0x43c0   :  { %v9776_v54 = vadd.f32 1.0, %v12072_v34 }
0x43c1   :  { %v12074_v44 = vpop.eup %12073 }
0x43c2   :  { %v9775_v11 = vadd.f32 1.0, %v12074_v44  ;;  %v9780_v41 = vmul.f32 0.5, %v9776_v54 }
0x43c4   :  { %v9779_v23 = vmul.f32 0.5, %v9775_v11  ;;  %v9784_v59 = vmul.f32 %v9780_v41, %v9746_v8 }
0x43c6   :  { %v9783_v49 = vmul.f32 %v9779_v23, %v9741_v37 }
0x43c8   :  { %11691 = vmatprep.mubr.msk.f32.mxu1 %vm2326_vm5, %v9783_v49 }
0x43c9   :  { %11692 = vmatmul.mubr.msk.f32.gmra.mxu1 %vm2326_vm5, %v9784_v59 }
0x447a   :  { %v11690_v29 = vpop.f32.mrf.mxu1 }
0x447b   :  { %v9873_v46 = vadd.f32 %v11690_v29, %v10458_v28 }
0x447c   :  { %v9867_v25 = vpop.f32.mrf.mxu1 }
0x447d   :  { %v9868_v53 = vadd.f32 %v10458_v28, %v9867_v25  ;;  %v9887_v27 = vadd.f32 %v9873_v46, %v13854_v18  ;;  %v10467_v18 = vld [vmem:[%s14002_s2 + $0x23] ss:$0 sm:$0xff] }
0x447f   :  { %v9886_v61 = vadd.f32 %v9868_v53, %v13857_v58  ;;  %v10006_v58 = vpop.permute.xlu1 %10005 }
0x4481   :  { %11702 = vmatprep.mubr.msk.f32.mxu0 %vm170_vm1, %v9886_v61 }
0x4482   :  { %11703 = vmatmul.mubr.msk.f32.vlgmr.msra.gmra.mxu0 %vm170_vm1, %v9887_v27 }
0x4483   :  { %v10008_v36 = vpop.permute.xlu1 %10007 }
0x4489   :  { %v11693_v20 = vpop.f32.mrf.mxu1 }
0x448a   :  { %v9883_v38 = vadd.f32 %v11693_v20, %v10458_v28 }
0x448b   :  { %v9877_v12 = vpop.f32.mrf.mxu1 }
0x448c   :  { %v9878_v21 = vadd.f32 %v10458_v28, %v9877_v12  ;;  %v9889_v0 = vadd.f32 %v9883_v38, %v13867_v24 }
0x448e   :  { %v9888_v60 = vadd.f32 %v9878_v21, %v13865_v31  ;;  %v10016_v31 = vpop.permute.xlu1 %10015 }
0x4490   :  { %11705 = vmatprep.mubr.msk.f32.mxu0 %vm170_vm1, %v9888_v60 }
0x4491   :  { %11706 = vmatmul.mubr.msk.f32.gmra.mxu0 %vm170_vm1, %v9889_v0 }
0x4492   :  { %v10020_v40 = vpop.permute.xlu1 %10019 }
0x4542   :  { %v11704_v32 = vpop.f32.mrf.mxu0 }
0x4543   :  { %v9984_v2 = vadd.f32 %v11704_v32, %v10467_v18 }
0x4544   :  { %v9978_v4 = vpop.f32.mrf.mxu0 }
0x4545   :  { %v9998_v5 = vadd.f32 1.5, %v9984_v2  ;;  %v9979_v42 = vadd.f32 %v10467_v18, %v9978_v4 }
0x4547   :  { %v10026_v24 = vsel %vm33_vm0, %v9998_v5, %v10004_v35  ;;  %v9997_v10 = vadd.f32 1.5, %v9979_v42 }
0x4548   :  { %v10030_v45 = vsel %vm2326_vm5, %v10026_v24, %v10016_v31 }
0x4549   :  { %v10035_v50 = vsel %vm10033_vm2, %v10030_v45, 0.0  ;;  %v10025_v30 = vsel %vm33_vm0, %v9997_v10, %v10002_v22 }
0x454a   :  { %10039 = vst [vmem:[%s14003_s3 + $0x8] sm:$0xff] %v10035_v50  ;;  %v10029_v63 = vsel %vm2326_vm5, %v10025_v30, %v10014_v51 }
0x454b   :  { %v10034_v8 = vsel %vm10033_vm2, %v10029_v63, 0.0 }
0x454c   :  { %10038 = vst [vmem:[%s14003_s3] sm:$0xff] %v10034_v8 }
0x4551   :  { %v11707_v39 = vpop.f32.mrf.mxu0 }
0x4552   :  { %v9994_v19 = vadd.f32 %v11707_v39, %v10467_v18 }
0x4553   :  { %v9988_v37 = vpop.f32.mrf.mxu0 }
0x4554   :  { %v10000_v7 = vadd.f32 1.5, %v9994_v19  ;;  %v9989_v14 = vadd.f32 %v10467_v18, %v9988_v37 }
0x4556   :  { %v10028_v48 = vsel %vm33_vm0, %v10000_v7, %v10008_v36  ;;  %v9999_v9 = vadd.f32 1.5, %v9989_v14 }
0x4557   :  { %v10032_v15 = vsel %vm2326_vm5, %v10028_v48, %v10020_v40 }
0x4558   :  { %v10037_v16 = vsel %vm10033_vm2, %v10032_v15, 0.0  ;;  %v10027_v56 = vsel %vm33_vm0, %v9999_v9, %v10006_v58 }
0x4559   :  { %10041 = vst [vmem:[%s14003_s3 + $0x18] sm:$0xff] %v10037_v16  ;;  %v10031_v17 = vsel %vm2326_vm5, %v10027_v56, %v10018_v3 }
0x455a   :  { %v10036_v1 = vsel %vm10033_vm2, %v10031_v17, 0.0 }
0x455b   :  { %10040 = vst [vmem:[%s14003_s3 + $0x10] sm:$0xff] %v10036_v1 }

</bundles_post_ra>
